<compile_context>
chip_gen: v7x
topology: tpu7x:2x2x1
jax: 0.10.0
libtpu: 0.0.40
codegen_flags: <defaults>
</compile_context>

<pallas_src>
import functools
import math

import jax
import jax.numpy as jnp
from jax.experimental import pallas as pl
from jax.experimental.pallas import tpu as pltpu

HIGHEST = jax.lax.Precision.HIGHEST
LRELU_SLOPE = 0.2
EPS = 1e-5          # PyTorch InstanceNorm2d default eps


# --------------------------------------------------------------------------- #
# Small helpers
# --------------------------------------------------------------------------- #
def _round_up(x, m):
    return ((x + m - 1) // m) * m


def _cparams(num_grid_axes, est_bytes):
    """All-parallel grid axes + a VMEM budget derived from the actual footprint."""
    hard_cap = 96 << 20
    try:
        cap = getattr(pltpu.get_tpu_info(), "vmem_capacity_bytes", None)
        if cap:
            hard_cap = int(cap * 3 // 4)
    except Exception:
        pass
    limit = int(min(hard_cap, max(3 * int(est_bytes), 32 << 20)))
    return pltpu.CompilerParams(
        dimension_semantics=("parallel",) * num_grid_axes,
        vmem_limit_bytes=limit,
    )


def _pick_tile_h(H, W):
    """Rows-per-tile: TH | H, (TH*W) % 128 == 0, THW as close to 512 as possible
    (256-wide MXUs on v6e/v7x want >=256 lanes; 16x16 images -> TH=16, THW=256)."""
    cands = [th for th in range(1, H + 1) if H % th == 0 and (th * W) % 128 == 0]
    if not cands:
        # Fallback: whole image per tile (masked lane stores, acceptable for odd W).
        return H
    return min(cands, key=lambda th: abs(th * W - 512))


# --------------------------------------------------------------------------- #
# Kernel 1: grouped masked 1x1 convs + mlp_shared + mlp_shared_2 (fused, per image)
# --------------------------------------------------------------------------- #
def _im2col_vmem(plane, H, W):
    """(H+2, W+2, Cin) zero-padded f32 plane -> (H*W, 9*Cin) bf16 columns (VMEM only)."""
    pats = []
    for k in range(9):
        kh, kw = divmod(k, 3)
        pats.append(plane[kh:kh + H, kw:kw + W, :].reshape(H * W, -1))
    return jnp.concatenate(pats, axis=-1).astype(jnp.bfloat16)


def _zero_borders(ref, H, W, Cf):
    """Write only the 1-px border strips of a (H+2, W+2, Cf) plane to zero."""
    dt = ref.dtype
    ref[0:1, :, :] = jnp.zeros((1, W + 2, Cf), dt)
    ref[H + 1:H + 2, :, :] = jnp.zeros((1, W + 2, Cf), dt)
    ref[1:1 + H, 0:1, :] = jnp.zeros((H, 1, Cf), dt)
    ref[1:1 + H, W + 1:W + 2, :] = jnp.zeros((H, 1, Cf), dt)


def _features_kernel(y_ref, m_ref, w1_ref, b1_ref, w2_ref, b2_ref, w3_ref, b3_ref,
                     o_ref, s1_ref, s2_ref, *, H, W, C, D):
    Cout = s1_ref.shape[-1]
    NH = o_ref.shape[-1]

    # (1) sum_i conv1x1_i(y_i * m_i): D small masked GEMMs accumulated in f32.
    #     Masks arrive as (HW, D); no host-side repeat / duplicate HBM stream.
    acc = None
    for i in range(D):
        ymi = y_ref[:, i * C:(i + 1) * C] * m_ref[:, i:i + 1]          # (HW, C) bf16
        d = jnp.dot(ymi, w1_ref[i * C:(i + 1) * C, :],
                    preferred_element_type=jnp.float32)
        acc = d if acc is None else acc + d
    feat = acc + b1_ref[...]                                           # (HW, Cout) f32

    # (2) mlp_shared: 3x3 SAME conv + LeakyReLU(0.2) via zero-padded VMEM plane.
    #     Only the border strips are zeroed; the interior is written once.
    _zero_borders(s1_ref, H, W, Cout)
    s1_ref[1:1 + H, 1:1 + W, :] = feat.reshape(H, W, Cout)
    h = jnp.dot(_im2col_vmem(s1_ref[...], H, W), w2_ref[...],
                preferred_element_type=jnp.float32) + b2_ref[...]
    h = jnp.maximum(h, LRELU_SLOPE * h)

    # (3) mlp_shared_2: 3x3 SAME conv + LeakyReLU(0.2).
    _zero_borders(s2_ref, H, W, Cout)
    s2_ref[1:1 + H, 1:1 + W, :] = h.reshape(H, W, Cout)
    actv = jnp.dot(_im2col_vmem(s2_ref[...], H, W), w3_ref[...],
                   preferred_element_type=jnp.float32) + b3_ref[...]
    actv = jnp.maximum(actv, LRELU_SLOPE * actv)

    # (4) emit a zero-padded bf16 activation plane (borders + interior only),
    #     so the consumer needs no halo DMA and no per-patch casts.
    _zero_borders(o_ref, H, W, NH)
    o_ref[1:1 + H, 1:1 + W, :] = actv.reshape(H, W, NH).astype(o_ref.dtype)


def _features(y, m, pk, H, W, C, D):
    N, HW, DC = y.shape
    Cout = pk["w_sh"].shape[-1]
    NH = pk["w_sh2"].shape[-1]
    est = (
        2 * (HW * DC * 2 + HW * D * 2)                 # y + mask blocks (double-buffered)
        + 2 * ((H + 2) * (W + 2) * NH * 2)             # bf16 output plane (double-buffered)
        + 2 * ((H + 2) * (W + 2) * Cout * 4)           # two f32 scratch planes
        + pk["w1"].size * 2 + pk["w_sh"].size * 2 + pk["w_sh2"].size * 2
        + 2 * 9 * HW * Cout * 2                        # in-kernel im2col temporaries
        + 2 * HW * NH * 4                              # actv / h f32 temporaries
    )
    return pl.pallas_call(
        functools.partial(_features_kernel, H=H, W=W, C=C, D=D),
        out_shape=jax.ShapeDtypeStruct((N, H + 2, W + 2, NH), jnp.bfloat16),
        grid=(N,),
        in_specs=[
            pl.BlockSpec((None, HW, DC), lambda n: (n, 0, 0)),
            pl.BlockSpec((None, HW, D), lambda n: (n, 0, 0)),
            pl.BlockSpec(pk["w1"].shape, lambda n: (0, 0)),
            pl.BlockSpec(pk["b1"].shape, lambda n: (0, 0)),
            pl.BlockSpec(pk["w_sh"].shape, lambda n: (0, 0)),
            pl.BlockSpec(pk["b_sh"].shape, lambda n: (0, 0)),
            pl.BlockSpec(pk["w_sh2"].shape, lambda n: (0, 0)),
            pl.BlockSpec(pk["b_sh2"].shape, lambda n: (0, 0)),
        ],
        out_specs=pl.BlockSpec((None, H + 2, W + 2, NH), lambda n: (n, 0, 0, 0)),
        scratch_shapes=[
            pltpu.VMEM((H + 2, W + 2, Cout), jnp.float32),   # padded feat_y plane
            pltpu.VMEM((H + 2, W + 2, Cout), jnp.float32),   # padded h plane
        ],
        compiler_params=_cparams(1, est),
    )(y, m, pk["w1"], pk["b1"], pk["w_sh"], pk["b_sh"], pk["w_sh2"], pk["b_sh2"])


# --------------------------------------------------------------------------- #
# Kernel 2: fused gamma/beta convs + instance-norm apply + modulation (row-tiled)
# --------------------------------------------------------------------------- #
def _spade_kernel(x_ref, mean_ref, rstd_ref, a_ref, w_ref, b_ref, o_ref, *, W, TH, C):
    NH = a_ref.shape[-1]
    THW = TH * W
    row0 = pl.multiple_of(pl.program_id(1) * TH, TH)

    # instance-norm application (stats precomputed over the full H*W extent)
    normalized = (x_ref[...] - mean_ref[...]) * rstd_ref[...]          # (C, THW) f32

    # gamma & beta 3x3 convs fused into 9 shifted GEMMs.  Activation plane is
    # already bf16 (no per-patch casts); gamma||beta out-channels padded only to
    # 8 sublanes, so the trailing transpose is tiny and the weights stay small.
    acc = None                                                         # (THW, C2) f32
    for kh in range(3):
        rows = a_ref[pl.ds(row0 + kh, TH), :, :]                       # (TH, W+2, NH) bf16
        for kw in range(3):
            patch = rows[:, kw:kw + W, :].reshape(THW, NH)
            contrib = jnp.dot(patch, w_ref[kh * 3 + kw],
                              preferred_element_type=jnp.float32)
            acc = contrib if acc is None else acc + contrib

    gb = (acc + b_ref[...]).T                                          # (C2, THW)
    gamma = gb[0:C, :]
    beta = gb[C:2 * C, :]
    o_ref[...] = normalized * (1.0 + gamma) + beta                     # lane-dense (C, THW)


def _spade_out(x2d, mean, rstd, actv_pad, w_gb, b_gb, H, W, TH, C):
    N = x2d.shape[0]
    HW = H * W
    NH = actv_pad.shape[-1]
    THW = TH * W
    T = H // TH
    est = (
        2 * (C * THW * 4) * 2                          # x block + out block (double-buffered)
        + 2 * 2 * (C * 4)                              # mean / rstd
        + 2 * ((H + 2) * (W + 2) * NH * 2)             # bf16 activation plane (double-buffered)
        + w_gb.size * 2 + b_gb.size * 4
        + 9 * THW * NH * 2                             # shifted-patch temporaries
    )
    return pl.pallas_call(
        functools.partial(_spade_kernel, W=W, TH=TH, C=C),
        out_shape=jax.ShapeDtypeStruct((N, C, HW), jnp.float32),
        grid=(N, T),
        in_specs=[
            pl.BlockSpec((None, C, THW), lambda n, t: (n, 0, t)),
            pl.BlockSpec((None, C, 1), lambda n, t: (n, 0, 0)),
            pl.BlockSpec((None, C, 1), lambda n, t: (n, 0, 0)),
            pl.BlockSpec((None, H + 2, W + 2, NH), lambda n, t: (n, 0, 0, 0)),
            pl.BlockSpec(w_gb.shape, lambda n, t: (0, 0, 0)),
            pl.BlockSpec(b_gb.shape, lambda n, t: (0, 0)),
        ],
        out_specs=pl.BlockSpec((None, C, THW), lambda n, t: (n, 0, t)),
        compiler_params=_cparams(2, est),
    )(x2d, mean, rstd, actv_pad, w_gb, b_gb)


# --------------------------------------------------------------------------- #
# Parameter setup / packing and the full forward pass
# --------------------------------------------------------------------------- #
def init_params(key, C, Cout, D, nhidden=512):
    ks = jax.random.split(key, 10)
    p = {}
    p["w1x1"] = 0.2 * jax.random.normal(ks[0], (D, C, Cout), jnp.float32)
    b1 = 0.05 * jax.random.normal(ks[1], (D, Cout), jnp.float32)
    p["b1x1_sum"] = jnp.sum(b1, axis=0, keepdims=True)                      # (1, Cout)
    p["w_sh"] = (1.0 / math.sqrt(9 * Cout)) * jax.random.normal(ks[2], (3, 3, Cout, Cout), jnp.float32)
    p["b_sh"] = 0.05 * jax.random.normal(ks[3], (1, Cout), jnp.float32)
    p["w_sh2"] = (1.0 / math.sqrt(9 * Cout)) * jax.random.normal(ks[4], (3, 3, Cout, nhidden), jnp.float32)
    p["b_sh2"] = 0.05 * jax.random.normal(ks[5], (1, nhidden), jnp.float32)
    p["w_g"] = (1.0 / math.sqrt(9 * nhidden)) * jax.random.normal(ks[6], (3, 3, nhidden, C), jnp.float32)
    p["b_g"] = 0.05 * jax.random.normal(ks[7], (1, C), jnp.float32)
    p["w_b"] = (1.0 / math.sqrt(9 * nhidden)) * jax.random.normal(ks[8], (3, 3, nhidden, C), jnp.float32)
    p["b_b"] = 0.05 * jax.random.normal(ks[9], (1, C), jnp.float32)
    return p


def _pack_params(p, C, D):
    Cout = p["w1x1"].shape[-1]
    NH = p["w_sh2"].shape[-1]
    bf16 = jnp.bfloat16
    C2 = _round_up(2 * C, 8)      # gamma||beta out-channels, sublane-aligned (NOT 128-padded)
    w_gb = jnp.concatenate([p["w_g"], p["w_b"]], axis=-1)                   # (3,3,NH,2C)
    w_gb = jnp.pad(w_gb, ((0, 0), (0, 0), (0, 0), (0, C2 - 2 * C)))
    b_gb = jnp.pad(jnp.concatenate([p["b_g"], p["b_b"]], axis=-1), ((0, 0), (0, C2 - 2 * C)))
    return {
        "w1": p["w1x1"].reshape(D * C, Cout).astype(bf16),                  # stacked grouped-1x1
        "b1": p["b1x1_sum"],
        "w_sh": p["w_sh"].reshape(9 * Cout, Cout).astype(bf16),
        "b_sh": p["b_sh"],
        "w_sh2": p["w_sh2"].reshape(9 * Cout, NH).astype(bf16),
        "b_sh2": p["b_sh2"],
        "w_gb": w_gb.reshape(9, NH, C2).astype(bf16),
        "b_gb": b_gb,                                                       # (1, C2) f32
    }


def rsim_spade_forward(x_nchw, y_nchw, masks_nchw, p, D):
    N, C, H, W = x_nchw.shape
    HW = H * W
    pk = _pack_params(p, C, D)

    # reference features: channels-last, flattened spatial, bf16 MXU operands.
    # Masks stay (N, HW, D): no host-side repeat / duplicated HBM stream.
    y = jnp.transpose(y_nchw, (0, 2, 3, 1)).reshape(N, HW, D * C).astype(jnp.bfloat16)
    m = jnp.transpose(masks_nchw, (0, 2, 3, 1)).reshape(N, HW, D).astype(jnp.bfloat16)

    # kernel 1: grouped 1x1 + mlp_shared + mlp_shared_2 (zero-padded bf16 plane)
    actv_pad = _features(y, m, pk, H, W, C, D)                              # (N, H+2, W+2, NH)

    # instance-norm pass 1: tiny per-(n,c) reduction over H*W, done in plain XLA
    x2d = x_nchw.reshape(N, C, HW)
    mean = jnp.mean(x2d, axis=2, keepdims=True)
    var = jnp.mean(jnp.square(x2d - mean), axis=2, keepdims=True)
    rstd = jax.lax.rsqrt(var + EPS)

    # kernel 2: gamma/beta convs + norm application + modulation, row-tiled
    TH = _pick_tile_h(H, W)
    out2d = _spade_out(x2d, mean, rstd, actv_pad, pk["w_gb"], pk["b_gb"], H, W, TH, C)
    return out2d.reshape(N, C, H, W)


# --------------------------------------------------------------------------- #
# Pure-JAX references for numerical verification
# --------------------------------------------------------------------------- #
def reference_forward(x_nchw, y_nchw, masks_nchw, p, D, match_kernel_precision=True):
    N, C, H, W = x_nchw.shape
    if match_kernel_precision:
        q = lambda t: t.astype(jnp.bfloat16).astype(jnp.float32)   # emulate bf16 MXU operands
    else:
        q = lambda t: t

    x = jnp.transpose(x_nchw, (0, 2, 3, 1))
    y = jnp.transpose(y_nchw, (0, 2, 3, 1))
    m = jnp.transpose(masks_nchw, (0, 2, 3, 1))
    ym = q(y) * q(jnp.repeat(m, C, axis=-1))
    w1 = p["w1x1"].reshape(D * C, -1)
    feat = jnp.einsum("nhwk,ko->nhwo", ym, q(w1), precision=HIGHEST) + p["b1x1_sum"][0]

    def conv3(xh, w, b):
        o = jax.lax.conv_general_dilated(q(xh), q(w), (1, 1), "SAME",
                                         dimension_numbers=("NHWC", "HWIO", "NHWC"),
                                         precision=HIGHEST)
        return o + b[0]

    lrelu = lambda t: jnp.maximum(t, LRELU_SLOPE * t)
    h = lrelu(conv3(feat, p["w_sh"], p["b_sh"]))
    actv = lrelu(conv3(h, p["w_sh2"], p["b_sh2"]))
    gamma = conv3(actv, p["w_g"], p["b_g"])
    beta = conv3(actv, p["w_b"], p["b_b"])

    mean = jnp.mean(x, axis=(1, 2), keepdims=True)
    var = jnp.mean(jnp.square(x - mean), axis=(1, 2), keepdims=True)
    normalized = (x - mean) * jax.lax.rsqrt(var + EPS)
    out = normalized * (1.0 + gamma) + beta
    return jnp.transpose(out, (0, 3, 1, 2))


# --------------------------------------------------------------------------- #
if __name__ == "__main__":
    key = jax.random.PRNGKey(0)
    # input_channels=4, output_channels=8, num_domains=3, 16x16 feature maps
    N, C, Cout, D, H, W = 2, 4, 8, 3, 16, 16
    k1, k2, k3, k4 = jax.random.split(key, 4)

    x = jax.random.normal(k1, (N, C, H, W), jnp.float32)
    y = jax.random.normal(k2, (N, D * C, H, W), jnp.float32)
    masks = (jax.random.uniform(k3, (N, D, H, W)) > 0.5).astype(jnp.float32)
    params = init_params(k4, C, Cout, D)

    out = jax.block_until_ready(rsim_spade_forward(x, y, masks, params, D))
    assert out.shape == (N, C, H, W)

    ref_matched = reference_forward(x, y, masks, params, D, match_kernel_precision=True)
    ref_f32 = reference_forward(x, y, masks, params, D, match_kernel_precision=False)
    err_matched = float(jnp.max(jnp.abs(out - ref_matched)))
    err_f32 = float(jnp.max(jnp.abs(out - ref_f32)))
    if err_matched > 3e-3:
        raise AssertionError(f"mismatch vs precision-matched reference: {err_matched}")
    if err_f32 > 5e-2:
        raise AssertionError(f"mismatch vs float32 reference: {err_f32}")
    print("KERNEL_OK")
</pallas_src>

<mosaic_0001>
module attributes {stable_mosaic.version = 11 : i64} {
  func.func @_features_kernel(%arg0: i32, %arg1: memref<1x256x12xbf16, #tpu.memory_space<vmem>>, %arg2: memref<1x256x3xbf16, #tpu.memory_space<vmem>>, %arg3: memref<12x8xbf16, #tpu.memory_space<vmem>>, %arg4: memref<1x8xf32, #tpu.memory_space<vmem>>, %arg5: memref<72x8xbf16, #tpu.memory_space<vmem>>, %arg6: memref<1x8xf32, #tpu.memory_space<vmem>>, %arg7: memref<72x512xbf16, #tpu.memory_space<vmem>>, %arg8: memref<1x512xf32, #tpu.memory_space<vmem>>, %arg9: memref<1x18x18x512xbf16, #tpu.memory_space<vmem>>, %arg10: memref<18x18x8xf32, #tpu.memory_space<vmem>>, %arg11: memref<18x18x8xf32, #tpu.memory_space<vmem>>) attributes {dimension_semantics = [#tpu.dimension_semantics<parallel>], iteration_bounds = array<i64: 2>, scalar_prefetch = 0 : i64, scratch_operands = 2 : i64, tpu.core_type = #tpu.core_type<tc>, window_params = [{transform_indices = @transform_0, window_bounds = array<i64: 1, 256, 12>}, {transform_indices = @transform_1, window_bounds = array<i64: 1, 256, 3>}, {pipeline_mode = #tpu.pipeline_mode<synchronous>, transform_indices = @transform_2, window_bounds = array<i64: 12, 8>}, {pipeline_mode = #tpu.pipeline_mode<synchronous>, transform_indices = @transform_3, window_bounds = array<i64: 1, 8>}, {pipeline_mode = #tpu.pipeline_mode<synchronous>, transform_indices = @transform_4, window_bounds = array<i64: 72, 8>}, {pipeline_mode = #tpu.pipeline_mode<synchronous>, transform_indices = @transform_5, window_bounds = array<i64: 1, 8>}, {pipeline_mode = #tpu.pipeline_mode<synchronous>, transform_indices = @transform_6, window_bounds = array<i64: 72, 512>}, {pipeline_mode = #tpu.pipeline_mode<synchronous>, transform_indices = @transform_7, window_bounds = array<i64: 1, 512>}, {transform_indices = @transform_8, window_bounds = array<i64: 1, 18, 18, 512>}]} {
    %c0 = arith.constant 0 : index
    %c0_0 = arith.constant 0 : index
    %c0_1 = arith.constant 0 : index
    %0 = vector.load %arg1[%c0, %c0_0, %c0_1] : memref<1x256x12xbf16, #tpu.memory_space<vmem>>, vector<1x256x4xbf16>
    %1 = vector.shape_cast %0 : vector<1x256x4xbf16> to vector<256x4xbf16>
    %c0_2 = arith.constant 0 : index
    %c0_3 = arith.constant 0 : index
    %c0_4 = arith.constant 0 : index
    %2 = vector.load %arg2[%c0_2, %c0_3, %c0_4] : memref<1x256x3xbf16, #tpu.memory_space<vmem>>, vector<1x256x1xbf16>
    %3 = vector.shape_cast %2 : vector<1x256x1xbf16> to vector<256x1xbf16>
    %4 = vector.broadcast %3 : vector<256x1xbf16> to vector<256x4xbf16>
    %5 = arith.mulf %1, %4 : vector<256x4xbf16>
    %c0_5 = arith.constant 0 : index
    %c0_6 = arith.constant 0 : index
    %6 = vector.load %arg3[%c0_5, %c0_6] : memref<12x8xbf16, #tpu.memory_space<vmem>>, vector<4x8xbf16>
    %cst = arith.constant dense<0.000000e+00> : vector<256x8xf32>
    %7 = tpu.matmul %5, %6, %cst {dimension_numbers = #tpu.dot_dimension_numbers<[1], [0], [0], [1], [0, 0, 1, 1], [], []>} : vector<256x4xbf16>, vector<4x8xbf16>, vector<256x8xf32> -> vector<256x8xf32>
    %c0_7 = arith.constant 0 : index
    %c0_8 = arith.constant 0 : index
    %c4 = arith.constant 4 : index
    %8 = vector.load %arg1[%c0_7, %c0_8, %c4] : memref<1x256x12xbf16, #tpu.memory_space<vmem>>, vector<1x256x4xbf16>
    %9 = vector.shape_cast %8 : vector<1x256x4xbf16> to vector<256x4xbf16>
    %c0_9 = arith.constant 0 : index
    %c0_10 = arith.constant 0 : index
    %c1 = arith.constant 1 : index
    %10 = vector.load %arg2[%c0_9, %c0_10, %c1] : memref<1x256x3xbf16, #tpu.memory_space<vmem>>, vector<1x256x1xbf16>
    %11 = vector.shape_cast %10 : vector<1x256x1xbf16> to vector<256x1xbf16>
    %12 = vector.broadcast %11 : vector<256x1xbf16> to vector<256x4xbf16>
    %13 = arith.mulf %9, %12 : vector<256x4xbf16>
    %c4_11 = arith.constant 4 : index
    %c0_12 = arith.constant 0 : index
    %14 = vector.load %arg3[%c4_11, %c0_12] : memref<12x8xbf16, #tpu.memory_space<vmem>>, vector<4x8xbf16>
    %cst_13 = arith.constant dense<0.000000e+00> : vector<256x8xf32>
    %15 = tpu.matmul %13, %14, %cst_13 {dimension_numbers = #tpu.dot_dimension_numbers<[1], [0], [0], [1], [0, 0, 1, 1], [], []>} : vector<256x4xbf16>, vector<4x8xbf16>, vector<256x8xf32> -> vector<256x8xf32>
    %16 = arith.addf %7, %15 : vector<256x8xf32>
    %c0_14 = arith.constant 0 : index
    %c0_15 = arith.constant 0 : index
    %c8 = arith.constant 8 : index
    %17 = vector.load %arg1[%c0_14, %c0_15, %c8] : memref<1x256x12xbf16, #tpu.memory_space<vmem>>, vector<1x256x4xbf16>
    %18 = vector.shape_cast %17 : vector<1x256x4xbf16> to vector<256x4xbf16>
    %c0_16 = arith.constant 0 : index
    %c0_17 = arith.constant 0 : index
    %c2 = arith.constant 2 : index
    %19 = vector.load %arg2[%c0_16, %c0_17, %c2] : memref<1x256x3xbf16, #tpu.memory_space<vmem>>, vector<1x256x1xbf16>
    %20 = vector.shape_cast %19 : vector<1x256x1xbf16> to vector<256x1xbf16>
    %21 = vector.broadcast %20 : vector<256x1xbf16> to vector<256x4xbf16>
    %22 = arith.mulf %18, %21 : vector<256x4xbf16>
    %c8_18 = arith.constant 8 : index
    %c0_19 = arith.constant 0 : index
    %23 = vector.load %arg3[%c8_18, %c0_19] : memref<12x8xbf16, #tpu.memory_space<vmem>>, vector<4x8xbf16>
    %cst_20 = arith.constant dense<0.000000e+00> : vector<256x8xf32>
    %24 = tpu.matmul %22, %23, %cst_20 {dimension_numbers = #tpu.dot_dimension_numbers<[1], [0], [0], [1], [0, 0, 1, 1], [], []>} : vector<256x4xbf16>, vector<4x8xbf16>, vector<256x8xf32> -> vector<256x8xf32>
    %25 = arith.addf %16, %24 : vector<256x8xf32>
    %c0_21 = arith.constant 0 : index
    %c0_22 = arith.constant 0 : index
    %26 = vector.load %arg4[%c0_21, %c0_22] : memref<1x8xf32, #tpu.memory_space<vmem>>, vector<1x8xf32>
    %27 = vector.broadcast %26 : vector<1x8xf32> to vector<256x8xf32>
    %28 = arith.addf %25, %27 : vector<256x8xf32>
    %cst_23 = arith.constant 0.000000e+00 : f32
    %29 = vector.broadcast %cst_23 : f32 to vector<1x18x8xf32>
    %c0_24 = arith.constant 0 : index
    %c0_25 = arith.constant 0 : index
    %c0_26 = arith.constant 0 : index
    %30 = vector.load %arg10[%c0_24, %c0_25, %c0_26] : memref<18x18x8xf32, #tpu.memory_space<vmem>>, vector<1x18x8xf32>
    tpu.vector_store %arg10[%c0_24, %c0_25, %c0_26], %29 {strides = array<i32>} : memref<18x18x8xf32, #tpu.memory_space<vmem>>, vector<1x18x8xf32>,
    %cst_27 = arith.constant 0.000000e+00 : f32
    %31 = vector.broadcast %cst_27 : f32 to vector<1x18x8xf32>
    %c17 = arith.constant 17 : index
    %c0_28 = arith.constant 0 : index
    %c0_29 = arith.constant 0 : index
    %32 = vector.load %arg10[%c17, %c0_28, %c0_29] : memref<18x18x8xf32, #tpu.memory_space<vmem>>, vector<1x18x8xf32>
    tpu.vector_store %arg10[%c17, %c0_28, %c0_29], %31 {strides = array<i32>} : memref<18x18x8xf32, #tpu.memory_space<vmem>>, vector<1x18x8xf32>,
    %cst_30 = arith.constant 0.000000e+00 : f32
    %33 = vector.broadcast %cst_30 : f32 to vector<16x1x8xf32>
    %c1_31 = arith.constant 1 : index
    %c0_32 = arith.constant 0 : index
    %c0_33 = arith.constant 0 : index
    %34 = vector.load %arg10[%c1_31, %c0_32, %c0_33] : memref<18x18x8xf32, #tpu.memory_space<vmem>>, vector<16x1x8xf32>
    tpu.vector_store %arg10[%c1_31, %c0_32, %c0_33], %33 {strides = array<i32>} : memref<18x18x8xf32, #tpu.memory_space<vmem>>, vector<16x1x8xf32>,
    %cst_34 = arith.constant 0.000000e+00 : f32
    %35 = vector.broadcast %cst_34 : f32 to vector<16x1x8xf32>
    %c1_35 = arith.constant 1 : index
    %c17_36 = arith.constant 17 : index
    %c0_37 = arith.constant 0 : index
    %36 = vector.load %arg10[%c1_35, %c17_36, %c0_37] : memref<18x18x8xf32, #tpu.memory_space<vmem>>, vector<16x1x8xf32>
    tpu.vector_store %arg10[%c1_35, %c17_36, %c0_37], %35 {strides = array<i32>} : memref<18x18x8xf32, #tpu.memory_space<vmem>>, vector<16x1x8xf32>,
    %37 = vector.shape_cast %28 : vector<256x8xf32> to vector<16x16x8xf32>
    %c1_38 = arith.constant 1 : index
    %c1_39 = arith.constant 1 : index
    %c0_40 = arith.constant 0 : index
    %38 = vector.load %arg10[%c1_38, %c1_39, %c0_40] : memref<18x18x8xf32, #tpu.memory_space<vmem>>, vector<16x16x8xf32>
    tpu.vector_store %arg10[%c1_38, %c1_39, %c0_40], %37 {strides = array<i32>} : memref<18x18x8xf32, #tpu.memory_space<vmem>>, vector<16x16x8xf32>,
    %c0_41 = arith.constant 0 : index
    %c0_42 = arith.constant 0 : index
    %c0_43 = arith.constant 0 : index
    %39 = vector.load %arg10[%c0_41, %c0_42, %c0_43] : memref<18x18x8xf32, #tpu.memory_space<vmem>>, vector<18x18x8xf32>
    %40 = vector.extract_strided_slice %39 {offsets = [0, 0, 0], sizes = [16, 16, 8], strides = [1, 1, 1]} : vector<18x18x8xf32> to vector<16x16x8xf32>
    %41 = vector.shape_cast %40 : vector<16x16x8xf32> to vector<256x8xf32>
    %42 = vector.extract_strided_slice %39 {offsets = [0, 1, 0], sizes = [16, 16, 8], strides = [1, 1, 1]} : vector<18x18x8xf32> to vector<16x16x8xf32>
    %43 = vector.shape_cast %42 : vector<16x16x8xf32> to vector<256x8xf32>
    %44 = vector.extract_strided_slice %39 {offsets = [0, 2, 0], sizes = [16, 16, 8], strides = [1, 1, 1]} : vector<18x18x8xf32> to vector<16x16x8xf32>
    %45 = vector.shape_cast %44 : vector<16x16x8xf32> to vector<256x8xf32>
    %46 = vector.extract_strided_slice %39 {offsets = [1, 0, 0], sizes = [16, 16, 8], strides = [1, 1, 1]} : vector<18x18x8xf32> to vector<16x16x8xf32>
    %47 = vector.shape_cast %46 : vector<16x16x8xf32> to vector<256x8xf32>
    %48 = vector.extract_strided_slice %39 {offsets = [1, 1, 0], sizes = [16, 16, 8], strides = [1, 1, 1]} : vector<18x18x8xf32> to vector<16x16x8xf32>
    %49 = vector.shape_cast %48 : vector<16x16x8xf32> to vector<256x8xf32>
    %50 = vector.extract_strided_slice %39 {offsets = [1, 2, 0], sizes = [16, 16, 8], strides = [1, 1, 1]} : vector<18x18x8xf32> to vector<16x16x8xf32>
    %51 = vector.shape_cast %50 : vector<16x16x8xf32> to vector<256x8xf32>
    %52 = vector.extract_strided_slice %39 {offsets = [2, 0, 0], sizes = [16, 16, 8], strides = [1, 1, 1]} : vector<18x18x8xf32> to vector<16x16x8xf32>
    %53 = vector.shape_cast %52 : vector<16x16x8xf32> to vector<256x8xf32>
    %54 = vector.extract_strided_slice %39 {offsets = [2, 1, 0], sizes = [16, 16, 8], strides = [1, 1, 1]} : vector<18x18x8xf32> to vector<16x16x8xf32>
    %55 = vector.shape_cast %54 : vector<16x16x8xf32> to vector<256x8xf32>
    %56 = vector.extract_strided_slice %39 {offsets = [2, 2, 0], sizes = [16, 16, 8], strides = [1, 1, 1]} : vector<18x18x8xf32> to vector<16x16x8xf32>
    %57 = vector.shape_cast %56 : vector<16x16x8xf32> to vector<256x8xf32>
    %58 = tpu.concatenate %41, %43, %45, %47, %49, %51, %53, %55, %57 in 1 : vector<256x8xf32>, vector<256x8xf32>, vector<256x8xf32>, vector<256x8xf32>, vector<256x8xf32>, vector<256x8xf32>, vector<256x8xf32>, vector<256x8xf32>, vector<256x8xf32> -> vector<256x72xf32>
    %59 = arith.truncf %58 : vector<256x72xf32> to vector<256x72xbf16>
    %c0_44 = arith.constant 0 : index
    %c0_45 = arith.constant 0 : index
    %60 = vector.load %arg5[%c0_44, %c0_45] : memref<72x8xbf16, #tpu.memory_space<vmem>>, vector<72x8xbf16>
    %cst_46 = arith.constant dense<0.000000e+00> : vector<256x8xf32>
    %61 = tpu.matmul %59, %60, %cst_46 {dimension_numbers = #tpu.dot_dimension_numbers<[1], [0], [0], [1], [0, 0, 1, 1], [], []>} : vector<256x72xbf16>, vector<72x8xbf16>, vector<256x8xf32> -> vector<256x8xf32>
    %c0_47 = arith.constant 0 : index
    %c0_48 = arith.constant 0 : index
    %62 = vector.load %arg6[%c0_47, %c0_48] : memref<1x8xf32, #tpu.memory_space<vmem>>, vector<1x8xf32>
    %63 = vector.broadcast %62 : vector<1x8xf32> to vector<256x8xf32>
    %64 = arith.addf %61, %63 : vector<256x8xf32>
    %cst_49 = arith.constant 2.000000e-01 : f32
    %65 = vector.broadcast %cst_49 : f32 to vector<256x8xf32>
    %66 = arith.mulf %65, %64 : vector<256x8xf32>
    %67 = arith.maximumf %64, %66 : vector<256x8xf32>
    %cst_50 = arith.constant 0.000000e+00 : f32
    %68 = vector.broadcast %cst_50 : f32 to vector<1x18x8xf32>
    %c0_51 = arith.constant 0 : index
    %c0_52 = arith.constant 0 : index
    %c0_53 = arith.constant 0 : index
    %69 = vector.load %arg11[%c0_51, %c0_52, %c0_53] : memref<18x18x8xf32, #tpu.memory_space<vmem>>, vector<1x18x8xf32>
    tpu.vector_store %arg11[%c0_51, %c0_52, %c0_53], %68 {strides = array<i32>} : memref<18x18x8xf32, #tpu.memory_space<vmem>>, vector<1x18x8xf32>,
    %cst_54 = arith.constant 0.000000e+00 : f32
    %70 = vector.broadcast %cst_54 : f32 to vector<1x18x8xf32>
    %c17_55 = arith.constant 17 : index
    %c0_56 = arith.constant 0 : index
    %c0_57 = arith.constant 0 : index
    %71 = vector.load %arg11[%c17_55, %c0_56, %c0_57] : memref<18x18x8xf32, #tpu.memory_space<vmem>>, vector<1x18x8xf32>
    tpu.vector_store %arg11[%c17_55, %c0_56, %c0_57], %70 {strides = array<i32>} : memref<18x18x8xf32, #tpu.memory_space<vmem>>, vector<1x18x8xf32>,
    %cst_58 = arith.constant 0.000000e+00 : f32
    %72 = vector.broadcast %cst_58 : f32 to vector<16x1x8xf32>
    %c1_59 = arith.constant 1 : index
    %c0_60 = arith.constant 0 : index
    %c0_61 = arith.constant 0 : index
    %73 = vector.load %arg11[%c1_59, %c0_60, %c0_61] : memref<18x18x8xf32, #tpu.memory_space<vmem>>, vector<16x1x8xf32>
    tpu.vector_store %arg11[%c1_59, %c0_60, %c0_61], %72 {strides = array<i32>} : memref<18x18x8xf32, #tpu.memory_space<vmem>>, vector<16x1x8xf32>,
    %cst_62 = arith.constant 0.000000e+00 : f32
    %74 = vector.broadcast %cst_62 : f32 to vector<16x1x8xf32>
    %c1_63 = arith.constant 1 : index
    %c17_64 = arith.constant 17 : index
    %c0_65 = arith.constant 0 : index
    %75 = vector.load %arg11[%c1_63, %c17_64, %c0_65] : memref<18x18x8xf32, #tpu.memory_space<vmem>>, vector<16x1x8xf32>
    tpu.vector_store %arg11[%c1_63, %c17_64, %c0_65], %74 {strides = array<i32>} : memref<18x18x8xf32, #tpu.memory_space<vmem>>, vector<16x1x8xf32>,
    %76 = vector.shape_cast %67 : vector<256x8xf32> to vector<16x16x8xf32>
    %c1_66 = arith.constant 1 : index
    %c1_67 = arith.constant 1 : index
    %c0_68 = arith.constant 0 : index
    %77 = vector.load %arg11[%c1_66, %c1_67, %c0_68] : memref<18x18x8xf32, #tpu.memory_space<vmem>>, vector<16x16x8xf32>
    tpu.vector_store %arg11[%c1_66, %c1_67, %c0_68], %76 {strides = array<i32>} : memref<18x18x8xf32, #tpu.memory_space<vmem>>, vector<16x16x8xf32>,
    %c0_69 = arith.constant 0 : index
    %c0_70 = arith.constant 0 : index
    %c0_71 = arith.constant 0 : index
    %78 = vector.load %arg11[%c0_69, %c0_70, %c0_71] : memref<18x18x8xf32, #tpu.memory_space<vmem>>, vector<18x18x8xf32>
    %79 = vector.extract_strided_slice %78 {offsets = [0, 0, 0], sizes = [16, 16, 8], strides = [1, 1, 1]} : vector<18x18x8xf32> to vector<16x16x8xf32>
    %80 = vector.shape_cast %79 : vector<16x16x8xf32> to vector<256x8xf32>
    %81 = vector.extract_strided_slice %78 {offsets = [0, 1, 0], sizes = [16, 16, 8], strides = [1, 1, 1]} : vector<18x18x8xf32> to vector<16x16x8xf32>
    %82 = vector.shape_cast %81 : vector<16x16x8xf32> to vector<256x8xf32>
    %83 = vector.extract_strided_slice %78 {offsets = [0, 2, 0], sizes = [16, 16, 8], strides = [1, 1, 1]} : vector<18x18x8xf32> to vector<16x16x8xf32>
    %84 = vector.shape_cast %83 : vector<16x16x8xf32> to vector<256x8xf32>
    %85 = vector.extract_strided_slice %78 {offsets = [1, 0, 0], sizes = [16, 16, 8], strides = [1, 1, 1]} : vector<18x18x8xf32> to vector<16x16x8xf32>
    %86 = vector.shape_cast %85 : vector<16x16x8xf32> to vector<256x8xf32>
    %87 = vector.extract_strided_slice %78 {offsets = [1, 1, 0], sizes = [16, 16, 8], strides = [1, 1, 1]} : vector<18x18x8xf32> to vector<16x16x8xf32>
    %88 = vector.shape_cast %87 : vector<16x16x8xf32> to vector<256x8xf32>
    %89 = vector.extract_strided_slice %78 {offsets = [1, 2, 0], sizes = [16, 16, 8], strides = [1, 1, 1]} : vector<18x18x8xf32> to vector<16x16x8xf32>
    %90 = vector.shape_cast %89 : vector<16x16x8xf32> to vector<256x8xf32>
    %91 = vector.extract_strided_slice %78 {offsets = [2, 0, 0], sizes = [16, 16, 8], strides = [1, 1, 1]} : vector<18x18x8xf32> to vector<16x16x8xf32>
    %92 = vector.shape_cast %91 : vector<16x16x8xf32> to vector<256x8xf32>
    %93 = vector.extract_strided_slice %78 {offsets = [2, 1, 0], sizes = [16, 16, 8], strides = [1, 1, 1]} : vector<18x18x8xf32> to vector<16x16x8xf32>
    %94 = vector.shape_cast %93 : vector<16x16x8xf32> to vector<256x8xf32>
    %95 = vector.extract_strided_slice %78 {offsets = [2, 2, 0], sizes = [16, 16, 8], strides = [1, 1, 1]} : vector<18x18x8xf32> to vector<16x16x8xf32>
    %96 = vector.shape_cast %95 : vector<16x16x8xf32> to vector<256x8xf32>
    %97 = tpu.concatenate %80, %82, %84, %86, %88, %90, %92, %94, %96 in 1 : vector<256x8xf32>, vector<256x8xf32>, vector<256x8xf32>, vector<256x8xf32>, vector<256x8xf32>, vector<256x8xf32>, vector<256x8xf32>, vector<256x8xf32>, vector<256x8xf32> -> vector<256x72xf32>
    %98 = arith.truncf %97 : vector<256x72xf32> to vector<256x72xbf16>
    %c0_72 = arith.constant 0 : index
    %c0_73 = arith.constant 0 : index
    %99 = vector.load %arg7[%c0_72, %c0_73] : memref<72x512xbf16, #tpu.memory_space<vmem>>, vector<72x512xbf16>
    %cst_74 = arith.constant dense<0.000000e+00> : vector<256x512xf32>
    %100 = tpu.matmul %98, %99, %cst_74 {dimension_numbers = #tpu.dot_dimension_numbers<[1], [0], [0], [1], [0, 0, 1, 1], [], []>} : vector<256x72xbf16>, vector<72x512xbf16>, vector<256x512xf32> -> vector<256x512xf32>
    %c0_75 = arith.constant 0 : index
    %c0_76 = arith.constant 0 : index
    %101 = vector.load %arg8[%c0_75, %c0_76] : memref<1x512xf32, #tpu.memory_space<vmem>>, vector<1x512xf32>
    %102 = vector.broadcast %101 : vector<1x512xf32> to vector<256x512xf32>
    %103 = arith.addf %100, %102 : vector<256x512xf32>
    %cst_77 = arith.constant 2.000000e-01 : f32
    %104 = vector.broadcast %cst_77 : f32 to vector<256x512xf32>
    %105 = arith.mulf %104, %103 : vector<256x512xf32>
    %106 = arith.maximumf %103, %105 : vector<256x512xf32>
    %cst_78 = arith.constant 0.000000e+00 : bf16
    %107 = vector.broadcast %cst_78 : bf16 to vector<1x18x512xbf16>
    %c0_79 = arith.constant 0 : index
    %c0_80 = arith.constant 0 : index
    %c0_81 = arith.constant 0 : index
    %c0_82 = arith.constant 0 : index
    %108 = vector.load %arg9[%c0_79, %c0_80, %c0_81, %c0_82] : memref<1x18x18x512xbf16, #tpu.memory_space<vmem>>, vector<1x1x18x512xbf16>
    %109 = vector.shape_cast %108 : vector<1x1x18x512xbf16> to vector<1x18x512xbf16>
    %110 = vector.shape_cast %107 : vector<1x18x512xbf16> to vector<1x1x18x512xbf16>
    tpu.vector_store %arg9[%c0_79, %c0_80, %c0_81, %c0_82], %110 {strides = array<i32>} : memref<1x18x18x512xbf16, #tpu.memory_space<vmem>>, vector<1x1x18x512xbf16>,
    %cst_83 = arith.constant 0.000000e+00 : bf16
    %111 = vector.broadcast %cst_83 : bf16 to vector<1x18x512xbf16>
    %c0_84 = arith.constant 0 : index
    %c17_85 = arith.constant 17 : index
    %c0_86 = arith.constant 0 : index
    %c0_87 = arith.constant 0 : index
    %112 = vector.load %arg9[%c0_84, %c17_85, %c0_86, %c0_87] : memref<1x18x18x512xbf16, #tpu.memory_space<vmem>>, vector<1x1x18x512xbf16>
    %113 = vector.shape_cast %112 : vector<1x1x18x512xbf16> to vector<1x18x512xbf16>
    %114 = vector.shape_cast %111 : vector<1x18x512xbf16> to vector<1x1x18x512xbf16>
    tpu.vector_store %arg9[%c0_84, %c17_85, %c0_86, %c0_87], %114 {strides = array<i32>} : memref<1x18x18x512xbf16, #tpu.memory_space<vmem>>, vector<1x1x18x512xbf16>,
    %cst_88 = arith.constant 0.000000e+00 : bf16
    %115 = vector.broadcast %cst_88 : bf16 to vector<16x1x512xbf16>
    %c0_89 = arith.constant 0 : index
    %c1_90 = arith.constant 1 : index
    %c0_91 = arith.constant 0 : index
    %c0_92 = arith.constant 0 : index
    %116 = vector.load %arg9[%c0_89, %c1_90, %c0_91, %c0_92] : memref<1x18x18x512xbf16, #tpu.memory_space<vmem>>, vector<1x16x1x512xbf16>
    %117 = vector.shape_cast %116 : vector<1x16x1x512xbf16> to vector<16x1x512xbf16>
    %118 = vector.shape_cast %115 : vector<16x1x512xbf16> to vector<1x16x1x512xbf16>
    tpu.vector_store %arg9[%c0_89, %c1_90, %c0_91, %c0_92], %118 {strides = array<i32>} : memref<1x18x18x512xbf16, #tpu.memory_space<vmem>>, vector<1x16x1x512xbf16>,
    %cst_93 = arith.constant 0.000000e+00 : bf16
    %119 = vector.broadcast %cst_93 : bf16 to vector<16x1x512xbf16>
    %c0_94 = arith.constant 0 : index
    %c1_95 = arith.constant 1 : index
    %c17_96 = arith.constant 17 : index
    %c0_97 = arith.constant 0 : index
    %120 = vector.load %arg9[%c0_94, %c1_95, %c17_96, %c0_97] : memref<1x18x18x512xbf16, #tpu.memory_space<vmem>>, vector<1x16x1x512xbf16>
    %121 = vector.shape_cast %120 : vector<1x16x1x512xbf16> to vector<16x1x512xbf16>
    %122 = vector.shape_cast %119 : vector<16x1x512xbf16> to vector<1x16x1x512xbf16>
    tpu.vector_store %arg9[%c0_94, %c1_95, %c17_96, %c0_97], %122 {strides = array<i32>} : memref<1x18x18x512xbf16, #tpu.memory_space<vmem>>, vector<1x16x1x512xbf16>,
    %123 = vector.shape_cast %106 : vector<256x512xf32> to vector<16x16x512xf32>
    %124 = arith.truncf %123 : vector<16x16x512xf32> to vector<16x16x512xbf16>
    %c0_98 = arith.constant 0 : index
    %c1_99 = arith.constant 1 : index
    %c1_100 = arith.constant 1 : index
    %c0_101 = arith.constant 0 : index
    %125 = vector.load %arg9[%c0_98, %c1_99, %c1_100, %c0_101] : memref<1x18x18x512xbf16, #tpu.memory_space<vmem>>, vector<1x16x16x512xbf16>
    %126 = vector.shape_cast %125 : vector<1x16x16x512xbf16> to vector<16x16x512xbf16>
    %127 = vector.shape_cast %124 : vector<16x16x512xbf16> to vector<1x16x16x512xbf16>
    tpu.vector_store %arg9[%c0_98, %c1_99, %c1_100, %c0_101], %127 {strides = array<i32>} : memref<1x18x18x512xbf16, #tpu.memory_space<vmem>>, vector<1x16x16x512xbf16>,
    return
  }
  func.func @transform_0(%arg0: i32) -> (i32, i32, i32) {
    %c0_i32 = arith.constant 0 : i32
    %c0_i32_0 = arith.constant 0 : i32
    %c0_i32_1 = arith.constant 0 : i32
    return %arg0, %c0_i32, %c0_i32_0 : i32, i32, i32
  }
  func.func @transform_1(%arg0: i32) -> (i32, i32, i32) {
    %c0_i32 = arith.constant 0 : i32
    %c0_i32_0 = arith.constant 0 : i32
    %c0_i32_1 = arith.constant 0 : i32
    return %arg0, %c0_i32, %c0_i32_0 : i32, i32, i32
  }
  func.func @transform_2(%arg0: i32) -> (i32, i32) {
    %c0_i32 = arith.constant 0 : i32
    %c0_i32_0 = arith.constant 0 : i32
    %c0_i32_1 = arith.constant 0 : i32
    return %c0_i32, %c0_i32_0 : i32, i32
  }
  func.func @transform_3(%arg0: i32) -> (i32, i32) {
    %c0_i32 = arith.constant 0 : i32
    %c0_i32_0 = arith.constant 0 : i32
    %c0_i32_1 = arith.constant 0 : i32
    return %c0_i32, %c0_i32_0 : i32, i32
  }
  func.func @transform_4(%arg0: i32) -> (i32, i32) {
    %c0_i32 = arith.constant 0 : i32
    %c0_i32_0 = arith.constant 0 : i32
    %c0_i32_1 = arith.constant 0 : i32
    return %c0_i32, %c0_i32_0 : i32, i32
  }
  func.func @transform_5(%arg0: i32) -> (i32, i32) {
    %c0_i32 = arith.constant 0 : i32
    %c0_i32_0 = arith.constant 0 : i32
    %c0_i32_1 = arith.constant 0 : i32
    return %c0_i32, %c0_i32_0 : i32, i32
  }
  func.func @transform_6(%arg0: i32) -> (i32, i32) {
    %c0_i32 = arith.constant 0 : i32
    %c0_i32_0 = arith.constant 0 : i32
    %c0_i32_1 = arith.constant 0 : i32
    return %c0_i32, %c0_i32_0 : i32, i32
  }
  func.func @transform_7(%arg0: i32) -> (i32, i32) {
    %c0_i32 = arith.constant 0 : i32
    %c0_i32_0 = arith.constant 0 : i32
    %c0_i32_1 = arith.constant 0 : i32
    return %c0_i32, %c0_i32_0 : i32, i32
  }
  func.func @transform_8(%arg0: i32) -> (i32, i32, i32, i32) {
    %c0_i32 = arith.constant 0 : i32
    %c0_i32_0 = arith.constant 0 : i32
    %c0_i32_1 = arith.constant 0 : i32
    %c0_i32_2 = arith.constant 0 : i32
    return %arg0, %c0_i32, %c0_i32_0, %c0_i32_1 : i32, i32, i32, i32
  }
}

</mosaic_0001>

<bundles_post_ra>
// kernel: tpu_custom_call.1
= control target key start
LH: loop header
LB: loop body
LE: loop exit
PB: predicated region body
PF: predicated region fallthrough
CT: control target
= control target key end

     0   :  { %s10401_s27 = smov 0   ;;  %s14242_s0 = inlined_call_operand.vmem [shape: bf16[2,256,12], index: 0, kind: input, shape index: {}]   ;;  %s14243_s1 = inlined_call_operand.vmem [shape: bf16[2,256,3], index: 1, kind: input, shape index: {}]   ;;  %s14244_s2 = inlined_call_operand.vmem [shape: bf16[12,8], index: 2, kind: input, shape index: {}]   ;;  %s14245_s3 = inlined_call_operand.vmem [shape: f32[1,8], index: 3, kind: input, shape index: {}]   ;;  %s14246_s4 = inlined_call_operand.vmem [shape: bf16[72,8], index: 4, kind: input, shape index: {}]   ;;  %s14247_s5 = inlined_call_operand.vmem [shape: f32[1,8], index: 5, kind: input, shape index: {}]   ;;  %s14248_s6 = inlined_call_operand.vmem [shape: bf16[72,512], index: 6, kind: input, shape index: {}]   ;;  %s14249_s7 = inlined_call_operand.vmem [shape: f32[1,512], index: 7, kind: input, shape index: {}]   ;;  %s14250_s8 = inlined_call_operand.vmem [shape: bf16[2,18,18,512], index: 8, kind: output, shape index: {}]  }
   0x1 LB: > { %s8036_s28 = sadd.s32 4294967295, %s10339_s27   ;;  %p8040_p0 = scmp.ge.s32.totalorder %s10339_s27, 1  ;;  %s10339_s27 = sphi %s10401_s27, %s18_s27  }
   0x2   : > { %p272_p1 = scmp.lt.s32.totalorder %s10339_s27, 3 }
   0x4   : > { %p273_p2 = pnand %p8040_p0, %p272_p1 }
   0x6   : > { %276 = sbr.rel (%p273_p2) target bundleno = 1794 (0x702), region = 52 }
   0xd   : > { %p311_p3 = scmp.lt.s32.totalorder %s8036_s28, 1  ;;  %v10341_v0 = vmov 0   ;;  %v807_v9 = vld [vmem:[%s14244_s2] sm:$0x3]  ;;  %vm1358_vm0 = vcmask 1041408   ;;  %v10342_v35 = vmov 1   ;;  %v399_v38 = vlaneseq }
   0xe   : > { %8955 = vset.pattern.permute.xlu1 %v10341_v0  ;;  %8954 = vset.pattern.permute.xlu0 %v10341_v0  ;;  %v1652_v10 = vsel %vm1358_vm0, %v807_v9, 0  ;;  %v10343_v36 = vmov 839922192   ;;  %v10344_v44 = vmov 2   ;;  %vm1309_vm1 = vcmask 31744   ;;  %s10345_s22 = smov 124  }
   0xf   : > { %s14356_s28 = smov (!%p311_p3, %s8036_s28), 1  ;;  %8927 = vmatprep.subr.msk.bf16.mxu0 %vm1358_vm0, %v807_v9  ;;  %v397_v37 = vunpack.c.l.s4 %v10343_v36  ;;  %v10600_v40 = vshrl.u32 %v399_v38, 7  ;;  %s10346_s25 = smov 120   ;;  %vm2595_vm2 = vcmask 64512   ;;  %vm2598_vm3 = vcmask 58368  }
  0x10   : > { %s8580_s29 = sshll.u32 %s14356_s28, 7  ;;  %s8930_s30 = smul.u32 864, %s14356_s28  ;;  %8753 = vmatpush3.bf16.msra.mxu0 %v1652_v10  ;;  %vm2772_vm4 = vcmask 1046528   ;;  %vm2605_vm5 = vcmask 57344   ;;  %vm2853_vm6 = vcmask 1045504   ;;  %vm14270_vm7 = vcmask 1043456  }
  0x11   : > { %s10418_s11 = scalar_lea.vmem %s14243_s1, %s8580_s29  ;;  %v398_v39 = vunpack.c.0.s8 %v397_v37  ;;  %14291 = vst [vmem:[#allocation21_spill] sm:$0xff] %v10600_v40  ;;  %s10612_s19 = scalar_lea.vmem %s14242_s0, %s8580_s29  ;;  %vm3760_vm8 = vcmask 130048   ;;  %vm3793_vm9 = vcmask 195584   ;;  %vm3826_vm10 = vcmask 261120  }
  0x12   : > { %s10423_s14 = scalar_lea.vmem %s14250_s8, %s8930_s30  ;;  %v10426_v1 = vld [vmem:[%s10418_s11 + $0x8] sm:$0xf]  ;;  %v10429_v2 = vld [vmem:[%s10418_s11] sm:$0xf]  ;;  %v10446_v3 = vld [vmem:[%s10418_s11 + $0xc] sm:$0xf] }
  0x13   : > { %417 = vperm.xlu1 %8955, %v10426_v1   ;;  %6560 = vst [vmem:[%s10423_s14] sm:$0xff] %v10341_v0  ;;  %6561 = vst [vmem:[%s10423_s14 + $0x8] sm:$0xff] %v10341_v0  ;;  %393 = vperm.xlu0 %8954, %v10429_v2   ;;  %v10449_v4 = vld [vmem:[%s10418_s11 + $0x4] sm:$0xf]  ;;  %v10454_v5 = vld [vmem:[%s10418_s11 + $0x14] sm:$0xf]  ;;  %v10605_v41 = vsub.s32 %v398_v39, %v10600_v40  ;;  %s10348_s26 = smov 8  }
  0x14   : > { %6562 = vst [vmem:[%s10423_s14 + $0x10] sm:$0xff] %v10341_v0  ;;  %6563 = vst [vmem:[%s10423_s14 + $0x18] sm:$0xff] %v10341_v0  ;;  %v10457_v6 = vld [vmem:[%s10418_s11 + $0x10] sm:$0xf]  ;;  %v10462_v7 = vld [vmem:[%s10418_s11 + $0x1c] sm:$0xf] }
  0x15   : > { %6564 = vst [vmem:[%s10423_s14 + $0x20] sm:$0x11] %v10341_v0  ;;  %6565 = vst [vmem:[%s10423_s14 + $0x28] sm:$0x11] %v10341_v0  ;;  %v10465_v8 = vld [vmem:[%s10418_s11 + $0x18] sm:$0xf] }
  0x16   : > { %8220 = vst [vmem:[%s10423_s14 + $0x330] sm:$0xff] %v10341_v0  ;;  %8221 = vst [vmem:[%s10423_s14 + $0x338] sm:$0xff] %v10341_v0  ;;  %v10475_v11 = vld [vmem:[%s10418_s11 + $0x24] sm:$0xf]  ;;  %v10478_v12 = vld [vmem:[%s10418_s11 + $0x20] sm:$0xf] }
  0x17   : > { %8222 = vst [vmem:[%s10423_s14 + $0x340] sm:$0xff] %v10341_v0  ;;  %8223 = vst [vmem:[%s10423_s14 + $0x348] sm:$0xff] %v10341_v0  ;;  %429 = vperm.xlu1 %8955, %v10446_v3   ;;  %405 = vperm.xlu0 %8954, %v10449_v4   ;;  %v10483_v13 = vld [vmem:[%s10418_s11 + $0x2c] sm:$0xf]  ;;  %v10486_v14 = vld [vmem:[%s10418_s11 + $0x28] sm:$0xf] }
  0x18   : > { %8224 = vst [vmem:[%s10423_s14 + $0x350] sm:$0x11] %v10341_v0  ;;  %8225 = vst [vmem:[%s10423_s14 + $0x358] sm:$0x11] %v10341_v0  ;;  %v10491_v15 = vld [vmem:[%s10418_s11 + $0x34] sm:$0xf] }
  0x19   : > { %v10494_v16 = vld [vmem:[%s10418_s11 + $0x30] sm:$0xf]  ;;  %v10499_v17 = vld [vmem:[%s10418_s11 + $0x3c] sm:$0xf]  ;;  %v10502_v18 = vld [vmem:[%s10418_s11 + $0x38] sm:$0xf] }
  0x1a   : > { %14274 = vst [vmem:[#allocation4_spill] sm:$0xff] %v10499_v17  ;;  %v10507_v19 = vld [vmem:[%s10418_s11 + $0x44] sm:$0xf]  ;;  %v10510_v20 = vld [vmem:[%s10418_s11 + $0x40] sm:$0xf]  ;;  %s10349_s28 = smov 16  }
  0x1b   : > { %453 = vperm.xlu1 %8955, %v10454_v5   ;;  %441 = vperm.xlu0 %8954, %v10457_v6   ;;  %14275 = vst [vmem:[#allocation5_spill] sm:$0xff] %v10507_v19  ;;  %14276 = vst [vmem:[#allocation6_spill] sm:$0xff] %v10510_v20  ;;  %v10515_v21 = vld [vmem:[%s10418_s11 + $0x4c] sm:$0xf]  ;;  %v10518_v22 = vld [vmem:[%s10418_s11 + $0x48] sm:$0xf] }
  0x1c   : > { %14277 = vst [vmem:[#allocation7_spill] sm:$0xff] %v10515_v21  ;;  %14278 = vst [vmem:[#allocation8_spill] sm:$0xff] %v10518_v22  ;;  %v10523_v23 = vld [vmem:[%s10418_s11 + $0x54] sm:$0xf]  ;;  %v10526_v24 = vld [vmem:[%s10418_s11 + $0x50] sm:$0xf] }
  0x1d   : > { %14279 = vst [vmem:[#allocation9_spill] sm:$0xff] %v10523_v23  ;;  %14280 = vst [vmem:[#allocation10_spill] sm:$0xff] %v10526_v24  ;;  %v10531_v25 = vld [vmem:[%s10418_s11 + $0x5c] sm:$0xf]  ;;  %v10534_v26 = vld [vmem:[%s10418_s11 + $0x58] sm:$0xf] }
  0x1e   : > { %14281 = vst [vmem:[#allocation11_spill] sm:$0xff] %v10531_v25  ;;  %14282 = vst [vmem:[#allocation12_spill] sm:$0xff] %v10534_v26  ;;  %v10539_v27 = vld [vmem:[%s10418_s11 + $0x64] sm:$0xf]  ;;  %v10542_v28 = vld [vmem:[%s10418_s11 + $0x60] sm:$0xf] }
  0x1f   : > { %477 = vperm.xlu1 %8955, %v10462_v7   ;;  %465 = vperm.xlu0 %8954, %v10465_v8   ;;  %14283 = vst [vmem:[#allocation13_spill] sm:$0xff] %v10539_v27  ;;  %14284 = vst [vmem:[#allocation14_spill] sm:$0xff] %v10542_v28  ;;  %v10547_v29 = vld [vmem:[%s10418_s11 + $0x6c] sm:$0xf]  ;;  %v10550_v30 = vld [vmem:[%s10418_s11 + $0x68] sm:$0xf] }
  0x20   : > { %14285 = vst [vmem:[#allocation15_spill] sm:$0xff] %v10547_v29  ;;  %14286 = vst [vmem:[#allocation16_spill] sm:$0xff] %v10550_v30  ;;  %v10555_v31 = vld [vmem:[%s10418_s11 + $0x74] sm:$0xf]  ;;  %v10558_v32 = vld [vmem:[%s10418_s11 + $0x70] sm:$0xf] }
  0x21   : > { %14287 = vst [vmem:[#allocation17_spill] sm:$0xff] %v10555_v31  ;;  %14288 = vst [vmem:[#allocation18_spill] sm:$0xff] %v10558_v32  ;;  %v10563_v33 = vld [vmem:[%s10418_s11 + $0x7c] sm:$0xf]  ;;  %v10566_v34 = vld [vmem:[%s10418_s11 + $0x78] sm:$0xf] }
  0x22   : > { %14289 = vst [vmem:[#allocation19_spill] sm:$0xff] %v10563_v33  ;;  %14290 = vst [vmem:[#allocation20_spill] sm:$0xff] %v10566_v34  ;;  %v10615_v45 = vld [vmem:[%s10612_s19 + $0x8] sm:$0xf]  ;;  %v10620_v49 = vld [vmem:[%s10612_s19 + $0xc] sm:$0xf] }
  0x23   : > { %501 = vperm.xlu1 %8955, %v10475_v11   ;;  %489 = vperm.xlu0 %8954, %v10478_v12   ;;  %v10623_v51 = vld [vmem:[%s10612_s19] sm:$0xf]  ;;  %v10626_v52 = vld [vmem:[%s10612_s19 + $0x4] sm:$0xf]  ;;  %v10635_v60 = vld [vmem:[%s10612_s19 + $0x14] sm:$0xf] }
  0x24   : > { %v10638_v62 = vld [vmem:[%s10612_s19 + $0x10] sm:$0xf]  ;;  %v10646_v38 = vld [vmem:[%s10612_s19 + $0x1c] sm:$0xf]  ;;  %v10715_v40 = vld [vmem:[%s10612_s19 + $0x48] sm:$0xf] }
  0x25   : > { %s10350_s13 = smov 24   ;;  %s10351_s15 = smov 48   ;;  %vm14272_vm11 = vcmask 326656   ;;  %vm3892_vm12 = vcmask 392192   ;;  %vm3925_vm13 = vcmask 457728   ;;  %vm14273_vm14 = vcmask 523264  }
  0x26   : > { %s10352_s16 = smov 32   ;;  %s10353_s17 = smov 40   ;;  %vm4050_vm15 = vcmask 588800  }
  0x27   : > { %525 = vperm.xlu1 %8955, %v10483_v13   ;;  %513 = vperm.xlu0 %8954, %v10486_v14   ;;  %s10354_s20 = smov 56   ;;  %s10355_s21 = smov 64  }
  0x2b   : > { %549 = vperm.xlu1 %8955, %v10491_v15   ;;  %537 = vperm.xlu0 %8954, %v10494_v16  }
  0x2f   : > { %573 = vperm.xlu1 %8955, %v10499_v17   ;;  %561 = vperm.xlu0 %8954, %v10502_v18  }
  0x33   : > { %597 = vperm.xlu1 %8955, %v10507_v19   ;;  %585 = vperm.xlu0 %8954, %v10510_v20  }
  0x37   : > { %621 = vperm.xlu1 %8955, %v10515_v21   ;;  %609 = vperm.xlu0 %8954, %v10518_v22  }
  0x3b   : > { %645 = vperm.xlu1 %8955, %v10523_v23   ;;  %633 = vperm.xlu0 %8954, %v10526_v24  }
  0x3f   : > { %669 = vperm.xlu1 %8955, %v10531_v25   ;;  %657 = vperm.xlu0 %8954, %v10534_v26  }
  0x43   : > { %693 = vperm.xlu1 %8955, %v10539_v27   ;;  %681 = vperm.xlu0 %8954, %v10542_v28  }
  0x47   : > { %717 = vperm.xlu1 %8955, %v10547_v29   ;;  %705 = vperm.xlu0 %8954, %v10550_v30  }
  0x4b   : > { %741 = vperm.xlu1 %8955, %v10555_v31   ;;  %729 = vperm.xlu0 %8954, %v10558_v32  }
  0x4f   : > { %765 = vperm.xlu1 %8955, %v10563_v33   ;;  %753 = vperm.xlu0 %8954, %v10566_v34  }
  0x53   : > { %8957 = vset.pattern.permute.xlu1 %v10342_v35  ;;  %8956 = vset.pattern.permute.xlu0 %v10342_v35 }
  0x54   : > { %820 = vperm.xlu1 %8957, %v10449_v4   ;;  %809 = vperm.xlu0 %8956, %v10429_v2  }
  0x58   : > { %831 = vperm.xlu1 %8957, %v10426_v1   ;;  %842 = vperm.xlu0 %8956, %v10446_v3  }
  0x5c   : > { %853 = vperm.xlu1 %8957, %v10457_v6   ;;  %864 = vperm.xlu0 %8956, %v10454_v5  }
  0x60   : > { %875 = vperm.xlu1 %8957, %v10465_v8   ;;  %886 = vperm.xlu0 %8956, %v10462_v7  }
  0x64   : > { %897 = vperm.xlu1 %8957, %v10478_v12   ;;  %908 = vperm.xlu0 %8956, %v10475_v11  }
  0x68   : > { %919 = vperm.xlu1 %8957, %v10486_v14   ;;  %930 = vperm.xlu0 %8956, %v10483_v13  }
  0x6c   : > { %941 = vperm.xlu1 %8957, %v10494_v16   ;;  %952 = vperm.xlu0 %8956, %v10491_v15  }
  0x70   : > { %963 = vperm.xlu1 %8957, %v10502_v18   ;;  %974 = vperm.xlu0 %8956, %v10499_v17  }
  0x74   : > { %985 = vperm.xlu1 %8957, %v10510_v20   ;;  %996 = vperm.xlu0 %8956, %v10507_v19  }
  0x78   : > { %1007 = vperm.xlu1 %8957, %v10518_v22   ;;  %1018 = vperm.xlu0 %8956, %v10515_v21   ;;  %v10786_v22 = vld [vmem:[%s10612_s19 + $0x78] sm:$0xf] }
  0x7c   : > { %1029 = vperm.xlu1 %8957, %v10526_v24   ;;  %1040 = vperm.xlu0 %8956, %v10523_v23   ;;  %v10771_v23 = vld [vmem:[%s10612_s19 + $0x74] sm:$0xf]  ;;  %v10783_v24 = vld [vmem:[%s10612_s19 + $0x7c] sm:$0xf] }
  0x80   : > { %1051 = vperm.xlu1 %8957, %v10534_v26   ;;  %1062 = vperm.xlu0 %8956, %v10531_v25   ;;  %v10759_v25 = vld [vmem:[%s10612_s19 + $0x68] sm:$0xf] }
  0x84   : > { %1073 = vperm.xlu1 %8957, %v10542_v28   ;;  %1084 = vperm.xlu0 %8956, %v10539_v27  }
  0x88   : > { %1095 = vperm.xlu1 %8957, %v10550_v30   ;;  %1106 = vperm.xlu0 %8956, %v10547_v29   ;;  %v10737_v29 = vld [vmem:[%s10612_s19 + $0x58] sm:$0xf]  ;;  %v10749_v30 = vld [vmem:[%s10612_s19 + $0x60] sm:$0xf] }
  0x8c   : > { %1117 = vperm.xlu1 %8957, %v10558_v32   ;;  %1128 = vperm.xlu0 %8956, %v10555_v31  }
  0x90   : > { %1139 = vperm.xlu1 %8957, %v10566_v34   ;;  %1150 = vperm.xlu0 %8956, %v10563_v33   ;;  %v10727_v34 = vld [vmem:[%s10612_s19 + $0x50] sm:$0xf] }
  0x92   : > { %v418_v42 = vpop.permute.xlu1 %417  ;;  %v394_v43 = vpop.permute.xlu0 %393 }
  0x93   : > { %v426_v46 = vrot.slane %v418_v42, %v10605_v41  ;;  %v402_v47 = vrot.slane %v394_v43, %v10605_v41  ;;  %v10649_v42 = vld [vmem:[%s10612_s19 + $0x18] sm:$0xf] }
  0x94   : > { %8958 = vset.pattern.permute.xlu1 %v10344_v44  ;;  %8959 = vset.pattern.permute.xlu0 %v10344_v44 }
  0x95   : > { %v777_v55 = vmul.bf16 %v426_v46, %v10615_v45  ;;  %v775_v57 = vmul.bf16 %v402_v47, %v10623_v51 }
  0x96   : > { %v430_v48 = vpop.permute.xlu1 %429  ;;  %v406_v50 = vpop.permute.xlu0 %405 }
  0x97   : > { %v438_v53 = vrot.slane %v430_v48, %v10605_v41  ;;  %v414_v54 = vrot.slane %v406_v50, %v10605_v41 }
  0x99   : > { %v778_v56 = vmul.bf16 %v438_v53, %v10620_v49  ;;  %v776_v58 = vmul.bf16 %v414_v54, %v10626_v52  ;;  %v10658_v53 = vld [vmem:[%s10612_s19 + $0x24] sm:$0xf] }
  0x9a   : > { %v454_v59 = vpop.permute.xlu1 %453  ;;  %v442_v61 = vpop.permute.xlu0 %441 }
  0x9b   : > { %v8080_v63 = vcombine.low %v777_v55, %v778_v56  ;;  %v462_v0 = vrot.slane %v454_v59, %v10605_v41  ;;  %v450_v9 = vrot.slane %v442_v61, %v10605_v41  ;;  %v8079_v10 = vcombine.low %v775_v57, %v776_v58  ;;  %v10661_v55 = vld [vmem:[%s10612_s19 + $0x20] sm:$0xf] }
  0x9d   : > { %v780_v35 = vmul.bf16 %v462_v0, %v10635_v60  ;;  %v779_v36 = vmul.bf16 %v450_v9, %v10638_v62  ;;  %8754 = vmatprep.mubr.msk.bf16.mxu0 %vm1309_vm1, %v8079_v10  ;;  %v10668_v0 = vld [vmem:[%s10612_s19 + $0x2c] sm:$0xf]  ;;  %v10671_v10 = vld [vmem:[%s10612_s19 + $0x28] sm:$0xf] }
  0x9e   : > { %v478_v37 = vpop.permute.xlu1 %477  ;;  %v466_v39 = vpop.permute.xlu0 %465  ;;  %8755 = vmatmul.mubr.msk.bf16.vlgmr.msra.gmra.mrb[0].mxu0 %vm1309_vm1, %v8080_v63 }
  0x9f   : > { %v8081_v43 = vcombine.low %v779_v36, %v780_v35  ;;  %v486_v44 = vrot.slane %v478_v37, %v10605_v41  ;;  %v474_v46 = vrot.slane %v466_v39, %v10605_v41 }
  0xa1   : > { %v782_v47 = vmul.bf16 %v486_v44, %v10646_v38  ;;  %v781_v48 = vmul.bf16 %v474_v46, %v10649_v42  ;;  %8758 = vmatprep.mubr.msk.bf16.mxu0 %vm1309_vm1, %v8081_v43  ;;  %v10680_v46 = vld [vmem:[%s10612_s19 + $0x34] sm:$0xf] }
  0xa2   : > { %v502_v50 = vpop.permute.xlu1 %501  ;;  %v490_v54 = vpop.permute.xlu0 %489 }
  0xa3   : > { %v8082_v56 = vcombine.low %v781_v48, %v782_v47  ;;  %v510_v57 = vrot.slane %v502_v50, %v10605_v41  ;;  %v498_v58 = vrot.slane %v490_v54, %v10605_v41  ;;  %v10683_v48 = vld [vmem:[%s10612_s19 + $0x30] sm:$0xf] }
  0xa5   : > { %v784_v59 = vmul.bf16 %v510_v57, %v10658_v53  ;;  %v783_v61 = vmul.bf16 %v498_v58, %v10661_v55 }
  0xa6   : > { %v526_v63 = vpop.permute.xlu1 %525  ;;  %v514_v9 = vpop.permute.xlu0 %513  ;;  %8759 = vmatmul.mubr.msk.bf16.gmra.mrb[4].mxu0 %vm1309_vm1, %v8082_v56 }
  0xa7   : > { %v8083_v35 = vcombine.low %v783_v61, %v784_v59  ;;  %v534_v36 = vrot.slane %v526_v63, %v10605_v41  ;;  %v522_v37 = vrot.slane %v514_v9, %v10605_v41  ;;  %v10690_v61 = vld [vmem:[%s10612_s19 + $0x3c] sm:$0xf]  ;;  %v10693_v9 = vld [vmem:[%s10612_s19 + $0x38] sm:$0xf] }
  0xa9   : > { %v786_v39 = vmul.bf16 %v534_v36, %v10668_v0  ;;  %v785_v43 = vmul.bf16 %v522_v37, %v10671_v10  ;;  %8762 = vmatprep.mubr.msk.bf16.mxu0 %vm1309_vm1, %v8083_v35 }
  0xaa   : > { %v550_v44 = vpop.permute.xlu1 %549  ;;  %v538_v47 = vpop.permute.xlu0 %537 }
  0xab   : > { %v8084_v50 = vcombine.low %v785_v43, %v786_v39  ;;  %v558_v54 = vrot.slane %v550_v44, %v10605_v41  ;;  %v546_v56 = vrot.slane %v538_v47, %v10605_v41  ;;  %v10702_v47 = vld [vmem:[%s10612_s19 + $0x44] sm:$0xf] }
  0xad   : > { %v788_v57 = vmul.bf16 %v558_v54, %v10680_v46  ;;  %v787_v58 = vmul.bf16 %v546_v56, %v10683_v48  ;;  %v10705_v56 = vld [vmem:[%s10612_s19 + $0x40] sm:$0xf] }
  0xae   : > { %v574_v59 = vpop.permute.xlu1 %573  ;;  %v562_v63 = vpop.permute.xlu0 %561  ;;  %8763 = vmatmul.mubr.msk.bf16.gmra.mrb[8].mxu0 %vm1309_vm1, %v8084_v50 }
  0xaf   : > { %v8085_v35 = vcombine.low %v787_v58, %v788_v57  ;;  %v582_v36 = vrot.slane %v574_v59, %v10605_v41  ;;  %v570_v37 = vrot.slane %v562_v63, %v10605_v41 }
  0xb1   : > { %v790_v39 = vmul.bf16 %v582_v36, %v10690_v61  ;;  %v789_v43 = vmul.bf16 %v570_v37, %v10693_v9  ;;  %8766 = vmatprep.mubr.msk.bf16.mxu0 %vm1309_vm1, %v8085_v35  ;;  %v10712_v37 = vld [vmem:[%s10612_s19 + $0x4c] sm:$0xf] }
  0xb2   : > { %v598_v44 = vpop.permute.xlu1 %597  ;;  %v586_v54 = vpop.permute.xlu0 %585 }
  0xb3   : > { %v8086_v50 = vcombine.low %v789_v43, %v790_v39  ;;  %v606_v57 = vrot.slane %v598_v44, %v10605_v41  ;;  %v594_v58 = vrot.slane %v586_v54, %v10605_v41 }
  0xb5   : > { %v792_v59 = vmul.bf16 %v606_v57, %v10702_v47  ;;  %v791_v63 = vmul.bf16 %v594_v58, %v10705_v56  ;;  %v10724_v58 = vld [vmem:[%s10612_s19 + $0x54] sm:$0xf] }
  0xb6   : > { %v622_v36 = vpop.permute.xlu1 %621  ;;  %v610_v35 = vpop.permute.xlu0 %609  ;;  %8767 = vmatmul.mubr.msk.bf16.gmra.mrb[12].mxu0 %vm1309_vm1, %v8086_v50 }
  0xb7   : > { %v8087_v33 = vcombine.low %v791_v63, %v792_v59  ;;  %v630_v39 = vrot.slane %v622_v36, %v10605_v41  ;;  %v618_v43 = vrot.slane %v610_v35, %v10605_v41 }
  0xb9   : > { %v794_v44 = vmul.bf16 %v630_v39, %v10712_v37  ;;  %v793_v54 = vmul.bf16 %v618_v43, %v10715_v40  ;;  %8770 = vmatprep.mubr.msk.bf16.mxu0 %vm1309_vm1, %v8087_v33  ;;  %v10734_v43 = vld [vmem:[%s10612_s19 + $0x5c] sm:$0xf] }
  0xba   : > { %v646_v57 = vpop.permute.xlu1 %645  ;;  %v634_v31 = vpop.permute.xlu0 %633 }
  0xbb   : > { %v8088_v50 = vcombine.low %v793_v54, %v794_v44  ;;  %v654_v59 = vrot.slane %v646_v57, %v10605_v41  ;;  %v642_v63 = vrot.slane %v634_v31, %v10605_v41 }
  0xbd   : > { %v796_v36 = vmul.bf16 %v654_v59, %v10724_v58  ;;  %v795_v35 = vmul.bf16 %v642_v63, %v10727_v34  ;;  %v10746_v63 = vld [vmem:[%s10612_s19 + $0x64] sm:$0xf] }
  0xbe   : > { %v670_v39 = vpop.permute.xlu1 %669  ;;  %v658_v33 = vpop.permute.xlu0 %657  ;;  %8771 = vmatmul.mubr.msk.bf16.gmra.mrb[16].mxu0 %vm1309_vm1, %v8088_v50 }
  0xbf   : > { %v8089_v32 = vcombine.low %v795_v35, %v796_v36  ;;  %v678_v44 = vrot.slane %v670_v39, %v10605_v41  ;;  %v666_v54 = vrot.slane %v658_v33, %v10605_v41 }
  0xc1   : > { %v798_v31 = vmul.bf16 %v678_v44, %v10734_v43  ;;  %v797_v57 = vmul.bf16 %v666_v54, %v10737_v29  ;;  %8774 = vmatprep.mubr.msk.bf16.mxu0 %vm1309_vm1, %v8089_v32  ;;  %v10756_v54 = vld [vmem:[%s10612_s19 + $0x6c] sm:$0xf] }
  0xc2   : > { %v694_v59 = vpop.permute.xlu1 %693  ;;  %v682_v27 = vpop.permute.xlu0 %681 }
  0xc3   : > { %v8090_v50 = vcombine.low %v797_v57, %v798_v31  ;;  %v702_v36 = vrot.slane %v694_v59, %v10605_v41  ;;  %v690_v35 = vrot.slane %v682_v27, %v10605_v41 }
  0xc5   : > { %v800_v39 = vmul.bf16 %v702_v36, %v10746_v63  ;;  %v799_v33 = vmul.bf16 %v690_v35, %v10749_v30  ;;  %v10240_v36 = vld [vmem:[%s14244_s2] ss:$0 sps:$4 sm:$0xcc]  }
  0xc6   : > { %v718_v44 = vpop.permute.xlu1 %717  ;;  %v706_v32 = vpop.permute.xlu0 %705  ;;  %8775 = vmatmul.mubr.msk.bf16.gmra.mrb[20].mxu0 %vm1309_vm1, %v8090_v50 }
  0xc7   : > { %v8091_v28 = vcombine.low %v799_v33, %v800_v39  ;;  %v726_v31 = vrot.slane %v718_v44, %v10605_v41  ;;  %v714_v57 = vrot.slane %v706_v32, %v10605_v41  ;;  %v10774_v39 = vld [vmem:[%s10612_s19 + $0x70] sm:$0xf] }
  0xc9   : > { %v802_v27 = vmul.bf16 %v726_v31, %v10756_v54  ;;  %v801_v59 = vmul.bf16 %v714_v57, %v10759_v25  ;;  %8778 = vmatprep.mubr.msk.bf16.mxu0 %vm1309_vm1, %v8091_v28  ;;  %v1308_v31 = vrot.slane %v10240_v36, 2 }
  0xca   : > { %v742_v35 = vpop.permute.xlu1 %741  ;;  %v730_v50 = vpop.permute.xlu0 %729 }
  0xcb   : > { %v8092_v33 = vcombine.low %v801_v59, %v802_v27  ;;  %v750_v44 = vrot.slane %v742_v35, %v10605_v41  ;;  %v738_v32 = vrot.slane %v730_v50, %v10605_v41  ;;  %8926 = vmatprep.subr.msk.bf16.mxu1 %vm1358_vm0, %v1308_v31  ;;  %v1360_v26 = vsel %vm1358_vm0, %v1308_v31, 0 }
  0xcc   : > { %8719 = vmatpush3.bf16.msra.mxu1 %v1360_v26 }
  0xcd   : > { %v804_v57 = vmul.bf16 %v750_v44, %v10771_v23  ;;  %v803_v28 = vmul.bf16 %v738_v32, %v10774_v39 }
  0xce   : > { %v766_v21 = vpop.permute.xlu1 %765  ;;  %v754_v19 = vpop.permute.xlu0 %753  ;;  %8779 = vmatmul.mubr.msk.bf16.gmra.mrb[24].mxu0 %vm1309_vm1, %v8092_v33 }
  0xcf   : > { %v8093_v27 = vcombine.low %v803_v28, %v804_v57  ;;  %v774_v59 = vrot.slane %v766_v21, %v10605_v41  ;;  %v762_v36 = vrot.slane %v754_v19, %v10605_v41 }
  0xd1   : > { %v806_v35 = vmul.bf16 %v774_v59, %v10783_v24  ;;  %v805_v50 = vmul.bf16 %v762_v36, %v10786_v22  ;;  %8782 = vmatprep.mubr.msk.bf16.mxu0 %vm1309_vm1, %v8093_v27 }
  0xd3   : > { %v8094_v44 = vcombine.low %v805_v50, %v806_v35  ;;  %v821_v32 = vpop.permute.xlu1 %820  ;;  %v810_v31 = vpop.permute.xlu0 %809 }
  0xd4   : > { %v829_v17 = vrot.slane %v821_v32, %v10605_v41  ;;  %v818_v20 = vrot.slane %v810_v31, %v10605_v41 }
  0xd6   : > { %v1161_v26 = vmul.bf16 %v829_v17, %v10626_v52  ;;  %v1160_v33 = vmul.bf16 %v818_v20, %v10623_v51  ;;  %8783 = vmatmul.mubr.msk.bf16.gmra.mrb[28].mxu0 %vm1309_vm1, %v8094_v44 }
  0xd7   : > { %v832_v19 = vpop.permute.xlu1 %831  ;;  %v843_v21 = vpop.permute.xlu0 %842 }
  0xd8   : > { %v840_v57 = vrot.slane %v832_v19, %v10605_v41  ;;  %v851_v28 = vrot.slane %v843_v21, %v10605_v41  ;;  %v8046_v27 = vcombine.low %v1160_v33, %v1161_v26 }
  0xda   : > { %v1162_v59 = vmul.bf16 %v840_v57, %v10615_v45  ;;  %v1163_v36 = vmul.bf16 %v851_v28, %v10620_v49  ;;  %1273 = vrot.lane.b32.xlu1 %v8046_v27, %s10345_s22 }
  0xdb   : > { %v854_v35 = vpop.permute.xlu1 %853  ;;  %v865_v17 = vpop.permute.xlu0 %864 }
  0xdc   : > { %v862_v20 = vrot.slane %v854_v35, %v10605_v41  ;;  %v873_v50 = vrot.slane %v865_v17, %v10605_v41  ;;  %v8047_v44 = vcombine.low %v1162_v59, %v1163_v36 }
  0xde   : > { %v1164_v32 = vmul.bf16 %v862_v20, %v10638_v62  ;;  %v1165_v31 = vmul.bf16 %v873_v50, %v10635_v60  ;;  %1275 = vrot.lane.b32.xlu0 %v8047_v44, %s10345_s22 }
  0xdf   : > { %v876_v26 = vpop.permute.xlu1 %875  ;;  %v887_v33 = vpop.permute.xlu0 %886 }
  0xe0   : > { %v884_v19 = vrot.slane %v876_v26, %v10605_v41  ;;  %v895_v21 = vrot.slane %v887_v33, %v10605_v41  ;;  %v8048_v57 = vcombine.low %v1164_v32, %v1165_v31 }
  0xe2   : > { %v1166_v28 = vmul.bf16 %v884_v19, %v10649_v42  ;;  %v1167_v27 = vmul.bf16 %v895_v21, %v10646_v38  ;;  %1277 = vrot.lane.b32.xlu1 %v8048_v57, %s10345_s22 }
  0xe3   : > { %v898_v59 = vpop.permute.xlu1 %897  ;;  %v909_v36 = vpop.permute.xlu0 %908 }
  0xe4   : > { %v906_v35 = vrot.slane %v898_v59, %v10605_v41  ;;  %v917_v17 = vrot.slane %v909_v36, %v10605_v41  ;;  %v8049_v20 = vcombine.low %v1166_v28, %v1167_v27 }
  0xe6   : > { %v1168_v50 = vmul.bf16 %v906_v35, %v10661_v55  ;;  %v1169_v44 = vmul.bf16 %v917_v17, %v10658_v53  ;;  %1279 = vrot.lane.b32.xlu0 %v8049_v20, %s10345_s22 }
  0xe7   : > { %v920_v32 = vpop.permute.xlu1 %919  ;;  %v931_v31 = vpop.permute.xlu0 %930 }
  0xe8   : > { %v928_v26 = vrot.slane %v920_v32, %v10605_v41  ;;  %v939_v33 = vrot.slane %v931_v31, %v10605_v41  ;;  %v8050_v19 = vcombine.low %v1168_v50, %v1169_v44 }
  0xea   : > { %v1170_v21 = vmul.bf16 %v928_v26, %v10671_v10  ;;  %v1171_v57 = vmul.bf16 %v939_v33, %v10668_v0  ;;  %1281 = vrot.lane.b32.xlu1 %v8050_v19, %s10345_s22 }
  0xeb   : > { %v942_v28 = vpop.permute.xlu1 %941  ;;  %v953_v27 = vpop.permute.xlu0 %952 }
  0xec   : > { %v950_v59 = vrot.slane %v942_v28, %v10605_v41  ;;  %v961_v36 = vrot.slane %v953_v27, %v10605_v41  ;;  %v8051_v35 = vcombine.low %v1170_v21, %v1171_v57 }
  0xee   : > { %v1172_v17 = vmul.bf16 %v950_v59, %v10683_v48  ;;  %v1173_v20 = vmul.bf16 %v961_v36, %v10680_v46  ;;  %1283 = vrot.lane.b32.xlu0 %v8051_v35, %s10345_s22 }
  0xef   : > { %v964_v50 = vpop.permute.xlu1 %963  ;;  %v975_v44 = vpop.permute.xlu0 %974 }
  0xf0   : > { %v972_v32 = vrot.slane %v964_v50, %v10605_v41  ;;  %v983_v31 = vrot.slane %v975_v44, %v10605_v41  ;;  %v8052_v26 = vcombine.low %v1172_v17, %v1173_v20 }
  0xf2   : > { %v1174_v33 = vmul.bf16 %v972_v32, %v10693_v9  ;;  %v1175_v19 = vmul.bf16 %v983_v31, %v10690_v61  ;;  %1285 = vrot.lane.b32.xlu1 %v8052_v26, %s10345_s22 }
  0xf3   : > { %v986_v21 = vpop.permute.xlu1 %985  ;;  %v997_v57 = vpop.permute.xlu0 %996 }
  0xf4   : > { %v994_v28 = vrot.slane %v986_v21, %v10605_v41  ;;  %v1005_v27 = vrot.slane %v997_v57, %v10605_v41  ;;  %v8053_v59 = vcombine.low %v1174_v33, %v1175_v19 }
  0xf6   : > { %v1176_v36 = vmul.bf16 %v994_v28, %v10705_v56  ;;  %v1177_v35 = vmul.bf16 %v1005_v27, %v10702_v47  ;;  %1287 = vrot.lane.b32.xlu0 %v8053_v59, %s10345_s22 }
  0xf7   : > { %v1008_v17 = vpop.permute.xlu1 %1007  ;;  %v1019_v20 = vpop.permute.xlu0 %1018 }
  0xf8   : > { %v1016_v50 = vrot.slane %v1008_v17, %v10605_v41  ;;  %v1027_v44 = vrot.slane %v1019_v20, %v10605_v41  ;;  %v8054_v32 = vcombine.low %v1176_v36, %v1177_v35 }
  0xfa   : > { %v1178_v31 = vmul.bf16 %v1016_v50, %v10715_v40  ;;  %v1179_v26 = vmul.bf16 %v1027_v44, %v10712_v37  ;;  %1289 = vrot.lane.b32.xlu1 %v8054_v32, %s10345_s22 }
  0xfb   : > { %v1030_v33 = vpop.permute.xlu1 %1029  ;;  %v1041_v19 = vpop.permute.xlu0 %1040 }
  0xfc   : > { %v1038_v21 = vrot.slane %v1030_v33, %v10605_v41  ;;  %v1049_v57 = vrot.slane %v1041_v19, %v10605_v41  ;;  %v8055_v28 = vcombine.low %v1178_v31, %v1179_v26 }
  0xfe   : > { %v1180_v27 = vmul.bf16 %v1038_v21, %v10727_v34  ;;  %v1181_v59 = vmul.bf16 %v1049_v57, %v10724_v58  ;;  %1291 = vrot.lane.b32.xlu0 %v8055_v28, %s10345_s22 }
  0xff   : > { %v1052_v36 = vpop.permute.xlu1 %1051  ;;  %v1063_v35 = vpop.permute.xlu0 %1062 }
 0x100   : > { %v1060_v17 = vrot.slane %v1052_v36, %v10605_v41  ;;  %v1071_v20 = vrot.slane %v1063_v35, %v10605_v41  ;;  %v8056_v50 = vcombine.low %v1180_v27, %v1181_v59 }
 0x102   : > { %v1182_v44 = vmul.bf16 %v1060_v17, %v10737_v29  ;;  %v1183_v32 = vmul.bf16 %v1071_v20, %v10734_v43  ;;  %1293 = vrot.lane.b32.xlu1 %v8056_v50, %s10345_s22 }
 0x103   : > { %v1074_v31 = vpop.permute.xlu1 %1073  ;;  %v1085_v26 = vpop.permute.xlu0 %1084 }
 0x104   : > { %v1082_v33 = vrot.slane %v1074_v31, %v10605_v41  ;;  %v1093_v19 = vrot.slane %v1085_v26, %v10605_v41  ;;  %v8057_v21 = vcombine.low %v1182_v44, %v1183_v32 }
 0x106   : > { %v1184_v57 = vmul.bf16 %v1082_v33, %v10749_v30  ;;  %v1185_v28 = vmul.bf16 %v1093_v19, %v10746_v63  ;;  %1295 = vrot.lane.b32.xlu0 %v8057_v21, %s10345_s22 }
 0x107   : > { %v1096_v27 = vpop.permute.xlu1 %1095  ;;  %v1107_v59 = vpop.permute.xlu0 %1106 }
 0x108   : > { %v1104_v36 = vrot.slane %v1096_v27, %v10605_v41  ;;  %v1115_v35 = vrot.slane %v1107_v59, %v10605_v41  ;;  %v8058_v17 = vcombine.low %v1184_v57, %v1185_v28 }
 0x10a   : > { %v1186_v20 = vmul.bf16 %v1104_v36, %v10759_v25  ;;  %v1187_v50 = vmul.bf16 %v1115_v35, %v10756_v54  ;;  %1297 = vrot.lane.b32.xlu1 %v8058_v17, %s10345_s22 }
 0x10b   : > { %v1118_v44 = vpop.permute.xlu1 %1117  ;;  %v1129_v32 = vpop.permute.xlu0 %1128 }
 0x10c   : > { %v1126_v31 = vrot.slane %v1118_v44, %v10605_v41  ;;  %v1137_v26 = vrot.slane %v1129_v32, %v10605_v41  ;;  %v8059_v33 = vcombine.low %v1186_v20, %v1187_v50  ;;  %v14306_v44 = vld [vmem:[#allocation20_spill] sm:$0xff]  ;;  %v14307_v32 = vld [vmem:[#allocation17_spill] sm:$0xff] }
 0x10e   : > { %v1188_v19 = vmul.bf16 %v1126_v31, %v10774_v39  ;;  %v1189_v21 = vmul.bf16 %v1137_v26, %v10771_v23  ;;  %1299 = vrot.lane.b32.xlu0 %v8059_v33, %s10345_s22  ;;  %v14308_v26 = vld [vmem:[#allocation19_spill] sm:$0xff] }
 0x10f   : > { %v1140_v57 = vpop.permute.xlu1 %1139  ;;  %v1151_v28 = vpop.permute.xlu0 %1150 }
 0x110   : > { %v1148_v27 = vrot.slane %v1140_v57, %v10605_v41  ;;  %v1159_v59 = vrot.slane %v1151_v28, %v10605_v41  ;;  %v8060_v36 = vcombine.low %v1188_v19, %v1189_v21  ;;  %v2199_v19 = vld [vmem:[%s14244_s2 + $0x4] sm:$0x3] }
 0x111   : > { %8928 = vmatprep.subr.msk.bf16.mxu0 %vm1358_vm0, %v2199_v19  ;;  %v2361_v21 = vsel %vm1358_vm0, %v2199_v19, 0  ;;  %vm6574_vm0 = vcmask 1040384  }
 0x112   : > { %v1190_v35 = vmul.bf16 %v1148_v27, %v10786_v22  ;;  %v1191_v17 = vmul.bf16 %v1159_v59, %v10783_v24  ;;  %1301 = vrot.lane.b32.xlu1 %v8060_v36, %s10345_s22  ;;  %8787 = vmatpush3.bf16.msra.mxu0 %v2361_v21 }
 0x114   : > { %v8061_v20 = vcombine.low %v1190_v35, %v1191_v17 }
 0x116   : > { %1303 = vrot.lane.b32.xlu0 %v8061_v20, %s10345_s22  ;;  %1816 = vperm.xlu1 %8958, %v10429_v2   ;;  %v14293_v2 = vld [vmem:[#allocation4_spill] sm:$0xff] }
 0x11a   : > { %1827 = vperm.xlu0 %8959, %v10449_v4   ;;  %1838 = vperm.xlu1 %8958, %v10426_v1   ;;  %v14292_v1 = vld [vmem:[#allocation6_spill] sm:$0xff]  ;;  %v14295_v4 = vld [vmem:[#allocation5_spill] sm:$0xff] }
 0x11e   : > { %1860 = vperm.xlu0 %8959, %v10457_v6   ;;  %1849 = vperm.xlu1 %8958, %v10446_v3   ;;  %v14294_v3 = vld [vmem:[#allocation8_spill] sm:$0xff]  ;;  %v14297_v6 = vld [vmem:[#allocation7_spill] sm:$0xff] }
 0x122   : > { %1882 = vperm.xlu0 %8959, %v10465_v8   ;;  %1871 = vperm.xlu1 %8958, %v10454_v5   ;;  %v14296_v5 = vld [vmem:[#allocation10_spill] sm:$0xff]  ;;  %v14299_v8 = vld [vmem:[#allocation9_spill] sm:$0xff] }
 0x126   : > { %1904 = vperm.xlu0 %8959, %v10478_v12   ;;  %1893 = vperm.xlu1 %8958, %v10462_v7   ;;  %v14298_v7 = vld [vmem:[#allocation12_spill] sm:$0xff]  ;;  %v14301_v12 = vld [vmem:[#allocation11_spill] sm:$0xff] }
 0x12a   : > { %1926 = vperm.xlu0 %8959, %v10486_v14   ;;  %1915 = vperm.xlu1 %8958, %v10475_v11   ;;  %v14300_v11 = vld [vmem:[#allocation14_spill] sm:$0xff]  ;;  %v14303_v14 = vld [vmem:[#allocation13_spill] sm:$0xff] }
 0x12e   : > { %1948 = vperm.xlu0 %8959, %v10494_v16   ;;  %1937 = vperm.xlu1 %8958, %v10483_v13   ;;  %v14302_v13 = vld [vmem:[#allocation16_spill] sm:$0xff]  ;;  %v14304_v16 = vld [vmem:[#allocation18_spill] sm:$0xff] }
 0x132   : > { %1970 = vperm.xlu0 %8959, %v10502_v18   ;;  %1959 = vperm.xlu1 %8958, %v10491_v15   ;;  %v14305_v18 = vld [vmem:[#allocation15_spill] sm:$0xff] }
 0x136   : > { %1992 = vperm.xlu0 %8959, %v14292_v1   ;;  %1981 = vperm.xlu1 %8958, %v14293_v2  }
 0x13a   : > { %2014 = vperm.xlu0 %8959, %v14294_v3   ;;  %2003 = vperm.xlu1 %8958, %v14295_v4  }
 0x13e   : > { %2036 = vperm.xlu0 %8959, %v14296_v5   ;;  %2025 = vperm.xlu1 %8958, %v14297_v6  }
 0x142   : > { %2058 = vperm.xlu0 %8959, %v14298_v7   ;;  %2047 = vperm.xlu1 %8958, %v14299_v8  }
 0x146   : > { %2080 = vperm.xlu0 %8959, %v14300_v11   ;;  %2069 = vperm.xlu1 %8958, %v14301_v12  }
 0x14a   : > { %2102 = vperm.xlu0 %8959, %v14302_v13   ;;  %2091 = vperm.xlu1 %8958, %v14303_v14  }
 0x14c   : > { %v1274_v15 = vpop.permute.xlu1 %1273 }
 0x14d   : > { %8720 = vmatprep.mubr.msk.bf16.mxu1 %vm1309_vm1, %v1274_v15 }
 0x14e   : > { %2124 = vperm.xlu0 %8959, %v14304_v16   ;;  %2113 = vperm.xlu1 %8958, %v14305_v18  }
 0x150   : > { %v1276_v50 = vpop.permute.xlu0 %1275 }
 0x151   : > { %8721 = vmatmul.mubr.msk.bf16.vlgmr.msra.gmra.mrb[0].mxu1 %vm1309_vm1, %v1276_v50 }
 0x152   : > { %2146 = vperm.xlu0 %8959, %v14306_v44   ;;  %2135 = vperm.xlu1 %8958, %v14307_v32  }
 0x154   : > { %v1278_v31 = vpop.permute.xlu1 %1277 }
 0x155   : > { %8724 = vmatprep.mubr.msk.bf16.mxu1 %vm1309_vm1, %v1278_v31 }
 0x156   : > { %2157 = vperm.xlu1 %8958, %v14308_v26  }
 0x158   : > { %v1280_v33 = vpop.permute.xlu0 %1279 }
 0x159   : > { %8725 = vmatmul.mubr.msk.bf16.gmra.mrb[4].mxu1 %vm1309_vm1, %v1280_v33 }
 0x15c   : > { %v1282_v57 = vpop.permute.xlu1 %1281 }
 0x15d   : > { %8728 = vmatprep.mubr.msk.bf16.mxu1 %vm1309_vm1, %v1282_v57 }
 0x160   : > { %v1284_v28 = vpop.permute.xlu0 %1283 }
 0x161   : > { %8729 = vmatmul.mubr.msk.bf16.gmra.mrb[8].mxu1 %vm1309_vm1, %v1284_v28 }
 0x164   : > { %v1286_v27 = vpop.permute.xlu1 %1285 }
 0x165   : > { %8732 = vmatprep.mubr.msk.bf16.mxu1 %vm1309_vm1, %v1286_v27 }
 0x168   : > { %v1288_v59 = vpop.permute.xlu0 %1287 }
 0x169   : > { %8733 = vmatmul.mubr.msk.bf16.gmra.mrb[12].mxu1 %vm1309_vm1, %v1288_v59 }
 0x16c   : > { %v1290_v36 = vpop.permute.xlu1 %1289 }
 0x16d   : > { %8736 = vmatprep.mubr.msk.bf16.mxu1 %vm1309_vm1, %v1290_v36 }
 0x170   : > { %v1292_v35 = vpop.permute.xlu0 %1291 }
 0x171   : > { %8737 = vmatmul.mubr.msk.bf16.gmra.mrb[16].mxu1 %vm1309_vm1, %v1292_v35 }
 0x174   : > { %v1294_v17 = vpop.permute.xlu1 %1293 }
 0x175   : > { %8740 = vmatprep.mubr.msk.bf16.mxu1 %vm1309_vm1, %v1294_v17 }
 0x178   : > { %v1296_v20 = vpop.permute.xlu0 %1295 }
 0x179   : > { %8741 = vmatmul.mubr.msk.bf16.gmra.mrb[20].mxu1 %vm1309_vm1, %v1296_v20 }
 0x17c   : > { %v1298_v1 = vpop.permute.xlu1 %1297 }
 0x17d   : > { %8744 = vmatprep.mubr.msk.bf16.mxu1 %vm1309_vm1, %v1298_v1 }
 0x180   : > { %v1300_v2 = vpop.permute.xlu0 %1299 }
 0x181   : > { %8745 = vmatmul.mubr.msk.bf16.gmra.mrb[24].mxu1 %vm1309_vm1, %v1300_v2 }
 0x184   : > { %v1302_v3 = vpop.permute.xlu1 %1301 }
 0x185   : > { %8748 = vmatprep.mubr.msk.bf16.mxu1 %vm1309_vm1, %v1302_v3 }
 0x188   : > { %v1304_v4 = vpop.permute.xlu0 %1303 }
 0x189   : > { %8749 = vmatmul.mubr.msk.bf16.gmra.mrb[28].mxu1 %vm1309_vm1, %v1304_v4 }
 0x195   : > { %v1817_v5 = vpop.permute.xlu1 %1816 }
 0x196   : > { %v1825_v6 = vrot.slane %v1817_v5, %v10605_v41 }
 0x198   : > { %v2167_v12 = vmul.bf16 %v1825_v6, %v10623_v51 }
 0x199   : > { %v1828_v7 = vpop.permute.xlu0 %1827  ;;  %v1839_v8 = vpop.permute.xlu1 %1838 }
 0x19a   : > { %v1836_v11 = vrot.slane %v1828_v7, %v10605_v41  ;;  %v1847_v14 = vrot.slane %v1839_v8, %v10605_v41 }
 0x19c   : > { %v2168_v13 = vmul.bf16 %v1836_v11, %v10626_v52  ;;  %v2169_v44 = vmul.bf16 %v1847_v14, %v10615_v45 }
 0x19d   : > { %v1861_v15 = vpop.permute.xlu0 %1860  ;;  %v1850_v16 = vpop.permute.xlu1 %1849 }
 0x19e   : > { %v8111_v18 = vcombine.low %v2167_v12, %v2168_v13  ;;  %v1858_v50 = vrot.slane %v1850_v16, %v10605_v41  ;;  %v1869_v32 = vrot.slane %v1861_v15, %v10605_v41 }
 0x1a0   : > { %v2170_v31 = vmul.bf16 %v1858_v50, %v10620_v49  ;;  %2280 = vrot.lane.b32.xlu0 %v8111_v18, %s10346_s25  ;;  %v2171_v19 = vmul.bf16 %v1869_v32, %v10638_v62 }
 0x1a1   : > { %v1883_v26 = vpop.permute.xlu0 %1882  ;;  %v1872_v51 = vpop.permute.xlu1 %1871 }
 0x1a2   : > { %v8112_v33 = vcombine.low %v2169_v44, %v2170_v31  ;;  %v1880_v52 = vrot.slane %v1872_v51, %v10605_v41  ;;  %v1891_v21 = vrot.slane %v1883_v26, %v10605_v41 }
 0x1a4   : > { %v2172_v57 = vmul.bf16 %v1880_v52, %v10635_v60  ;;  %2282 = vrot.lane.b32.xlu1 %v8112_v33, %s10346_s25  ;;  %v2173_v59 = vmul.bf16 %v1891_v21, %v10649_v42 }
 0x1a5   : > { %v1905_v45 = vpop.permute.xlu0 %1904  ;;  %v1894_v28 = vpop.permute.xlu1 %1893 }
 0x1a6   : > { %v8113_v27 = vcombine.low %v2171_v19, %v2172_v57  ;;  %v1902_v49 = vrot.slane %v1894_v28, %v10605_v41  ;;  %v1913_v36 = vrot.slane %v1905_v45, %v10605_v41 }
 0x1a8   : > { %v2174_v35 = vmul.bf16 %v1902_v49, %v10646_v38  ;;  %2284 = vrot.lane.b32.xlu0 %v8113_v27, %s10346_s25  ;;  %v2175_v1 = vmul.bf16 %v1913_v36, %v10661_v55 }
 0x1a9   : > { %v1927_v62 = vpop.permute.xlu0 %1926  ;;  %v1916_v17 = vpop.permute.xlu1 %1915 }
 0x1aa   : > { %v8114_v20 = vcombine.low %v2173_v59, %v2174_v35  ;;  %v1924_v60 = vrot.slane %v1916_v17, %v10605_v41  ;;  %v1935_v2 = vrot.slane %v1927_v62, %v10605_v41 }
 0x1ac   : > { %v2176_v3 = vmul.bf16 %v1924_v60, %v10658_v53  ;;  %2286 = vrot.lane.b32.xlu1 %v8114_v20, %s10346_s25  ;;  %v2177_v6 = vmul.bf16 %v1935_v2, %v10671_v10 }
 0x1ad   : > { %v1949_v42 = vpop.permute.xlu0 %1948  ;;  %v1938_v4 = vpop.permute.xlu1 %1937 }
 0x1ae   : > { %v8115_v5 = vcombine.low %v2175_v1, %v2176_v3  ;;  %v1946_v38 = vrot.slane %v1938_v4, %v10605_v41  ;;  %v1957_v7 = vrot.slane %v1949_v42, %v10605_v41 }
 0x1b0   : > { %v2178_v8 = vmul.bf16 %v1946_v38, %v10668_v0  ;;  %2288 = vrot.lane.b32.xlu0 %v8115_v5, %s10346_s25  ;;  %v2179_v13 = vmul.bf16 %v1957_v7, %v10683_v48 }
 0x1b1   : > { %v1971_v55 = vpop.permute.xlu0 %1970  ;;  %v1960_v11 = vpop.permute.xlu1 %1959 }
 0x1b2   : > { %v8116_v12 = vcombine.low %v2177_v6, %v2178_v8  ;;  %v1968_v53 = vrot.slane %v1960_v11, %v10605_v41  ;;  %v1979_v14 = vrot.slane %v1971_v55, %v10605_v41 }
 0x1b4   : > { %v2180_v15 = vmul.bf16 %v1968_v53, %v10680_v46  ;;  %2290 = vrot.lane.b32.xlu1 %v8116_v12, %s10346_s25  ;;  %v2181_v50 = vmul.bf16 %v1979_v14, %v10693_v9 }
 0x1b5   : > { %v1993_v10 = vpop.permute.xlu0 %1992  ;;  %v1982_v16 = vpop.permute.xlu1 %1981 }
 0x1b6   : > { %v8117_v18 = vcombine.low %v2179_v13, %v2180_v15  ;;  %v1990_v0 = vrot.slane %v1982_v16, %v10605_v41  ;;  %v2001_v44 = vrot.slane %v1993_v10, %v10605_v41 }
 0x1b8   : > { %v2182_v32 = vmul.bf16 %v1990_v0, %v10690_v61  ;;  %2292 = vrot.lane.b32.xlu0 %v8117_v18, %s10346_s25  ;;  %v2183_v51 = vmul.bf16 %v2001_v44, %v10705_v56 }
 0x1b9   : > { %v2015_v48 = vpop.permute.xlu0 %2014  ;;  %v2004_v31 = vpop.permute.xlu1 %2003 }
 0x1ba   : > { %v8118_v26 = vcombine.low %v2181_v50, %v2182_v32  ;;  %v2012_v46 = vrot.slane %v2004_v31, %v10605_v41  ;;  %v2023_v33 = vrot.slane %v2015_v48, %v10605_v41 }
 0x1bc   : > { %v2184_v52 = vmul.bf16 %v2012_v46, %v10702_v47  ;;  %2294 = vrot.lane.b32.xlu1 %v8118_v26, %s10346_s25  ;;  %v2185_v57 = vmul.bf16 %v2023_v33, %v10715_v40 }
 0x1bd   : > { %v2037_v9 = vpop.permute.xlu0 %2036  ;;  %v2026_v19 = vpop.permute.xlu1 %2025 }
 0x1be   : > { %v8119_v21 = vcombine.low %v2183_v51, %v2184_v52  ;;  %v2034_v61 = vrot.slane %v2026_v19, %v10605_v41  ;;  %v2045_v45 = vrot.slane %v2037_v9, %v10605_v41 }
 0x1c0   : > { %v2186_v28 = vmul.bf16 %v2034_v61, %v10712_v37  ;;  %2296 = vrot.lane.b32.xlu0 %v8119_v21, %s10346_s25  ;;  %v2187_v59 = vmul.bf16 %v2045_v45, %v10727_v34 }
 0x1c1   : > { %v2059_v56 = vpop.permute.xlu0 %2058  ;;  %v2048_v27 = vpop.permute.xlu1 %2047 }
 0x1c2   : > { %v8120_v49 = vcombine.low %v2185_v57, %v2186_v28  ;;  %v2056_v47 = vrot.slane %v2048_v27, %v10605_v41  ;;  %v2067_v36 = vrot.slane %v2059_v56, %v10605_v41 }
 0x1c4   : > { %v2188_v35 = vmul.bf16 %v2056_v47, %v10724_v58  ;;  %2298 = vrot.lane.b32.xlu1 %v8120_v49, %s10346_s25  ;;  %v2189_v20 = vmul.bf16 %v2067_v36, %v10737_v29 }
 0x1c5   : > { %v2081_v40 = vpop.permute.xlu0 %2080  ;;  %v2070_v62 = vpop.permute.xlu1 %2069 }
 0x1c6   : > { %v8121_v17 = vcombine.low %v2187_v59, %v2188_v35  ;;  %v2078_v37 = vrot.slane %v2070_v62, %v10605_v41  ;;  %v2089_v60 = vrot.slane %v2081_v40, %v10605_v41 }
 0x1c8   : > { %v2190_v1 = vmul.bf16 %v2078_v37, %v10734_v43  ;;  %2300 = vrot.lane.b32.xlu0 %v8121_v17, %s10346_s25  ;;  %v2191_v42 = vmul.bf16 %v2089_v60, %v10749_v30 }
 0x1c9   : > { %v2103_v34 = vpop.permute.xlu0 %2102  ;;  %v2092_v2 = vpop.permute.xlu1 %2091 }
 0x1ca   : > { %v8122_v3 = vcombine.low %v2189_v20, %v2190_v1  ;;  %v2100_v58 = vrot.slane %v2092_v2, %v10605_v41  ;;  %v2111_v4 = vrot.slane %v2103_v34, %v10605_v41 }
 0x1cc   : > { %v2192_v5 = vmul.bf16 %v2100_v58, %v10746_v63  ;;  %2302 = vrot.lane.b32.xlu1 %v8122_v3, %s10346_s25  ;;  %v2193_v7 = vmul.bf16 %v2111_v4, %v10759_v25  ;;  %v10272_v58 = vld [vmem:[%s10423_s14] sm:$0xff] }
 0x1cd   : > { %v2125_v29 = vpop.permute.xlu0 %2124  ;;  %v2114_v38 = vpop.permute.xlu1 %2113 }
 0x1ce   : > { %v8123_v6 = vcombine.low %v2191_v42, %v2192_v5  ;;  %v2122_v43 = vrot.slane %v2114_v38, %v10605_v41  ;;  %v2133_v8 = vrot.slane %v2125_v29, %v10605_v41 }
 0x1d0   : > { %v2194_v55 = vmul.bf16 %v2122_v43, %v10756_v54  ;;  %2304 = vrot.lane.b32.xlu0 %v8123_v6, %s10346_s25  ;;  %v2195_v53 = vmul.bf16 %v2133_v8, %v10774_v39  ;;  %v10347_v8 = vmov 0.0  }
 0x1d1   : > { %v2147_v30 = vpop.permute.xlu0 %2146  ;;  %v2136_v11 = vpop.permute.xlu1 %2135  ;;  %2596 = vst.msk [vmem:[#allocation2] sm:$0xff] %vm2595_vm2, %v10347_v8  ;;  %2597 = vst.msk [vmem:[#allocation2 + $0x8] sm:$0xff] %vm2595_vm2, %v10347_v8 }
 0x1d2   : > { %v8124_v12 = vcombine.low %v2193_v7, %v2194_v55  ;;  %v2144_v63 = vrot.slane %v2136_v11, %v10605_v41  ;;  %v2155_v13 = vrot.slane %v2147_v30, %v10605_v41  ;;  %2599 = vst.msk [vmem:[#allocation2 + $0x10] sm:$0x3] %vm2598_vm3, %v10347_v8  ;;  %2603 = vst.msk [vmem:[#allocation2 + $0x1a8] sm:$0x3] %vm2598_vm3, %v10347_v8 }
 0x1d3   : > { %2601 = vst.msk [vmem:[#allocation2 + $0x198] sm:$0xff] %vm2595_vm2, %v10347_v8  ;;  %2602 = vst.msk [vmem:[#allocation2 + $0x1a0] sm:$0xff] %vm2595_vm2, %v10347_v8 }
 0x1d4   : > { %v2196_v14 = vmul.bf16 %v2144_v63, %v10771_v23  ;;  %2306 = vrot.lane.b32.xlu1 %v8124_v12, %s10346_s25  ;;  %v2197_v54 = vmul.bf16 %v2155_v13, %v10786_v22  ;;  %4328 = vst.msk [vmem:[#allocation3] sm:$0xff] %vm2595_vm2, %v10347_v8  ;;  %4329 = vst.msk [vmem:[#allocation3 + $0x8] sm:$0xff] %vm2595_vm2, %v10347_v8 }
 0x1d5   : > { %v2158_v25 = vpop.permute.xlu1 %2157  ;;  %4330 = vst.msk [vmem:[#allocation3 + $0x10] sm:$0x3] %vm2598_vm3, %v10347_v8  ;;  %4334 = vst.msk [vmem:[#allocation3 + $0x1a8] sm:$0x3] %vm2598_vm3, %v10347_v8  ;;  %vm6577_vm3 = vcmask 1044484  }
 0x1d6   : > { %v8125_v15 = vcombine.low %v2195_v53, %v2196_v14  ;;  %v2166_v10 = vrot.slane %v2158_v25, %v10605_v41  ;;  %4332 = vst.msk [vmem:[#allocation3 + $0x198] sm:$0xff] %vm2595_vm2, %v10347_v8  ;;  %4333 = vst.msk [vmem:[#allocation3 + $0x1a0] sm:$0xff] %vm2595_vm2, %v10347_v8 }
 0x1d7   : > { %2607 = vst.msk [vmem:[#allocation2 + $0x30] sm:$0x1] %vm2605_vm5, %v10347_v8  ;;  %2606 = vst.msk [vmem:[#allocation2 + $0x18] sm:$0x1] %vm2605_vm5, %v10347_v8 }
 0x1d8   : > { %v2198_v16 = vmul.bf16 %v2166_v10, %v10783_v24  ;;  %2308 = vrot.lane.b32.xlu0 %v8125_v15, %s10346_s25  ;;  %v11109_v55 = vld [vmem:[#allocation2] sm:$0xff]  ;;  %v11111_v30 = vld [vmem:[#allocation2 + $0x8] sm:$0xff]  ;;  %2608 = vst.msk [vmem:[#allocation2 + $0x48] sm:$0x1] %vm2605_vm5, %v10347_v8  ;;  %2609 = vst.msk [vmem:[#allocation2 + $0x60] sm:$0x1] %vm2605_vm5, %v10347_v8 }
 0x1d9   : > { %v11113_v11 = vld [vmem:[#allocation2 + $0x10] sm:$0x3]  ;;  %v2773_v12 = vrot.slane %v11109_v55, 1  ;;  %v2774_v63 = vrot.slane %v11111_v30, 1  ;;  %2610 = vst.msk [vmem:[#allocation2 + $0x78] sm:$0x1] %vm2605_vm5, %v10347_v8 }
 0x1da   : > { %v8126_v18 = vcombine.low %v2197_v54, %v2198_v16  ;;  %v2776_v53 = vrot.slane %v11113_v11, 1  ;;  %2611 = vst.msk [vmem:[#allocation2 + $0x90] sm:$0x1] %vm2605_vm5, %v10347_v8  ;;  %2612 = vst.msk [vmem:[#allocation2 + $0xa8] sm:$0x1] %vm2605_vm5, %v10347_v8  ;;  %v2854_v15 = vrot.slane %v11109_v55, 2 }
 0x1db   : > { %v11119_v13 = vsel %vm2772_vm4, %v2773_v12, %v2774_v63  ;;  %2613 = vst.msk [vmem:[#allocation2 + $0xc0] sm:$0x1] %vm2605_vm5, %v10347_v8  ;;  %2614 = vst.msk [vmem:[#allocation2 + $0xd8] sm:$0x1] %vm2605_vm5, %v10347_v8  ;;  %v2855_v10 = vrot.slane %v11111_v30, 2  ;;  %v2857_v54 = vrot.slane %v11113_v11, 2 }
 0x1dc   : > { %2310 = vrot.lane.b32.xlu1 %v8126_v18, %s10346_s25  ;;  %v11122_v14 = vsel %vm2772_vm4, %v2774_v63, %v2776_v53  ;;  %2615 = vst.msk [vmem:[#allocation2 + $0xf0] sm:$0x1] %vm2605_vm5, %v10347_v8  ;;  %2616 = vst.msk [vmem:[#allocation2 + $0x108] sm:$0x1] %vm2605_vm5, %v10347_v8 }
 0x1dd   : > { %2617 = vst.msk [vmem:[#allocation2 + $0x120] sm:$0x1] %vm2605_vm5, %v10347_v8  ;;  %2618 = vst.msk [vmem:[#allocation2 + $0x138] sm:$0x1] %vm2605_vm5, %v10347_v8  ;;  %v8960_v25 = vpack.i.bf16 %v11122_v14, %v11119_v13  ;;  %v2856_v16 = vsel %vm2853_vm6, %v2854_v15, %v2855_v10  ;;  %v2858_v18 = vsel %vm2853_vm6, %v2855_v10, %v2857_v54 }
 0x1de   : > { %2619 = vst.msk [vmem:[#allocation2 + $0x150] sm:$0x1] %vm2605_vm5, %v10347_v8  ;;  %2620 = vst.msk [vmem:[#allocation2 + $0x168] sm:$0x1] %vm2605_vm5, %v10347_v8 }
 0x1df   : > { %2621 = vst.msk [vmem:[#allocation2 + $0x180] sm:$0x1] %vm2605_vm5, %v10347_v8  ;;  %2622 = vst.msk [vmem:[#allocation2 + $0x29] sm:$0x1] %vm2605_vm5, %v10347_v8  ;;  %8961 = vrot.lane.b32.xlu0 %v8960_v25, %s10348_s26 }
 0x1e0   : > { %2623 = vst.msk [vmem:[#allocation2 + $0x41] sm:$0x1] %vm2605_vm5, %v10347_v8  ;;  %2624 = vst.msk [vmem:[#allocation2 + $0x59] sm:$0x1] %vm2605_vm5, %v10347_v8 }
 0x1e1   : > { %2625 = vst.msk [vmem:[#allocation2 + $0x71] sm:$0x1] %vm2605_vm5, %v10347_v8  ;;  %2626 = vst.msk [vmem:[#allocation2 + $0x89] sm:$0x1] %vm2605_vm5, %v10347_v8 }
 0x1e2   : > { %2627 = vst.msk [vmem:[#allocation2 + $0xa1] sm:$0x1] %vm2605_vm5, %v10347_v8  ;;  %2628 = vst.msk [vmem:[#allocation2 + $0xb9] sm:$0x1] %vm2605_vm5, %v10347_v8 }
 0x1e3   : > { %2629 = vst.msk [vmem:[#allocation2 + $0xd1] sm:$0x1] %vm2605_vm5, %v10347_v8  ;;  %2630 = vst.msk [vmem:[#allocation2 + $0xe9] sm:$0x1] %vm2605_vm5, %v10347_v8 }
 0x1e4   : > { %2631 = vst.msk [vmem:[#allocation2 + $0x101] sm:$0x1] %vm2605_vm5, %v10347_v8  ;;  %2632 = vst.msk [vmem:[#allocation2 + $0x119] sm:$0x1] %vm2605_vm5, %v10347_v8 }
 0x1e5   : > { %2633 = vst.msk [vmem:[#allocation2 + $0x131] sm:$0x1] %vm2605_vm5, %v10347_v8  ;;  %2634 = vst.msk [vmem:[#allocation2 + $0x149] sm:$0x1] %vm2605_vm5, %v10347_v8 }
 0x1e6   : > { %2635 = vst.msk [vmem:[#allocation2 + $0x161] sm:$0x1] %vm2605_vm5, %v10347_v8  ;;  %2636 = vst.msk [vmem:[#allocation2 + $0x179] sm:$0x1] %vm2605_vm5, %v10347_v8 }
 0x1e7   : > { %2637 = vst.msk [vmem:[#allocation2 + $0x191] sm:$0x1] %vm2605_vm5, %v10347_v8  ;;  %4336 = vst.msk [vmem:[#allocation3 + $0x18] sm:$0x1] %vm2605_vm5, %v10347_v8 }
 0x1e8   : > { %4337 = vst.msk [vmem:[#allocation3 + $0x30] sm:$0x1] %vm2605_vm5, %v10347_v8  ;;  %4338 = vst.msk [vmem:[#allocation3 + $0x48] sm:$0x1] %vm2605_vm5, %v10347_v8 }
 0x1e9   : > { %4339 = vst.msk [vmem:[#allocation3 + $0x60] sm:$0x1] %vm2605_vm5, %v10347_v8  ;;  %4340 = vst.msk [vmem:[#allocation3 + $0x78] sm:$0x1] %vm2605_vm5, %v10347_v8 }
 0x1ea   : > { %4341 = vst.msk [vmem:[#allocation3 + $0x90] sm:$0x1] %vm2605_vm5, %v10347_v8  ;;  %4342 = vst.msk [vmem:[#allocation3 + $0xa8] sm:$0x1] %vm2605_vm5, %v10347_v8 }
 0x1eb   : > { %4343 = vst.msk [vmem:[#allocation3 + $0xc0] sm:$0x1] %vm2605_vm5, %v10347_v8  ;;  %4344 = vst.msk [vmem:[#allocation3 + $0xd8] sm:$0x1] %vm2605_vm5, %v10347_v8 }
 0x1ec   : > { %4345 = vst.msk [vmem:[#allocation3 + $0xf0] sm:$0x1] %vm2605_vm5, %v10347_v8  ;;  %4346 = vst.msk [vmem:[#allocation3 + $0x108] sm:$0x1] %vm2605_vm5, %v10347_v8 }
 0x1ed   : > { %4347 = vst.msk [vmem:[#allocation3 + $0x120] sm:$0x1] %vm2605_vm5, %v10347_v8  ;;  %4348 = vst.msk [vmem:[#allocation3 + $0x138] sm:$0x1] %vm2605_vm5, %v10347_v8 }
 0x1ee   : > { %4349 = vst.msk [vmem:[#allocation3 + $0x150] sm:$0x1] %vm2605_vm5, %v10347_v8  ;;  %4350 = vst.msk [vmem:[#allocation3 + $0x168] sm:$0x1] %vm2605_vm5, %v10347_v8 }
 0x1ef   : > { %4351 = vst.msk [vmem:[#allocation3 + $0x180] sm:$0x1] %vm2605_vm5, %v10347_v8  ;;  %4352 = vst.msk [vmem:[#allocation3 + $0x29] sm:$0x1] %vm2605_vm5, %v10347_v8 }
 0x1f0   : > { %4353 = vst.msk [vmem:[#allocation3 + $0x41] sm:$0x1] %vm2605_vm5, %v10347_v8  ;;  %4354 = vst.msk [vmem:[#allocation3 + $0x59] sm:$0x1] %vm2605_vm5, %v10347_v8 }
 0x1f1   : > { %4355 = vst.msk [vmem:[#allocation3 + $0x71] sm:$0x1] %vm2605_vm5, %v10347_v8  ;;  %4356 = vst.msk [vmem:[#allocation3 + $0x89] sm:$0x1] %vm2605_vm5, %v10347_v8 }
 0x1f2   : > { %4357 = vst.msk [vmem:[#allocation3 + $0xa1] sm:$0x1] %vm2605_vm5, %v10347_v8  ;;  %4358 = vst.msk [vmem:[#allocation3 + $0xb9] sm:$0x1] %vm2605_vm5, %v10347_v8 }
 0x1f3   : > { %4359 = vst.msk [vmem:[#allocation3 + $0xd1] sm:$0x1] %vm2605_vm5, %v10347_v8  ;;  %4360 = vst.msk [vmem:[#allocation3 + $0xe9] sm:$0x1] %vm2605_vm5, %v10347_v8 }
 0x1f4   : > { %4361 = vst.msk [vmem:[#allocation3 + $0x101] sm:$0x1] %vm2605_vm5, %v10347_v8  ;;  %4362 = vst.msk [vmem:[#allocation3 + $0x119] sm:$0x1] %vm2605_vm5, %v10347_v8 }
 0x1f5   : > { %4363 = vst.msk [vmem:[#allocation3 + $0x131] sm:$0x1] %vm2605_vm5, %v10347_v8  ;;  %4364 = vst.msk [vmem:[#allocation3 + $0x149] sm:$0x1] %vm2605_vm5, %v10347_v8 }
 0x1f6   : > { %4365 = vst.msk [vmem:[#allocation3 + $0x161] sm:$0x1] %vm2605_vm5, %v10347_v8  ;;  %4366 = vst.msk [vmem:[#allocation3 + $0x179] sm:$0x1] %vm2605_vm5, %v10347_v8 }
 0x1f7   : > { %4367 = vst.msk [vmem:[#allocation3 + $0x191] sm:$0x1] %vm2605_vm5, %v10347_v8 }
 0x212   : > { %v2281_v39 = vpop.permute.xlu0 %2280 }
 0x213   : > { %8788 = vmatprep.mubr.msk.bf16.mxu0 %vm1309_vm1, %v2281_v39  ;;  %v8965_v39 = vpack.i.bf16 %v2858_v18, %v2856_v16  ;;  %v10242_v16 = vld [vmem:[%s14246_s4 + $0x8] sm:$0xff]  }
 0x215   : > { %8966 = vrot.lane.b32.xlu0 %v8965_v39, %s10349_s28 }
 0x216   : > { %v2283_v0 = vpop.permute.xlu1 %2282 }
 0x217   : > { %8789 = vmatmul.mubr.msk.bf16.vlgmr.msra.gmra.mrb[0].mxu0 %vm1309_vm1, %v2283_v0 }
 0x21a   : > { %v2285_v23 = vpop.permute.xlu0 %2284 }
 0x21b   : > { %8792 = vmatprep.mubr.msk.bf16.mxu0 %vm1309_vm1, %v2285_v23  ;;  %v11264_v23 = vld [vmem:[%s14245_s3] ss:$0 sm:$0xff] }
 0x21e   : > { %v2287_v50 = vpop.permute.xlu1 %2286 }
 0x21f   : > { %8793 = vmatmul.mubr.msk.bf16.gmra.mrb[4].mxu0 %vm1309_vm1, %v2287_v50 }
 0x222   : > { %v2289_v22 = vpop.permute.xlu0 %2288 }
 0x223   : > { %8796 = vmatprep.mubr.msk.bf16.mxu0 %vm1309_vm1, %v2289_v22 }
 0x224   : > { %v11013_v24 = vpop.f32.mrb[0].mxu1 }
 0x225   : > { %v11015_v41 = vpop.f32.mrb[1].mxu1 }
 0x226   : > { %v11017_v44 = vpop.f32.mrb[2].mxu1  ;;  %v2291_v32 = vpop.permute.xlu1 %2290 }
 0x227   : > { %v11019_v48 = vpop.f32.mrb[3].mxu1  ;;  %8797 = vmatmul.mubr.msk.bf16.gmra.mrb[8].mxu0 %vm1309_vm1, %v2291_v32  ;;  %v10241_v32 = vld [vmem:[%s14246_s4] sm:$0xff]  }
 0x228   : > { %8820 = vmatprep.subr.bf16.mxu1 %v10241_v32 }
 0x229   : > { %8821 = vmatpush3.bf16.msra.mxu1 %v10241_v32 }
 0x22a   : > { %v2293_v31 = vpop.permute.xlu0 %2292  ;;  %8822 = vmatprep.subr.bf16.mxu1 %v10242_v16 }
 0x22b   : > { %8800 = vmatprep.mubr.msk.bf16.mxu0 %vm1309_vm1, %v2293_v31 }
 0x22c   : > { %v11023_v26 = vpop.f32.mrb[4].mxu1 }
 0x22d   : > { %v11025_v46 = vpop.f32.mrb[5].mxu1  ;;  %8823 = vmatpush3.bf16.msra.mxu1 %v10242_v16 }
 0x22e   : > { %v11027_v51 = vpop.f32.mrb[6].mxu1  ;;  %v2295_v33 = vpop.permute.xlu1 %2294 }
 0x22f   : > { %v11029_v52 = vpop.f32.mrb[7].mxu1  ;;  %8801 = vmatmul.mubr.msk.bf16.gmra.mrb[12].mxu0 %vm1309_vm1, %v2295_v33 }
 0x232   : > { %v2297_v9 = vpop.permute.xlu0 %2296 }
 0x233   : > { %8804 = vmatprep.mubr.msk.bf16.mxu0 %vm1309_vm1, %v2297_v9 }
 0x234   : > { %v11033_v19 = vpop.f32.mrb[8].mxu1 }
 0x235   : > { %v11035_v21 = vpop.f32.mrb[9].mxu1 }
 0x236   : > { %v11037_v61 = vpop.f32.mrb[10].mxu1  ;;  %v2299_v57 = vpop.permute.xlu1 %2298 }
 0x237   : > { %v11039_v45 = vpop.f32.mrb[11].mxu1  ;;  %8805 = vmatmul.mubr.msk.bf16.gmra.mrb[16].mxu0 %vm1309_vm1, %v2299_v57 }
 0x23a   : > { %v2301_v28 = vpop.permute.xlu0 %2300 }
 0x23b   : > { %8808 = vmatprep.mubr.msk.bf16.mxu0 %vm1309_vm1, %v2301_v28 }
 0x23c   : > { %v11043_v56 = vpop.f32.mrb[12].mxu1 }
 0x23d   : > { %v11045_v27 = vpop.f32.mrb[13].mxu1 }
 0x23e   : > { %v11047_v49 = vpop.f32.mrb[14].mxu1  ;;  %v2303_v47 = vpop.permute.xlu1 %2302 }
 0x23f   : > { %v11049_v59 = vpop.f32.mrb[15].mxu1  ;;  %8809 = vmatmul.mubr.msk.bf16.gmra.mrb[20].mxu0 %vm1309_vm1, %v2303_v47 }
 0x242   : > { %v2305_v36 = vpop.permute.xlu0 %2304 }
 0x243   : > { %8812 = vmatprep.mubr.msk.bf16.mxu0 %vm1309_vm1, %v2305_v36 }
 0x244   : > { %v11053_v35 = vpop.f32.mrb[16].mxu1 }
 0x245   : > { %v11055_v40 = vpop.f32.mrb[17].mxu1 }
 0x246   : > { %v11057_v62 = vpop.f32.mrb[18].mxu1  ;;  %v2307_v17 = vpop.permute.xlu1 %2306 }
 0x247   : > { %v11059_v37 = vpop.f32.mrb[19].mxu1  ;;  %8813 = vmatmul.mubr.msk.bf16.gmra.mrb[24].mxu0 %vm1309_vm1, %v2307_v17 }
 0x24a   : > { %v2309_v20 = vpop.permute.xlu0 %2308 }
 0x24b   : > { %8816 = vmatprep.mubr.msk.bf16.mxu0 %vm1309_vm1, %v2309_v20 }
 0x24c   : > { %v11063_v60 = vpop.f32.mrb[20].mxu1 }
 0x24d   : > { %v11065_v1 = vpop.f32.mrb[21].mxu1 }
 0x24e   : > { %v11067_v34 = vpop.f32.mrb[22].mxu1  ;;  %v2311_v2 = vpop.permute.xlu1 %2310 }
 0x24f   : > { %v11069_v3 = vpop.f32.mrb[23].mxu1  ;;  %8817 = vmatmul.mubr.msk.bf16.gmra.mrb[28].mxu0 %vm1309_vm1, %v2311_v2  ;;  %vm14271_vm1 = vsmask.f32 256 }
 0x250   : > { %6143 = vmatprep.mubr.bf16.mxu0 %v10272_v58  ;;  %vm6576_vm5 = vmand %vm6574_vm0, %vm14271_vm1 }
 0x254   : > { %v11073_v42 = vpop.f32.mrb[24].mxu1 }
 0x255   : > { %v11075_v4 = vpop.f32.mrb[25].mxu1 }
 0x256   : > { %v11077_v5 = vpop.f32.mrb[26].mxu1 }
 0x257   : > { %v11079_v29 = vpop.f32.mrb[27].mxu1 }
 0x25c   : > { %v11081_v38 = vpop.f32.mrb[28].mxu1 }
 0x25d   : > { %v11083_v6 = vpop.f32.mrb[29].mxu1 }
 0x25e   : > { %v11085_v43 = vpop.f32.mrb[30].mxu1 }
 0x25f   : > { %v11087_v7 = vpop.f32.mrb[31].mxu1 }
 0x2ea   : > { %v8790_v0 = vpop.f32.mrb[0].mxu0 }
 0x2eb   : > { %v8862_v50 = vadd.f32 %v8790_v0, %v11013_v24  ;;  %v2397_v22 = vpop.f32.mrb[1].mxu0 }
 0x2ec   : > { %v8863_v31 = vadd.f32 %v2397_v22, %v11015_v41  ;;  %v8791_v33 = vpop.f32.mrb[2].mxu0 }
 0x2ed   : > { %v2565_v9 = vadd.f32 %v8862_v50, %v11264_v23  ;;  %v8864_v57 = vadd.f32 %v8791_v33, %v11017_v44  ;;  %v2400_v28 = vpop.f32.mrb[3].mxu0 }
 0x2ee   : > { %v2563_v47 = vadd.f32 %v8863_v31, %v11264_v23  ;;  %v8865_v36 = vadd.f32 %v2400_v28, %v11019_v48 }
 0x2ef   : > { %2640 = vst.msk [vmem:[#allocation2 + $0x31] sm:$0xff] %vm2595_vm2, %v2565_v9  ;;  %v2566_v24 = vadd.f32 %v8864_v57, %v11264_v23 }
 0x2f0   : > { %2638 = vst.msk [vmem:[#allocation2 + $0x19] sm:$0xff] %vm2595_vm2, %v2563_v47  ;;  %v2564_v41 = vadd.f32 %v8865_v36, %v11264_v23 }
 0x2f1   : > { %2641 = vst.msk [vmem:[#allocation2 + $0x39] sm:$0xff] %vm2595_vm2, %v2566_v24 }
 0x2f2   : > { %2639 = vst.msk [vmem:[#allocation2 + $0x21] sm:$0xff] %vm2595_vm2, %v2564_v41  ;;  %v8794_v44 = vpop.f32.mrb[4].mxu0 }
 0x2f3   : > { %v8866_v17 = vadd.f32 %v8794_v44, %v11023_v26  ;;  %v2413_v20 = vpop.f32.mrb[5].mxu0 }
 0x2f4   : > { %v8867_v2 = vadd.f32 %v2413_v20, %v11025_v46  ;;  %v8795_v48 = vpop.f32.mrb[6].mxu0 }
 0x2f5   : > { %v2569_v58 = vadd.f32 %v8866_v17, %v11264_v23  ;;  %v8868_v8 = vadd.f32 %v8795_v48, %v11027_v51  ;;  %v2416_v11 = vpop.f32.mrb[7].mxu0 }
 0x2f6   : > { %v2567_v12 = vadd.f32 %v8867_v2, %v11264_v23  ;;  %v8869_v63 = vadd.f32 %v2416_v11, %v11029_v52  ;;  %v2676_v53 = vld [vmem:[#allocation2 + $0x30] sm:$0xff] }
 0x2f7   : > { %2644 = vst.msk [vmem:[#allocation2 + $0x61] sm:$0xff] %vm2595_vm2, %v2569_v58  ;;  %v2570_v13 = vadd.f32 %v8868_v8, %v11264_v23  ;;  %v11292_v51 = vld [vmem:[#allocation2 + $0x18] sm:$0xff]  ;;  %v2783_v10 = vrot.slane %v2676_v53, 1  ;;  %v2864_v24 = vrot.slane %v2676_v53, 2 }
 0x2f8   : > { %2642 = vst.msk [vmem:[#allocation2 + $0x49] sm:$0xff] %vm2595_vm2, %v2567_v12  ;;  %v2568_v26 = vadd.f32 %v8869_v63, %v11264_v23  ;;  %v2677_v46 = vld [vmem:[#allocation2 + $0x38] sm:$0xff]  ;;  %v2678_v14 = vld [vmem:[#allocation2 + $0x40] sm:$0x3] }
 0x2f9   : > { %2645 = vst.msk [vmem:[#allocation2 + $0x69] sm:$0xff] %vm2595_vm2, %v2570_v13  ;;  %v8970_v25 = vpack.i.bf16 %v2677_v46, %v2676_v53  ;;  %v11294_v15 = vld [vmem:[#allocation2 + $0x20] sm:$0xff]  ;;  %v2784_v52 = vrot.slane %v2677_v46, 1  ;;  %v2786_v54 = vrot.slane %v2678_v14, 1  ;;  %v2865_v0 = vrot.slane %v2677_v46, 2 }
 0x2fa   : > { %2643 = vst.msk [vmem:[#allocation2 + $0x51] sm:$0xff] %vm2595_vm2, %v2568_v26  ;;  %v8798_v18 = vpop.f32.mrb[8].mxu0  ;;  %v8980_v39 = vpack.i.bf16 %v11294_v15, %v11292_v51  ;;  %v2867_v33 = vrot.slane %v2678_v14, 2  ;;  %v2675_v28 = vld [vmem:[#allocation2 + $0x28] sm:$0x3]  ;;  %v2779_v20 = vrot.slane %v11294_v15, 1 }
 0x2fb   : > { %v8870_v50 = vadd.f32 %v8798_v18, %v11033_v19  ;;  %8971 = vrot.lane.b32.xlu1 %v8970_v25, %s10350_s13  ;;  %v2429_v22 = vpop.f32.mrb[9].mxu0  ;;  %v2785_v32 = vsel %vm2772_vm4, %v2783_v10, %v2784_v52  ;;  %v2787_v31 = vsel %vm2772_vm4, %v2784_v52, %v2786_v54  ;;  %v2866_v2 = vsel %vm2853_vm6, %v2864_v24, %v2865_v0 }
 0x2fc   : > { %v8871_v9 = vadd.f32 %v2429_v22, %v11035_v21  ;;  %8981 = vrot.lane.b32.xlu0 %v8980_v39, %s10350_s13  ;;  %v8799_v57 = vpop.f32.mrb[10].mxu0  ;;  %v8985_v17 = vpack.i.bf16 %v2787_v31, %v2785_v32  ;;  %v2781_v48 = vrot.slane %v2675_v28, 1  ;;  %v2860_v26 = vrot.slane %v11294_v15, 2 }
 0x2fd   : > { %v2573_v47 = vadd.f32 %v8870_v50, %v11264_v23  ;;  %v8872_v19 = vadd.f32 %v8799_v57, %v11037_v61  ;;  %v2432_v36 = vpop.f32.mrb[11].mxu0  ;;  %v2868_v61 = vsel %vm2853_vm6, %v2865_v0, %v2867_v33  ;;  %v2862_v46 = vrot.slane %v2675_v28, 2 }
 0x2fe   : > { %v2571_v41 = vadd.f32 %v8871_v9, %v11264_v23  ;;  %v8873_v44 = vadd.f32 %v2432_v36, %v11039_v45  ;;  %v2778_v45 = vrot.slane %v11292_v51, 1  ;;  %v8990_v11 = vpack.i.bf16 %v2868_v61, %v2866_v2 }
 0x2ff   : > { %2648 = vst.msk [vmem:[#allocation2 + $0x91] sm:$0xff] %vm2595_vm2, %v2573_v47  ;;  %v2574_v21 = vadd.f32 %v8872_v19, %v11264_v23  ;;  %8976 = vrot.lane.b32.xlu1 %v8970_v25, %s10351_s15  ;;  %v2782_v13 = vsel %vm2772_vm4, %v2779_v20, %v2781_v48  ;;  %v2863_v50 = vsel %vm2853_vm6, %v2860_v26, %v2862_v46 }
 0x300   : > { %2646 = vst.msk [vmem:[#allocation2 + $0x79] sm:$0xff] %vm2595_vm2, %v2571_v41  ;;  %v2572_v58 = vadd.f32 %v8873_v44, %v11264_v23  ;;  %8986 = vrot.lane.b32.xlu0 %v8985_v17, %s10348_s26  ;;  %v2780_v12 = vsel %vm2772_vm4, %v2778_v45, %v2779_v20  ;;  %v2683_v57 = vld [vmem:[#allocation2 + $0x68] sm:$0xff]  ;;  %v2684_v19 = vld [vmem:[#allocation2 + $0x70] sm:$0x3] }
 0x301   : > { %2649 = vst.msk [vmem:[#allocation2 + $0x99] sm:$0xff] %vm2595_vm2, %v2574_v21  ;;  %v9025_v39 = vpack.i.bf16 %v2782_v13, %v2780_v12  ;;  %v11351_v9 = vld [vmem:[#allocation2 + $0x50] sm:$0xff]  ;;  %v11357_v44 = vld [vmem:[#allocation2 + $0x48] sm:$0xff]  ;;  %v2794_v21 = vrot.slane %v2683_v57, 1  ;;  %v2875_v12 = vrot.slane %v2683_v57, 2 }
 0x302   : > { %2647 = vst.msk [vmem:[#allocation2 + $0x81] sm:$0xff] %vm2595_vm2, %v2572_v58  ;;  %v8802_v8 = vpop.f32.mrb[12].mxu0 }
 0x303   : > { %v8874_v63 = vadd.f32 %v8802_v8, %v11043_v56  ;;  %8996 = vrot.lane.b32.xlu1 %v8985_v17, %s10352_s16  ;;  %v2445_v53 = vpop.f32.mrb[13].mxu0  ;;  %v2859_v56 = vrot.slane %v11292_v51, 2 }
 0x304   : > { %v8875_v14 = vadd.f32 %v2445_v53, %v11045_v27  ;;  %8991 = vrot.lane.b32.xlu0 %v8990_v11, %s10349_s28  ;;  %v8803_v25 = vpop.f32.mrb[14].mxu0 }
 0x305   : > { %v2577_v10 = vadd.f32 %v8874_v63, %v11264_v23  ;;  %v8876_v52 = vadd.f32 %v8803_v25, %v11047_v49  ;;  %v2448_v54 = vpop.f32.mrb[15].mxu0  ;;  %v2861_v27 = vsel %vm2853_vm6, %v2859_v56, %v2860_v26  ;;  %v2877_v63 = vrot.slane %v2684_v19, 2  ;;  %v2681_v26 = vld [vmem:[#allocation2 + $0x58] sm:$0x3] }
 0x306   : > { %v2575_v16 = vadd.f32 %v8875_v14, %v11264_v23  ;;  %v8877_v18 = vadd.f32 %v2448_v54, %v11049_v59  ;;  %v10243_v59 = vld [vmem:[%s14246_s4 + $0x10] sm:$0xff]   ;;  %v9030_v32 = vpack.i.bf16 %v2863_v50, %v2861_v27 }
 0x307   : > { %2652 = vst.msk [vmem:[#allocation2 + $0xc1] sm:$0xff] %vm2595_vm2, %v2577_v10  ;;  %v2578_v0 = vadd.f32 %v8876_v52, %v11264_v23  ;;  %9001 = vrot.lane.b32.xlu1 %v8990_v11, %s10353_s17  ;;  %8824 = vmatprep.subr.bf16.mxu1 %v10243_v59 }
 0x308   : > { %2650 = vst.msk [vmem:[#allocation2 + $0xa9] sm:$0xff] %vm2595_vm2, %v2575_v16  ;;  %v2576_v49 = vadd.f32 %v8877_v18, %v11264_v23  ;;  %9026 = vrot.lane.b32.xlu0 %v9025_v39, %s10352_s16  ;;  %8825 = vmatpush3.bf16.msra.mxu1 %v10243_v59  ;;  %v2878_v18 = vsel %vm2853_vm6, %v2875_v12, %v2877_v63  ;;  %v2688_v63 = vld [vmem:[#allocation2 + $0x90] sm:$0xff] }
 0x309   : > { %2653 = vst.msk [vmem:[#allocation2 + $0xc9] sm:$0xff] %vm2595_vm2, %v2578_v0  ;;  %v2788_v0 = vrot.slane %v11357_v44, 1 }
 0x30a   : > { %2651 = vst.msk [vmem:[#allocation2 + $0xb1] sm:$0xff] %vm2595_vm2, %v2576_v49  ;;  %v8806_v22 = vpop.f32.mrb[16].mxu0 }
 0x30b   : > { %v8878_v31 = vadd.f32 %v8806_v22, %v11053_v35  ;;  %9006 = vrot.lane.b32.xlu1 %v8985_v17, %s10354_s20  ;;  %v2461_v33 = vpop.f32.mrb[17].mxu0  ;;  %v2682_v35 = vld [vmem:[#allocation2 + $0x60] sm:$0xff] }
 0x30c   : > { %v8879_v28 = vadd.f32 %v2461_v33, %v11055_v40  ;;  %9031 = vrot.lane.b32.xlu0 %v9030_v32, %s10353_s17  ;;  %v8807_v47 = vpop.f32.mrb[18].mxu0  ;;  %v9045_v40 = vpack.i.bf16 %v11351_v9, %v11357_v44  ;;  %v2793_v48 = vrot.slane %v2682_v35, 1  ;;  %v2874_v10 = vrot.slane %v2682_v35, 2 }
 0x30d   : > { %v2581_v36 = vadd.f32 %v8878_v31, %v11264_v23  ;;  %v8880_v24 = vadd.f32 %v8807_v47, %v11057_v62  ;;  %v2464_v41 = vpop.f32.mrb[19].mxu0  ;;  %v2796_v62 = vrot.slane %v2684_v19, 1  ;;  %v9035_v27 = vpack.i.bf16 %v2683_v57, %v2682_v35 }
 0x30e   : > { %v2579_v17 = vadd.f32 %v8879_v28, %v11264_v23  ;;  %v8881_v20 = vadd.f32 %v2464_v41, %v11059_v37  ;;  %v2795_v58 = vsel %vm2772_vm4, %v2793_v48, %v2794_v21  ;;  %v2870_v33 = vrot.slane %v11351_v9, 2 }
 0x30f   : > { %2656 = vst.msk [vmem:[#allocation2 + $0xf1] sm:$0xff] %vm2595_vm2, %v2581_v36  ;;  %v2582_v2 = vadd.f32 %v8880_v24, %v11264_v23  ;;  %9011 = vrot.lane.b32.xlu1 %v8990_v11, %s10355_s21  ;;  %v2797_v11 = vsel %vm2772_vm4, %v2794_v21, %v2796_v62  ;;  %v2872_v28 = vrot.slane %v2681_v26, 2 }
 0x310   : > { %2654 = vst.msk [vmem:[#allocation2 + $0xd9] sm:$0xff] %vm2595_vm2, %v2579_v17  ;;  %v2580_v61 = vadd.f32 %v8881_v20, %v11264_v23  ;;  %9046 = vrot.lane.b32.xlu0 %v9045_v40, %s10350_s13  ;;  %v11384_v56 = vpack.i.bf16 %v2797_v11, %v2795_v58  ;;  %v2685_v11 = vld [vmem:[#allocation2 + $0x78] sm:$0xff] }
 0x311   : > { %2657 = vst.msk [vmem:[#allocation2 + $0xf9] sm:$0xff] %vm2595_vm2, %v2582_v2  ;;  %v2873_v20 = vsel %vm2853_vm6, %v2870_v33, %v2872_v28 }
 0x312   : > { %2655 = vst.msk [vmem:[#allocation2 + $0xe1] sm:$0xff] %vm2595_vm2, %v2580_v61  ;;  %v8810_v37 = vpop.f32.mrb[20].mxu0 }
 0x313   : > { %v8882_v45 = vadd.f32 %v8810_v37, %v11063_v60  ;;  %9016 = vrot.lane.b32.xlu1 %v9025_v39, %s10348_s26  ;;  %v2477_v8 = vpop.f32.mrb[21].mxu0  ;;  %v10244_v60 = vld [vmem:[%s14246_s4 + $0x18] sm:$0xff]   ;;  %v2791_v39 = vrot.slane %v2681_v26, 1  ;;  %v10245_v26 = vld [vmem:[%s14246_s4 + $0x20] ss:$0 sps:$4 sm:$0xff]  }
 0x314   : > { %v8883_v53 = vadd.f32 %v2477_v8, %v11065_v1  ;;  %9051 = vrot.lane.b32.xlu0 %v9045_v40, %s10351_s15  ;;  %v8811_v13 = vpop.f32.mrb[22].mxu0  ;;  %v2789_v1 = vrot.slane %v11351_v9, 1  ;;  %8826 = vmatprep.subr.bf16.mxu1 %v10244_v60  ;;  %v2690_v8 = vld [vmem:[#allocation2 + $0xa0] sm:$0x3] }
 0x315   : > { %v2585_v46 = vadd.f32 %v8882_v45, %v11264_v23  ;;  %v8884_v14 = vadd.f32 %v8811_v13, %v11067_v34  ;;  %v2480_v25 = vpop.f32.mrb[23].mxu0  ;;  %v2876_v34 = vsel %vm2853_vm6, %v2874_v10, %v2875_v12  ;;  %8827 = vmatpush3.bf16.msra.mxu1 %v10244_v60  ;;  %v2803_v13 = vrot.slane %v2688_v63, 1  ;;  %v2687_v60 = vld [vmem:[#allocation2 + $0x88] sm:$0x3] }
 0x316   : > { %v2583_v52 = vadd.f32 %v8883_v53, %v11264_v23  ;;  %v8885_v54 = vadd.f32 %v2480_v25, %v11069_v3  ;;  %v9060_v49 = vpack.i.bf16 %v2878_v18, %v2876_v34  ;;  %v2790_v59 = vsel %vm2772_vm4, %v2788_v0, %v2789_v1  ;;  %8929 = vmatprep.subr.msk.bf16.mxu1 %vm14270_vm7, %v10245_v26 }
 0x317   : > { %2660 = vst.msk [vmem:[#allocation2 + $0x121] sm:$0xff] %vm2595_vm2, %v2585_v46  ;;  %v2586_v16 = vadd.f32 %v8884_v14, %v11264_v23  ;;  %9021 = vrot.lane.b32.xlu1 %v9030_v32, %s10349_s28  ;;  %v2792_v31 = vsel %vm2772_vm4, %v2789_v1, %v2791_v39  ;;  %v2806_v53 = vrot.slane %v2690_v8, 1  ;;  %v2887_v10 = vrot.slane %v2690_v8, 2 }
 0x318   : > { %2658 = vst.msk [vmem:[#allocation2 + $0x109] sm:$0xff] %vm2595_vm2, %v2583_v52  ;;  %v2584_v3 = vadd.f32 %v8885_v54, %v11264_v23  ;;  %9056 = vrot.lane.b32.xlu0 %v11384_v56, %s10348_s26  ;;  %v9095_v17 = vpack.i.bf16 %v2792_v31, %v2790_v59  ;;  %v2884_v52 = vrot.slane %v2688_v63, 2  ;;  %v2801_v34 = vrot.slane %v2687_v60, 1 }
 0x319   : > { %2661 = vst.msk [vmem:[#allocation2 + $0x129] sm:$0xff] %vm2595_vm2, %v2586_v16  ;;  %v4101_v18 = vsel %vm14270_vm7, %v10245_v26, 0  ;;  %v2882_v59 = vrot.slane %v2687_v60, 2  ;;  %v2701_v26 = vld [vmem:[#allocation2 + $0xf8] sm:$0xff] }
 0x31a   : > { %2659 = vst.msk [vmem:[#allocation2 + $0x111] sm:$0xff] %vm2595_vm2, %v2584_v3  ;;  %v8814_v50 = vpop.f32.mrb[24].mxu0  ;;  %8829 = vmatpush3.bf16.msra.mxu1 %v4101_v18  ;;  %v2798_v3 = vrot.slane %v2685_v11, 1 }
 0x31b   : > { %v8886_v22 = vadd.f32 %v8814_v50, %v11073_v42  ;;  %9036 = vrot.lane.b32.xlu1 %v9035_v27, %s10350_s13  ;;  %v2493_v32 = vpop.f32.mrb[25].mxu0  ;;  %v2869_v42 = vrot.slane %v11357_v44, 2 }
 0x31c   : > { %v8887_v47 = vadd.f32 %v2493_v32, %v11075_v4  ;;  %9061 = vrot.lane.b32.xlu0 %v9060_v49, %s10349_s28  ;;  %v8815_v57 = vpop.f32.mrb[26].mxu0 }
 0x31d   : > { %v2589_v19 = vadd.f32 %v8886_v22, %v11264_v23  ;;  %v8888_v36 = vadd.f32 %v8815_v57, %v11077_v5  ;;  %v2496_v24 = vpop.f32.mrb[27].mxu0  ;;  %v2871_v4 = vsel %vm2853_vm6, %v2869_v42, %v2870_v33  ;;  %v2879_v22 = vrot.slane %v2685_v11, 2  ;;  %v2695_v57 = vld [vmem:[#allocation2 + $0xc8] sm:$0xff]  ;;  %v2694_v42 = vld [vmem:[#allocation2 + $0xc0] sm:$0xff] }
 0x31e   : > { %v2587_v41 = vadd.f32 %v8887_v47, %v11264_v23  ;;  %v8889_v35 = vadd.f32 %v2496_v24, %v11079_v29  ;;  %v9100_v44 = vpack.i.bf16 %v2873_v20, %v2871_v4  ;;  %v2692_v47 = vld [vmem:[#allocation2 + $0xb0] sm:$0xff]  ;;  %v2895_v20 = vrot.slane %v2695_v57, 2 }
 0x31f   : > { %2664 = vst.msk [vmem:[#allocation2 + $0x151] sm:$0xff] %vm2595_vm2, %v2589_v19  ;;  %v2590_v9 = vadd.f32 %v8888_v36, %v11264_v23  ;;  %9041 = vrot.lane.b32.xlu1 %v9035_v27, %s10351_s15  ;;  %v2696_v19 = vld [vmem:[#allocation2 + $0xd0] sm:$0x3]  ;;  %v2691_v36 = vld [vmem:[#allocation2 + $0xa8] sm:$0xff] }
 0x320   : > { %2662 = vst.msk [vmem:[#allocation2 + $0x139] sm:$0xff] %vm2595_vm2, %v2587_v41  ;;  %v2588_v5 = vadd.f32 %v8889_v35, %v11264_v23  ;;  %9096 = vrot.lane.b32.xlu0 %v9095_v17, %s10352_s16  ;;  %v9205_v24 = vpack.i.bf16 %v2692_v47, %v2691_v36  ;;  %v2814_v41 = vrot.slane %v2695_v57, 1  ;;  %v2816_v35 = vrot.slane %v2696_v19, 1 }
 0x321   : > { %2665 = vst.msk [vmem:[#allocation2 + $0x159] sm:$0xff] %vm2595_vm2, %v2590_v9 }
 0x322   : > { %2663 = vst.msk [vmem:[#allocation2 + $0x141] sm:$0xff] %vm2595_vm2, %v2588_v5  ;;  %v8818_v29 = vpop.f32.mrb[28].mxu0  ;;  %v2817_v4 = vsel %vm2772_vm4, %v2814_v41, %v2816_v35  ;;  %v2897_v5 = vrot.slane %v2696_v19, 2 }
 0x323   : > { %v8890_v40 = vadd.f32 %v8818_v29, %v11081_v38  ;;  %9066 = vrot.lane.b32.xlu1 %v11384_v56, %s10352_s16  ;;  %v2509_v21 = vpop.f32.mrb[29].mxu0  ;;  %v2693_v29 = vld [vmem:[#allocation2 + $0xb8] sm:$0x3] }
 0x324   : > { %v8891_v2 = vadd.f32 %v2509_v21, %v11083_v6  ;;  %9101 = vrot.lane.b32.xlu0 %v9100_v44, %s10353_s17  ;;  %v8819_v62 = vpop.f32.mrb[30].mxu0 }
 0x325   : > { %v2593_v61 = vadd.f32 %v8890_v40, %v11264_v23  ;;  %v8892_v48 = vadd.f32 %v8819_v62, %v11085_v43  ;;  %v2512_v37 = vpop.f32.mrb[31].mxu0  ;;  %v2686_v43 = vld [vmem:[#allocation2 + $0x80] sm:$0xff]  ;;  %v2809_v62 = vrot.slane %v2692_v47, 1 }
 0x326   : > { %v2591_v58 = vadd.f32 %v8891_v2, %v11264_v23  ;;  %v8893_v45 = vadd.f32 %v2512_v37, %v11087_v7  ;;  %v2689_v7 = vld [vmem:[#allocation2 + $0x98] sm:$0xff]  ;;  %v9125_v12 = vpack.i.bf16 %v2686_v43, %v2685_v11  ;;  %v2898_v2 = vsel %vm2853_vm6, %v2895_v20, %v2897_v5 }
 0x327   : > { %2668 = vst.msk [vmem:[#allocation2 + $0x181] sm:$0xff] %vm2595_vm2, %v2593_v61  ;;  %v2594_v38 = vadd.f32 %v8892_v48, %v11264_v23  ;;  %9071 = vrot.lane.b32.xlu1 %v9060_v49, %s10353_s17  ;;  %v2885_v25 = vrot.slane %v2689_v7, 2  ;;  %v9115_v39 = vpack.i.bf16 %v2689_v7, %v2688_v63  ;;  %v2811_v61 = vrot.slane %v2693_v29, 1 }
 0x328   : > { %2666 = vst.msk [vmem:[#allocation2 + $0x169] sm:$0xff] %vm2595_vm2, %v2591_v58  ;;  %v2592_v6 = vadd.f32 %v8893_v45, %v11264_v23  ;;  %9106 = vrot.lane.b32.xlu0 %v9095_v17, %s10354_s20  ;;  %v2804_v23 = vrot.slane %v2689_v7, 1  ;;  %v9195_v48 = vpack.i.bf16 %v2695_v57, %v2694_v42  ;;  %v2808_v37 = vrot.slane %v2691_v36, 1 }
 0x329   : > { %2669 = vst.msk [vmem:[#allocation2 + $0x189] sm:$0xff] %vm2595_vm2, %v2594_v38  ;;  %v2886_v1 = vsel %vm2853_vm6, %v2884_v52, %v2885_v25  ;;  %v2888_v16 = vsel %vm2853_vm6, %v2885_v25, %v2887_v10  ;;  %v2812_v38 = vsel %vm2772_vm4, %v2809_v62, %v2811_v61  ;;  %v2889_v7 = vrot.slane %v2691_v36, 2  ;;  %v2697_v25 = vld [vmem:[#allocation2 + $0xd8] sm:$0xff]  ;;  %v2700_v52 = vld [vmem:[#allocation2 + $0xf0] sm:$0xff] }
 0x32a   : > { %2667 = vst.msk [vmem:[#allocation2 + $0x171] sm:$0xff] %vm2595_vm2, %v2592_v6  ;;  %v2805_v46 = vsel %vm2772_vm4, %v2803_v13, %v2804_v23  ;;  %v2807_v14 = vsel %vm2772_vm4, %v2804_v23, %v2806_v53  ;;  %v9140_v0 = vpack.i.bf16 %v2888_v16, %v2886_v1  ;;  %v2810_v45 = vsel %vm2772_vm4, %v2808_v37, %v2809_v62  ;;  %v8962_v23 = vpop.permute.xlu0 %8961  ;;  %v2698_v13 = vld [vmem:[#allocation2 + $0xe0] sm:$0xff] }
 0x32b   : > { %9076 = vrot.lane.b32.xlu1 %v11384_v56, %s10354_s20  ;;  %v9135_v54 = vpack.i.bf16 %v2807_v14, %v2805_v46  ;;  %v2799_v56 = vrot.slane %v2686_v43, 1  ;;  %v2890_v6 = vrot.slane %v2692_v47, 2  ;;  %v9255_v8 = vpack.i.bf16 %v2812_v38, %v2810_v45  ;;  %v2702_v46 = vld [vmem:[#allocation2 + $0x100] sm:$0x3] }
 0x32c   : > { %9111 = vrot.lane.b32.xlu0 %v9100_v44, %s10355_s21  ;;  %v9285_v60 = vpack.i.bf16 %v2698_v13, %v2697_v25  ;;  %v8964_v1 = vunpack.i.h.bf16 %v8962_v23  ;;  %v8963_v16 = vunpack.i.l.bf16 %v8962_v23  ;;  %v2823_v18 = vrot.slane %v2700_v52, 1 }
 0x32d   : > { %v2800_v27 = vsel %vm2772_vm4, %v2798_v3, %v2799_v56  ;;  %v2802_v50 = vsel %vm2772_vm4, %v2799_v56, %v2801_v34  ;;  %v2891_v11 = vsel %vm2853_vm6, %v2889_v7, %v2890_v6  ;;  %v2826_v56 = vrot.slane %v2702_v46, 1 }
 0x32e   : > { %v9175_v32 = vpack.i.bf16 %v2802_v50, %v2800_v27  ;;  %v8967_v53 = vpop.permute.xlu0 %8966  ;;  %v2905_v27 = vrot.slane %v2701_v26, 2  ;;  %v2907_v50 = vrot.slane %v2702_v46, 2  ;;  %v2819_v19 = vrot.slane %v2698_v13, 1 }
 0x32f   : > { %9081 = vrot.lane.b32.xlu1 %v9060_v49, %s10355_s21  ;;  %v2880_v49 = vrot.slane %v2686_v43, 2  ;;  %v2892_v43 = vrot.slane %v2693_v29, 2 }
 0x330   : > { %9126 = vrot.lane.b32.xlu0 %v9125_v12, %s10350_s13 }
 0x331   : > { %v2881_v31 = vsel %vm2853_vm6, %v2879_v22, %v2880_v49  ;;  %v2883_v33 = vsel %vm2853_vm6, %v2880_v49, %v2882_v59  ;;  %v2699_v49 = vld [vmem:[#allocation2 + $0xe8] sm:$0x3]  ;;  %v3729_v59 = vsel %vm2595_vm2, %v11111_v30, %v8964_v1  ;;  %v3728_v22 = vsel %vm2595_vm2, %v11109_v55, %v8963_v16 }
 0x332   : > { %v9180_v28 = vpack.i.bf16 %v2883_v33, %v2881_v31  ;;  %v2904_v33 = vrot.slane %v2700_v52, 2  ;;  %v2821_v36 = vrot.slane %v2699_v49, 1  ;;  %v2818_v55 = vrot.slane %v2697_v25, 1 }
 0x333   : > { %9086 = vrot.lane.b32.xlu1 %v9095_v17, %s10348_s26  ;;  %v2813_v17 = vrot.slane %v2694_v42, 1 }
 0x334   : > { %9131 = vrot.lane.b32.xlu0 %v9125_v12, %s10351_s15  ;;  %v2893_v12 = vsel %vm2853_vm6, %v2890_v6, %v2892_v43  ;;  %v2906_v30 = vsel %vm2853_vm6, %v2904_v33, %v2905_v27  ;;  %v11574_v33 = vld [vmem:[#allocation2 + $0x110] sm:$0xff] }
 0x335   : > { %v2815_v9 = vsel %vm2772_vm4, %v2813_v17, %v2814_v41  ;;  %v9260_v63 = vpack.i.bf16 %v2893_v12, %v2891_v11  ;;  %v2902_v41 = vrot.slane %v2699_v49, 2 }
 0x336   : > { %v9215_v40 = vpack.i.bf16 %v2817_v4, %v2815_v9  ;;  %v9275_v9 = vpack.i.bf16 %v2701_v26, %v2700_v52  ;;  %v2899_v4 = vrot.slane %v2697_v25, 2 }
 0x337   : > { %9091 = vrot.lane.b32.xlu1 %v9100_v44, %s10349_s28  ;;  %v2894_v44 = vrot.slane %v2694_v42, 2  ;;  %v2900_v42 = vrot.slane %v2698_v13, 2 }
 0x338   : > { %9136 = vrot.lane.b32.xlu0 %v9135_v54, %s10348_s26 }
 0x339   : > { %v2896_v21 = vsel %vm2853_vm6, %v2894_v44, %v2895_v20  ;;  %v2820_v44 = vsel %vm2772_vm4, %v2818_v55, %v2819_v19  ;;  %v2901_v62 = vsel %vm2853_vm6, %v2899_v4, %v2900_v42  ;;  %v2903_v61 = vsel %vm2853_vm6, %v2900_v42, %v2902_v41  ;;  %v11580_v41 = vld [vmem:[#allocation2 + $0x118] sm:$0x3] }
 0x33a   : > { %v9220_v58 = vpack.i.bf16 %v2898_v2, %v2896_v21  ;;  %v11540_v6 = vpack.i.bf16 %v2903_v61, %v2901_v62 }
 0x33b   : > { %9116 = vrot.lane.b32.xlu1 %v9115_v39, %s10350_s13 }
 0x33c   : > { %9141 = vrot.lane.b32.xlu0 %v9140_v0, %s10349_s28 }
 0x33f   : > { %9121 = vrot.lane.b32.xlu1 %v9115_v39, %s10351_s15 }
 0x340   : > { %9176 = vrot.lane.b32.xlu0 %v9175_v32, %s10352_s16 }
 0x343   : > { %9146 = vrot.lane.b32.xlu1 %v9135_v54, %s10352_s16 }
 0x344   : > { %9181 = vrot.lane.b32.xlu0 %v9180_v28, %s10353_s17 }
 0x347   : > { %9151 = vrot.lane.b32.xlu1 %v9140_v0, %s10353_s17 }
 0x348   : > { %9186 = vrot.lane.b32.xlu0 %v9175_v32, %s10354_s20 }
 0x34b   : > { %9156 = vrot.lane.b32.xlu1 %v9135_v54, %s10354_s20  ;;  %v2824_v54 = vrot.slane %v2701_v26, 1 }
 0x34c   : > { %9191 = vrot.lane.b32.xlu0 %v9180_v28, %s10355_s21 }
 0x34d   : > { %v2825_v3 = vsel %vm2772_vm4, %v2823_v18, %v2824_v54 }
 0x34f   : > { %9161 = vrot.lane.b32.xlu1 %v9140_v0, %s10355_s21  ;;  %v2827_v0 = vsel %vm2772_vm4, %v2824_v54, %v2826_v56 }
 0x350   : > { %9206 = vrot.lane.b32.xlu0 %v9205_v24, %s10350_s13  ;;  %v11516_v57 = vpack.i.bf16 %v2827_v0, %v2825_v3 }
 0x353   : > { %9166 = vrot.lane.b32.xlu1 %v9175_v32, %s10348_s26  ;;  %v8968_v32 = vunpack.i.l.bf16 %v8967_v53 }
 0x354   : > { %9211 = vrot.lane.b32.xlu0 %v9205_v24, %s10351_s15  ;;  %v2908_v24 = vsel %vm2853_vm6, %v2905_v27, %v2907_v50 }
 0x355   : > { %v3761_v35 = vsel %vm3760_vm8, %v3728_v22, %v8968_v32  ;;  %v11527_v29 = vpack.i.bf16 %v2908_v24, %v2906_v30  ;;  %v2708_v22 = vld [vmem:[#allocation2 + $0x130] sm:$0x3] }
 0x356   : > { %v2836_v24 = vrot.slane %v2708_v22, 1 }
 0x357   : > { %9171 = vrot.lane.b32.xlu1 %v9180_v28, %s10349_s28  ;;  %v8969_v28 = vunpack.i.h.bf16 %v8967_v53 }
 0x358   : > { %9216 = vrot.lane.b32.xlu0 %v9215_v40, %s10348_s26 }
 0x359   : > { %v3762_v20 = vsel %vm3760_vm8, %v3729_v59, %v8969_v28  ;;  %v2707_v59 = vld [vmem:[#allocation2 + $0x128] sm:$0xff]  ;;  %v2706_v28 = vld [vmem:[#allocation2 + $0x120] sm:$0xff] }
 0x35a   : > { %v2834_v30 = vrot.slane %v2707_v59, 1  ;;  %v2915_v42 = vrot.slane %v2707_v59, 2 }
 0x35b   : > { %9196 = vrot.lane.b32.xlu1 %v9195_v48, %s10350_s13 }
 0x35c   : > { %9221 = vrot.lane.b32.xlu0 %v9220_v58, %s10349_s28 }
 0x35f   : > { %9201 = vrot.lane.b32.xlu1 %v9195_v48, %s10351_s15 }
 0x360   : > { %9256 = vrot.lane.b32.xlu0 %v9255_v8, %s10352_s16 }
 0x363   : > { %9226 = vrot.lane.b32.xlu1 %v9215_v40, %s10352_s16 }
 0x364   : > { %9261 = vrot.lane.b32.xlu0 %v9260_v63, %s10353_s17 }
 0x367   : > { %9231 = vrot.lane.b32.xlu1 %v9220_v58, %s10353_s17 }
 0x368   : > { %9266 = vrot.lane.b32.xlu0 %v9255_v8, %s10354_s20 }
 0x36b   : > { %9236 = vrot.lane.b32.xlu1 %v9215_v40, %s10354_s20  ;;  %v2822_v40 = vsel %vm2772_vm4, %v2819_v19, %v2821_v36  ;;  %v2703_v36 = vld [vmem:[#allocation2 + $0x108] sm:$0xff] }
 0x36c   : > { %9271 = vrot.lane.b32.xlu0 %v9260_v63, %s10355_s21  ;;  %v11538_v38 = vpack.i.bf16 %v2822_v40, %v2820_v44  ;;  %v9365_v4 = vpack.i.bf16 %v11574_v33, %v2703_v36  ;;  %v2833_v44 = vrot.slane %v2706_v28, 1  ;;  %v2914_v40 = vrot.slane %v2706_v28, 2 }
 0x36d   : > { %v11494_v14 = vpop.permute.xlu1 %8971 }
 0x36e   : > { %v11496_v10 = vpop.permute.xlu0 %8981  ;;  %v2835_v61 = vsel %vm2772_vm4, %v2833_v44, %v2834_v30 }
 0x36f   : > { %9241 = vrot.lane.b32.xlu1 %v9220_v58, %s10355_s21  ;;  %v8984_v21 = vunpack.i.h.bf16 %v11496_v10  ;;  %v8983_v2 = vunpack.i.l.bf16 %v11496_v10 }
 0x370   : > { %9286 = vrot.lane.b32.xlu0 %v9285_v60, %s10350_s13 }
 0x371   : > { %v11500_v34 = vpop.permute.xlu1 %8976  ;;  %v3795_v43 = vsel %vm3793_vm9, %v3762_v20, %v8984_v21  ;;  %v3794_v7 = vsel %vm3793_vm9, %v3761_v35, %v8983_v2  ;;  %v2917_v20 = vrot.slane %v2708_v22, 2  ;;  %v2829_v21 = vrot.slane %v11574_v33, 1 }
 0x372   : > { %v11502_v39 = vpop.permute.xlu0 %8986  ;;  %v8979_v12 = vunpack.i.h.bf16 %v11500_v34  ;;  %v2831_v2 = vrot.slane %v11580_v41, 1 }
 0x373   : > { %9246 = vrot.lane.b32.xlu1 %v9255_v8, %s10348_s26 }
 0x374   : > { %9291 = vrot.lane.b32.xlu0 %v9285_v60, %s10351_s15 }
 0x375   : > { %v11512_v31 = vpop.permute.xlu1 %8996 }
 0x376   : > { %v11514_v47 = vpop.permute.xlu0 %8991 }
 0x377   : > { %9251 = vrot.lane.b32.xlu1 %v9260_v63, %s10349_s28  ;;  %v8978_v63 = vunpack.i.l.bf16 %v11500_v34 }
 0x378   : > { %9296 = vrot.lane.b32.xlu0 %v11516_v57, %s10348_s26 }
 0x379   : > { %v11524_v17 = vpop.permute.xlu1 %9001 }
 0x37a   : > { %v9027_v5 = vpop.permute.xlu0 %9026 }
 0x37b   : > { %9276 = vrot.lane.b32.xlu1 %v9275_v9, %s10350_s13  ;;  %v9029_v48 = vunpack.i.h.bf16 %v9027_v5  ;;  %v9028_v37 = vunpack.i.l.bf16 %v9027_v5 }
 0x37c   : > { %9301 = vrot.lane.b32.xlu0 %v11527_v29, %s10349_s28 }
 0x37d   : > { %v9007_v58 = vpop.permute.xlu1 %9006  ;;  %v3828_v23 = vsel %vm3826_vm10, %v3795_v43, %v9029_v48  ;;  %v3827_v53 = vsel %vm3826_vm10, %v3794_v7, %v9028_v37  ;;  %v2837_v48 = vsel %vm2772_vm4, %v2834_v30, %v2836_v24  ;;  %v2916_v37 = vsel %vm2853_vm6, %v2914_v40, %v2915_v42 }
 0x37e   : > { %v9032_v45 = vpop.permute.xlu0 %9031  ;;  %v9009_v13 = vunpack.i.h.bf16 %v9007_v58  ;;  %v9008_v26 = vunpack.i.l.bf16 %v9007_v58  ;;  %v2918_v43 = vsel %vm2853_vm6, %v2915_v42, %v2917_v20  ;;  %v2828_v7 = vrot.slane %v2703_v36, 1 }
 0x37f   : > { %v9034_v8 = vunpack.i.h.bf16 %v9032_v45  ;;  %v9033_v11 = vunpack.i.l.bf16 %v9032_v45  ;;  %9281 = vrot.lane.b32.xlu1 %v9275_v9, %s10351_s15 }
 0x380   : > { %9336 = vrot.lane.b32.xlu0 %v11538_v38, %s10352_s16 }
 0x381   : > { %v3860_v46 = vsel %vm14272_vm11, %v3827_v53, %v9033_v11  ;;  %v3861_v25 = vsel %vm14272_vm11, %v3828_v23, %v9034_v8  ;;  %v9012_v10 = vpop.permute.xlu1 %9011  ;;  %v2832_v23 = vsel %vm2772_vm4, %v2829_v21, %v2831_v2  ;;  %v2910_v53 = vrot.slane %v11574_v33, 2 }
 0x382   : > { %v3893_v60 = vsel %vm3892_vm12, %v3860_v46, %v8978_v63  ;;  %v3894_v52 = vsel %vm3892_vm12, %v3861_v25, %v8979_v12  ;;  %v9014_v54 = vunpack.i.h.bf16 %v9012_v10  ;;  %v9013_v56 = vunpack.i.l.bf16 %v9012_v10  ;;  %v11555_v1 = vpop.permute.xlu0 %9046 }
 0x383   : > { %v3926_v16 = vsel %vm3925_vm13, %v3893_v60, %v9008_v26  ;;  %v3927_v34 = vsel %vm3925_vm13, %v3894_v52, %v9009_v13  ;;  %9306 = vrot.lane.b32.xlu1 %v11516_v57, %s10352_s16  ;;  %v11605_v12 = vpack.i.bf16 %v2707_v59, %v2706_v28  ;;  %v8974_v63 = vunpack.i.h.bf16 %v11494_v14 }
 0x384   : > { %v3959_v18 = vsel %vm14273_vm14, %v3926_v16, %v9013_v56  ;;  %v3960_v3 = vsel %vm14273_vm14, %v3927_v34, %v9014_v54  ;;  %9341 = vrot.lane.b32.xlu0 %v11540_v6, %s10353_s17  ;;  %v8989_v13 = vunpack.i.h.bf16 %v11502_v39  ;;  %v11616_v46 = vpack.i.bf16 %v2837_v48, %v2835_v61 }
 0x385   : > { %v9017_v0 = vpop.permute.xlu1 %9016  ;;  %v3991_v27 = vpack.c.bf16 %v3960_v3, %v3959_v18  ;;  %v11618_v25 = vpack.i.bf16 %v2918_v43, %v2916_v37  ;;  %v2909_v52 = vrot.slane %v2703_v36, 2  ;;  %v8999_v54 = vunpack.i.h.bf16 %v11512_v31 }
 0x386   : > { %v11565_v50 = vpop.permute.xlu0 %9051  ;;  %v9018_v19 = vunpack.i.l.bf16 %v9017_v0  ;;  %v9019_v55 = vunpack.i.h.bf16 %v9017_v0  ;;  %v8994_v56 = vunpack.i.h.bf16 %v11514_v47  ;;  %v2912_v18 = vrot.slane %v11580_v41, 2 }
 0x387   : > { %8830 = vmatprep.mubr.msk.bf16.mxu1 %vm4050_vm15, %v3991_v27  ;;  %9311 = vrot.lane.b32.xlu1 %v11527_v29, %s10353_s17  ;;  %v8993_v3 = vunpack.i.l.bf16 %v11514_v47  ;;  %v2911_v27 = vsel %vm2853_vm6, %v2909_v52, %v2910_v53  ;;  %v9003_v59 = vunpack.i.l.bf16 %v11524_v17  ;;  %v9048_v22 = vunpack.i.l.bf16 %v11555_v1  ;;  %v10274_v47 = vld [vmem:[#allocation2 + $0x30] sm:$0xff] }
 0x388   : > { %9346 = vrot.lane.b32.xlu0 %v11538_v38, %s10354_s20  ;;  %v3730_v62 = vsel %vm2595_vm2, %v11292_v51, %v9018_v19  ;;  %v3731_v58 = vsel %vm2595_vm2, %v11294_v15, %v9019_v55  ;;  %v8973_v51 = vunpack.i.l.bf16 %v11494_v14  ;;  %v2830_v15 = vsel %vm2772_vm4, %v2828_v7, %v2829_v21 }
 0x389   : > { %v9022_v49 = vpop.permute.xlu1 %9021  ;;  %v8988_v14 = vunpack.i.l.bf16 %v11502_v39  ;;  %v11627_v34 = vpack.i.bf16 %v2832_v23, %v2830_v15  ;;  %v9049_v39 = vunpack.i.h.bf16 %v11555_v1  ;;  %v9004_v19 = vunpack.i.h.bf16 %v11524_v17 }
 0x38a   : > { %v11572_v32 = vpop.permute.xlu0 %9056  ;;  %v9023_v35 = vunpack.i.l.bf16 %v9022_v49  ;;  %v9024_v5 = vunpack.i.h.bf16 %v9022_v49  ;;  %v10273_v49 = vld [vmem:[#allocation2 + $0x38] sm:$0xff]  ;;  %v9053_v20 = vunpack.i.l.bf16 %v11565_v50  ;;  %v9054_v44 = vunpack.i.h.bf16 %v11565_v50 }
 0x38b   : > { %9316 = vrot.lane.b32.xlu1 %v11516_v57, %s10354_s20  ;;  %v3732_v28 = vsel %vm2595_vm2, %v10274_v47, %v8988_v14  ;;  %v2913_v37 = vsel %vm2853_vm6, %v2910_v53, %v2912_v18  ;;  %v2714_v47 = vld [vmem:[#allocation2 + $0x160] sm:$0x3] }
 0x38c   : > { %9351 = vrot.lane.b32.xlu0 %v11540_v6, %s10355_s21  ;;  %v3764_v8 = vsel %vm3760_vm8, %v3731_v58, %v9024_v5 }
 0x38d   : > { %v11582_v9 = vpop.permute.xlu1 %9036  ;;  %v3797_v10 = vsel %vm3793_vm9, %v3764_v8, %v8974_v63 }
 0x38e   : > { %v11585_v57 = vpop.permute.xlu0 %9061  ;;  %v3830_v33 = vsel %vm3826_vm10, %v3797_v10, %v8999_v54  ;;  %v11676_v10 = vpack.i.bf16 %v2913_v37, %v2911_v27  ;;  %v10276_v37 = vld [vmem:[#allocation2 + $0x50] sm:$0xff] }
 0x38f   : > { %9321 = vrot.lane.b32.xlu1 %v11527_v29, %s10355_s21  ;;  %v3763_v29 = vsel %vm3760_vm8, %v3730_v62, %v9023_v35  ;;  %v3765_v35 = vsel %vm3760_vm8, %v3732_v28, %v8993_v3  ;;  %v3863_v5 = vsel %vm14272_vm11, %v3830_v33, %v9004_v19  ;;  %v2709_v28 = vld [vmem:[#allocation2 + $0x138] sm:$0xff]  ;;  %v2712_v19 = vld [vmem:[#allocation2 + $0x150] sm:$0xff] }
 0x390   : > { %9366 = vrot.lane.b32.xlu0 %v9365_v4, %s10350_s13  ;;  %v3796_v26 = vsel %vm3793_vm9, %v3763_v29, %v8973_v51  ;;  %v3798_v17 = vsel %vm3793_vm9, %v3765_v35, %v9048_v22  ;;  %v3896_v43 = vsel %vm3892_vm12, %v3863_v5, %v9054_v44  ;;  %v2713_v22 = vld [vmem:[#allocation2 + $0x158] sm:$0xff]  ;;  %v2846_v35 = vrot.slane %v2714_v47, 1 }
 0x391   : > { %v11600_v45 = vpop.permute.xlu1 %9041  ;;  %v2925_v5 = vrot.slane %v2713_v22, 2  ;;  %v11714_v44 = vpack.i.bf16 %v2713_v22, %v2712_v19 }
 0x392   : > { %v9097_v11 = vpop.permute.xlu0 %9096  ;;  %v9043_v58 = vunpack.i.l.bf16 %v11600_v45  ;;  %v9044_v15 = vunpack.i.h.bf16 %v11600_v45 }
 0x393   : > { %9326 = vrot.lane.b32.xlu1 %v11538_v38, %s10348_s26  ;;  %v8998_v38 = vunpack.i.l.bf16 %v11512_v31  ;;  %v3733_v31 = vsel %vm2595_vm2, %v10273_v49, %v8989_v13  ;;  %v9098_v36 = vunpack.i.l.bf16 %v9097_v11 }
 0x394   : > { %9371 = vrot.lane.b32.xlu0 %v9365_v4, %s10351_s15  ;;  %v3766_v24 = vsel %vm3760_vm8, %v3733_v31, %v8994_v56 }
 0x395   : > { %v11623_v60 = vpop.permute.xlu1 %9066  ;;  %v3829_v0 = vsel %vm3826_vm10, %v3796_v26, %v8998_v38  ;;  %v3799_v4 = vsel %vm3793_vm9, %v3766_v24, %v9049_v39  ;;  %v3831_v62 = vsel %vm3826_vm10, %v3798_v17, %v9098_v36  ;;  %v2844_v24 = vrot.slane %v2713_v22, 1  ;;  %v10277_v22 = vld [vmem:[#allocation2 + $0x68] sm:$0xff] }
 0x396   : > { %v9102_v16 = vpop.permute.xlu0 %9101  ;;  %v3862_v1 = vsel %vm14272_vm11, %v3829_v0, %v9003_v59  ;;  %v11697_v59 = vld [vmem:[#allocation2 + $0x140] sm:$0xff]  ;;  %v2927_v17 = vrot.slane %v2714_v47, 2 }
 0x397   : > { %9331 = vrot.lane.b32.xlu1 %v11540_v6, %s10349_s28  ;;  %v9099_v6 = vunpack.i.h.bf16 %v9097_v11  ;;  %v9104_v42 = vunpack.i.h.bf16 %v9102_v16  ;;  %v9103_v41 = vunpack.i.l.bf16 %v9102_v16  ;;  %v3895_v61 = vsel %vm3892_vm12, %v3862_v1, %v9053_v20 }
 0x398   : > { %9376 = vrot.lane.b32.xlu0 %v11616_v46, %s10348_s26  ;;  %v9445_v36 = vpack.i.bf16 %v11697_v59, %v2709_v28 }
 0x399   : > { %v11644_v30 = vpop.permute.xlu1 %9071  ;;  %v3832_v2 = vsel %vm3826_vm10, %v3799_v4, %v9099_v6  ;;  %v3864_v29 = vsel %vm14272_vm11, %v3831_v62, %v9103_v41 }
 0x39a   : > { %v9107_v55 = vpop.permute.xlu0 %9106  ;;  %v3865_v50 = vsel %vm14272_vm11, %v3832_v2, %v9104_v42  ;;  %v3897_v13 = vsel %vm3892_vm12, %v3864_v29, %v9043_v58  ;;  %v11706_v42 = vld [vmem:[#allocation2 + $0x148] sm:$0x3] }
 0x39b   : > { %9356 = vrot.lane.b32.xlu1 %v11605_v12, %s10350_s13  ;;  %v9109_v40 = vunpack.i.h.bf16 %v9107_v55  ;;  %v9108_v21 = vunpack.i.l.bf16 %v9107_v55  ;;  %v10275_v2 = vld [vmem:[#allocation2 + $0x48] sm:$0xff] }
 0x39c   : > { %9381 = vrot.lane.b32.xlu0 %v11618_v25, %s10349_s28 }
 0x39d   : > { %v9077_v48 = vpop.permute.xlu1 %9076  ;;  %v3929_v23 = vsel %vm3925_vm13, %v3896_v43, %v9109_v40  ;;  %v3928_v53 = vsel %vm3925_vm13, %v3895_v61, %v9108_v21  ;;  %v2839_v40 = vrot.slane %v11697_v59, 1  ;;  %v2841_v21 = vrot.slane %v11706_v42, 1 }
 0x39e   : > { %v9112_v7 = vpop.permute.xlu0 %9111  ;;  %v9079_v51 = vunpack.i.h.bf16 %v9077_v48  ;;  %v9078_v8 = vunpack.i.l.bf16 %v9077_v48  ;;  %v2924_v48 = vrot.slane %v2712_v19, 2  ;;  %v2838_v43 = vrot.slane %v2709_v28, 1 }
 0x39f   : > { %v9114_v11 = vunpack.i.h.bf16 %v9112_v7  ;;  %v9113_v63 = vunpack.i.l.bf16 %v9112_v7  ;;  %9361 = vrot.lane.b32.xlu1 %v11605_v12, %s10351_s15  ;;  %v3898_v12 = vsel %vm3892_vm12, %v3865_v50, %v9044_v15  ;;  %v2847_v50 = vsel %vm2772_vm4, %v2844_v24, %v2846_v35 }
 0x3a0   : > { %9416 = vrot.lane.b32.xlu0 %v11627_v34, %s10352_s16  ;;  %v3930_v16 = vsel %vm3925_vm13, %v3897_v13, %v9078_v8  ;;  %v3931_v18 = vsel %vm3925_vm13, %v3898_v12, %v9079_v51  ;;  %v9038_v7 = vunpack.i.l.bf16 %v11582_v9  ;;  %v9039_v15 = vunpack.i.h.bf16 %v11582_v9 }
 0x3a1   : > { %v3961_v26 = vsel %vm14273_vm14, %v3928_v53, %v9113_v63  ;;  %v3962_v14 = vsel %vm14273_vm14, %v3929_v23, %v9114_v11  ;;  %v9082_v38 = vpop.permute.xlu1 %9081  ;;  %v2926_v11 = vsel %vm2853_vm6, %v2924_v48, %v2925_v5  ;;  %v2928_v63 = vsel %vm2853_vm6, %v2925_v5, %v2927_v17 }
 0x3a2   : > { %v3992_v52 = vpack.c.bf16 %v3962_v14, %v3961_v26  ;;  %v9084_v45 = vunpack.i.h.bf16 %v9082_v38  ;;  %v9083_v54 = vunpack.i.l.bf16 %v9082_v38  ;;  %v11679_v56 = vpop.permute.xlu0 %9126  ;;  %v2840_v23 = vsel %vm2772_vm4, %v2838_v43, %v2839_v40 }
 0x3a3   : > { %9386 = vrot.lane.b32.xlu1 %v11616_v46, %s10352_s16  ;;  %v2842_v53 = vsel %vm2772_vm4, %v2839_v40, %v2841_v21  ;;  %v2920_v13 = vrot.slane %v11697_v59, 2  ;;  %v9059_v26 = vunpack.i.h.bf16 %v11572_v32  ;;  %v2919_v12 = vrot.slane %v2709_v28, 2 }
 0x3a4   : > { %v3963_v3 = vsel %vm14273_vm14, %v3930_v16, %v9083_v54  ;;  %v3964_v39 = vsel %vm14273_vm14, %v3931_v18, %v9084_v45  ;;  %8831 = vmatmul.mubr.msk.bf16.vlgmr.msra.gmra.mrb[32].mxu1 %vm4050_vm15, %v3992_v52  ;;  %9421 = vrot.lane.b32.xlu0 %v11676_v10, %s10353_s17  ;;  %v9058_v9 = vunpack.i.l.bf16 %v11572_v32  ;;  %v9068_v52 = vunpack.i.l.bf16 %v11623_v60 }
 0x3a5   : > { %v9087_v0 = vpop.permute.xlu1 %9086  ;;  %v3993_v27 = vpack.c.bf16 %v3964_v39, %v3963_v3  ;;  %v11746_v54 = vpack.i.bf16 %v2928_v63, %v2926_v11  ;;  %v9064_v16 = vunpack.i.h.bf16 %v11585_v57  ;;  %v9069_v18 = vunpack.i.h.bf16 %v11623_v60 }
 0x3a6   : > { %v11690_v49 = vpop.permute.xlu0 %9131  ;;  %v9088_v6 = vunpack.i.l.bf16 %v9087_v0  ;;  %v9089_v41 = vunpack.i.h.bf16 %v9087_v0  ;;  %v11750_v39 = vpack.i.bf16 %v2842_v53, %v2840_v23  ;;  %v2922_v0 = vrot.slane %v11706_v42, 2 }
 0x3a7   : > { %8834 = vmatprep.mubr.msk.bf16.mxu1 %vm4050_vm15, %v3993_v27  ;;  %9391 = vrot.lane.b32.xlu1 %v11618_v25, %s10353_s17  ;;  %v9063_v27 = vunpack.i.l.bf16 %v11585_v57  ;;  %v9129_v32 = vunpack.i.h.bf16 %v11679_v56  ;;  %v2921_v59 = vsel %vm2853_vm6, %v2919_v12, %v2920_v13  ;;  %v3737_v47 = vsel %vm2595_vm2, %v10277_v22, %v9059_v26  ;;  %v10278_v57 = vld [vmem:[#allocation2 + $0x60] sm:$0xff] }
 0x3a8   : > { %9426 = vrot.lane.b32.xlu0 %v11627_v34, %s10354_s20  ;;  %v3734_v62 = vsel %vm2595_vm2, %v10275_v2, %v9088_v6  ;;  %v3735_v58 = vsel %vm2595_vm2, %v10276_v37, %v9089_v41  ;;  %v9073_v60 = vunpack.i.l.bf16 %v11644_v30  ;;  %v9128_v28 = vunpack.i.l.bf16 %v11679_v56 }
 0x3a9   : > { %v9092_v31 = vpop.permute.xlu1 %9091  ;;  %v3736_v6 = vsel %vm2595_vm2, %v10278_v57, %v9058_v9  ;;  %v3770_v41 = vsel %vm3760_vm8, %v3737_v47, %v9064_v16  ;;  %v9133_v17 = vunpack.i.l.bf16 %v11690_v49  ;;  %v9134_v21 = vunpack.i.h.bf16 %v11690_v49  ;;  %v11826_v57 = vld [vmem:[#allocation2 + $0x168] sm:$0xff] }
 0x3aa   : > { %v11699_v33 = vpop.permute.xlu0 %9136  ;;  %v9093_v1 = vunpack.i.l.bf16 %v9092_v31  ;;  %v9094_v4 = vunpack.i.h.bf16 %v9092_v31  ;;  %v3803_v5 = vsel %vm3793_vm9, %v3770_v41, %v9129_v32 }
 0x3ab   : > { %9396 = vrot.lane.b32.xlu1 %v11616_v46, %s10354_s20  ;;  %v2843_v46 = vrot.slane %v2712_v19, 1 }
 0x3ac   : > { %9431 = vrot.lane.b32.xlu0 %v11676_v10, %s10355_s21  ;;  %v3767_v29 = vsel %vm3760_vm8, %v3734_v62, %v9093_v1  ;;  %v3768_v51 = vsel %vm3760_vm8, %v3735_v58, %v9094_v4 }
 0x3ad   : > { %v11708_v55 = vpop.permute.xlu1 %9116  ;;  %v2845_v61 = vsel %vm2772_vm4, %v2843_v46, %v2844_v24  ;;  %v3800_v14 = vsel %vm3793_vm9, %v3767_v29, %v9038_v7  ;;  %v3769_v46 = vsel %vm3760_vm8, %v3736_v6, %v9063_v27  ;;  %v2923_v29 = vsel %vm2853_vm6, %v2920_v13, %v2922_v0 }
 0x3ae   : > { %v11710_v20 = vpop.permute.xlu0 %9141  ;;  %v11739_v38 = vpack.i.bf16 %v2847_v50, %v2845_v61  ;;  %v3833_v31 = vsel %vm3826_vm10, %v3800_v14, %v9068_v52  ;;  %v11799_v52 = vpack.i.bf16 %v2923_v29, %v2921_v59 }
 0x3af   : > { %9401 = vrot.lane.b32.xlu1 %v11618_v25, %s10355_s21  ;;  %v3866_v56 = vsel %vm14272_vm11, %v3833_v31, %v9073_v60  ;;  %v11820_v60 = vld [vmem:[#allocation2 + $0x170] sm:$0xff] }
 0x3b0   : > { %9446 = vrot.lane.b32.xlu0 %v9445_v36, %s10350_s13  ;;  %v3899_v37 = vsel %vm3892_vm12, %v3866_v56, %v9133_v17  ;;  %v2930_v56 = vrot.slane %v11820_v60, 2  ;;  %v11841_v17 = vld [vmem:[#allocation2 + $0x180] sm:$0xff] }
 0x3b1   : > { %v11723_v25 = vpop.permute.xlu1 %9121 }
 0x3b2   : > { %v9177_v8 = vpop.permute.xlu0 %9176  ;;  %v9123_v50 = vunpack.i.l.bf16 %v11723_v25  ;;  %v9124_v23 = vunpack.i.h.bf16 %v11723_v25 }
 0x3b3   : > { %9406 = vrot.lane.b32.xlu1 %v11627_v34, %s10348_s26  ;;  %v3801_v34 = vsel %vm3793_vm9, %v3768_v51, %v9039_v15  ;;  %v9178_v24 = vunpack.i.l.bf16 %v9177_v8 }
 0x3b4   : > { %9451 = vrot.lane.b32.xlu0 %v9445_v36, %s10351_s15  ;;  %v3834_v19 = vsel %vm3826_vm10, %v3801_v34, %v9069_v18  ;;  %v9074_v36 = vunpack.i.h.bf16 %v11644_v30  ;;  %v3802_v30 = vsel %vm3793_vm9, %v3769_v46, %v9128_v28  ;;  %v2717_v28 = vld [vmem:[#allocation2 + $0x178] sm:$0x3] }
 0x3b5   : > { %v11744_v45 = vpop.permute.xlu1 %9146  ;;  %v3835_v48 = vsel %vm3826_vm10, %v3802_v30, %v9178_v24  ;;  %v2929_v30 = vrot.slane %v11826_v57, 2 }
 0x3b6   : > { %v9182_v3 = vpop.permute.xlu0 %9181  ;;  %v3867_v40 = vsel %vm14272_vm11, %v3834_v19, %v9074_v36  ;;  %v2849_v36 = vrot.slane %v11820_v60, 1 }
 0x3b7   : > { %9411 = vrot.lane.b32.xlu1 %v11676_v10, %s10349_s28  ;;  %v9179_v10 = vunpack.i.h.bf16 %v9177_v8  ;;  %v9184_v1 = vunpack.i.h.bf16 %v9182_v3  ;;  %v9183_v35 = vunpack.i.l.bf16 %v9182_v3  ;;  %v3900_v7 = vsel %vm3892_vm12, %v3867_v40, %v9134_v21  ;;  %v11846_v21 = vld [vmem:[#allocation2 + $0x190] sm:$0x3] }
 0x3b8   : > { %9456 = vrot.lane.b32.xlu0 %v11739_v38, %s10348_s26  ;;  %v2932_v40 = vrot.slane %v2717_v28, 2 }
 0x3b9   : > { %v11767_v42 = vpop.permute.xlu1 %9151  ;;  %v3836_v61 = vsel %vm3826_vm10, %v3803_v5, %v9179_v10  ;;  %v3868_v43 = vsel %vm14272_vm11, %v3835_v48, %v9183_v35  ;;  %v2851_v10 = vrot.slane %v2717_v28, 1  ;;  %v11833_v35 = vld [vmem:[#allocation2 + $0x188] sm:$0xff]  ;;  %v2848_v5 = vrot.slane %v11826_v57, 1 }
 0x3ba   : > { %v9187_v4 = vpop.permute.xlu0 %9186  ;;  %v3869_v49 = vsel %vm14272_vm11, %v3836_v61, %v9184_v1  ;;  %v3901_v26 = vsel %vm3892_vm12, %v3868_v43, %v9123_v50  ;;  %v2931_v43 = vsel %vm2853_vm6, %v2929_v30, %v2930_v56 }
 0x3bb   : > { %9436 = vrot.lane.b32.xlu1 %v11714_v44, %s10350_s13  ;;  %v9189_v2 = vunpack.i.h.bf16 %v9187_v4  ;;  %v9188_v62 = vunpack.i.l.bf16 %v9187_v4  ;;  %v2850_v61 = vsel %vm2772_vm4, %v2848_v5, %v2849_v36  ;;  %v2852_v48 = vsel %vm2772_vm4, %v2849_v36, %v2851_v10 }
 0x3bc   : > { %9461 = vrot.lane.b32.xlu0 %v11746_v54, %s10349_s28 }
 0x3bd   : > { %v9157_v58 = vpop.permute.xlu1 %9156  ;;  %v3933_v53 = vsel %vm3925_vm13, %v3900_v7, %v9189_v2  ;;  %v3932_v13 = vsel %vm3925_vm13, %v3899_v37, %v9188_v62  ;;  %v10279_v2 = vld [vmem:[#allocation2 + $0x78] sm:$0xff]  ;;  %v2938_v37 = vrot.slane %v11833_v35, 1  ;;  %v9118_v7 = vunpack.i.l.bf16 %v11708_v55 }
 0x3be   : > { %v9192_v51 = vpop.permute.xlu0 %9191  ;;  %v9159_v8 = vunpack.i.h.bf16 %v9157_v58  ;;  %v9158_v11 = vunpack.i.l.bf16 %v9157_v58  ;;  %v10280_v58 = vld [vmem:[#allocation2 + $0x80] sm:$0xff] }
 0x3bf   : > { %v9194_v63 = vunpack.i.h.bf16 %v9192_v51  ;;  %v9193_v15 = vunpack.i.l.bf16 %v9192_v51  ;;  %9441 = vrot.lane.b32.xlu1 %v11714_v44, %s10351_s15  ;;  %v3902_v44 = vsel %vm3892_vm12, %v3869_v49, %v9124_v23  ;;  %v2937_v49 = vrot.slane %v11841_v17, 1 }
 0x3c0   : > { %9496 = vrot.lane.b32.xlu0 %v11750_v39, %s10352_s16  ;;  %v3934_v3 = vsel %vm3925_vm13, %v3901_v26, %v9158_v11  ;;  %v3935_v0 = vsel %vm3925_vm13, %v3902_v44, %v9159_v8  ;;  %v2933_v11 = vsel %vm2853_vm6, %v2930_v56, %v2932_v40  ;;  %v11866_v23 = vpack.i.bf16 %v2852_v48, %v2850_v61 }
 0x3c1   : > { %v3965_v14 = vsel %vm14273_vm14, %v3932_v13, %v9193_v15  ;;  %v3966_v12 = vsel %vm14273_vm14, %v3933_v53, %v9194_v63  ;;  %v9162_v9 = vpop.permute.xlu1 %9161  ;;  %v2940_v63 = vrot.slane %v11846_v21, 1  ;;  %v9119_v15 = vunpack.i.h.bf16 %v11708_v55 }
 0x3c2   : > { %v9164_v34 = vunpack.i.h.bf16 %v9162_v9  ;;  %v9163_v25 = vunpack.i.l.bf16 %v9162_v9  ;;  %v11802_v16 = vpop.permute.xlu0 %9206  ;;  %v3994_v18 = vpack.c.bf16 %v3966_v12, %v3965_v14  ;;  %v11870_v53 = vpack.i.bf16 %v11833_v35, %v11841_v17 }
 0x3c3   : > { %9466 = vrot.lane.b32.xlu1 %v11739_v38, %s10352_s16  ;;  %v9139_v13 = vunpack.i.h.bf16 %v11699_v33  ;;  %v2939_v14 = vsel %vm2772_vm4, %v2937_v49, %v2938_v37  ;;  %v9138_v12 = vunpack.i.l.bf16 %v11699_v33  ;;  %v9148_v55 = vunpack.i.l.bf16 %v11744_v45 }
 0x3c4   : > { %v3967_v27 = vsel %vm14273_vm14, %v3934_v3, %v9163_v25  ;;  %v3968_v32 = vsel %vm14273_vm14, %v3935_v0, %v9164_v34  ;;  %8835 = vmatmul.mubr.msk.bf16.gmra.mrb[36].mxu1 %vm4050_vm15, %v3994_v18  ;;  %9501 = vrot.lane.b32.xlu0 %v11799_v52, %s10353_s17  ;;  %v11881_v44 = vpack.i.bf16 %v2933_v11, %v2931_v43  ;;  %v9144_v34 = vunpack.i.h.bf16 %v11710_v20 }
 0x3c5   : > { %v9167_v31 = vpop.permute.xlu1 %9166  ;;  %v3995_v59 = vpack.c.bf16 %v3968_v32, %v3967_v27  ;;  %v9149_v25 = vunpack.i.h.bf16 %v11744_v45  ;;  %v2941_v3 = vsel %vm2772_vm4, %v2938_v37, %v2940_v63  ;;  %v9143_v0 = vunpack.i.l.bf16 %v11710_v20  ;;  %v10281_v32 = vld [vmem:[#allocation2 + $0x98] sm:$0xff]  ;;  %v10282_v20 = vld [vmem:[#allocation2 + $0x90] sm:$0xff] }
 0x3c6   : > { %v11813_v22 = vpop.permute.xlu0 %9211  ;;  %v9168_v6 = vunpack.i.l.bf16 %v9167_v31  ;;  %v9169_v24 = vunpack.i.h.bf16 %v9167_v31  ;;  %v9209_v27 = vunpack.i.h.bf16 %v11802_v16  ;;  %v3741_v31 = vsel %vm2595_vm2, %v10281_v32, %v9139_v13 }
 0x3c7   : > { %8838 = vmatprep.mubr.msk.bf16.mxu1 %vm4050_vm15, %v3995_v59  ;;  %9471 = vrot.lane.b32.xlu1 %v11746_v54, %s10353_s17  ;;  %v9153_v59 = vunpack.i.l.bf16 %v11767_v42  ;;  %v3740_v28 = vsel %vm2595_vm2, %v10282_v20, %v9138_v12  ;;  %v9213_v40 = vunpack.i.l.bf16 %v11813_v22  ;;  %v2943_v12 = vrot.slane %v11833_v35, 2 }
 0x3c8   : > { %9506 = vrot.lane.b32.xlu0 %v11750_v39, %s10354_s20  ;;  %v3738_v62 = vsel %vm2595_vm2, %v10279_v2, %v9168_v6  ;;  %v3739_v29 = vsel %vm2595_vm2, %v10280_v58, %v9169_v24  ;;  %v9154_v6 = vunpack.i.h.bf16 %v11767_v42  ;;  %v3774_v24 = vsel %vm3760_vm8, %v3741_v31, %v9144_v34 }
 0x3c9   : > { %v9172_v47 = vpop.permute.xlu1 %9171  ;;  %v3807_v5 = vsel %vm3793_vm9, %v3774_v24, %v9209_v27  ;;  %v9214_v2 = vunpack.i.h.bf16 %v11813_v22 }
 0x3ca   : > { %v11822_v19 = vpop.permute.xlu0 %9216  ;;  %v9173_v41 = vunpack.i.l.bf16 %v9172_v47  ;;  %v9174_v4 = vunpack.i.h.bf16 %v9172_v47  ;;  %v9208_v47 = vunpack.i.l.bf16 %v11802_v16 }
 0x3cb   : > { %9476 = vrot.lane.b32.xlu1 %v11739_v38, %s10354_s20  ;;  %v9520_v38 = vpack.i.bf16 %v11820_v60, %v11826_v57 }
 0x3cc   : > { %9511 = vrot.lane.b32.xlu0 %v11799_v52, %s10355_s21  ;;  %v3772_v51 = vsel %vm3760_vm8, %v3739_v29, %v9174_v4 }
 0x3cd   : > { %v11831_v1 = vpop.permute.xlu1 %9196 }
 0x3ce   : > { %v11836_v46 = vpop.permute.xlu0 %9221 }
 0x3cf   : > { %9481 = vrot.lane.b32.xlu1 %v11746_v54, %s10355_s21  ;;  %v3771_v54 = vsel %vm3760_vm8, %v3738_v62, %v9173_v41 }
 0x3d0   : > { %9521 = vrot.lane.b32.xlu0 %v9520_v38, %s10350_s13  ;;  %v3804_v26 = vsel %vm3793_vm9, %v3771_v54, %v9118_v7  ;;  %v9530_v54 = vpack.i.bf16 %v2941_v3, %v2939_v14 }
 0x3d1   : > { %v11855_v50 = vpop.permute.xlu1 %9201  ;;  %v3837_v33 = vsel %vm3826_vm10, %v3804_v26, %v9148_v55 }
 0x3d2   : > { %v9257_v8 = vpop.permute.xlu0 %9256  ;;  %v3870_v16 = vsel %vm14272_vm11, %v3837_v33, %v9153_v59  ;;  %v9203_v43 = vunpack.i.l.bf16 %v11855_v50  ;;  %v9204_v13 = vunpack.i.h.bf16 %v11855_v50 }
 0x3d3   : > { %9486 = vrot.lane.b32.xlu1 %v11750_v39, %s10348_s26  ;;  %v3805_v39 = vsel %vm3793_vm9, %v3772_v51, %v9119_v15  ;;  %v9259_v36 = vunpack.i.h.bf16 %v9257_v8  ;;  %v9258_v10 = vunpack.i.l.bf16 %v9257_v8  ;;  %v3903_v58 = vsel %vm3892_vm12, %v3870_v16, %v9213_v40 }
 0x3d4   : > { %9526 = vrot.lane.b32.xlu0 %v9520_v38, %s10351_s15  ;;  %v3838_v45 = vsel %vm3826_vm10, %v3805_v39, %v9149_v25  ;;  %v3773_v38 = vsel %vm3760_vm8, %v3740_v28, %v9143_v0 }
 0x3d5   : > { %v11879_v9 = vpop.permute.xlu1 %9226  ;;  %v3871_v30 = vsel %vm14272_vm11, %v3838_v45, %v9154_v6  ;;  %v3806_v42 = vsel %vm3793_vm9, %v3773_v38, %v9208_v47  ;;  %v3840_v48 = vsel %vm3826_vm10, %v3807_v5, %v9259_v36  ;;  %v2721_v47 = vld [vmem:[#allocation2 + $0x198] sm:$0xff]  ;;  %v2722_v45 = vld [vmem:[#allocation2 + $0x1a0] sm:$0xff]  ;;  %v2723_v6 = vld [vmem:[#allocation2 + $0x1a8] sm:$0x3] }
 0x3d6   : > { %v9262_v18 = vpop.permute.xlu0 %9261  ;;  %v3839_v37 = vsel %vm3826_vm10, %v3806_v42, %v9258_v10  ;;  %v3904_v22 = vsel %vm3892_vm12, %v3871_v30, %v9214_v2  ;;  %v2951_v24 = vrot.slane %v2722_v45, 1  ;;  %v2956_v38 = vrot.slane %v2722_v45, 2 }
 0x3d7   : > { %9491 = vrot.lane.b32.xlu1 %v11799_v52, %s10349_s28  ;;  %v9264_v41 = vunpack.i.h.bf16 %v9262_v18  ;;  %v9263_v56 = vunpack.i.l.bf16 %v9262_v18  ;;  %v2945_v18 = vrot.slane %v11846_v21, 2  ;;  %v2942_v21 = vrot.slane %v11841_v17, 2 }
 0x3d8   : > { %9546 = vrot.lane.b32.xlu0 %v11866_v23, %s10352_s16  ;;  %v2953_v17 = vrot.slane %v2723_v6, 1  ;;  %v9575_v5 = vpack.i.bf16 %v2722_v45, %v2721_v47  ;;  %v2955_v40 = vrot.slane %v2721_v47, 2 }
 0x3d9   : > { %v11899_v52 = vpop.permute.xlu1 %9231  ;;  %v3872_v49 = vsel %vm14272_vm11, %v3839_v37, %v9263_v56  ;;  %v3873_v7 = vsel %vm14272_vm11, %v3840_v48, %v9264_v41  ;;  %v2946_v10 = vsel %vm2853_vm6, %v2943_v12, %v2945_v18  ;;  %v2950_v41 = vrot.slane %v2721_v47, 1 }
 0x3da   : > { %v9267_v4 = vpop.permute.xlu0 %9266  ;;  %v3905_v55 = vsel %vm3892_vm12, %v3872_v49, %v9203_v43  ;;  %v3906_v50 = vsel %vm3892_vm12, %v3873_v7, %v9204_v13  ;;  %v10284_v49 = vld [vmem:[#allocation2 + $0xa8] sm:$0xff] }
 0x3db   : > { %9516 = vrot.lane.b32.xlu1 %v11870_v53, %s10350_s13  ;;  %v9269_v62 = vunpack.i.h.bf16 %v9267_v4  ;;  %v9268_v61 = vunpack.i.l.bf16 %v9267_v4  ;;  %v2952_v30 = vsel %vm2772_vm4, %v2950_v41, %v2951_v24 }
 0x3dc   : > { %9551 = vrot.lane.b32.xlu0 %v11881_v44, %s10353_s17 }
 0x3dd   : > { %v9237_v29 = vpop.permute.xlu1 %9236  ;;  %v3937_v26 = vsel %vm3925_vm13, %v3904_v22, %v9269_v62  ;;  %v3936_v14 = vsel %vm3925_vm13, %v3903_v58, %v9268_v61  ;;  %v2958_v62 = vrot.slane %v2723_v6, 2 }
 0x3de   : > { %v9272_v51 = vpop.permute.xlu0 %9271  ;;  %v9239_v8 = vunpack.i.h.bf16 %v9237_v29  ;;  %v9238_v11 = vunpack.i.l.bf16 %v9237_v29  ;;  %v10283_v29 = vld [vmem:[#allocation2 + $0xb0] sm:$0xff] }
 0x3df   : > { %v9274_v63 = vunpack.i.h.bf16 %v9272_v51  ;;  %v9273_v15 = vunpack.i.l.bf16 %v9272_v51  ;;  %9531 = vrot.lane.b32.xlu1 %v9530_v54, %s10352_s16  ;;  %v2959_v22 = vsel %vm2853_vm6, %v2956_v38, %v2958_v62 }
 0x3e0   : > { %9556 = vrot.lane.b32.xlu0 %v11866_v23, %s10354_s20  ;;  %v3938_v32 = vsel %vm3925_vm13, %v3905_v55, %v9238_v11  ;;  %v3939_v35 = vsel %vm3925_vm13, %v3906_v50, %v9239_v8  ;;  %v9219_v55 = vunpack.i.h.bf16 %v11822_v19 }
 0x3e1   : > { %v3969_v39 = vsel %vm14273_vm14, %v3936_v14, %v9273_v15  ;;  %v3970_v34 = vsel %vm14273_vm14, %v3937_v26, %v9274_v63  ;;  %v9242_v25 = vpop.permute.xlu1 %9241  ;;  %v9199_v63 = vunpack.i.h.bf16 %v11831_v1  ;;  %v9198_v15 = vunpack.i.l.bf16 %v11831_v1 }
 0x3e2   : > { %v9244_v3 = vunpack.i.h.bf16 %v9242_v25  ;;  %v9243_v0 = vunpack.i.l.bf16 %v9242_v25  ;;  %v11932_v27 = vpop.permute.xlu0 %9286  ;;  %v3996_v33 = vpack.c.bf16 %v3970_v34, %v3969_v39  ;;  %v9218_v39 = vunpack.i.l.bf16 %v11822_v19 }
 0x3e3   : > { %9536 = vrot.lane.b32.xlu1 %v11866_v23, %s10348_s26  ;;  %v2944_v23 = vsel %vm2853_vm6, %v2942_v21, %v2943_v12  ;;  %v9229_v34 = vunpack.i.h.bf16 %v11879_v9  ;;  %v9228_v25 = vunpack.i.l.bf16 %v11879_v9  ;;  %v9224_v1 = vunpack.i.h.bf16 %v11836_v46  ;;  %v10286_v21 = vld [vmem:[#allocation2 + $0xc0] sm:$0xff] }
 0x3e4   : > { %v3971_v31 = vsel %vm14273_vm14, %v3938_v32, %v9243_v0  ;;  %v3972_v59 = vsel %vm14273_vm14, %v3939_v35, %v9244_v3  ;;  %8839 = vmatmul.mubr.msk.bf16.gmra.mrb[40].mxu1 %vm4050_vm15, %v3996_v33  ;;  %9561 = vrot.lane.b32.xlu0 %v11881_v44, %s10355_s21  ;;  %v9565_v16 = vpack.i.bf16 %v2946_v10, %v2944_v23  ;;  %v9223_v3 = vunpack.i.l.bf16 %v11836_v46 }
 0x3e5   : > { %v9247_v20 = vpop.permute.xlu1 %9246  ;;  %v3997_v28 = vpack.c.bf16 %v3972_v59, %v3971_v31  ;;  %v9234_v32 = vunpack.i.h.bf16 %v11899_v52  ;;  %v9233_v19 = vunpack.i.l.bf16 %v11899_v52  ;;  %v9289_v35 = vunpack.i.h.bf16 %v11932_v27  ;;  %v10285_v31 = vld [vmem:[#allocation2 + $0xc8] sm:$0xff] }
 0x3e6   : > { %v11944_v36 = vpop.permute.xlu0 %9291  ;;  %v9249_v42 = vunpack.i.h.bf16 %v9247_v20  ;;  %v9248_v2 = vunpack.i.l.bf16 %v9247_v20  ;;  %v9288_v9 = vunpack.i.l.bf16 %v11932_v27  ;;  %v3745_v59 = vsel %vm2595_vm2, %v10285_v31, %v9219_v55 }
 0x3e7   : > { %8842 = vmatprep.mubr.msk.bf16.mxu1 %vm4050_vm15, %v3997_v28  ;;  %9541 = vrot.lane.b32.xlu1 %v11881_v44, %s10349_s28  ;;  %v2954_v44 = vsel %vm2772_vm4, %v2951_v24, %v2953_v17  ;;  %v3744_v46 = vsel %vm2595_vm2, %v10286_v21, %v9218_v39  ;;  %v3778_v27 = vsel %vm3760_vm8, %v3745_v59, %v9224_v1  ;;  %v9294_v41 = vunpack.i.h.bf16 %v11944_v36 }
 0x3e8   : > { %9571 = vrot.lane.b32.xlu0 %v11870_v53, %s10351_s15  ;;  %v9585_v58 = vpack.i.bf16 %v2954_v44, %v2952_v30  ;;  %v3743_v43 = vsel %vm2595_vm2, %v10283_v29, %v9249_v42  ;;  %v3742_v7 = vsel %vm2595_vm2, %v10284_v49, %v9248_v2  ;;  %v3777_v24 = vsel %vm3760_vm8, %v3744_v46, %v9223_v3 }
 0x3e9   : > { %v9252_v56 = vpop.permute.xlu1 %9251  ;;  %v9293_v17 = vunpack.i.l.bf16 %v11944_v36 }
 0x3ea   : > { %v11953_v4 = vpop.permute.xlu0 %9296  ;;  %v9254_v53 = vunpack.i.h.bf16 %v9252_v56  ;;  %v9253_v61 = vunpack.i.l.bf16 %v9252_v56  ;;  %v3811_v56 = vsel %vm3793_vm9, %v3778_v27, %v9289_v35 }
 0x3eb   : > { %9566 = vrot.lane.b32.xlu1 %v9565_v16, %s10353_s17 }
 0x3ec   : > { %9581 = vrot.lane.b32.xlu0 %v9530_v54, %s10354_s20  ;;  %v2957_v54 = vsel %vm2853_vm6, %v2955_v40, %v2956_v38  ;;  %v3775_v51 = vsel %vm3760_vm8, %v3742_v7, %v9253_v61  ;;  %v3776_v8 = vsel %vm3760_vm8, %v3743_v43, %v9254_v53 }
 0x3ed   : > { %v11959_v48 = vpop.permute.xlu1 %9276  ;;  %v9595_v26 = vpack.i.bf16 %v2959_v22, %v2957_v54  ;;  %v3808_v14 = vsel %vm3793_vm9, %v3775_v51, %v9198_v15  ;;  %v3809_v12 = vsel %vm3793_vm9, %v3776_v8, %v9199_v63 }
 0x3ee   : > { %v11961_v37 = vpop.permute.xlu0 %9301  ;;  %v3841_v0 = vsel %vm3826_vm10, %v3808_v14, %v9228_v25  ;;  %v3842_v33 = vsel %vm3826_vm10, %v3809_v12, %v9229_v34  ;;  %v4402_v14 = vld [vmem:[#allocation3 + $0x10] sm:$0x3] }
 0x3ef   : > { %9576 = vrot.lane.b32.xlu1 %v9575_v5, %s10351_s15  ;;  %v3874_v23 = vsel %vm14272_vm11, %v3841_v0, %v9233_v19  ;;  %v3875_v52 = vsel %vm14272_vm11, %v3842_v33, %v9234_v32  ;;  %v4505_v0 = vrot.slane %v4402_v14, 1 }
 0x3f0   : > { %9591 = vrot.lane.b32.xlu0 %v9565_v16, %s10355_s21  ;;  %v3810_v16 = vsel %vm3793_vm9, %v3777_v24, %v9288_v9  ;;  %v3907_v42 = vsel %vm3892_vm12, %v3874_v23, %v9293_v17  ;;  %v3908_v2 = vsel %vm3892_vm12, %v3875_v52, %v9294_v41 }
 0x3f1   : > { %v9282_v11 = vpop.permute.xlu1 %9281 }
 0x3f2   : > { %v9337_v13 = vpop.permute.xlu0 %9336  ;;  %v9284_v62 = vunpack.i.h.bf16 %v9282_v11  ;;  %v9283_v53 = vunpack.i.l.bf16 %v9282_v11 }
 0x3f3   : > { %9586 = vrot.lane.b32.xlu1 %v9585_v58, %s10354_s20  ;;  %v9339_v47 = vunpack.i.h.bf16 %v9337_v13  ;;  %v9338_v45 = vunpack.i.l.bf16 %v9337_v13  ;;  %v4400_v13 = vld [vmem:[#allocation3] sm:$0xff] }
 0x3f4   : > { %v4502_v25 = vrot.slane %v4400_v13, 1  ;;  %v4582_v19 = vrot.slane %v4400_v13, 2 }
 0x3f5   : > { %v11980_v18 = vpop.permute.xlu1 %9306  ;;  %v3844_v40 = vsel %vm3826_vm10, %v3811_v56, %v9339_v47  ;;  %v3843_v30 = vsel %vm3826_vm10, %v3810_v16, %v9338_v45 }
 0x3f6   : > { %v9342_v50 = vpop.permute.xlu0 %9341 }
 0x3f7   : > { %9596 = vrot.lane.b32.xlu1 %v9595_v26, %s10355_s21  ;;  %v9344_v28 = vunpack.i.h.bf16 %v9342_v50  ;;  %v9343_v6 = vunpack.i.l.bf16 %v9342_v50  ;;  %v4401_v26 = vld [vmem:[#allocation3 + $0x8] sm:$0xff] }
 0x3f8   : > { %v4503_v3 = vrot.slane %v4401_v26, 1  ;;  %v4583_v35 = vrot.slane %v4401_v26, 2 }
 0x3f9   : > { %v11993_v20 = vpop.permute.xlu1 %9311  ;;  %v3876_v61 = vsel %vm14272_vm11, %v3843_v30, %v9343_v6  ;;  %v3877_v36 = vsel %vm14272_vm11, %v3844_v40, %v9344_v28  ;;  %v4585_v28 = vrot.slane %v4402_v14, 2  ;;  %v10288_v40 = vld [vmem:[#allocation2 + $0xe0] sm:$0xff]  ;;  %v10290_v14 = vld [vmem:[#allocation2 + $0xf0] sm:$0xff] }
 0x3fa   : > { %v9347_v10 = vpop.permute.xlu0 %9346  ;;  %v3909_v51 = vsel %vm3892_vm12, %v3876_v61, %v9283_v53  ;;  %v3910_v8 = vsel %vm3892_vm12, %v3877_v36, %v9284_v62  ;;  %v4504_v59 = vsel %vm2772_vm4, %v4502_v25, %v4503_v3  ;;  %v4506_v46 = vsel %vm2772_vm4, %v4503_v3, %v4505_v0 }
 0x3fb   : > { %v9349_v38 = vunpack.i.h.bf16 %v9347_v10  ;;  %v9348_v5 = vunpack.i.l.bf16 %v9347_v10  ;;  %v9600_v47 = vpack.i.bf16 %v4506_v46, %v4504_v59  ;;  %v4584_v45 = vsel %vm2853_vm6, %v4582_v19, %v4583_v35 }
 0x3fc   : > { %v4586_v23 = vsel %vm2853_vm6, %v4583_v35, %v4585_v28  ;;  %v9279_v61 = vunpack.i.h.bf16 %v11959_v48  ;;  %v9299_v36 = vunpack.i.h.bf16 %v11953_v4 }
 0x3fd   : > { %v9317_v44 = vpop.permute.xlu1 %9316  ;;  %v3941_v54 = vsel %vm3925_vm13, %v3908_v2, %v9349_v38  ;;  %v3940_v22 = vsel %vm3925_vm13, %v3907_v42, %v9348_v5  ;;  %9601 = vrot.lane.b32.xlu0 %v9600_v47, %s10348_s26  ;;  %v9605_v10 = vpack.i.bf16 %v4586_v23, %v4584_v45  ;;  %v10287_v38 = vld [vmem:[#allocation2 + $0xd8] sm:$0xff] }
 0x3fe   : > { %v9352_v58 = vpop.permute.xlu0 %9351  ;;  %v9319_v29 = vunpack.i.h.bf16 %v9317_v44  ;;  %v9318_v43 = vunpack.i.l.bf16 %v9317_v44  ;;  %v9278_v44 = vunpack.i.l.bf16 %v11959_v48 }
 0x3ff   : > { %v9354_v49 = vunpack.i.h.bf16 %v9352_v58  ;;  %v9353_v7 = vunpack.i.l.bf16 %v9352_v58 }
 0x400   : > { %v3942_v50 = vsel %vm3925_vm13, %v3909_v51, %v9318_v43  ;;  %v3943_v1 = vsel %vm3925_vm13, %v3910_v8, %v9319_v29  ;;  %v9298_v29 = vunpack.i.l.bf16 %v11953_v4  ;;  %v9308_v43 = vunpack.i.l.bf16 %v11980_v18 }
 0x401   : > { %v3973_v63 = vsel %vm14273_vm14, %v3940_v22, %v9353_v7  ;;  %v3974_v11 = vsel %vm14273_vm14, %v3941_v54, %v9354_v49  ;;  %v9322_v15 = vpop.permute.xlu1 %9321  ;;  %9606 = vrot.lane.b32.xlu0 %v9605_v10, %s10349_s28  ;;  %v9304_v54 = vunpack.i.h.bf16 %v11961_v37  ;;  %v9309_v22 = vunpack.i.h.bf16 %v11980_v18 }
 0x402   : > { %v9324_v12 = vunpack.i.h.bf16 %v9322_v15  ;;  %v9323_v55 = vunpack.i.l.bf16 %v9322_v15  ;;  %v12015_v39 = vpop.permute.xlu0 %9366  ;;  %v3998_v34 = vpack.c.bf16 %v3974_v11, %v3973_v63  ;;  %v9303_v8 = vunpack.i.l.bf16 %v11961_v37  ;;  %v10289_v11 = vld [vmem:[#allocation2 + $0xf8] sm:$0xff] }
 0x403   : > { %v9369_v48 = vunpack.i.h.bf16 %v12015_v39  ;;  %v3749_v4 = vsel %vm2595_vm2, %v10289_v11, %v9299_v36  ;;  %v9313_v15 = vunpack.i.l.bf16 %v11993_v20  ;;  %v9368_v13 = vunpack.i.l.bf16 %v12015_v39 }
 0x404   : > { %v3975_v33 = vsel %vm14273_vm14, %v3942_v50, %v9323_v55  ;;  %v3976_v32 = vsel %vm14273_vm14, %v3943_v1, %v9324_v12  ;;  %8843 = vmatmul.mubr.msk.bf16.gmra.mrb[44].mxu1 %vm4050_vm15, %v3998_v34  ;;  %v3748_v12 = vsel %vm2595_vm2, %v10290_v14, %v9298_v29  ;;  %v9314_v18 = vunpack.i.h.bf16 %v11993_v20 }
 0x405   : > { %v9327_v9 = vpop.permute.xlu1 %9326  ;;  %v3999_v31 = vpack.c.bf16 %v3976_v32, %v3975_v33  ;;  %v3782_v25 = vsel %vm3760_vm8, %v3749_v4, %v9304_v54  ;;  %v3781_v39 = vsel %vm3760_vm8, %v3748_v12, %v9303_v8  ;;  %v10291_v12 = vld [vmem:[#allocation2 + $0x108] sm:$0xff] }
 0x406   : > { %v12023_v21 = vpop.permute.xlu0 %9371  ;;  %v9328_v24 = vunpack.i.l.bf16 %v9327_v9  ;;  %v9329_v27 = vunpack.i.h.bf16 %v9327_v9  ;;  %v3815_v33 = vsel %vm3793_vm9, %v3782_v25, %v9369_v48  ;;  %v3814_v20 = vsel %vm3793_vm9, %v3781_v39, %v9368_v13 }
 0x407   : > { %8846 = vmatprep.mubr.msk.bf16.mxu1 %vm4050_vm15, %v3999_v31  ;;  %v9373_v32 = vunpack.i.l.bf16 %v12023_v21  ;;  %v9374_v35 = vunpack.i.h.bf16 %v12023_v21 }
 0x408   : > { %v3746_v5 = vsel %vm2595_vm2, %v10287_v38, %v9328_v24  ;;  %v3747_v30 = vsel %vm2595_vm2, %v10288_v40, %v9329_v27 }
 0x409   : > { %v9332_v6 = vpop.permute.xlu1 %9331 }
 0x40a   : > { %v12030_v52 = vpop.permute.xlu0 %9376  ;;  %v9333_v41 = vunpack.i.l.bf16 %v9332_v6  ;;  %v9334_v56 = vunpack.i.h.bf16 %v9332_v6 }
 0x40c   : > { %v3779_v42 = vsel %vm3760_vm8, %v3746_v5, %v9333_v41  ;;  %v3780_v62 = vsel %vm3760_vm8, %v3747_v30, %v9334_v56 }
 0x40d   : > { %v12032_v17 = vpop.permute.xlu1 %9356  ;;  %v3812_v58 = vsel %vm3793_vm9, %v3779_v42, %v9278_v44  ;;  %v3813_v49 = vsel %vm3793_vm9, %v3780_v62, %v9279_v61 }
 0x40e   : > { %v12035_v16 = vpop.permute.xlu0 %9381  ;;  %v3845_v63 = vsel %vm3826_vm10, %v3812_v58, %v9308_v43  ;;  %v3846_v26 = vsel %vm3826_vm10, %v3813_v49, %v9309_v22  ;;  %v9359_v39 = vunpack.i.h.bf16 %v12032_v17 }
 0x40f   : > { %v3878_v3 = vsel %vm14272_vm11, %v3845_v63, %v9313_v15  ;;  %v3879_v19 = vsel %vm14272_vm11, %v3846_v26, %v9314_v18 }
 0x410   : > { %v3911_v47 = vsel %vm3892_vm12, %v3878_v3, %v9373_v32  ;;  %v3912_v10 = vsel %vm3892_vm12, %v3879_v19, %v9374_v35  ;;  %v9378_v19 = vunpack.i.l.bf16 %v12030_v52 }
 0x411   : > { %v12040_v2 = vpop.permute.xlu1 %9361 }
 0x412   : > { %v9417_v53 = vpop.permute.xlu0 %9416  ;;  %v9363_v28 = vunpack.i.l.bf16 %v12040_v2  ;;  %v9364_v38 = vunpack.i.h.bf16 %v12040_v2 }
 0x413   : > { %v9419_v55 = vunpack.i.h.bf16 %v9417_v53  ;;  %v9418_v37 = vunpack.i.l.bf16 %v9417_v53 }
 0x415   : > { %v12050_v7 = vpop.permute.xlu1 %9386  ;;  %v3848_v59 = vsel %vm3826_vm10, %v3815_v33, %v9419_v55  ;;  %v3847_v46 = vsel %vm3826_vm10, %v3814_v20, %v9418_v37  ;;  %v10292_v55 = vld [vmem:[#allocation2 + $0x110] sm:$0xff]  ;;  %v9379_v33 = vunpack.i.h.bf16 %v12030_v52 }
 0x416   : > { %v9422_v51 = vpop.permute.xlu0 %9421  ;;  %v9388_v20 = vunpack.i.l.bf16 %v12050_v7 }
 0x417   : > { %v9424_v50 = vunpack.i.h.bf16 %v9422_v51  ;;  %v9423_v1 = vunpack.i.l.bf16 %v9422_v51 }
 0x419   : > { %v12063_v34 = vpop.permute.xlu1 %9391  ;;  %v3880_v6 = vsel %vm14272_vm11, %v3847_v46, %v9423_v1  ;;  %v3881_v23 = vsel %vm14272_vm11, %v3848_v59, %v9424_v50  ;;  %v9358_v1 = vunpack.i.l.bf16 %v12032_v17  ;;  %v9389_v59 = vunpack.i.h.bf16 %v12050_v7 }
 0x41a   : > { %v9427_v0 = vpop.permute.xlu0 %9426  ;;  %v3913_v30 = vsel %vm3892_vm12, %v3880_v6, %v9363_v28  ;;  %v3914_v53 = vsel %vm3892_vm12, %v3881_v23, %v9364_v38  ;;  %v10293_v28 = vld [vmem:[#allocation2 + $0x128] sm:$0xff]  ;;  %v9393_v6 = vunpack.i.l.bf16 %v12063_v34  ;;  %v9394_v7 = vunpack.i.h.bf16 %v12063_v34 }
 0x41b   : > { %v9429_v9 = vunpack.i.h.bf16 %v9427_v0  ;;  %v9428_v31 = vunpack.i.l.bf16 %v9427_v0  ;;  %v3753_v52 = vsel %vm2595_vm2, %v10293_v28, %v9379_v33 }
 0x41d   : > { %v9397_v45 = vpop.permute.xlu1 %9396  ;;  %v3945_v5 = vsel %vm3925_vm13, %v3912_v10, %v9429_v9  ;;  %v3944_v40 = vsel %vm3925_vm13, %v3911_v47, %v9428_v31  ;;  %v9384_v31 = vunpack.i.h.bf16 %v12035_v16  ;;  %v9383_v47 = vunpack.i.l.bf16 %v12035_v16 }
 0x41e   : > { %v9432_v24 = vpop.permute.xlu0 %9431  ;;  %v9399_v27 = vunpack.i.h.bf16 %v9397_v45  ;;  %v9398_v21 = vunpack.i.l.bf16 %v9397_v45 }
 0x41f   : > { %v9434_v41 = vunpack.i.h.bf16 %v9432_v24  ;;  %v9433_v56 = vunpack.i.l.bf16 %v9432_v24  ;;  %v10294_v24 = vld [vmem:[#allocation2 + $0x120] sm:$0xff] }
 0x420   : > { %v3946_v2 = vsel %vm3925_vm13, %v3913_v30, %v9398_v21  ;;  %v3947_v43 = vsel %vm3925_vm13, %v3914_v53, %v9399_v27  ;;  %v3752_v27 = vsel %vm2595_vm2, %v10294_v24, %v9378_v19 }
 0x421   : > { %v3977_v42 = vsel %vm14273_vm14, %v3944_v40, %v9433_v56  ;;  %v3978_v44 = vsel %vm14273_vm14, %v3945_v5, %v9434_v41  ;;  %v9402_v62 = vpop.permute.xlu1 %9401  ;;  %v3786_v56 = vsel %vm3760_vm8, %v3753_v52, %v9384_v31 }
 0x422   : > { %v9404_v61 = vunpack.i.h.bf16 %v9402_v62  ;;  %v9403_v36 = vunpack.i.l.bf16 %v9402_v62  ;;  %v12087_v58 = vpop.permute.xlu0 %9446  ;;  %v4000_v29 = vpack.c.bf16 %v3978_v44, %v3977_v42  ;;  %v3785_v42 = vsel %vm3760_vm8, %v3752_v27, %v9383_v47  ;;  %v10296_v27 = vld [vmem:[#allocation2 + $0x138] sm:$0xff] }
 0x423   : > { %v9449_v17 = vunpack.i.h.bf16 %v12087_v58  ;;  %v9448_v23 = vunpack.i.l.bf16 %v12087_v58 }
 0x424   : > { %v3979_v49 = vsel %vm14273_vm14, %v3946_v2, %v9403_v36  ;;  %v3980_v54 = vsel %vm14273_vm14, %v3947_v43, %v9404_v61  ;;  %8847 = vmatmul.mubr.msk.bf16.gmra.mrb[48].mxu1 %vm4050_vm15, %v4000_v29 }
 0x425   : > { %v9407_v22 = vpop.permute.xlu1 %9406  ;;  %v4001_v51 = vpack.c.bf16 %v3980_v54, %v3979_v49  ;;  %v3819_v44 = vsel %vm3793_vm9, %v3786_v56, %v9449_v17  ;;  %v3818_v34 = vsel %vm3793_vm9, %v3785_v42, %v9448_v23 }
 0x426   : > { %v12094_v8 = vpop.permute.xlu0 %9451  ;;  %v9408_v11 = vunpack.i.l.bf16 %v9407_v22  ;;  %v9409_v4 = vunpack.i.h.bf16 %v9407_v22 }
 0x427   : > { %8850 = vmatprep.mubr.msk.bf16.mxu1 %vm4050_vm15, %v4001_v51  ;;  %v9453_v62 = vunpack.i.l.bf16 %v12094_v8  ;;  %v9454_v61 = vunpack.i.h.bf16 %v12094_v8 }
 0x428   : > { %v3750_v18 = vsel %vm2595_vm2, %v10291_v12, %v9408_v11  ;;  %v3751_v37 = vsel %vm2595_vm2, %v10292_v55, %v9409_v4 }
 0x429   : > { %v9412_v48 = vpop.permute.xlu1 %9411 }
 0x42a   : > { %v12097_v63 = vpop.permute.xlu0 %9456  ;;  %v9413_v15 = vunpack.i.l.bf16 %v9412_v48  ;;  %v9414_v26 = vunpack.i.h.bf16 %v9412_v48 }
 0x42c   : > { %v3783_v25 = vsel %vm3760_vm8, %v3750_v18, %v9413_v15  ;;  %v3784_v3 = vsel %vm3760_vm8, %v3751_v37, %v9414_v26 }
 0x42d   : > { %v12099_v13 = vpop.permute.xlu1 %9436  ;;  %v3816_v32 = vsel %vm3793_vm9, %v3783_v25, %v9358_v1  ;;  %v3817_v35 = vsel %vm3793_vm9, %v3784_v3, %v9359_v39 }
 0x42e   : > { %v12101_v14 = vpop.permute.xlu0 %9461  ;;  %v3849_v45 = vsel %vm3826_vm10, %v3816_v32, %v9388_v20  ;;  %v3850_v10 = vsel %vm3826_vm10, %v3817_v35, %v9389_v59 }
 0x42f   : > { %v3882_v40 = vsel %vm14272_vm11, %v3849_v45, %v9393_v6  ;;  %v3883_v53 = vsel %vm14272_vm11, %v3850_v10, %v9394_v7  ;;  %v10295_v10 = vld [vmem:[#allocation2 + $0x140] sm:$0xff] }
 0x430   : > { %v3915_v43 = vsel %vm3892_vm12, %v3882_v40, %v9453_v62  ;;  %v3916_v48 = vsel %vm3892_vm12, %v3883_v53, %v9454_v61 }
 0x431   : > { %v12106_v50 = vpop.permute.xlu1 %9441 }
 0x432   : > { %v9497_v0 = vpop.permute.xlu0 %9496  ;;  %v9443_v54 = vunpack.i.l.bf16 %v12106_v50  ;;  %v9444_v12 = vunpack.i.h.bf16 %v12106_v50 }
 0x433   : > { %v9499_v21 = vunpack.i.h.bf16 %v9497_v0  ;;  %v9498_v16 = vunpack.i.l.bf16 %v9497_v0 }
 0x435   : > { %v12116_v9 = vpop.permute.xlu1 %9466  ;;  %v3852_v29 = vsel %vm3826_vm10, %v3819_v44, %v9499_v21  ;;  %v3851_v2 = vsel %vm3826_vm10, %v3818_v34, %v9498_v16  ;;  %v9439_v21 = vunpack.i.h.bf16 %v12099_v13  ;;  %v9438_v16 = vunpack.i.l.bf16 %v12099_v13 }
 0x436   : > { %v9502_v46 = vpop.permute.xlu0 %9501  ;;  %v9469_v44 = vunpack.i.h.bf16 %v12116_v9  ;;  %v9468_v62 = vunpack.i.l.bf16 %v12116_v9 }
 0x437   : > { %v9504_v38 = vunpack.i.h.bf16 %v9502_v46  ;;  %v9503_v5 = vunpack.i.l.bf16 %v9502_v46 }
 0x439   : > { %v12129_v41 = vpop.permute.xlu1 %9471  ;;  %v3884_v22 = vsel %vm14272_vm11, %v3851_v2, %v9503_v5  ;;  %v3885_v51 = vsel %vm14272_vm11, %v3852_v29, %v9504_v38 }
 0x43a   : > { %v9507_v30 = vpop.permute.xlu0 %9506  ;;  %v3917_v37 = vsel %vm3892_vm12, %v3884_v22, %v9443_v54  ;;  %v3918_v0 = vsel %vm3892_vm12, %v3885_v51, %v9444_v12  ;;  %v9474_v61 = vunpack.i.h.bf16 %v12129_v41  ;;  %v9459_v51 = vunpack.i.h.bf16 %v12097_v63 }
 0x43b   : > { %v9509_v36 = vunpack.i.h.bf16 %v9507_v30  ;;  %v9508_v58 = vunpack.i.l.bf16 %v9507_v30  ;;  %v9463_v12 = vunpack.i.l.bf16 %v12101_v14 }
 0x43d   : > { %v9477_v49 = vpop.permute.xlu1 %9476  ;;  %v3949_v18 = vsel %vm3925_vm13, %v3916_v48, %v9509_v36  ;;  %v3948_v55 = vsel %vm3925_vm13, %v3915_v43, %v9508_v58  ;;  %v9473_v36 = vunpack.i.l.bf16 %v12129_v41  ;;  %v9458_v48 = vunpack.i.l.bf16 %v12097_v63 }
 0x43e   : > { %v9512_v11 = vpop.permute.xlu0 %9511  ;;  %v9479_v4 = vunpack.i.h.bf16 %v9477_v49  ;;  %v9478_v8 = vunpack.i.l.bf16 %v9477_v49 }
 0x43f   : > { %v9514_v15 = vunpack.i.h.bf16 %v9512_v11  ;;  %v9513_v26 = vunpack.i.l.bf16 %v9512_v11 }
 0x440   : > { %v3950_v50 = vsel %vm3925_vm13, %v3917_v37, %v9478_v8  ;;  %v3951_v20 = vsel %vm3925_vm13, %v3918_v0, %v9479_v4 }
 0x441   : > { %v3981_v25 = vsel %vm14273_vm14, %v3948_v55, %v9513_v26  ;;  %v3982_v1 = vsel %vm14273_vm14, %v3949_v18, %v9514_v15  ;;  %v9482_v3 = vpop.permute.xlu1 %9481  ;;  %v9464_v26 = vunpack.i.h.bf16 %v12101_v14  ;;  %v10297_v14 = vld [vmem:[#allocation2 + $0x158] sm:$0xff] }
 0x442   : > { %v9484_v39 = vunpack.i.h.bf16 %v9482_v3  ;;  %v9483_v33 = vunpack.i.l.bf16 %v9482_v3  ;;  %v12153_v32 = vpop.permute.xlu0 %9521  ;;  %v4002_v19 = vpack.c.bf16 %v3982_v1, %v3981_v25 }
 0x443   : > { %v9524_v37 = vunpack.i.h.bf16 %v12153_v32  ;;  %v9523_v25 = vunpack.i.l.bf16 %v12153_v32 }
 0x444   : > { %v3983_v35 = vsel %vm14273_vm14, %v3950_v50, %v9483_v33  ;;  %v3984_v31 = vsel %vm14273_vm14, %v3951_v20, %v9484_v39  ;;  %8851 = vmatmul.mubr.msk.bf16.gmra.mrb[52].mxu1 %vm4050_vm15, %v4002_v19  ;;  %v3757_v20 = vsel %vm2595_vm2, %v10297_v14, %v9459_v51 }
 0x445   : > { %v9487_v59 = vpop.permute.xlu1 %9486  ;;  %v4003_v46 = vpack.c.bf16 %v3984_v31, %v3983_v35  ;;  %v10298_v35 = vld [vmem:[#allocation2 + $0x150] sm:$0xff] }
 0x446   : > { %v9527_v47 = vpop.permute.xlu0 %9526  ;;  %v9489_v17 = vunpack.i.h.bf16 %v9487_v59  ;;  %v9488_v45 = vunpack.i.l.bf16 %v9487_v59  ;;  %v3756_v31 = vsel %vm2595_vm2, %v10298_v35, %v9458_v48  ;;  %v12249_v35 = vld [vmem:[%s14247_s5] ss:$0 sm:$0xff] }
 0x447   : > { %8854 = vmatprep.mubr.msk.bf16.mxu1 %vm4050_vm15, %v4003_v46  ;;  %v9529_v54 = vunpack.i.h.bf16 %v9527_v47  ;;  %v9528_v22 = vunpack.i.l.bf16 %v9527_v47  ;;  %v3789_v32 = vsel %vm3760_vm8, %v3756_v31, %v9463_v12  ;;  %v3790_v47 = vsel %vm3760_vm8, %v3757_v20, %v9464_v26  ;;  %v12243_v20 = vld [vmem:[%s10423_s14] sm:$0xff] }
 0x448   : > { %v3755_v24 = vsel %vm2595_vm2, %v10295_v10, %v9489_v17  ;;  %v3754_v7 = vsel %vm2595_vm2, %v10296_v27, %v9488_v45  ;;  %v3823_v17 = vsel %vm3793_vm9, %v3790_v47, %v9524_v37  ;;  %v3822_v45 = vsel %vm3793_vm9, %v3789_v32, %v9523_v25 }
 0x449   : > { %v9492_v28 = vpop.permute.xlu1 %9491 }
 0x44a   : > { %v9494_v52 = vunpack.i.h.bf16 %v9492_v28  ;;  %v9493_v6 = vunpack.i.l.bf16 %v9492_v28  ;;  %v12161_v23 = vpop.permute.xlu0 %9546 }
 0x44b   : > { %v9548_v0 = vunpack.i.l.bf16 %v12161_v23  ;;  %v9549_v28 = vunpack.i.h.bf16 %v12161_v23 }
 0x44c   : > { %v3787_v56 = vsel %vm3760_vm8, %v3754_v7, %v9493_v6  ;;  %v3788_v38 = vsel %vm3760_vm8, %v3755_v24, %v9494_v52 }
 0x44d   : > { %v12169_v5 = vpop.permute.xlu1 %9516  ;;  %v3820_v40 = vsel %vm3793_vm9, %v3787_v56, %v9438_v16  ;;  %v3821_v30 = vsel %vm3793_vm9, %v3788_v38, %v9439_v21  ;;  %v3855_v10 = vsel %vm3826_vm10, %v3822_v45, %v9548_v0 }
 0x44e   : > { %v12173_v42 = vpop.permute.xlu0 %9551  ;;  %v3853_v53 = vsel %vm3826_vm10, %v3820_v40, %v9468_v62  ;;  %v3854_v13 = vsel %vm3826_vm10, %v3821_v30, %v9469_v44  ;;  %v9519_v40 = vunpack.i.h.bf16 %v12169_v5  ;;  %v9518_v30 = vunpack.i.l.bf16 %v12169_v5 }
 0x44f   : > { %v3886_v29 = vsel %vm14272_vm11, %v3853_v53, %v9473_v36  ;;  %v3887_v2 = vsel %vm14272_vm11, %v3854_v13, %v9474_v61  ;;  %v9553_v52 = vunpack.i.l.bf16 %v12173_v42  ;;  %v9554_v24 = vunpack.i.h.bf16 %v12173_v42 }
 0x450   : > { %v3919_v4 = vsel %vm3892_vm12, %v3886_v29, %v9528_v22  ;;  %v3920_v8 = vsel %vm3892_vm12, %v3887_v2, %v9529_v54  ;;  %v3856_v42 = vsel %vm3826_vm10, %v3823_v17, %v9549_v28 }
 0x451   : > { %v12179_v34 = vpop.permute.xlu1 %9531 }
 0x452   : > { %v9557_v58 = vpop.permute.xlu0 %9556  ;;  %v9533_v13 = vunpack.i.l.bf16 %v12179_v34 }
 0x453   : > { %v9559_v43 = vunpack.i.h.bf16 %v9557_v58  ;;  %v9558_v49 = vunpack.i.l.bf16 %v9557_v58 }
 0x455   : > { %v9537_v9 = vpop.permute.xlu1 %9536  ;;  %v3953_v18 = vsel %vm3925_vm13, %v3920_v8, %v9559_v43  ;;  %v3952_v55 = vsel %vm3925_vm13, %v3919_v4, %v9558_v49  ;;  %v9534_v49 = vunpack.i.h.bf16 %v12179_v34 }
 0x456   : > { %v9562_v11 = vpop.permute.xlu0 %9561  ;;  %v9539_v39 = vunpack.i.h.bf16 %v9537_v9  ;;  %v9538_v33 = vunpack.i.l.bf16 %v9537_v9 }
 0x457   : > { %v9564_v41 = vunpack.i.h.bf16 %v9562_v11  ;;  %v9563_v15 = vunpack.i.l.bf16 %v9562_v11 }
 0x458   : > { %v3759_v27 = vsel %vm2595_vm2, %v11820_v60, %v9539_v39  ;;  %v3758_v7 = vsel %vm2595_vm2, %v11826_v57, %v9538_v33  ;;  %v3888_v60 = vsel %vm14272_vm11, %v3855_v10, %v9553_v52  ;;  %v3889_v57 = vsel %vm14272_vm11, %v3856_v42, %v9554_v24 }
 0x459   : > { %v3985_v63 = vsel %vm14273_vm14, %v3952_v55, %v9563_v15  ;;  %v3986_v1 = vsel %vm14273_vm14, %v3953_v18, %v9564_v41  ;;  %v9542_v3 = vpop.permute.xlu1 %9541 }
 0x45a   : > { %v9572_v19 = vpop.permute.xlu0 %9571  ;;  %v4004_v50 = vpack.c.bf16 %v3986_v1, %v3985_v63  ;;  %v9544_v59 = vunpack.i.h.bf16 %v9542_v3  ;;  %v9543_v46 = vunpack.i.l.bf16 %v9542_v3 }
 0x45b   : > { %v9574_v38 = vunpack.i.h.bf16 %v9572_v19  ;;  %v9573_v23 = vunpack.i.l.bf16 %v9572_v19 }
 0x45c   : > { %8855 = vmatmul.mubr.msk.bf16.gmra.mrb[56].mxu1 %vm4050_vm15, %v4004_v50  ;;  %v3791_v16 = vsel %vm3760_vm8, %v3758_v7, %v9543_v46  ;;  %v3792_v56 = vsel %vm3760_vm8, %v3759_v27, %v9544_v59 }
 0x45d   : > { %v9567_v6 = vpop.permute.xlu1 %9566  ;;  %v3824_v61 = vsel %vm3793_vm9, %v3791_v16, %v9518_v30  ;;  %v3825_v36 = vsel %vm3793_vm9, %v3792_v56, %v9519_v40  ;;  %v3921_v29 = vsel %vm3892_vm12, %v3888_v60, %v9573_v23  ;;  %v3922_v5 = vsel %vm3892_vm12, %v3889_v57, %v9574_v38 }
 0x45e   : > { %v9582_v21 = vpop.permute.xlu0 %9581  ;;  %v9569_v54 = vunpack.i.h.bf16 %v9567_v6  ;;  %v9568_v51 = vunpack.i.l.bf16 %v9567_v6  ;;  %v3857_v48 = vsel %vm3826_vm10, %v3824_v61, %v9533_v13  ;;  %v3858_v41 = vsel %vm3826_vm10, %v3825_v36, %v9534_v49  ;;  %v10249_v49 = vld [vmem:[%s14248_s6 + $0x8] ss:$16 sps:$4 sm:$0xff]  }
 0x45f   : > { %v9584_v44 = vunpack.i.h.bf16 %v9582_v21  ;;  %v9583_v62 = vunpack.i.l.bf16 %v9582_v21 }
 0x460   : > { %v3890_v55 = vsel %vm14272_vm11, %v3857_v48, %v9568_v51  ;;  %v3891_v37 = vsel %vm14272_vm11, %v3858_v41, %v9569_v54  ;;  %v10251_v54 = vld [vmem:[%s14248_s6 + $0xc] ss:$16 sps:$4 sm:$0xff]   ;;  %v10254_v41 = vld [vmem:[%s14248_s6 + $0x24] ss:$16 sps:$4 sm:$0xff]  }
 0x461   : > { %v9577_v53 = vpop.permute.xlu1 %9576  ;;  %v3954_v22 = vsel %vm3925_vm13, %v3921_v29, %v9583_v62  ;;  %v3955_v9 = vsel %vm3925_vm13, %v3922_v5, %v9584_v44  ;;  %v10246_v5 = vld [vmem:[%s14248_s6] ss:$16 sps:$4 sm:$0xff]   ;;  %6111 = vmatprep.subr.bf16.mxu0 %v10251_v54 }
 0x462   : > { %v9592_v58 = vpop.permute.xlu0 %9591  ;;  %v9579_v15 = vunpack.i.h.bf16 %v9577_v53  ;;  %v9578_v26 = vunpack.i.l.bf16 %v9577_v53  ;;  %6112 = vmatpush1.bf16.msra.mxu0 %v10249_v49 }
 0x463   : > { %v9594_v2 = vunpack.i.h.bf16 %v9592_v58  ;;  %v9593_v43 = vunpack.i.l.bf16 %v9592_v58 }
 0x464   : > { %v3923_v63 = vsel %vm3892_vm12, %v3890_v55, %v9578_v26  ;;  %v3924_v1 = vsel %vm3892_vm12, %v3891_v37, %v9579_v15  ;;  %v10255_v15 = vld [vmem:[%s14248_s6 + $0x28] ss:$16 sps:$4 sm:$0xff]   ;;  %v10257_v55 = vld [vmem:[%s14248_s6 + $0x2c] ss:$16 sps:$4 sm:$0xff]  }
 0x465   : > { %v3987_v11 = vsel %vm14273_vm14, %v3954_v22, %v9593_v43  ;;  %v3988_v4 = vsel %vm14273_vm14, %v3955_v9, %v9594_v2  ;;  %v9587_v8 = vpop.permute.xlu1 %9586  ;;  %v10248_v2 = vld [vmem:[%s14248_s6 + $0x4] ss:$16 sps:$4 sm:$0xff]   ;;  %6113 = vmatprep.subr.bf16.mxu0 %v10257_v55 }
 0x466   : > { %v4005_v12 = vpack.c.bf16 %v3988_v4, %v3987_v11  ;;  %v9589_v18 = vunpack.i.h.bf16 %v9587_v8  ;;  %v9588_v34 = vunpack.i.l.bf16 %v9587_v8  ;;  %5918 = vmatprep.subr.bf16.mxu1 %v10248_v2  ;;  %v10252_v8 = vld [vmem:[%s14248_s6 + $0x20] ss:$16 sps:$4 sm:$0xff]   ;;  %6114 = vmatpush1.bf16.msra.mxu0 %v10255_v15 }
 0x467   : > { %5919 = vmatpush1.bf16.msra.mxu1 %v10246_v5 }
 0x468   : > { %8858 = vmatprep.mubr.msk.bf16.mxu1 %vm4050_vm15, %v4005_v12  ;;  %v3956_v39 = vsel %vm3925_vm13, %v3923_v63, %v9588_v34  ;;  %v3957_v33 = vsel %vm3925_vm13, %v3924_v1, %v9589_v18  ;;  %5920 = vmatprep.subr.bf16.mxu1 %v10254_v41  ;;  %v10258_v63 = vld [vmem:[%s14248_s6 + $0x40] ss:$16 sps:$4 sm:$0xff]   ;;  %v10260_v1 = vld [vmem:[%s14248_s6 + $0x44] ss:$16 sps:$4 sm:$0xff]  }
 0x469   : > { %v9597_v25 = vpop.permute.xlu1 %9596 }
 0x46a   : > { %v9599_v3 = vunpack.i.h.bf16 %v9597_v25  ;;  %v9598_v0 = vunpack.i.l.bf16 %v9597_v25 }
 0x46b   : > { %5921 = vmatpush1.bf16.msra.mxu1 %v10252_v8 }
 0x46c   : > { %v3989_v19 = vsel %vm14273_vm14, %v3956_v39, %v9598_v0  ;;  %v3990_v50 = vsel %vm14273_vm14, %v3957_v33, %v9599_v3  ;;  %v10261_v3 = vld [vmem:[%s14248_s6 + $0x48] ss:$16 sps:$4 sm:$0xff]   ;;  %v10263_v33 = vld [vmem:[%s14248_s6 + $0x4c] ss:$16 sps:$4 sm:$0xff]   ;;  %5922 = vmatprep.subr.bf16.mxu1 %v10260_v1 }
 0x46d   : > { %v4006_v14 = vpack.c.bf16 %v3990_v50, %v3989_v19  ;;  %6115 = vmatprep.subr.bf16.mxu0 %v10263_v33 }
 0x46e   : > { %6116 = vmatpush1.bf16.msra.mxu0 %v10261_v3 }
 0x46f   : > { %8859 = vmatmul.mubr.msk.bf16.gmra.mrb[60].mxu1 %vm4050_vm15, %v4006_v14 }
 0x470   : > { %5950 = vmatprep.mubr.bf16.mxu1 %v12243_v20  ;;  %5923 = vmatpush1.bf16.msra.mxu1 %v10258_v63 }
 0x477   : > { %v8832_v31 = vpop.f32.mrb[32].mxu1 }
 0x478   : > { %v4146_v59 = vadd.f32 %v8832_v31, %v12249_v35  ;;  %v4137_v46 = vpop.f32.mrb[33].mxu1 }
 0x479   : > { %v4138_v32 = vadd.f32 %v12249_v35, %v4137_v46  ;;  %v8833_v47 = vpop.f32.mrb[34].mxu1 }
 0x47a   : > { %v4266_v17 = vmul.f32 0.2, %v4146_v59  ;;  %v4149_v45 = vadd.f32 %v8833_v47, %v12249_v35  ;;  %v4140_v28 = vpop.f32.mrb[35].mxu1 }
 0x47b   : > { %v4264_v52 = vmul.f32 0.2, %v4138_v32  ;;  %v4141_v6 = vadd.f32 %v12249_v35, %v4140_v28 }
 0x47c   : > { %v4298_v10 = vmax.f32 %v4146_v59, %v4266_v17  ;;  %v4267_v24 = vmul.f32 0.2, %v4149_v45 }
 0x47d   : > { %v4296_v27 = vmax.f32 %v4138_v32, %v4264_v52  ;;  %v4265_v7 = vmul.f32 0.2, %v4141_v6  ;;  %v10264_v52 = vld [vmem:[%s14248_s6 + $0x60] ss:$16 sps:$4 sm:$0xff]  }
 0x47e   : > { %4370 = vst.msk [vmem:[#allocation3 + $0x31] sm:$0xff] %vm2595_vm2, %v4298_v10  ;;  %v4299_v21 = vmax.f32 %v4149_v45, %v4267_v24 }
 0x47f   : > { %4368 = vst.msk [vmem:[#allocation3 + $0x19] sm:$0xff] %vm2595_vm2, %v4296_v27  ;;  %v4297_v16 = vmax.f32 %v4141_v6, %v4265_v7  ;;  %v10266_v6 = vld [vmem:[%s14248_s6 + $0x64] ss:$16 sps:$4 sm:$0xff]   ;;  %v10267_v27 = vld [vmem:[%s14248_s6 + $0x68] ss:$16 sps:$4 sm:$0xff]  }
 0x480   : > { %4371 = vst.msk [vmem:[#allocation3 + $0x39] sm:$0xff] %vm2595_vm2, %v4299_v21  ;;  %v10269_v7 = vld [vmem:[%s14248_s6 + $0x6c] ss:$16 sps:$4 sm:$0xff]   ;;  %5924 = vmatprep.subr.bf16.mxu1 %v10266_v6 }
 0x481   : > { %4369 = vst.msk [vmem:[#allocation3 + $0x21] sm:$0xff] %vm2595_vm2, %v4297_v16  ;;  %6117 = vmatprep.subr.bf16.mxu0 %v10269_v7  ;;  %5925 = vmatpush1.bf16.msra.mxu1 %v10264_v52 }
 0x482   : > { %6118 = vmatpush1.bf16.msra.mxu0 %v10267_v27 }
 0x485   : > { %v4406_v56 = vld [vmem:[#allocation3 + $0x30] sm:$0xff] }
 0x486   : > { %v4592_v40 = vrot.slane %v4406_v56, 2  ;;  %v12265_v36 = vld [vmem:[#allocation3 + $0x18] sm:$0xff]  ;;  %v4512_v29 = vrot.slane %v4406_v56, 1 }
 0x487   : > { %v4407_v38 = vld [vmem:[#allocation3 + $0x38] sm:$0xff]  ;;  %v4408_v23 = vld [vmem:[#allocation3 + $0x40] sm:$0x3]  ;;  %v4507_v11 = vrot.slane %v12265_v36, 1  ;;  %v4587_v37 = vrot.slane %v12265_v36, 2 }
 0x488   : > { %v9615_v30 = vpack.i.bf16 %v4407_v38, %v4406_v56  ;;  %v4593_v44 = vrot.slane %v4407_v38, 2  ;;  %v4595_v62 = vrot.slane %v4408_v23, 2  ;;  %v12259_v42 = vld [vmem:[#allocation3 + $0x20] sm:$0xff]  ;;  %v4513_v60 = vrot.slane %v4407_v38, 1  ;;  %v4405_v61 = vld [vmem:[#allocation3 + $0x28] sm:$0x3] }
 0x489   : > { %v4515_v53 = vrot.slane %v4408_v23, 1  ;;  %v9620_v43 = vpack.i.bf16 %v12259_v42, %v12265_v36  ;;  %v4508_v51 = vrot.slane %v12259_v42, 1  ;;  %v4510_v48 = vrot.slane %v4405_v61, 1  ;;  %v5744_v23 = vld [vmem:[%s14248_s6 + $0x80] sm:$0xff] }
 0x48a   : > { %9616 = vrot.lane.b32.xlu0 %v9615_v30, %s10350_s13  ;;  %9611 = vrot.lane.b32.xlu1 %v9615_v30, %s10351_s15  ;;  %v4594_v57 = vsel %vm2853_vm6, %v4592_v40, %v4593_v44  ;;  %v4596_v13 = vsel %vm2853_vm6, %v4593_v44, %v4595_v62  ;;  %v4514_v22 = vsel %vm2772_vm4, %v4512_v29, %v4513_v60  ;;  %v4588_v18 = vrot.slane %v12259_v42, 2  ;;  %v5745_v40 = vld [vmem:[%s14248_s6 + $0x88] sm:$0xff] }
 0x48b   : > { %v12267_v58 = vpack.i.bf16 %v4596_v13, %v4594_v57  ;;  %v4516_v9 = vsel %vm2772_vm4, %v4513_v60, %v4515_v53  ;;  %v4509_v26 = vsel %vm2772_vm4, %v4507_v11, %v4508_v51  ;;  %v4511_v12 = vsel %vm2772_vm4, %v4508_v51, %v4510_v48 }
 0x48c   : > { %v9625_v4 = vpack.i.bf16 %v4516_v9, %v4514_v22  ;;  %v4590_v34 = vrot.slane %v4405_v61, 2  ;;  %v9655_v25 = vpack.i.bf16 %v4511_v12, %v4509_v26  ;;  %v4589_v0 = vsel %vm2853_vm6, %v4587_v37, %v4588_v18 }
 0x48d   : > { %v8183_v30 = vcombine.high %v5744_v23, %v5744_v23  ;;  %v8185_v44 = vcombine.high %v5745_v40, %v5745_v40  ;;  %v8182_v62 = vcombine.low %v5744_v23, %v5744_v23  ;;  %v8184_v60 = vcombine.low %v5745_v40, %v5745_v40 }
 0x48e   : > { %9621 = vrot.lane.b32.xlu0 %v9620_v43, %s10350_s13  ;;  %9641 = vrot.lane.b32.xlu1 %v12267_v58, %s10355_s21  ;;  %v4591_v39 = vsel %vm2853_vm6, %v4588_v18, %v4590_v34 }
 0x48f   : > { %v9660_v31 = vpack.i.bf16 %v4591_v39, %v4589_v0  ;;  %8186 = vmatprep.subr.msk.bf16.mxu1 %vm14270_vm7, %v8183_v30  ;;  %8203 = vmatprep.subr.msk.bf16.mxu0 %vm14270_vm7, %v8185_v44  ;;  %v5907_v53 = vsel %vm14270_vm7, %v8182_v62, 0  ;;  %v5913_v57 = vsel %vm14270_vm7, %v8184_v60, 0 }
 0x490   : > { %5927 = vmatpush1.bf16.msra.mxu1 %v5907_v53  ;;  %6120 = vmatpush1.bf16.msra.mxu0 %v5913_v57 }
 0x492   : > { %9626 = vrot.lane.b32.xlu0 %v9625_v4, %s10348_s26  ;;  %9646 = vrot.lane.b32.xlu1 %v9625_v4, %s10352_s16 }
 0x496   : > { %9631 = vrot.lane.b32.xlu0 %v12267_v58, %s10349_s28  ;;  %9656 = vrot.lane.b32.xlu1 %v9655_v25, %s10348_s26 }
 0x497   : > { %v8836_v19 = vpop.f32.mrb[36].mxu1 }
 0x498   : > { %v4162_v50 = vadd.f32 %v8836_v19, %v12249_v35  ;;  %v4153_v14 = vpop.f32.mrb[37].mxu1 }
 0x499   : > { %v4154_v59 = vadd.f32 %v12249_v35, %v4153_v14  ;;  %v8837_v46 = vpop.f32.mrb[38].mxu1 }
 0x49a   : > { %v4270_v32 = vmul.f32 0.2, %v4162_v50  ;;  %v4165_v47 = vadd.f32 %v8837_v46, %v12249_v35  ;;  %v4156_v17 = vpop.f32.mrb[39].mxu1  ;;  %9636 = vrot.lane.b32.xlu0 %v9625_v4, %s10354_s20  ;;  %9661 = vrot.lane.b32.xlu1 %v9660_v31, %s10349_s28 }
 0x49b   : > { %v4268_v45 = vmul.f32 0.2, %v4154_v59  ;;  %v4157_v28 = vadd.f32 %v12249_v35, %v4156_v17 }
 0x49c   : > { %v4302_v10 = vmax.f32 %v4162_v50, %v4270_v32  ;;  %v4271_v24 = vmul.f32 0.2, %v4165_v47 }
 0x49d   : > { %v4300_v21 = vmax.f32 %v4154_v59, %v4268_v45  ;;  %v4269_v16 = vmul.f32 0.2, %v4157_v28 }
 0x49e   : > { %4374 = vst.msk [vmem:[#allocation3 + $0x61] sm:$0xff] %vm2595_vm2, %v4302_v10  ;;  %v4303_v56 = vmax.f32 %v4165_v47, %v4271_v24  ;;  %9651 = vrot.lane.b32.xlu0 %v12267_v58, %s10353_s17  ;;  %9666 = vrot.lane.b32.xlu1 %v9655_v25, %s10352_s16 }
 0x49f   : > { %4372 = vst.msk [vmem:[#allocation3 + $0x49] sm:$0xff] %vm2595_vm2, %v4300_v21  ;;  %v4301_v38 = vmax.f32 %v4157_v28, %v4269_v16 }
 0x4a0   : > { %4375 = vst.msk [vmem:[#allocation3 + $0x69] sm:$0xff] %vm2595_vm2, %v4303_v56 }
 0x4a1   : > { %4373 = vst.msk [vmem:[#allocation3 + $0x51] sm:$0xff] %vm2595_vm2, %v4301_v38 }
 0x4a2   : > { %9671 = vrot.lane.b32.xlu0 %v9660_v31, %s10353_s17 }
 0x4a5   : > { %v4412_v13 = vld [vmem:[#allocation3 + $0x60] sm:$0xff] }
 0x4a6   : > { %v4409_v22 = vld [vmem:[#allocation3 + $0x48] sm:$0xff]  ;;  %v4522_v9 = vrot.slane %v4412_v13, 1  ;;  %v4602_v51 = vrot.slane %v4412_v13, 2 }
 0x4a7   : > { %v4413_v61 = vld [vmem:[#allocation3 + $0x68] sm:$0xff]  ;;  %v4414_v58 = vld [vmem:[#allocation3 + $0x70] sm:$0x3]  ;;  %v4517_v55 = vrot.slane %v4409_v22, 1  ;;  %v4597_v0 = vrot.slane %v4409_v22, 2 }
 0x4a8   : > { %v9680_v29 = vpack.i.bf16 %v4413_v61, %v4412_v13  ;;  %v4410_v5 = vld [vmem:[#allocation3 + $0x50] sm:$0xff]  ;;  %v4523_v2 = vrot.slane %v4413_v61, 1  ;;  %v4525_v43 = vrot.slane %v4414_v58, 1  ;;  %v4603_v49 = vrot.slane %v4413_v61, 2  ;;  %v4411_v15 = vld [vmem:[#allocation3 + $0x58] sm:$0x3] }
 0x4a9   : > { %v4605_v54 = vrot.slane %v4414_v58, 2  ;;  %v9690_v48 = vpack.i.bf16 %v4410_v5, %v4409_v22  ;;  %v4518_v18 = vrot.slane %v4410_v5, 1  ;;  %v4520_v34 = vrot.slane %v4411_v15, 1 }
 0x4aa   : > { %9681 = vrot.lane.b32.xlu0 %v9680_v29, %s10350_s13  ;;  %9676 = vrot.lane.b32.xlu1 %v9680_v29, %s10351_s15  ;;  %v4524_v11 = vsel %vm2772_vm4, %v4522_v9, %v4523_v2  ;;  %v4526_v4 = vsel %vm2772_vm4, %v4523_v2, %v4525_v43  ;;  %v4604_v8 = vsel %vm2853_vm6, %v4602_v51, %v4603_v49  ;;  %v4598_v63 = vrot.slane %v4410_v5, 2 }
 0x4ab   : > { %v4606_v41 = vsel %vm2853_vm6, %v4603_v49, %v4605_v54  ;;  %v9695_v26 = vpack.i.bf16 %v4526_v4, %v4524_v11  ;;  %v4519_v37 = vsel %vm2772_vm4, %v4517_v55, %v4518_v18  ;;  %v4521_v25 = vsel %vm2772_vm4, %v4518_v18, %v4520_v34 }
 0x4ac   : > { %v9710_v12 = vpack.i.bf16 %v4606_v41, %v4604_v8  ;;  %v4600_v1 = vrot.slane %v4411_v15, 2  ;;  %v9725_v19 = vpack.i.bf16 %v4521_v25, %v4519_v37  ;;  %v4599_v31 = vsel %vm2853_vm6, %v4597_v0, %v4598_v63 }
 0x4ae   : > { %9691 = vrot.lane.b32.xlu0 %v9690_v48, %s10350_s13  ;;  %9686 = vrot.lane.b32.xlu1 %v9690_v48, %s10351_s15  ;;  %v4601_v59 = vsel %vm2853_vm6, %v4598_v63, %v4600_v1 }
 0x4af   : > { %v9730_v6 = vpack.i.bf16 %v4601_v59, %v4599_v31 }
 0x4b2   : > { %9696 = vrot.lane.b32.xlu0 %v9695_v26, %s10348_s26  ;;  %9711 = vrot.lane.b32.xlu1 %v9710_v12, %s10355_s21 }
 0x4b6   : > { %9701 = vrot.lane.b32.xlu0 %v9710_v12, %s10349_s28  ;;  %9716 = vrot.lane.b32.xlu1 %v9695_v26, %s10352_s16 }
 0x4b7   : > { %v8840_v3 = vpop.f32.mrb[40].mxu1 }
 0x4b8   : > { %v4178_v39 = vadd.f32 %v8840_v3, %v12249_v35  ;;  %v4169_v33 = vpop.f32.mrb[41].mxu1 }
 0x4b9   : > { %v4170_v50 = vadd.f32 %v12249_v35, %v4169_v33  ;;  %v8841_v14 = vpop.f32.mrb[42].mxu1 }
 0x4ba   : > { %v4274_v46 = vmul.f32 0.2, %v4178_v39  ;;  %v4181_v32 = vadd.f32 %v8841_v14, %v12249_v35  ;;  %v4172_v47 = vpop.f32.mrb[43].mxu1  ;;  %9706 = vrot.lane.b32.xlu0 %v9695_v26, %s10354_s20  ;;  %9726 = vrot.lane.b32.xlu1 %v9725_v19, %s10348_s26 }
 0x4bb   : > { %v4272_v17 = vmul.f32 0.2, %v4170_v50  ;;  %v4173_v45 = vadd.f32 %v12249_v35, %v4172_v47 }
 0x4bc   : > { %v4306_v28 = vmax.f32 %v4178_v39, %v4274_v46  ;;  %v4275_v52 = vmul.f32 0.2, %v4181_v32 }
 0x4bd   : > { %v4304_v10 = vmax.f32 %v4170_v50, %v4272_v17  ;;  %v4273_v24 = vmul.f32 0.2, %v4173_v45 }
 0x4be   : > { %4378 = vst.msk [vmem:[#allocation3 + $0x91] sm:$0xff] %vm2595_vm2, %v4306_v28  ;;  %v4307_v27 = vmax.f32 %v4181_v32, %v4275_v52  ;;  %9721 = vrot.lane.b32.xlu0 %v9710_v12, %s10353_s17  ;;  %9731 = vrot.lane.b32.xlu1 %v9730_v6, %s10349_s28 }
 0x4bf   : > { %4376 = vst.msk [vmem:[#allocation3 + $0x79] sm:$0xff] %vm2595_vm2, %v4304_v10  ;;  %v4305_v7 = vmax.f32 %v4173_v45, %v4273_v24 }
 0x4c0   : > { %4379 = vst.msk [vmem:[#allocation3 + $0x99] sm:$0xff] %vm2595_vm2, %v4307_v27 }
 0x4c1   : > { %4377 = vst.msk [vmem:[#allocation3 + $0x81] sm:$0xff] %vm2595_vm2, %v4305_v7 }
 0x4c2   : > { %9736 = vrot.lane.b32.xlu0 %v9725_v19, %s10354_s20  ;;  %9741 = vrot.lane.b32.xlu1 %v9730_v6, %s10355_s21 }
 0x4c5   : > { %v4418_v21 = vld [vmem:[#allocation3 + $0x90] sm:$0xff] }
 0x4c6   : > { %9751 = vrot.lane.b32.xlu0 %v9730_v6, %s10353_s17  ;;  %9746 = vrot.lane.b32.xlu1 %v9725_v19, %s10352_s16  ;;  %v4415_v60 = vld [vmem:[#allocation3 + $0x78] sm:$0xff]  ;;  %v4532_v53 = vrot.slane %v4418_v21, 1  ;;  %v4612_v57 = vrot.slane %v4418_v21, 2 }
 0x4c7   : > { %v4419_v16 = vld [vmem:[#allocation3 + $0x98] sm:$0xff]  ;;  %v4420_v56 = vld [vmem:[#allocation3 + $0xa0] sm:$0x3]  ;;  %v4527_v9 = vrot.slane %v4415_v60, 1  ;;  %v4607_v41 = vrot.slane %v4415_v60, 2 }
 0x4c8   : > { %v9760_v38 = vpack.i.bf16 %v4419_v16, %v4418_v21  ;;  %v4416_v23 = vld [vmem:[#allocation3 + $0x80] sm:$0xff]  ;;  %v4533_v40 = vrot.slane %v4419_v16, 1  ;;  %v4535_v30 = vrot.slane %v4420_v56, 1  ;;  %v4613_v44 = vrot.slane %v4419_v16, 2  ;;  %v4417_v2 = vld [vmem:[#allocation3 + $0x88] sm:$0x3] }
 0x4c9   : > { %v4615_v62 = vrot.slane %v4420_v56, 2  ;;  %v9770_v13 = vpack.i.bf16 %v4416_v23, %v4415_v60  ;;  %v4528_v54 = vrot.slane %v4416_v23, 1  ;;  %v4530_v22 = vrot.slane %v4417_v2, 1 }
 0x4ca   : > { %9761 = vrot.lane.b32.xlu0 %v9760_v38, %s10350_s13  ;;  %9756 = vrot.lane.b32.xlu1 %v9760_v38, %s10351_s15  ;;  %v4534_v61 = vsel %vm2772_vm4, %v4532_v53, %v4533_v40  ;;  %v4536_v58 = vsel %vm2772_vm4, %v4533_v40, %v4535_v30  ;;  %v4614_v29 = vsel %vm2853_vm6, %v4612_v57, %v4613_v44  ;;  %v4608_v11 = vrot.slane %v4416_v23, 2 }
 0x4cb   : > { %v4616_v5 = vsel %vm2853_vm6, %v4613_v44, %v4615_v62  ;;  %v9775_v43 = vpack.i.bf16 %v4536_v58, %v4534_v61  ;;  %v4529_v51 = vsel %vm2772_vm4, %v4527_v9, %v4528_v54  ;;  %v4531_v48 = vsel %vm2772_vm4, %v4528_v54, %v4530_v22  ;;  %v12433_v62 = vpop.permute.xlu0 %9601 }
 0x4cc   : > { %v9790_v49 = vpack.i.bf16 %v4616_v5, %v4614_v29  ;;  %v4610_v4 = vrot.slane %v4417_v2, 2  ;;  %v9805_v12 = vpack.i.bf16 %v4531_v48, %v4529_v51  ;;  %v4609_v55 = vsel %vm2853_vm6, %v4607_v41, %v4608_v11 }
 0x4ce   : > { %9771 = vrot.lane.b32.xlu0 %v9770_v13, %s10350_s13  ;;  %9766 = vrot.lane.b32.xlu1 %v9770_v13, %s10351_s15  ;;  %v4611_v37 = vsel %vm2853_vm6, %v4608_v11, %v4610_v4 }
 0x4cf   : > { %v9810_v19 = vpack.i.bf16 %v4611_v37, %v4609_v55  ;;  %v12441_v5 = vpop.permute.xlu0 %9606 }
 0x4d2   : > { %9776 = vrot.lane.b32.xlu0 %v9775_v43, %s10348_s26  ;;  %9791 = vrot.lane.b32.xlu1 %v9790_v49, %s10355_s21 }
 0x4d6   : > { %9781 = vrot.lane.b32.xlu0 %v9790_v49, %s10349_s28  ;;  %9796 = vrot.lane.b32.xlu1 %v9775_v43, %s10352_s16 }
 0x4d7   : > { %v8844_v8 = vpop.f32.mrb[44].mxu1 }
 0x4d8   : > { %v4194_v15 = vadd.f32 %v8844_v8, %v12249_v35  ;;  %v4185_v26 = vpop.f32.mrb[45].mxu1 }
 0x4d9   : > { %v4186_v18 = vadd.f32 %v12249_v35, %v4185_v26  ;;  %v8845_v34 = vpop.f32.mrb[46].mxu1 }
 0x4da   : > { %v4278_v25 = vmul.f32 0.2, %v4194_v15  ;;  %v4197_v63 = vadd.f32 %v8845_v34, %v12249_v35  ;;  %v4188_v1 = vpop.f32.mrb[47].mxu1  ;;  %9786 = vrot.lane.b32.xlu0 %v9775_v43, %s10354_s20  ;;  %9806 = vrot.lane.b32.xlu1 %v9805_v12, %s10348_s26 }
 0x4db   : > { %v4276_v3 = vmul.f32 0.2, %v4186_v18  ;;  %v4189_v0 = vadd.f32 %v12249_v35, %v4188_v1 }
 0x4dc   : > { %v4310_v39 = vmax.f32 %v4194_v15, %v4278_v25  ;;  %v4279_v33 = vmul.f32 0.2, %v4197_v63 }
 0x4dd   : > { %v4308_v50 = vmax.f32 %v4186_v18, %v4276_v3  ;;  %v4277_v14 = vmul.f32 0.2, %v4189_v0 }
 0x4de   : > { %4382 = vst.msk [vmem:[#allocation3 + $0xc1] sm:$0xff] %vm2595_vm2, %v4310_v39  ;;  %v4311_v31 = vmax.f32 %v4197_v63, %v4279_v33  ;;  %9801 = vrot.lane.b32.xlu0 %v9790_v49, %s10353_s17  ;;  %9811 = vrot.lane.b32.xlu1 %v9810_v19, %s10349_s28 }
 0x4df   : > { %4380 = vst.msk [vmem:[#allocation3 + $0xa9] sm:$0xff] %vm2595_vm2, %v4308_v50  ;;  %v4309_v59 = vmax.f32 %v4189_v0, %v4277_v14 }
 0x4e0   : > { %4383 = vst.msk [vmem:[#allocation3 + $0xc9] sm:$0xff] %vm2595_vm2, %v4311_v31 }
 0x4e1   : > { %4381 = vst.msk [vmem:[#allocation3 + $0xb1] sm:$0xff] %vm2595_vm2, %v4309_v59  ;;  %v9604_v59 = vunpack.i.h.bf16 %v12433_v62 }
 0x4e2   : > { %9816 = vrot.lane.b32.xlu0 %v9805_v12, %s10354_s20  ;;  %9821 = vrot.lane.b32.xlu1 %v9810_v19, %s10355_s21 }
 0x4e5   : > { %v4424_v46 = vld [vmem:[#allocation3 + $0xc0] sm:$0xff] }
 0x4e6   : > { %9831 = vrot.lane.b32.xlu0 %v9810_v19, %s10353_s17  ;;  %9826 = vrot.lane.b32.xlu1 %v9805_v12, %s10352_s16  ;;  %v4421_v24 = vld [vmem:[#allocation3 + $0xa8] sm:$0xff]  ;;  %v4542_v27 = vrot.slane %v4424_v46, 1  ;;  %v4622_v7 = vrot.slane %v4424_v46, 2 }
 0x4e7   : > { %v4425_v32 = vld [vmem:[#allocation3 + $0xc8] sm:$0xff]  ;;  %v4426_v47 = vld [vmem:[#allocation3 + $0xd0] sm:$0x3]  ;;  %v4537_v57 = vrot.slane %v4421_v24, 1  ;;  %v4617_v43 = vrot.slane %v4421_v24, 2 }
 0x4e8   : > { %v9840_v17 = vpack.i.bf16 %v4425_v32, %v4424_v46  ;;  %v4422_v45 = vld [vmem:[#allocation3 + $0xb0] sm:$0xff]  ;;  %v4543_v28 = vrot.slane %v4425_v32, 1  ;;  %v4545_v52 = vrot.slane %v4426_v47, 1  ;;  %v4623_v6 = vrot.slane %v4425_v32, 2  ;;  %v4423_v40 = vld [vmem:[#allocation3 + $0xb8] sm:$0x3] }
 0x4e9   : > { %v4625_v10 = vrot.slane %v4426_v47, 2  ;;  %v9850_v21 = vpack.i.bf16 %v4422_v45, %v4421_v24  ;;  %v4538_v60 = vrot.slane %v4422_v45, 1  ;;  %v4540_v53 = vrot.slane %v4423_v40, 1 }
 0x4ea   : > { %9841 = vrot.lane.b32.xlu0 %v9840_v17, %s10350_s13  ;;  %9836 = vrot.lane.b32.xlu1 %v9840_v17, %s10351_s15  ;;  %v4544_v16 = vsel %vm2772_vm4, %v4542_v27, %v4543_v28  ;;  %v4546_v56 = vsel %vm2772_vm4, %v4543_v28, %v4545_v52  ;;  %v4624_v38 = vsel %vm2853_vm6, %v4622_v7, %v4623_v6  ;;  %v4618_v58 = vrot.slane %v4422_v45, 2  ;;  %v10300_v7 = vld [vmem:[#allocation3 + $0x8] sm:$0xff] }
 0x4eb   : > { %v4626_v23 = vsel %vm2853_vm6, %v4623_v6, %v4625_v10  ;;  %v9855_v30 = vpack.i.bf16 %v4546_v56, %v4544_v16  ;;  %v4539_v13 = vsel %vm2772_vm4, %v4537_v57, %v4538_v60  ;;  %v4541_v61 = vsel %vm2772_vm4, %v4538_v60, %v4540_v53  ;;  %v10301_v16 = vld [vmem:[#allocation3] sm:$0xff] }
 0x4ec   : > { %v9865_v44 = vpack.i.bf16 %v4626_v23, %v4624_v38  ;;  %v4620_v29 = vrot.slane %v4423_v40, 2  ;;  %v9885_v22 = vpack.i.bf16 %v4541_v61, %v4539_v13  ;;  %v4619_v48 = vsel %vm2853_vm6, %v4617_v43, %v4618_v58 }
 0x4ed   : > { %v9603_v46 = vunpack.i.l.bf16 %v12433_v62  ;;  %v9608_v24 = vunpack.i.l.bf16 %v12441_v5  ;;  %v9609_v38 = vunpack.i.h.bf16 %v12441_v5 }
 0x4ee   : > { %9851 = vrot.lane.b32.xlu0 %v9850_v21, %s10350_s13  ;;  %9846 = vrot.lane.b32.xlu1 %v9850_v21, %s10351_s15  ;;  %v4621_v11 = vsel %vm2853_vm6, %v4618_v58, %v4620_v29  ;;  %v5457_v21 = vsel %vm2595_vm2, %v10300_v7, %v9604_v59 }
 0x4ef   : > { %v9890_v37 = vpack.i.bf16 %v4621_v11, %v4619_v48  ;;  %v5456_v56 = vsel %vm2595_vm2, %v10301_v16, %v9603_v46  ;;  %v5489_v29 = vsel %vm3760_vm8, %v5457_v21, %v9609_v38 }
 0x4f0   : > { %v5488_v57 = vsel %vm3760_vm8, %v5456_v56, %v9608_v24 }
 0x4f2   : > { %9856 = vrot.lane.b32.xlu0 %v9855_v30, %s10348_s26  ;;  %9866 = vrot.lane.b32.xlu1 %v9865_v44, %s10355_s21 }
 0x4f6   : > { %9861 = vrot.lane.b32.xlu0 %v9855_v30, %s10354_s20  ;;  %9871 = vrot.lane.b32.xlu1 %v9855_v30, %s10352_s16 }
 0x4f7   : > { %v8848_v2 = vpop.f32.mrb[48].mxu1 }
 0x4f8   : > { %v4210_v49 = vadd.f32 %v8848_v2, %v12249_v35  ;;  %v4201_v54 = vpop.f32.mrb[49].mxu1 }
 0x4f9   : > { %v4202_v9 = vadd.f32 %v12249_v35, %v4201_v54  ;;  %v8849_v51 = vpop.f32.mrb[50].mxu1 }
 0x4fa   : > { %v4282_v4 = vmul.f32 0.2, %v4210_v49  ;;  %v4213_v8 = vadd.f32 %v8849_v51, %v12249_v35  ;;  %v4204_v41 = vpop.f32.mrb[51].mxu1  ;;  %9876 = vrot.lane.b32.xlu0 %v9865_v44, %s10353_s17  ;;  %9886 = vrot.lane.b32.xlu1 %v9885_v22, %s10348_s26 }
 0x4fb   : > { %v4280_v15 = vmul.f32 0.2, %v4202_v9  ;;  %v4205_v26 = vadd.f32 %v12249_v35, %v4204_v41 }
 0x4fc   : > { %v4314_v12 = vmax.f32 %v4210_v49, %v4282_v4  ;;  %v4283_v18 = vmul.f32 0.2, %v4213_v8  ;;  %v12451_v34 = vpop.permute.xlu0 %9616  ;;  %v12453_v55 = vpop.permute.xlu1 %9611 }
 0x4fd   : > { %v4312_v25 = vmax.f32 %v4202_v9, %v4280_v15  ;;  %v4281_v63 = vmul.f32 0.2, %v4205_v26  ;;  %v9614_v5 = vunpack.i.h.bf16 %v12453_v55 }
 0x4fe   : > { %4386 = vst.msk [vmem:[#allocation3 + $0xf1] sm:$0xff] %vm2595_vm2, %v4314_v12  ;;  %v4315_v1 = vmax.f32 %v4213_v8, %v4283_v18  ;;  %9881 = vrot.lane.b32.xlu0 %v9865_v44, %s10349_s28  ;;  %9891 = vrot.lane.b32.xlu1 %v9890_v37, %s10349_s28 }
 0x4ff   : > { %4384 = vst.msk [vmem:[#allocation3 + $0xd9] sm:$0xff] %vm2595_vm2, %v4312_v25  ;;  %v4313_v3 = vmax.f32 %v4205_v26, %v4281_v63 }
 0x500   : > { %4387 = vst.msk [vmem:[#allocation3 + $0xf9] sm:$0xff] %vm2595_vm2, %v4315_v1  ;;  %v9622_v0 = vpop.permute.xlu0 %9621  ;;  %v12460_v39 = vpop.permute.xlu1 %9641 }
 0x501   : > { %4385 = vst.msk [vmem:[#allocation3 + $0xe1] sm:$0xff] %vm2595_vm2, %v4313_v3  ;;  %v9624_v13 = vunpack.i.h.bf16 %v9622_v0  ;;  %v9623_v61 = vunpack.i.l.bf16 %v9622_v0  ;;  %v9644_v26 = vunpack.i.h.bf16 %v12460_v39  ;;  %v9643_v12 = vunpack.i.l.bf16 %v12460_v39 }
 0x502   : > { %9896 = vrot.lane.b32.xlu0 %v9885_v22, %s10354_s20  ;;  %9901 = vrot.lane.b32.xlu1 %v9890_v37, %s10355_s21 }
 0x503   : > { %v5520_v41 = vsel %vm3793_vm9, %v5488_v57, %v9623_v61  ;;  %v5521_v15 = vsel %vm3793_vm9, %v5489_v29, %v9624_v13 }
 0x504   : > { %v12465_v33 = vpop.permute.xlu0 %9626  ;;  %v12467_v19 = vpop.permute.xlu1 %9646 }
 0x505   : > { %v4430_v50 = vld [vmem:[#allocation3 + $0xf0] sm:$0xff] }
 0x506   : > { %9911 = vrot.lane.b32.xlu0 %v9890_v37, %s10353_s17  ;;  %9906 = vrot.lane.b32.xlu1 %v9885_v22, %s10352_s16  ;;  %v12479_v28 = vld [vmem:[#allocation3 + $0xd8] sm:$0xff]  ;;  %v4552_v27 = vrot.slane %v4430_v50, 1  ;;  %v4632_v58 = vrot.slane %v4430_v50, 2  ;;  %v9613_v22 = vunpack.i.l.bf16 %v12453_v55 }
 0x507   : > { %v4431_v14 = vld [vmem:[#allocation3 + $0xf8] sm:$0xff]  ;;  %v4432_v31 = vld [vmem:[#allocation3 + $0x100] sm:$0x3]  ;;  %v4547_v8 = vrot.slane %v12479_v28, 1  ;;  %v4627_v63 = vrot.slane %v12479_v28, 2 }
 0x508   : > { %v12473_v32 = vpop.permute.xlu0 %9631  ;;  %v12475_v47 = vpop.permute.xlu1 %9656  ;;  %v9915_v17 = vpack.i.bf16 %v4431_v14, %v4430_v50  ;;  %v12477_v45 = vld [vmem:[#allocation3 + $0xe0] sm:$0xff]  ;;  %v4553_v52 = vrot.slane %v4431_v14, 1  ;;  %v4555_v6 = vrot.slane %v4432_v31, 1  ;;  %v4633_v62 = vrot.slane %v4431_v14, 2  ;;  %v12494_v53 = vld [vmem:[#allocation3 + $0xe8] sm:$0x3] }
 0x509   : > { %v9925_v10 = vpack.i.bf16 %v12477_v45, %v12479_v28  ;;  %v4635_v60 = vrot.slane %v4432_v31, 2  ;;  %v4548_v54 = vrot.slane %v12477_v45, 1  ;;  %v4550_v48 = vrot.slane %v12494_v53, 1 }
 0x50a   : > { %9916 = vrot.lane.b32.xlu0 %v9915_v17, %s10351_s15  ;;  %v4554_v30 = vsel %vm2772_vm4, %v4552_v27, %v4553_v52  ;;  %v4556_v44 = vsel %vm2772_vm4, %v4553_v52, %v4555_v6  ;;  %v4634_v9 = vsel %vm2853_vm6, %v4632_v58, %v4633_v62  ;;  %v4628_v50 = vrot.slane %v12477_v45, 2 }
 0x50b   : > { %9926 = vrot.lane.b32.xlu1 %v9925_v10, %s10351_s15  ;;  %v9935_v49 = vpack.i.bf16 %v4556_v44, %v4554_v30  ;;  %v4636_v51 = vsel %vm2853_vm6, %v4633_v62, %v4635_v60  ;;  %v4549_v25 = vsel %vm2772_vm4, %v4547_v8, %v4548_v54  ;;  %v4551_v0 = vsel %vm2772_vm4, %v4548_v54, %v4550_v48 }
 0x50c   : > { %v9637_v23 = vpop.permute.xlu0 %9636  ;;  %v12489_v40 = vpop.permute.xlu1 %9661  ;;  %v9945_v37 = vpack.i.bf16 %v4636_v51, %v4634_v9  ;;  %v4630_v28 = vrot.slane %v12494_v53, 2  ;;  %v9965_v24 = vpack.i.bf16 %v4551_v0, %v4549_v25  ;;  %v4629_v56 = vsel %vm2853_vm6, %v4627_v63, %v4628_v50 }
 0x50d   : > { %v9639_v18 = vunpack.i.h.bf16 %v9637_v23  ;;  %v9638_v14 = vunpack.i.l.bf16 %v9637_v23  ;;  %v9658_v54 = vunpack.i.l.bf16 %v12475_v47  ;;  %v9663_v9 = vunpack.i.l.bf16 %v12489_v40 }
 0x50e   : > { %9921 = vrot.lane.b32.xlu0 %v9915_v17, %s10350_s13  ;;  %v4631_v13 = vsel %vm2853_vm6, %v4628_v50, %v4630_v28  ;;  %v9659_v48 = vunpack.i.h.bf16 %v12475_v47  ;;  %v9664_v8 = vunpack.i.h.bf16 %v12489_v40  ;;  %v9618_v47 = vunpack.i.l.bf16 %v12451_v34 }
 0x50f   : > { %9931 = vrot.lane.b32.xlu1 %v9925_v10, %s10350_s13  ;;  %v9634_v25 = vunpack.i.h.bf16 %v12473_v32  ;;  %v9633_v0 = vunpack.i.l.bf16 %v12473_v32 }
 0x510   : > { %v12500_v2 = vpop.permute.xlu0 %9651  ;;  %v9667_v43 = vpop.permute.xlu1 %9666 }
 0x511   : > { %v9669_v11 = vunpack.i.h.bf16 %v9667_v43  ;;  %v9668_v4 = vunpack.i.l.bf16 %v9667_v43 }
 0x512   : > { %9936 = vrot.lane.b32.xlu0 %v9935_v49, %s10348_s26 }
 0x513   : > { %9941 = vrot.lane.b32.xlu1 %v9935_v49, %s10354_s20  ;;  %v5553_v31 = vsel %vm3826_vm10, %v5521_v15, %v9669_v11  ;;  %v5552_v39 = vsel %vm3826_vm10, %v5520_v41, %v9668_v4  ;;  %v5458_v41 = vsel %vm2595_vm2, %v12265_v36, %v9658_v54  ;;  %v5459_v15 = vsel %vm2595_vm2, %v12259_v42, %v9659_v48 }
 0x514   : > { %v9672_v55 = vpop.permute.xlu0 %9671  ;;  %v5491_v40 = vsel %vm3760_vm8, %v5459_v15, %v9664_v8  ;;  %v9648_v42 = vunpack.i.l.bf16 %v12467_v19 }
 0x515   : > { %v9674_v1 = vunpack.i.h.bf16 %v9672_v55  ;;  %v9673_v3 = vunpack.i.l.bf16 %v9672_v55  ;;  %v9629_v55 = vunpack.i.h.bf16 %v12465_v33 }
 0x516   : > { %9946 = vrot.lane.b32.xlu0 %v9945_v37, %s10355_s21 }
 0x517   : > { %v5584_v59 = vsel %vm14272_vm11, %v5552_v39, %v9673_v3  ;;  %v5585_v46 = vsel %vm14272_vm11, %v5553_v31, %v9674_v1  ;;  %v8852_v17 = vpop.f32.mrb[52].mxu1  ;;  %9951 = vrot.lane.b32.xlu1 %v9935_v49, %s10352_s16 }
 0x518   : > { %v5616_v52 = vsel %vm3892_vm12, %v5584_v59, %v9613_v22  ;;  %v5617_v6 = vsel %vm3892_vm12, %v5585_v46, %v9614_v5  ;;  %v4226_v45 = vadd.f32 %v8852_v17, %v12249_v35  ;;  %v4217_v10 = vpop.f32.mrb[53].mxu1  ;;  %v9975_v22 = vpack.i.bf16 %v4631_v13, %v4629_v56 }
 0x519   : > { %v5648_v27 = vsel %vm3925_vm13, %v5616_v52, %v9638_v14  ;;  %v5649_v7 = vsel %vm3925_vm13, %v5617_v6, %v9639_v18  ;;  %v4218_v21 = vadd.f32 %v12249_v35, %v4217_v10  ;;  %v8853_v16 = vpop.f32.mrb[54].mxu1  ;;  %v9619_v18 = vunpack.i.h.bf16 %v12451_v34 }
 0x51a   : > { %v5680_v38 = vsel %vm14273_vm14, %v5648_v27, %v9643_v12  ;;  %v5681_v23 = vsel %vm14273_vm14, %v5649_v7, %v9644_v26  ;;  %v4286_v30 = vmul.f32 0.2, %v4226_v45  ;;  %v4229_v44 = vadd.f32 %v8853_v16, %v12249_v35  ;;  %v4220_v62 = vpop.f32.mrb[55].mxu1  ;;  %9956 = vrot.lane.b32.xlu0 %v9945_v37, %s10353_s17 }
 0x51b   : > { %v5712_v60 = vpack.c.bf16 %v5681_v23, %v5680_v38  ;;  %v4284_v53 = vmul.f32 0.2, %v4218_v21  ;;  %v4221_v57 = vadd.f32 %v12249_v35, %v4220_v62  ;;  %9966 = vrot.lane.b32.xlu1 %v9965_v24, %s10348_s26  ;;  %v5523_v50 = vsel %vm3793_vm9, %v5491_v40, %v9619_v18 }
 0x51c   : > { %v4318_v61 = vmax.f32 %v4226_v45, %v4286_v30  ;;  %v4287_v58 = vmul.f32 0.2, %v4229_v44  ;;  %v12539_v29 = vpop.permute.xlu0 %9681  ;;  %v12541_v5 = vpop.permute.xlu1 %9676  ;;  %v9653_v34 = vunpack.i.l.bf16 %v12500_v2  ;;  %v9649_v59 = vunpack.i.h.bf16 %v12467_v19  ;;  %v10302_v45 = vld [vmem:[#allocation3 + $0x38] sm:$0xff] }
 0x51d   : > { %v4316_v43 = vmax.f32 %v4218_v21, %v4284_v53  ;;  %v4285_v49 = vmul.f32 0.2, %v4221_v57  ;;  %8187 = vmatmul.mubr.msk.bf16.vlgmr.msra.gmra.mrb[64].mxu1 %vm4050_vm15, %v5712_v60  ;;  %8204 = vmatmul.mubr.msk.bf16.vlgmr.msra.gmra.mrb[32].mxu0 %vm4050_vm15, %v5712_v60  ;;  %v9654_v52 = vunpack.i.h.bf16 %v12500_v2  ;;  %v5461_v10 = vsel %vm2595_vm2, %v10302_v45, %v9629_v55 }
 0x51e   : > { %4390 = vst.msk [vmem:[#allocation3 + $0x121] sm:$0xff] %vm2595_vm2, %v4318_v61  ;;  %v4319_v35 = vmax.f32 %v4229_v44, %v4287_v58  ;;  %9961 = vrot.lane.b32.xlu0 %v9945_v37, %s10349_s28  ;;  %5960 = vmatprep.mubr.bf16.mxu1 %v12243_v20  ;;  %v9628_v37 = vunpack.i.l.bf16 %v12465_v33  ;;  %v5555_v19 = vsel %vm3826_vm10, %v5523_v50, %v9649_v59  ;;  %v9679_v53 = vunpack.i.h.bf16 %v12541_v5 }
 0x51f   : > { %4388 = vst.msk [vmem:[#allocation3 + $0x109] sm:$0xff] %vm2595_vm2, %v4316_v43  ;;  %v4317_v51 = vmax.f32 %v4221_v57, %v4285_v49  ;;  %6153 = vmatprep.mubr.bf16.mxu0 %v12243_v20  ;;  %9976 = vrot.lane.b32.xlu1 %v9975_v22, %s10355_s21  ;;  %v5490_v20 = vsel %vm3760_vm8, %v5458_v41, %v9663_v9  ;;  %v9678_v61 = vunpack.i.l.bf16 %v12541_v5 }
 0x520   : > { %4391 = vst.msk [vmem:[#allocation3 + $0x129] sm:$0xff] %vm2595_vm2, %v4319_v35  ;;  %v12555_v11 = vpop.permute.xlu0 %9691  ;;  %v12557_v4 = vpop.permute.xlu1 %9686  ;;  %v5522_v36 = vsel %vm3793_vm9, %v5490_v20, %v9618_v47  ;;  %v12606_v16 = vsel %vm3760_vm8, %v5461_v10, %v9634_v25  ;;  %v5587_v60 = vsel %vm14272_vm11, %v5555_v19, %v9654_v52 }
 0x521   : > { %4389 = vst.msk [vmem:[#allocation3 + $0x111] sm:$0xff] %vm2595_vm2, %v4317_v51  ;;  %v5554_v46 = vsel %vm3826_vm10, %v5522_v36, %v9648_v42  ;;  %v9688_v57 = vunpack.i.l.bf16 %v12557_v4  ;;  %v9694_v58 = vunpack.i.h.bf16 %v12555_v11  ;;  %v9689_v43 = vunpack.i.h.bf16 %v12557_v4 }
 0x522   : > { %9971 = vrot.lane.b32.xlu0 %v9965_v24, %s10354_s20  ;;  %v5586_v2 = vsel %vm14272_vm11, %v5554_v46, %v9653_v34  ;;  %v9693_v35 = vunpack.i.l.bf16 %v12555_v11 }
 0x523   : > { %9986 = vrot.lane.b32.xlu1 %v9975_v22, %s10353_s17  ;;  %v5618_v36 = vsel %vm3892_vm12, %v5586_v2, %v9688_v57  ;;  %v5619_v25 = vsel %vm3892_vm12, %v5587_v60, %v9689_v43 }
 0x524   : > { %v12569_v26 = vpop.permute.xlu0 %9696  ;;  %v12571_v12 = vpop.permute.xlu1 %9711 }
 0x525   : > { %v4436_v63 = vld [vmem:[#allocation3 + $0x120] sm:$0xff] }
 0x526   : > { %9981 = vrot.lane.b32.xlu0 %v9965_v24, %s10352_s16  ;;  %v12593_v17 = vld [vmem:[#allocation3 + $0x108] sm:$0xff]  ;;  %v10303_v24 = vld [vmem:[#allocation3 + $0x30] sm:$0xff]  ;;  %v4562_v7 = vrot.slane %v4436_v63, 1  ;;  %v4642_v54 = vrot.slane %v4436_v63, 2 }
 0x527   : > { %v4437_v1 = vld [vmem:[#allocation3 + $0x128] sm:$0xff]  ;;  %v4438_v3 = vld [vmem:[#allocation3 + $0x130] sm:$0x3]  ;;  %9991 = vrot.lane.b32.xlu1 %v9975_v22, %s10349_s28  ;;  %v5460_v27 = vsel %vm2595_vm2, %v10303_v24, %v9628_v37 }
 0x528   : > { %v12585_v14 = vpop.permute.xlu0 %9701  ;;  %v12587_v31 = vpop.permute.xlu1 %9716  ;;  %v9995_v33 = vpack.i.bf16 %v4437_v1, %v4436_v63  ;;  %v12589_v39 = vld [vmem:[#allocation3 + $0x110] sm:$0xff]  ;;  %v4563_v32 = vrot.slane %v4437_v1, 1  ;;  %v4565_v28 = vrot.slane %v4438_v3, 1  ;;  %v12603_v21 = vsel %vm3760_vm8, %v5460_v27, %v9633_v0  ;;  %v12620_v13 = vld [vmem:[#allocation3 + $0x118] sm:$0x3] }
 0x529   : > { %v10005_v6 = vpack.i.bf16 %v12589_v39, %v12593_v17  ;;  %v4643_v44 = vrot.slane %v4437_v1, 2  ;;  %v4645_v62 = vrot.slane %v4438_v3, 2  ;;  %v12629_v22 = vld [vmem:[%s14247_s5] ss:$0 sm:$0xff]  ;;  %v4558_v41 = vrot.slane %v12589_v39, 1 }
 0x52a   : > { %9996 = vrot.lane.b32.xlu0 %v9995_v33, %s10351_s15  ;;  %v4564_v23 = vsel %vm2772_vm4, %v4562_v7, %v4563_v32  ;;  %v4566_v30 = vsel %vm2772_vm4, %v4563_v32, %v4565_v28  ;;  %v4560_v18 = vrot.slane %v12620_v13, 1  ;;  %v4557_v3 = vrot.slane %v12593_v17, 1 }
 0x52b   : > { %10006 = vrot.lane.b32.xlu1 %v10005_v6, %s10351_s15  ;;  %v10015_v8 = vpack.i.bf16 %v4566_v30, %v4564_v23  ;;  %v4644_v15 = vsel %vm2853_vm6, %v4642_v54, %v4643_v44  ;;  %v4646_v40 = vsel %vm2853_vm6, %v4643_v44, %v4645_v62  ;;  %v4638_v7 = vrot.slane %v12589_v39, 2 }
 0x52c   : > { %v12610_v56 = vpop.permute.xlu0 %9706  ;;  %v12612_v38 = vpop.permute.xlu1 %9726  ;;  %v4559_v28 = vsel %vm2772_vm4, %v4557_v3, %v4558_v41  ;;  %v4561_v52 = vsel %vm2772_vm4, %v4558_v41, %v4560_v18  ;;  %v4640_v2 = vrot.slane %v12620_v13, 2  ;;  %v4637_v62 = vrot.slane %v12593_v17, 2 }
 0x52d   : > { %v5525_v17 = vsel %vm3793_vm9, %v12606_v16, %v9694_v58  ;;  %v9709_v11 = vunpack.i.h.bf16 %v12610_v56  ;;  %v9708_v16 = vunpack.i.l.bf16 %v12610_v56 }
 0x52e   : > { %10001 = vrot.lane.b32.xlu0 %v9995_v33, %s10350_s13  ;;  %v10025_v33 = vpack.i.bf16 %v4646_v40, %v4644_v15  ;;  %v4639_v41 = vsel %vm2853_vm6, %v4637_v62, %v4638_v7 }
 0x52f   : > { %v8856_v49 = vpop.f32.mrb[56].mxu1  ;;  %10011 = vrot.lane.b32.xlu1 %v10005_v6, %s10350_s13 }
 0x530   : > { %v4242_v9 = vadd.f32 %v12629_v22, %v8856_v49  ;;  %v12633_v51 = vpop.permute.xlu0 %9721  ;;  %v4233_v48 = vpop.f32.mrb[57].mxu1 }
 0x531   : > { %v4234_v4 = vadd.f32 %v12629_v22, %v4233_v48  ;;  %v12637_v20 = vpop.permute.xlu1 %9731  ;;  %v8857_v47 = vpop.f32.mrb[58].mxu1 }
 0x532   : > { %v4290_v55 = vmul.f32 0.2, %v4242_v9  ;;  %v4245_v37 = vadd.f32 %v12629_v22, %v8857_v47  ;;  %10016 = vrot.lane.b32.xlu0 %v10015_v8, %s10348_s26  ;;  %v4236_v42 = vpop.f32.mrb[59].mxu1  ;;  %v9714_v47 = vunpack.i.h.bf16 %v12571_v12 }
 0x533   : > { %v4288_v63 = vmul.f32 0.2, %v4234_v4  ;;  %v4237_v1 = vadd.f32 %v12629_v22, %v4236_v42  ;;  %10021 = vrot.lane.b32.xlu1 %v10015_v8, %s10354_s20 }
 0x534   : > { %v4322_v0 = vmax.f32 %v4242_v9, %v4290_v55  ;;  %v4291_v50 = vmul.f32 0.2, %v4245_v37  ;;  %v9737_v34 = vpop.permute.xlu0 %9736  ;;  %v10045_v9 = vpack.i.bf16 %v4561_v52, %v4559_v28  ;;  %v9713_v55 = vunpack.i.l.bf16 %v12571_v12 }
 0x535   : > { %v4320_v59 = vmax.f32 %v4234_v4, %v4288_v63  ;;  %v4289_v46 = vmul.f32 0.2, %v4237_v1  ;;  %v9742_v32 = vpop.permute.xlu1 %9741  ;;  %v9739_v45 = vunpack.i.h.bf16 %v9737_v34  ;;  %v9738_v10 = vunpack.i.l.bf16 %v9737_v34 }
 0x536   : > { %4394 = vst.msk [vmem:[#allocation3 + $0x151] sm:$0xff] %vm2595_vm2, %v4322_v0  ;;  %v4323_v6 = vmax.f32 %v4245_v37, %v4291_v50  ;;  %v9744_v24 = vunpack.i.h.bf16 %v9742_v32  ;;  %10026 = vrot.lane.b32.xlu0 %v10025_v33, %s10355_s21  ;;  %v9743_v19 = vunpack.i.l.bf16 %v9742_v32  ;;  %v4641_v4 = vsel %vm2853_vm6, %v4638_v7, %v4640_v2  ;;  %v10306_v2 = vld [vmem:[#allocation3 + $0x50] sm:$0xff] }
 0x537   : > { %4392 = vst.msk [vmem:[#allocation3 + $0x139] sm:$0xff] %vm2595_vm2, %v4320_v59  ;;  %v4321_v27 = vmax.f32 %v4237_v1, %v4289_v46  ;;  %v5650_v23 = vsel %vm3925_vm13, %v5618_v36, %v9738_v10  ;;  %v5651_v30 = vsel %vm3925_vm13, %v5619_v25, %v9739_v45  ;;  %10031 = vrot.lane.b32.xlu1 %v10015_v8, %s10352_s16  ;;  %v12688_v36 = vld [vmem:[%s10423_s14] sm:$0xff]  ;;  %v9729_v0 = vunpack.i.h.bf16 %v12612_v38 }
 0x538   : > { %4395 = vst.msk [vmem:[#allocation3 + $0x159] sm:$0xff] %vm2595_vm2, %v4323_v6  ;;  %v9752_v44 = vpop.permute.xlu0 %9751  ;;  %v5682_v60 = vsel %vm14273_vm14, %v5650_v23, %v9743_v19  ;;  %v5683_v57 = vsel %vm14273_vm14, %v5651_v30, %v9744_v24  ;;  %v5524_v8 = vsel %vm3793_vm9, %v12603_v21, %v9693_v35  ;;  %v10055_v42 = vpack.i.bf16 %v4641_v4, %v4639_v41  ;;  %v10307_v30 = vld [vmem:[#allocation3 + $0x48] sm:$0xff] }
 0x539   : > { %4393 = vst.msk [vmem:[#allocation3 + $0x141] sm:$0xff] %vm2595_vm2, %v4321_v27  ;;  %v9754_v39 = vunpack.i.h.bf16 %v9752_v44  ;;  %v9753_v43 = vunpack.i.l.bf16 %v9752_v44  ;;  %v9747_v13 = vpop.permute.xlu1 %9746  ;;  %v5713_v48 = vpack.c.bf16 %v5683_v57, %v5682_v60  ;;  %v9728_v50 = vunpack.i.l.bf16 %v12612_v38 }
 0x53a   : > { %v9749_v49 = vunpack.i.h.bf16 %v9747_v13  ;;  %v9748_v54 = vunpack.i.l.bf16 %v9747_v13  ;;  %10036 = vrot.lane.b32.xlu0 %v10025_v33, %s10353_s17  ;;  %v9733_v59 = vunpack.i.l.bf16 %v12637_v20  ;;  %v9734_v52 = vunpack.i.h.bf16 %v12637_v20 }
 0x53b   : > { %10046 = vrot.lane.b32.xlu1 %v10045_v9, %s10348_s26  ;;  %8188 = vmatmul.mubr.msk.bf16.gmra.mrb[68].mxu1 %vm4050_vm15, %v5713_v48  ;;  %v9699_v27 = vunpack.i.h.bf16 %v12569_v26  ;;  %v5463_v23 = vsel %vm2595_vm2, %v10306_v2, %v9729_v0  ;;  %v5462_v44 = vsel %vm2595_vm2, %v10307_v30, %v9728_v50  ;;  %v10309_v0 = vld [vmem:[#allocation3 + $0x60] sm:$0xff] }
 0x53c   : > { %v5557_v15 = vsel %vm3826_vm10, %v5525_v17, %v9749_v49  ;;  %v5556_v40 = vsel %vm3826_vm10, %v5524_v8, %v9748_v54  ;;  %v12678_v21 = vpop.permute.xlu0 %9761  ;;  %8205 = vmatmul.mubr.msk.bf16.gmra.mrb[36].mxu0 %vm4050_vm15, %v5713_v48  ;;  %5970 = vmatprep.mubr.bf16.mxu1 %v12688_v36 }
 0x53d   : > { %v5589_v58 = vsel %vm14272_vm11, %v5557_v15, %v9754_v39  ;;  %v5588_v35 = vsel %vm14272_vm11, %v5556_v40, %v9753_v43  ;;  %v12685_v18 = vpop.permute.xlu1 %9756  ;;  %6163 = vmatprep.mubr.bf16.mxu0 %v12688_v36  ;;  %v4442_v57 = vld [vmem:[#allocation3 + $0x150] sm:$0xff]  ;;  %v5494_v43 = vsel %vm3760_vm8, %v5462_v44, %v9733_v59  ;;  %v9683_v15 = vunpack.i.l.bf16 %v12539_v29 }
 0x53e   : > { %v5620_v37 = vsel %vm3892_vm12, %v5588_v35, %v9678_v61  ;;  %v5621_v56 = vsel %vm3892_vm12, %v5589_v58, %v9679_v53  ;;  %10041 = vrot.lane.b32.xlu0 %v10025_v33, %s10349_s28  ;;  %v12746_v17 = vld [vmem:[#allocation3 + $0x138] sm:$0xff]  ;;  %v4572_v58 = vrot.slane %v4442_v57, 1  ;;  %v10308_v35 = vld [vmem:[#allocation3 + $0x68] sm:$0xff]  ;;  %v4652_v59 = vrot.slane %v4442_v57, 2 }
 0x53f   : > { %v5652_v25 = vsel %vm3925_vm13, %v5620_v37, %v9708_v16  ;;  %v5653_v63 = vsel %vm3925_vm13, %v5621_v56, %v9709_v11  ;;  %10056 = vrot.lane.b32.xlu1 %v10055_v42, %s10355_s21  ;;  %v12724_v24 = vld [vmem:[#allocation3 + $0x158] sm:$0xff]  ;;  %v12730_v20 = vld [vmem:[#allocation3 + $0x160] sm:$0x3]  ;;  %v9698_v16 = vunpack.i.l.bf16 %v12569_v26  ;;  %v5526_v37 = vsel %vm3793_vm9, %v5494_v43, %v9683_v15 }
 0x540   : > { %v12703_v12 = vpop.permute.xlu0 %9771  ;;  %v5684_v1 = vsel %vm14273_vm14, %v5652_v25, %v9713_v55  ;;  %v5685_v61 = vsel %vm14273_vm14, %v5653_v63, %v9714_v47  ;;  %v12735_v39 = vld [vmem:[#allocation3 + $0x140] sm:$0xff]  ;;  %v10075_v54 = vpack.i.bf16 %v12724_v24, %v4442_v57  ;;  %v4573_v41 = vrot.slane %v12724_v24, 1 }
 0x541   : > { %v12707_v5 = vpop.permute.xlu1 %9766  ;;  %v5714_v53 = vpack.c.bf16 %v5685_v61, %v5684_v1  ;;  %v4575_v4 = vrot.slane %v12730_v20, 1  ;;  %v9684_v47 = vunpack.i.h.bf16 %v12539_v29  ;;  %v10085_v11 = vpack.i.bf16 %v12735_v39, %v12746_v17 }
 0x542   : > { %10051 = vrot.lane.b32.xlu0 %v10045_v9, %s10354_s20  ;;  %v8860_v3 = vpop.f32.mrb[60].mxu1  ;;  %v5465_v55 = vsel %vm2595_vm2, %v10308_v35, %v9699_v27  ;;  %v4574_v26 = vsel %vm2772_vm4, %v4572_v58, %v4573_v41  ;;  %v4653_v63 = vrot.slane %v12724_v24, 2  ;;  %v4655_v1 = vrot.slane %v12730_v20, 2 }
 0x543   : > { %v4258_v34 = vadd.f32 %v12629_v22, %v8860_v3  ;;  %v4249_v33 = vpop.f32.mrb[61].mxu1  ;;  %10066 = vrot.lane.b32.xlu1 %v10055_v42, %s10353_s17  ;;  %8189 = vmatmul.mubr.msk.bf16.gmra.mrb[72].mxu1 %vm4050_vm15, %v5714_v53  ;;  %v4576_v25 = vsel %vm2772_vm4, %v4573_v41, %v4575_v4  ;;  %v9703_v61 = vunpack.i.l.bf16 %v12585_v14  ;;  %v9718_v3 = vunpack.i.l.bf16 %v12587_v31 }
 0x544   : > { %v4250_v46 = vadd.f32 %v12629_v22, %v4249_v33  ;;  %v12717_v32 = vpop.permute.xlu0 %9776  ;;  %v8861_v28 = vpop.f32.mrb[62].mxu1  ;;  %8206 = vmatmul.mubr.msk.bf16.gmra.mrb[40].mxu0 %vm4050_vm15, %v5714_v53  ;;  %5980 = vmatprep.mubr.bf16.mxu1 %v12688_v36  ;;  %v9719_v53 = vunpack.i.h.bf16 %v12587_v31  ;;  %v5464_v50 = vsel %vm2595_vm2, %v10309_v0, %v9698_v16  ;;  %v9724_v33 = vunpack.i.h.bf16 %v12633_v51 }
 0x545   : > { %v4294_v6 = vmul.f32 0.2, %v4258_v34  ;;  %v12721_v38 = vpop.permute.xlu1 %9791  ;;  %v4261_v45 = vadd.f32 %v12629_v22, %v8861_v28  ;;  %v4252_v10 = vpop.f32.mrb[63].mxu1  ;;  %6173 = vmatprep.mubr.bf16.mxu0 %v12688_v36  ;;  %v9768_v28 = vunpack.i.l.bf16 %v12707_v5  ;;  %v9769_v24 = vunpack.i.h.bf16 %v12707_v5 }
 0x546   : > { %v4292_v19 = vmul.f32 0.2, %v4250_v46  ;;  %v4253_v7 = vadd.f32 %v12629_v22, %v4252_v10  ;;  %10061 = vrot.lane.b32.xlu0 %v10045_v9, %s10352_s16  ;;  %v5495_v9 = vsel %vm3760_vm8, %v5463_v23, %v9734_v52  ;;  %v5558_v52 = vsel %vm3826_vm10, %v5526_v37, %v9718_v3 }
 0x547   : > { %v4326_v62 = vmax.f32 %v4258_v34, %v4294_v6  ;;  %v4295_v60 = vmul.f32 0.2, %v4261_v45  ;;  %10071 = vrot.lane.b32.xlu1 %v10055_v42, %s10349_s28  ;;  %v5527_v29 = vsel %vm3793_vm9, %v5495_v9, %v9684_v47  ;;  %v9704_v34 = vunpack.i.h.bf16 %v12585_v14 }
 0x548   : > { %v4324_v22 = vmax.f32 %v4250_v46, %v4292_v19  ;;  %v4293_v13 = vmul.f32 0.2, %v4253_v7  ;;  %v12739_v49 = vpop.permute.xlu0 %9781  ;;  %v4441_v46 = vld [vmem:[#allocation3 + $0x148] sm:$0x3]  ;;  %v5559_v6 = vsel %vm3826_vm10, %v5527_v29, %v9719_v53  ;;  %v9723_v10 = vunpack.i.l.bf16 %v12633_v51 }
 0x549   : > { %4398 = vst.msk [vmem:[#allocation3 + $0x181] sm:$0xff] %vm2595_vm2, %v4326_v62  ;;  %v4327_v48 = vmax.f32 %v4261_v45, %v4295_v60  ;;  %v12744_v8 = vpop.permute.xlu1 %9796  ;;  %v10095_v45 = vpack.i.bf16 %v4576_v25, %v4574_v26  ;;  %v4654_v27 = vsel %vm2853_vm6, %v4652_v59, %v4653_v63  ;;  %v4656_v19 = vsel %vm2853_vm6, %v4653_v63, %v4655_v1 }
 0x54a   : > { %4396 = vst.msk [vmem:[#allocation3 + $0x169] sm:$0xff] %vm2595_vm2, %v4324_v22  ;;  %v4325_v40 = vmax.f32 %v4253_v7, %v4293_v13  ;;  %10076 = vrot.lane.b32.xlu0 %v10075_v54, %s10351_s15  ;;  %v5496_v7 = vsel %vm3760_vm8, %v5464_v50, %v9703_v61  ;;  %v4568_v20 = vrot.slane %v12735_v39, 1  ;;  %v4570_v2 = vrot.slane %v4441_v46, 1 }
 0x54b   : > { %4399 = vst.msk [vmem:[#allocation3 + $0x189] sm:$0xff] %vm2595_vm2, %v4327_v48  ;;  %10086 = vrot.lane.b32.xlu1 %v10085_v11, %s10351_s15  ;;  %v5497_v23 = vsel %vm3760_vm8, %v5465_v55, %v9704_v34  ;;  %v9774_v30 = vunpack.i.h.bf16 %v12703_v12  ;;  %v5590_v51 = vsel %vm14272_vm11, %v5558_v52, %v9723_v10  ;;  %v5591_v5 = vsel %vm14272_vm11, %v5559_v6, %v9724_v33 }
 0x54c   : > { %4397 = vst.msk [vmem:[#allocation3 + $0x171] sm:$0xff] %vm2595_vm2, %v4325_v40  ;;  %v12763_v56 = vpop.permute.xlu0 %9786  ;;  %v9773_v44 = vunpack.i.l.bf16 %v12703_v12  ;;  %v5622_v62 = vsel %vm3892_vm12, %v5590_v51, %v9768_v28  ;;  %v10105_v57 = vpack.i.bf16 %v4656_v19, %v4654_v27  ;;  %v4567_v43 = vrot.slane %v12746_v17, 1 }
 0x54d   : > { %v12765_v42 = vpop.permute.xlu1 %9806  ;;  %v5623_v22 = vsel %vm3892_vm12, %v5591_v5, %v9769_v24  ;;  %v4571_v12 = vsel %vm2772_vm4, %v4568_v20, %v4570_v2  ;;  %v4648_v40 = vrot.slane %v12735_v39, 2  ;;  %v9759_v16 = vunpack.i.h.bf16 %v12685_v18 }
 0x54e   : > { %10081 = vrot.lane.b32.xlu0 %v10075_v54, %s10350_s13  ;;  %v4569_v4 = vsel %vm2772_vm4, %v4567_v43, %v4568_v20  ;;  %v4647_v63 = vrot.slane %v12746_v17, 2  ;;  %v5528_v1 = vsel %vm3793_vm9, %v5496_v7, %v9773_v44  ;;  %v9758_v3 = vunpack.i.l.bf16 %v12685_v18  ;;  %v12852_v44 = vld [vmem:[#allocation3 + $0x1a8] sm:$0x3] }
 0x54f   : > { %10091 = vrot.lane.b32.xlu1 %v10085_v11, %s10350_s13  ;;  %v4650_v11 = vrot.slane %v4441_v46, 2  ;;  %v10125_v53 = vpack.i.bf16 %v4571_v12, %v4569_v4  ;;  %v5529_v0 = vsel %vm3793_vm9, %v5497_v23, %v9774_v30  ;;  %v9794_v17 = vunpack.i.h.bf16 %v12721_v38  ;;  %v12848_v30 = vld [vmem:[#allocation3 + $0x1a0] sm:$0xff] }
 0x550   : > { %v12782_v31 = vpop.permute.xlu0 %9801  ;;  %v4649_v50 = vsel %vm2853_vm6, %v4647_v63, %v4648_v40  ;;  %v9789_v18 = vunpack.i.h.bf16 %v12763_v56  ;;  %v9788_v28 = vunpack.i.l.bf16 %v12763_v56  ;;  %v9793_v10 = vunpack.i.l.bf16 %v12721_v38  ;;  %v12846_v38 = vld [vmem:[#allocation3 + $0x198] sm:$0xff] }
 0x551   : > { %v12786_v14 = vpop.permute.xlu1 %9811  ;;  %v4651_v34 = vsel %vm2853_vm6, %v4648_v40, %v4650_v11  ;;  %v4679_v43 = vrot.slane %v12848_v30, 1  ;;  %v10310_v11 = vld [vmem:[#allocation3 + $0x78] sm:$0xff] }
 0x552   : > { %10096 = vrot.lane.b32.xlu0 %v10095_v45, %s10348_s26  ;;  %v10135_v19 = vpack.i.bf16 %v4651_v34, %v4649_v50  ;;  %v9763_v50 = vunpack.i.l.bf16 %v12678_v21 }
 0x553   : > { %10101 = vrot.lane.b32.xlu1 %v10095_v45, %s10354_s20  ;;  %v12880_v40 = vld [vmem:[#allocation3 + $0x178] sm:$0x3] }
 0x554   : > { %v9817_v60 = vpop.permute.xlu0 %9816 }
 0x555   : > { %v9819_v13 = vunpack.i.h.bf16 %v9817_v60  ;;  %v9818_v54 = vunpack.i.l.bf16 %v9817_v60  ;;  %v9822_v9 = vpop.permute.xlu1 %9821  ;;  %v12857_v60 = vld [vmem:[#allocation3 + $0x190] sm:$0x3] }
 0x556   : > { %v9824_v48 = vunpack.i.h.bf16 %v9822_v9  ;;  %v9823_v41 = vunpack.i.l.bf16 %v9822_v9  ;;  %10106 = vrot.lane.b32.xlu0 %v10105_v57, %s10355_s21 }
 0x557   : > { %v5654_v47 = vsel %vm3925_vm13, %v5622_v62, %v9818_v54  ;;  %v5655_v15 = vsel %vm3925_vm13, %v5623_v22, %v9819_v13  ;;  %10111 = vrot.lane.b32.xlu1 %v10095_v45, %s10352_s16  ;;  %v12855_v62 = vld [vmem:[#allocation3 + $0x188] sm:$0xff]  ;;  %v4678_v22 = vrot.slane %v12846_v38, 1  ;;  %v9809_v13 = vunpack.i.h.bf16 %v12765_v42 }
 0x558   : > { %v5686_v58 = vsel %vm14273_vm14, %v5654_v47, %v9823_v41  ;;  %v5687_v35 = vsel %vm14273_vm14, %v5655_v15, %v9824_v48  ;;  %v9832_v55 = vpop.permute.xlu0 %9831  ;;  %v9813_v54 = vunpack.i.l.bf16 %v12786_v14  ;;  %v4448_v48 = vld [vmem:[#allocation3 + $0x180] sm:$0xff]  ;;  %v4681_v41 = vrot.slane %v12852_v44, 1  ;;  %v12878_v15 = vld [vmem:[#allocation3 + $0x170] sm:$0xff] }
 0x559   : > { %v5715_v37 = vpack.c.bf16 %v5687_v35, %v5686_v58  ;;  %v9834_v29 = vunpack.i.h.bf16 %v9832_v55  ;;  %v9833_v26 = vunpack.i.l.bf16 %v9832_v55  ;;  %v9827_v25 = vpop.permute.xlu1 %9826  ;;  %v4671_v12 = vrot.slane %v12855_v62, 2  ;;  %v10311_v55 = vld [vmem:[#allocation3 + $0x80] sm:$0xff] }
 0x55a   : > { %v9829_v61 = vunpack.i.h.bf16 %v9827_v25  ;;  %v9828_v39 = vunpack.i.l.bf16 %v9827_v25  ;;  %10116 = vrot.lane.b32.xlu0 %v10105_v57, %s10353_s17  ;;  %v4673_v47 = vrot.slane %v12857_v60, 2  ;;  %v4670_v58 = vrot.slane %v4448_v48, 2  ;;  %v12894_v25 = vld [vmem:[#allocation3 + $0x168] sm:$0xff] }
 0x55b   : > { %8190 = vmatmul.mubr.msk.bf16.gmra.mrb[76].mxu1 %vm4050_vm15, %v5715_v37  ;;  %8207 = vmatmul.mubr.msk.bf16.gmra.mrb[44].mxu0 %vm4050_vm15, %v5715_v37  ;;  %v12884_v35 = vsel %vm2772_vm4, %v4678_v22, %v4679_v43  ;;  %v5467_v37 = vsel %vm2595_vm2, %v10311_v55, %v9809_v13  ;;  %v12897_v63 = vsel %vm2772_vm4, %v4679_v43, %v4681_v41  ;;  %v10312_v43 = vld [vmem:[#allocation3 + $0x90] sm:$0xff] }
 0x55c   : > { %v5561_v33 = vsel %vm3826_vm10, %v5529_v0, %v9829_v61  ;;  %v5560_v59 = vsel %vm3826_vm10, %v5528_v1, %v9828_v39  ;;  %10126 = vrot.lane.b32.xlu1 %v10125_v53, %s10348_s26  ;;  %v12825_v46 = vpop.permute.xlu0 %9841  ;;  %5990 = vmatprep.mubr.bf16.mxu1 %v12688_v36  ;;  %v4672_v61 = vsel %vm2853_vm6, %v4670_v58, %v4671_v12  ;;  %v9764_v0 = vunpack.i.h.bf16 %v12678_v21 }
 0x55d   : > { %v5593_v52 = vsel %vm14272_vm11, %v5561_v33, %v9834_v29  ;;  %v5592_v6 = vsel %vm14272_vm11, %v5560_v59, %v9833_v26  ;;  %v12832_v45 = vpop.permute.xlu1 %9836  ;;  %6183 = vmatprep.mubr.bf16.mxu0 %v12688_v36  ;;  %v12892_v26 = vpack.i.bf16 %v12855_v62, %v4448_v48  ;;  %v4674_v39 = vsel %vm2853_vm6, %v4671_v12, %v4673_v47 }
 0x55e   : > { %v5624_v24 = vsel %vm3892_vm12, %v5592_v6, %v9758_v3  ;;  %v5625_v27 = vsel %vm3892_vm12, %v5593_v52, %v9759_v16  ;;  %10121 = vrot.lane.b32.xlu0 %v10105_v57, %s10349_s28  ;;  %v9808_v57 = vunpack.i.l.bf16 %v12765_v42  ;;  %v9814_v42 = vunpack.i.h.bf16 %v12786_v14 }
 0x55f   : > { %v5656_v7 = vsel %vm3925_vm13, %v5624_v24, %v9788_v28  ;;  %v5657_v56 = vsel %vm3925_vm13, %v5625_v27, %v9789_v18  ;;  %v4580_v3 = vrot.slane %v12880_v40, 1  ;;  %v9779_v33 = vunpack.i.h.bf16 %v12717_v32 }
 0x560   : > { %10136 = vrot.lane.b32.xlu1 %v10135_v19, %s10355_s21  ;;  %v12842_v20 = vpop.permute.xlu0 %9851  ;;  %v5688_v2 = vsel %vm14273_vm14, %v5656_v7, %v9793_v10  ;;  %v5689_v23 = vsel %vm14273_vm14, %v5657_v56, %v9794_v17  ;;  %v5466_v16 = vsel %vm2595_vm2, %v10310_v11, %v9808_v57  ;;  %v5499_v34 = vsel %vm3760_vm8, %v5467_v37, %v9814_v42 }
 0x561   : > { %v12850_v51 = vpop.permute.xlu1 %9846  ;;  %v5716_v5 = vpack.c.bf16 %v5689_v23, %v5688_v2  ;;  %v5498_v29 = vsel %vm3760_vm8, %v5466_v16, %v9813_v54  ;;  %v10160_v17 = vpack.i.bf16 %v12878_v15, %v12894_v25  ;;  %v4577_v59 = vrot.slane %v12894_v25, 1 }
 0x562   : > { %10131 = vrot.lane.b32.xlu0 %v10125_v53, %s10354_s20  ;;  %v4666_v18 = vrot.slane %v12855_v62, 1  ;;  %v4668_v28 = vrot.slane %v12857_v60, 1  ;;  %v9778_v52 = vunpack.i.l.bf16 %v12717_v32  ;;  %v9783_v21 = vunpack.i.l.bf16 %v12739_v49 }
 0x563   : > { %8191 = vmatmul.mubr.msk.bf16.gmra.mrb[80].mxu1 %vm4050_vm15, %v5716_v5  ;;  %8208 = vmatmul.mubr.msk.bf16.gmra.mrb[48].mxu0 %vm4050_vm15, %v5716_v5  ;;  %v5530_v6 = vsel %vm3793_vm9, %v5498_v29, %v9763_v50  ;;  %v12922_v24 = vpack.i.bf16 %v4674_v39, %v4672_v61  ;;  %v5531_v27 = vsel %vm3793_vm9, %v5499_v34, %v9764_v0  ;;  %v4665_v2 = vrot.slane %v4448_v48, 1  ;;  %v10313_v48 = vld [vmem:[#allocation3 + $0x98] sm:$0xff] }
 0x564   : > { %10146 = vrot.lane.b32.xlu1 %v10135_v19, %s10353_s17  ;;  %v12867_v9 = vpop.permute.xlu0 %9856  ;;  %6000 = vmatprep.mubr.bf16.mxu1 %v12688_v36  ;;  %v9784_v32 = vunpack.i.h.bf16 %v12739_v49  ;;  %v9799_v23 = vunpack.i.h.bf16 %v12744_v8  ;;  %v9798_v5 = vunpack.i.l.bf16 %v12744_v8  ;;  %v4669_v60 = vsel %vm2772_vm4, %v4666_v18, %v4668_v28 }
 0x565   : > { %v12871_v4 = vpop.permute.xlu1 %9866  ;;  %6193 = vmatprep.mubr.bf16.mxu0 %v12688_v36  ;;  %v4667_v62 = vsel %vm2772_vm4, %v4665_v2, %v4666_v18  ;;  %v10230_v57 = vpack.i.bf16 %v12897_v63, %v12884_v35  ;;  %v5468_v22 = vsel %vm2595_vm2, %v10312_v43, %v9778_v52  ;;  %v5469_v41 = vsel %vm2595_vm2, %v10313_v48, %v9779_v33  ;;  %v8292_v63 = vld [vmem:[%s10423_s14 + $0x58] sm:$0x11] }
 0x566   : > { %10141 = vrot.lane.b32.xlu0 %v10125_v53, %s10352_s16  ;;  %v4578_v53 = vrot.slane %v12878_v15, 1  ;;  %v5562_v13 = vsel %vm3826_vm10, %v5530_v6, %v9798_v5  ;;  %v5563_v49 = vsel %vm3826_vm10, %v5531_v27, %v9799_v23  ;;  %v5500_v12 = vsel %vm3760_vm8, %v5468_v22, %v9783_v21 }
 0x567   : > { %v9804_v47 = vunpack.i.h.bf16 %v12782_v31  ;;  %v9803_v42 = vunpack.i.l.bf16 %v12782_v31  ;;  %v5501_v16 = vsel %vm3760_vm8, %v5469_v41, %v9784_v32  ;;  %v9849_v58 = vunpack.i.h.bf16 %v12850_v51 }
 0x568   : > { %10151 = vrot.lane.b32.xlu1 %v10135_v19, %s10349_s28  ;;  %v12889_v14 = vpop.permute.xlu0 %9861  ;;  %v4579_v7 = vsel %vm2772_vm4, %v4577_v59, %v4578_v53  ;;  %v4581_v56 = vsel %vm2772_vm4, %v4578_v53, %v4580_v3  ;;  %v9848_v55 = vunpack.i.l.bf16 %v12850_v51  ;;  %v12954_v37 = vpack.i.bf16 %v4669_v60, %v4667_v62 }
 0x569   : > { %v12899_v1 = vpop.permute.xlu1 %9871  ;;  %v10185_v54 = vpack.i.bf16 %v4581_v56, %v4579_v7  ;;  %v5594_v29 = vsel %vm14272_vm11, %v5562_v13, %v9803_v42  ;;  %v5595_v61 = vsel %vm14272_vm11, %v5563_v49, %v9804_v47  ;;  %v4658_v39 = vrot.slane %v12878_v15, 2  ;;  %v8226_v47 = vld [vmem:[%s10423_s14 + $0x30] sm:$0x11] }
 0x56a   : > { %10156 = vrot.lane.b32.xlu0 %v12892_v26, %s10351_s15  ;;  %v4660_v31 = vrot.slane %v12880_v40, 2  ;;  %v9839_v53 = vunpack.i.h.bf16 %v12832_v45  ;;  %v9854_v3 = vunpack.i.h.bf16 %v12842_v20  ;;  %v9853_v0 = vunpack.i.l.bf16 %v12842_v20 }
 0x56b   : > { %v4657_v33 = vrot.slane %v12894_v25, 2  ;;  %v5626_v59 = vsel %vm3892_vm12, %v5594_v29, %v9848_v55  ;;  %v5627_v15 = vsel %vm3892_vm12, %v5595_v61, %v9849_v58  ;;  %v9838_v6 = vunpack.i.l.bf16 %v12832_v45 }
 0x56c   : > { %10161 = vrot.lane.b32.xlu1 %v10160_v17, %s10351_s15  ;;  %v12920_v10 = vpop.permute.xlu0 %9876  ;;  %v4661_v21 = vsel %vm2853_vm6, %v4658_v39, %v4660_v31  ;;  %v5532_v5 = vsel %vm3793_vm9, %v5500_v12, %v9853_v0  ;;  %v5533_v43 = vsel %vm3793_vm9, %v5501_v16, %v9854_v3  ;;  %vm6578_vm4 = vsmask.f32 4352 }
 0x56d   : > { %v12925_v19 = vpop.permute.xlu1 %9886  ;;  %v4659_v52 = vsel %vm2853_vm6, %v4657_v33, %v4658_v39  ;;  %v9869_v22 = vunpack.i.h.bf16 %v12871_v4  ;;  %v9863_v48 = vunpack.i.l.bf16 %v12889_v14  ;;  %vm6579_vm7 = vmand %vm6577_vm3, %vm6578_vm4  ;;  %v9868_v42 = vunpack.i.l.bf16 %v12871_v4 }
 0x56e   : > { %10176 = vrot.lane.b32.xlu0 %v12922_v24, %s10355_s21  ;;  %v12980_v45 = vpack.i.bf16 %v4661_v21, %v4659_v52  ;;  %vm13009_vm1 = vmor %vm6579_vm7, %vm6576_vm5  ;;  %vm6679_vm4 = vsmask.f32 7954  ;;  %v4686_v33 = vrot.slane %v12852_v44, 2  ;;  %v10314_v52 = vld [vmem:[#allocation3 + $0xa8] sm:$0xff]  ;;  %v10225_v21 = vpack.i.bf16 %v12848_v30, %v12846_v38 }
 0x56f   : > { %v6582_v31 = vsel %vm13009_vm1, 0, %v8226_v47  ;;  %vm6680_vm5 = vmand %vm6577_vm3, %vm6679_vm4  ;;  %v9858_v47 = vunpack.i.l.bf16 %v12867_v9  ;;  %vm14315_vm3 = vcmask 523264  }
 0x570   : > { %10166 = vrot.lane.b32.xlu1 %v10160_v17, %s10350_s13  ;;  %v12942_v8 = vpop.permute.xlu0 %9881  ;;  %8227 = vst [vmem:[%s10423_s14 + $0x30] sm:$0x11] %v6582_v31 }
 0x571   : > { %v12948_v11 = vpop.permute.xlu1 %9891 }
 0x572   : > { %10186 = vrot.lane.b32.xlu0 %v10185_v54, %s10354_s20 }
 0x574   : > { %10171 = vrot.lane.b32.xlu1 %v12954_v37, %s10354_s20  ;;  %v9897_v51 = vpop.permute.xlu0 %9896 }
 0x575   : > { %v9899_v50 = vunpack.i.h.bf16 %v9897_v51  ;;  %v9898_v34 = vunpack.i.l.bf16 %v9897_v51  ;;  %v9902_v17 = vpop.permute.xlu1 %9901  ;;  %v8290_v51 = vld [vmem:[%s10423_s14 + $0x50] sm:$0x11] }
 0x576   : > { %v9904_v40 = vunpack.i.h.bf16 %v9902_v17  ;;  %v9903_v18 = vunpack.i.l.bf16 %v9902_v17  ;;  %10196 = vrot.lane.b32.xlu0 %v10185_v54, %s10352_s16  ;;  %v4683_v17 = vrot.slane %v12846_v38, 2 }
 0x577   : > { %v5658_v28 = vsel %vm3925_vm13, %v5626_v59, %v9898_v34  ;;  %v5659_v20 = vsel %vm3925_vm13, %v5627_v15, %v9899_v50  ;;  %v4684_v34 = vrot.slane %v12848_v30, 2  ;;  %v9889_v59 = vunpack.i.h.bf16 %v12925_v19 }
 0x578   : > { %v5690_v25 = vsel %vm14273_vm14, %v5658_v28, %v9903_v18  ;;  %v5691_v27 = vsel %vm14273_vm14, %v5659_v20, %v9904_v40  ;;  %10181 = vrot.lane.b32.xlu1 %v10185_v54, %s10348_s26  ;;  %v9912_v7 = vpop.permute.xlu0 %9911  ;;  %v9864_v54 = vunpack.i.h.bf16 %v12889_v14  ;;  %v9893_v15 = vunpack.i.l.bf16 %v12948_v11 }
 0x579   : > { %v5717_v56 = vpack.c.bf16 %v5691_v27, %v5690_v25  ;;  %v9914_v2 = vunpack.i.h.bf16 %v9912_v7  ;;  %v9913_v32 = vunpack.i.l.bf16 %v9912_v7  ;;  %v9907_v23 = vpop.permute.xlu1 %9906  ;;  %v9894_v20 = vunpack.i.h.bf16 %v12948_v11 }
 0x57a   : > { %v9909_v62 = vunpack.i.h.bf16 %v9907_v23  ;;  %v9908_v60 = vunpack.i.l.bf16 %v9907_v23  ;;  %10201 = vrot.lane.b32.xlu0 %v12892_v26, %s10350_s13  ;;  %v4685_v11 = vsel %vm2853_vm6, %v4683_v17, %v4684_v34  ;;  %v9844_v23 = vunpack.i.h.bf16 %v12825_v46 }
 0x57b   : > { %8192 = vmatmul.mubr.msk.bf16.gmra.mrb[84].mxu1 %vm4050_vm15, %v5717_v56  ;;  %8209 = vmatmul.mubr.msk.bf16.gmra.mrb[52].mxu0 %vm4050_vm15, %v5717_v56  ;;  %v4687_v56 = vsel %vm2853_vm6, %v4684_v34, %v4686_v33  ;;  %vm14313_vm6 = vcmask 326656   ;;  %v10317_v33 = vld [vmem:[#allocation3 + $0xc8] sm:$0xff] }
 0x57c   : > { %v5565_v13 = vsel %vm3826_vm10, %v5533_v43, %v9909_v62  ;;  %v5564_v49 = vsel %vm3826_vm10, %v5532_v5, %v9908_v60  ;;  %10191 = vrot.lane.b32.xlu1 %v12980_v45, %s10355_s21  ;;  %v12990_v26 = vpop.permute.xlu0 %9916  ;;  %6010 = vmatprep.mubr.bf16.mxu1 %v12688_v36  ;;  %v10235_v30 = vpack.i.bf16 %v4687_v56, %v4685_v11  ;;  %v9873_v62 = vunpack.i.l.bf16 %v12899_v1 }
 0x57d   : > { %v5597_v41 = vsel %vm14272_vm11, %v5565_v13, %v9914_v2  ;;  %v5596_v12 = vsel %vm14272_vm11, %v5564_v49, %v9913_v32  ;;  %6203 = vmatprep.mubr.bf16.mxu0 %v12688_v36  ;;  %v13005_v55 = vpop.permute.xlu1 %9926  ;;  %vm6677_vm11 = vsmask.f32 7938  ;;  %v9843_v2 = vunpack.i.l.bf16 %v12825_v46 }
 0x57e   : > { %v5628_v16 = vsel %vm3892_vm12, %v5596_v12, %v9838_v6  ;;  %v5629_v58 = vsel %vm3892_vm12, %v5597_v41, %v9839_v53  ;;  %10211 = vrot.lane.b32.xlu0 %v12922_v24, %s10353_s17  ;;  %v8228_v53 = vld [vmem:[%s10423_s14 + $0x38] sm:$0x11]  ;;  %vm6678_vm7 = vmand %vm6574_vm0, %vm6677_vm11  ;;  %v10315_v6 = vld [vmem:[#allocation3 + $0xb0] sm:$0xff]  ;;  %v9874_v43 = vunpack.i.h.bf16 %v12899_v1  ;;  %v9878_v49 = vunpack.i.l.bf16 %v12920_v10 }
 0x57f   : > { %v5660_v29 = vsel %vm3925_vm13, %v5628_v16, %v9863_v48  ;;  %v5661_v4 = vsel %vm3925_vm13, %v5629_v58, %v9864_v54  ;;  %v5471_v25 = vsel %vm2595_vm2, %v10315_v6, %v9889_v59  ;;  %v9929_v54 = vunpack.i.h.bf16 %v13005_v55  ;;  %vm14314_vm0 = vmmov %vm14313_vm6 }
 0x580   : > { %10206 = vrot.lane.b32.xlu1 %v12954_v37, %s10352_s16  ;;  %v13017_v61 = vpop.permute.xlu0 %9921  ;;  %v5692_v39 = vsel %vm14273_vm14, %v5660_v29, %v9868_v42  ;;  %v5693_v24 = vsel %vm14273_vm14, %v5661_v4, %v9869_v22  ;;  %v6585_v37 = vsel %vm13009_vm1, 0, %v8228_v53  ;;  %vm13043_vm14 = vmor %vm6680_vm5, %vm6678_vm7  ;;  %v5503_v32 = vsel %vm3760_vm8, %v5471_v25, %v9894_v20  ;;  %v8230_v53 = vld [vmem:[%s10423_s14 + $0x60] sm:$0x11] }
 0x581   : > { %v13025_v3 = vpop.permute.xlu1 %9931  ;;  %v5718_v0 = vpack.c.bf16 %v5693_v24, %v5692_v39  ;;  %8229 = vst [vmem:[%s10423_s14 + $0x38] sm:$0x11] %v6585_v37  ;;  %v6683_v18 = vsel %vm13043_vm14, 0, %v8290_v51  ;;  %v6686_v28 = vsel %vm13043_vm14, 0, %v8292_v63  ;;  %v5535_v60 = vsel %vm3793_vm9, %v5503_v32, %v9844_v23  ;;  %v10316_v63 = vld [vmem:[#allocation3 + $0xc0] sm:$0xff]  ;;  %vm14316_vm7 = vmmov %vm14315_vm3 }
 0x582   : > { %10231 = vrot.lane.b32.xlu0 %v10230_v57, %s10354_s20  ;;  %v9888_v57 = vunpack.i.l.bf16 %v12925_v19  ;;  %8291 = vst [vmem:[%s10423_s14 + $0x50] sm:$0x11] %v6683_v18  ;;  %8293 = vst [vmem:[%s10423_s14 + $0x58] sm:$0x11] %v6686_v28  ;;  %v9928_v22 = vunpack.i.l.bf16 %v13005_v55  ;;  %v5567_v48 = vsel %vm3826_vm10, %v5535_v60, %v9874_v43  ;;  %v9879_v41 = vunpack.i.h.bf16 %v12920_v10 }
 0x583   : > { %8193 = vmatmul.mubr.msk.bf16.gmra.mrb[88].mxu1 %vm4050_vm15, %v5718_v0  ;;  %8210 = vmatmul.mubr.msk.bf16.gmra.mrb[56].mxu0 %vm4050_vm15, %v5718_v0  ;;  %v9859_v1 = vunpack.i.h.bf16 %v12867_v9  ;;  %v9884_v16 = vunpack.i.h.bf16 %v12942_v8  ;;  %v9883_v58 = vunpack.i.l.bf16 %v12942_v8  ;;  %v9934_v10 = vunpack.i.h.bf16 %v13025_v3  ;;  %vm14317_vm5 = vmmov %vm14314_vm0 }
 0x584   : > { %v13041_v50 = vpop.permute.xlu0 %9936  ;;  %10216 = vrot.lane.b32.xlu1 %v12980_v45, %s10353_s17  ;;  %6020 = vmatprep.mubr.bf16.mxu1 %v12688_v36  ;;  %v5470_v19 = vsel %vm2595_vm2, %v10314_v52, %v9888_v57  ;;  %v5599_v55 = vsel %vm14314_vm0, %v5567_v48, %v9879_v41  ;;  %v9933_v9 = vunpack.i.l.bf16 %v13025_v3  ;;  %v6588_v8 = vsel %vm13009_vm1, 0, %v8230_v53 }
 0x585   : > { %v13057_v40 = vpop.permute.xlu1 %9941  ;;  %6213 = vmatprep.mubr.bf16.mxu0 %v12688_v36  ;;  %v5502_v27 = vsel %vm3760_vm8, %v5470_v19, %v9893_v15  ;;  %v5631_v39 = vsel %vm3892_vm12, %v5599_v55, %v9929_v54  ;;  %v5472_v57 = vsel %vm2595_vm2, %v10316_v63, %v9858_v47  ;;  %8231 = vst [vmem:[%s10423_s14 + $0x60] sm:$0x11] %v6588_v8  ;;  %v9918_v32 = vunpack.i.l.bf16 %v12990_v26  ;;  %v8232_v47 = vld [vmem:[%s10423_s14 + $0x68] sm:$0x11]  ;;  %v10319_v63 = vld [vmem:[#allocation3 + $0xe0] sm:$0xff] }
 0x586   : > { %v5534_v38 = vsel %vm3793_vm9, %v5502_v27, %v9843_v2  ;;  %v5473_v59 = vsel %vm2595_vm2, %v10317_v33, %v9859_v1  ;;  %v5504_v15 = vsel %vm3760_vm8, %v5472_v57, %v9883_v58  ;;  %v9919_v2 = vunpack.i.h.bf16 %v12990_v26 }
 0x587   : > { %v5566_v13 = vsel %vm3826_vm10, %v5534_v38, %v9873_v62  ;;  %v5505_v20 = vsel %vm3760_vm8, %v5473_v59, %v9884_v16  ;;  %v5536_v25 = vsel %vm3793_vm9, %v5504_v15, %v9933_v9  ;;  %v6591_v55 = vsel %vm13009_vm1, 0, %v8232_v47 }
 0x588   : > { %v13067_v44 = vpop.permute.xlu0 %9946  ;;  %10221 = vrot.lane.b32.xlu1 %v12980_v45, %s10349_s28  ;;  %v5598_v42 = vsel %vm14313_vm6, %v5566_v13, %v9878_v49  ;;  %v5537_v6 = vsel %vm3793_vm9, %v5505_v20, %v9934_v10  ;;  %vm14318_vm6 = vmmov %vm14314_vm0  ;;  %v9943_v13 = vunpack.i.l.bf16 %v13057_v40  ;;  %8233 = vst [vmem:[%s10423_s14 + $0x68] sm:$0x11] %v6591_v55  ;;  %v9923_v33 = vunpack.i.l.bf16 %v13017_v61 }
 0x589   : > { %v13076_v7 = vpop.permute.xlu1 %9951  ;;  %v5630_v29 = vsel %vm3892_vm12, %v5598_v42, %v9928_v22  ;;  %v9944_v22 = vunpack.i.h.bf16 %v13057_v40  ;;  %v9949_v54 = vunpack.i.h.bf16 %v13067_v44  ;;  %v9948_v48 = vunpack.i.l.bf16 %v13067_v44  ;;  %v8294_v42 = vld [vmem:[%s10423_s14 + $0x80] sm:$0x11]  ;;  %vm14319_vm0 = vmmov %vm14315_vm3 }
 0x58a   : > { %v6689_v44 = vsel %vm13043_vm14, 0, %v8294_v42  ;;  %v9924_v15 = vunpack.i.h.bf16 %v13017_v61 }
 0x58b   : > { %8295 = vst [vmem:[%s10423_s14 + $0x80] sm:$0x11] %v6689_v44 }
 0x58c   : > { %v13083_v5 = vpop.permute.xlu0 %9956  ;;  %10226 = vrot.lane.b32.xlu1 %v10225_v21, %s10351_s15 }
 0x58d   : > { %v13089_v45 = vpop.permute.xlu1 %9966 }
 0x590   : > { %v13094_v46 = vpop.permute.xlu0 %9961  ;;  %10236 = vrot.lane.b32.xlu1 %v10235_v30, %s10355_s21 }
 0x591   : > { %v9977_v12 = vpop.permute.xlu1 %9976 }
 0x592   : > { %v9979_v0 = vunpack.i.h.bf16 %v9977_v12  ;;  %v9978_v37 = vunpack.i.l.bf16 %v9977_v12 }
 0x594   : > { %v9972_v4 = vpop.permute.xlu0 %9971 }
 0x595   : > { %v9974_v24 = vunpack.i.h.bf16 %v9972_v4  ;;  %v9973_v31 = vunpack.i.l.bf16 %v9972_v4  ;;  %v9987_v51 = vpop.permute.xlu1 %9986  ;;  %v9968_v4 = vunpack.i.l.bf16 %v13089_v45 }
 0x596   : > { %v9989_v27 = vunpack.i.h.bf16 %v9987_v51  ;;  %v9988_v11 = vunpack.i.l.bf16 %v9987_v51 }
 0x597   : > { %v5662_v34 = vsel %vm3925_vm13, %v5630_v29, %v9973_v31  ;;  %v5663_v17 = vsel %vm3925_vm13, %v5631_v39, %v9974_v24  ;;  %v8296_v29 = vld [vmem:[%s10423_s14 + $0x88] sm:$0x11]  ;;  %v8234_v24 = vld [vmem:[%s10423_s14 + $0x90] sm:$0x11]  ;;  %v9969_v31 = vunpack.i.h.bf16 %v13089_v45 }
 0x598   : > { %v9982_v3 = vpop.permute.xlu0 %9981  ;;  %v5694_v18 = vsel %vm14315_vm3, %v5662_v34, %v9978_v37  ;;  %v5695_v28 = vsel %vm14316_vm7, %v5663_v17, %v9979_v0  ;;  %vm14320_vm3 = vmmov %vm14319_vm0  ;;  %v6692_v10 = vsel %vm13043_vm14, 0, %v8296_v29  ;;  %v6594_v0 = vsel %vm13009_vm1, 0, %v8234_v24  ;;  %v10318_v45 = vld [vmem:[#allocation3 + $0xd8] sm:$0xff]  ;;  %v10320_v29 = vld [vmem:[#allocation3 + $0xf0] sm:$0xff] }
 0x599   : > { %v9984_v52 = vunpack.i.h.bf16 %v9982_v3  ;;  %v9983_v19 = vunpack.i.l.bf16 %v9982_v3  ;;  %v5719_v21 = vpack.c.bf16 %v5695_v28, %v5694_v18  ;;  %v9992_v56 = vpop.permute.xlu1 %9991  ;;  %8297 = vst [vmem:[%s10423_s14 + $0x88] sm:$0x11] %v6692_v10  ;;  %8235 = vst [vmem:[%s10423_s14 + $0x90] sm:$0x11] %v6594_v0  ;;  %v5474_v8 = vsel %vm2595_vm2, %v10318_v45, %v9968_v4  ;;  %v10321_v24 = vld [vmem:[#allocation3 + $0xf8] sm:$0xff] }
 0x59a   : > { %v9993_v53 = vunpack.i.l.bf16 %v9992_v56  ;;  %v9994_v37 = vunpack.i.h.bf16 %v9992_v56  ;;  %v5475_v57 = vsel %vm2595_vm2, %v10319_v63, %v9969_v31  ;;  %v9953_v18 = vunpack.i.l.bf16 %v13076_v7  ;;  %vm14321_vm7 = vmmov %vm14317_vm5 }
 0x59b   : > { %v5568_v23 = vsel %vm3826_vm10, %v5536_v25, %v9983_v19  ;;  %v5569_v38 = vsel %vm3826_vm10, %v5537_v6, %v9984_v52  ;;  %8194 = vmatmul.mubr.msk.bf16.gmra.mrb[92].mxu1 %vm4050_vm15, %v5719_v21  ;;  %8211 = vmatmul.mubr.msk.bf16.gmra.mrb[60].mxu0 %vm4050_vm15, %v5719_v21  ;;  %v9954_v52 = vunpack.i.h.bf16 %v13076_v7  ;;  %v8236_v19 = vld [vmem:[%s10423_s14 + $0x98] sm:$0x11]  ;;  %v8298_v25 = vld [vmem:[%s10423_s14 + $0xb0] sm:$0x11]  ;;  %v9959_v7 = vunpack.i.h.bf16 %v13083_v5 }
 0x59c   : > { %v5600_v30 = vsel %vm14317_vm5, %v5568_v23, %v9988_v11  ;;  %v5601_v62 = vsel %vm14318_vm6, %v5569_v38, %v9989_v27  ;;  %v13133_v60 = vpop.permute.xlu0 %9996  ;;  %6030 = vmatprep.mubr.bf16.mxu1 %v12688_v36  ;;  %6223 = vmatprep.mubr.bf16.mxu0 %v12688_v36  ;;  %v5506_v34 = vsel %vm3760_vm8, %v5474_v8, %v9993_v53  ;;  %v6597_v61 = vsel %vm13009_vm1, 0, %v8236_v19  ;;  %vm14322_vm6 = vmmov %vm14319_vm0 }
 0x59d   : > { %v5632_v26 = vsel %vm3892_vm12, %v5600_v30, %v9918_v32  ;;  %v5633_v43 = vsel %vm3892_vm12, %v5601_v62, %v9919_v2  ;;  %v13141_v49 = vpop.permute.xlu1 %10006  ;;  %v5507_v59 = vsel %vm3760_vm8, %v5475_v57, %v9994_v37  ;;  %v5538_v3 = vsel %vm3793_vm9, %v5506_v34, %v9923_v33  ;;  %8237 = vst [vmem:[%s10423_s14 + $0x98] sm:$0x11] %v6597_v61 }
 0x59e   : > { %v5664_v12 = vsel %vm3925_vm13, %v5632_v26, %v9943_v13  ;;  %v5665_v1 = vsel %vm3925_vm13, %v5633_v43, %v9944_v22  ;;  %v5539_v28 = vsel %vm3793_vm9, %v5507_v59, %v9924_v15  ;;  %v5570_v21 = vsel %vm3826_vm10, %v5538_v3, %v9953_v18  ;;  %v8300_v26 = vld [vmem:[%s10423_s14 + $0xb8] sm:$0x11] }
 0x59f   : > { %v5696_v40 = vsel %vm14319_vm0, %v5664_v12, %v9948_v48  ;;  %v5697_v58 = vsel %vm14320_vm3, %v5665_v1, %v9949_v54  ;;  %v9958_v27 = vunpack.i.l.bf16 %v13083_v5  ;;  %v5571_v11 = vsel %vm3826_vm10, %v5539_v28, %v9954_v52  ;;  %v8238_v12 = vld [vmem:[%s10423_s14 + $0xc0] sm:$0x11]  ;;  %vm14323_vm3 = vmmov %vm14317_vm5 }
 0x5a0   : > { %v13145_v41 = vpop.permute.xlu0 %10001  ;;  %v5720_v39 = vpack.c.bf16 %v5697_v58, %v5696_v40  ;;  %v6695_v56 = vsel %vm13043_vm14, 0, %v8298_v25  ;;  %v10008_v2 = vunpack.i.l.bf16 %v13141_v49  ;;  %v10009_v23 = vunpack.i.h.bf16 %v13141_v49 }
 0x5a1   : > { %v13151_v16 = vpop.permute.xlu1 %10011  ;;  %8299 = vst [vmem:[%s10423_s14 + $0xb0] sm:$0x11] %v6695_v56  ;;  %v5602_v38 = vsel %vm14321_vm7, %v5570_v21, %v9958_v27  ;;  %v5603_v30 = vsel %vm14317_vm5, %v5571_v11, %v9959_v7  ;;  %v9939_v43 = vunpack.i.h.bf16 %v13041_v50  ;;  %v9938_v22 = vunpack.i.l.bf16 %v13041_v50  ;;  %vm14324_vm7 = vmmov %vm14323_vm3  ;;  %v13252_v27 = vld [vmem:[%s10423_s14] sm:$0xff] }
 0x5a2   : > { %v9964_v5 = vunpack.i.h.bf16 %v13094_v46  ;;  %v9963_v13 = vunpack.i.l.bf16 %v13094_v46  ;;  %v5634_v54 = vsel %vm3892_vm12, %v5602_v38, %v10008_v2  ;;  %v6698_v49 = vsel %vm13043_vm14, 0, %v8300_v26  ;;  %v8302_v38 = vld [vmem:[%s10423_s14 + $0xe0] sm:$0x11]  ;;  %vm14325_vm5 = vmmov %vm14319_vm0 }
 0x5a3   : > { %8195 = vmatmul.mubr.msk.bf16.gmra.mrb[96].mxu1 %vm4050_vm15, %v5720_v39  ;;  %8212 = vmatmul.mubr.msk.bf16.gmra.mrb[64].mxu0 %vm4050_vm15, %v5720_v39  ;;  %v5635_v1 = vsel %vm3892_vm12, %v5603_v30, %v10009_v23  ;;  %8301 = vst [vmem:[%s10423_s14 + $0xb8] sm:$0x11] %v6698_v49  ;;  %v6600_v50 = vsel %vm13009_vm1, 0, %v8238_v12  ;;  %v10014_v40 = vunpack.i.h.bf16 %v13151_v16  ;;  %v10013_v58 = vunpack.i.l.bf16 %v13151_v16  ;;  %v8240_v23 = vld [vmem:[%s10423_s14 + $0xc8] sm:$0x11] }
 0x5a4   : > { %v13167_v9 = vpop.permute.xlu0 %10016  ;;  %6040 = vmatprep.mubr.bf16.mxu1 %v12688_v36  ;;  %6233 = vmatprep.mubr.bf16.mxu0 %v12688_v36  ;;  %8239 = vst [vmem:[%s10423_s14 + $0xc0] sm:$0x11] %v6600_v50  ;;  %v5476_v4 = vsel %vm2595_vm2, %v10320_v29, %v9938_v22  ;;  %v5477_v31 = vsel %vm2595_vm2, %v10321_v24, %v9939_v43  ;;  %v9999_v18 = vunpack.i.h.bf16 %v13133_v60  ;;  %v9998_v28 = vunpack.i.l.bf16 %v13133_v60  ;;  %v8242_v50 = vld [vmem:[%s10423_s14 + $0xf0] sm:$0x11]  ;;  %v10324_v29 = vld [vmem:[#allocation3 + $0x110] sm:$0xff] }
 0x5a5   : > { %v13175_v51 = vpop.permute.xlu1 %10021  ;;  %v5508_v53 = vsel %vm3760_vm8, %v5476_v4, %v9963_v13  ;;  %v5509_v45 = vsel %vm3760_vm8, %v5477_v31, %v9964_v5  ;;  %v10003_v24 = vunpack.i.l.bf16 %v13145_v41 }
 0x5a6   : > { %v5541_v34 = vsel %vm3793_vm9, %v5509_v45, %v10014_v40  ;;  %v5540_v33 = vsel %vm3793_vm9, %v5508_v53, %v10013_v58  ;;  %v10024_v56 = vunpack.i.h.bf16 %v13175_v51  ;;  %v10023_v7 = vunpack.i.l.bf16 %v13175_v51  ;;  %v8306_v45 = vld [vmem:[%s10423_s14 + $0x110] sm:$0x11] }
 0x5a7   : > { %v10004_v53 = vunpack.i.h.bf16 %v13145_v41 }
 0x5a8   : > { %v13182_v17 = vpop.permute.xlu0 %10026 }
 0x5a9   : > { %v13187_v36 = vpop.permute.xlu1 %10031  ;;  %v10029_v30 = vunpack.i.h.bf16 %v13182_v17 }
 0x5aa   : > { %v10034_v41 = vunpack.i.h.bf16 %v13187_v36 }
 0x5ac   : > { %v13192_v20 = vpop.permute.xlu0 %10036 }
 0x5ad   : > { %v13197_v6 = vpop.permute.xlu1 %10046 }
 0x5ae   : > { %v10049_v12 = vunpack.i.h.bf16 %v13197_v6 }
 0x5b0   : > { %v13209_v32 = vpop.permute.xlu0 %10041  ;;  %v5479_v4 = vsel %vm2595_vm2, %v10324_v29, %v10049_v12 }
 0x5b1   : > { %v10057_v62 = vpop.permute.xlu1 %10056 }
 0x5b2   : > { %v10059_v46 = vunpack.i.h.bf16 %v10057_v62  ;;  %v10058_v55 = vunpack.i.l.bf16 %v10057_v62  ;;  %v10028_v62 = vunpack.i.l.bf16 %v13182_v17  ;;  %v6701_v17 = vsel %vm13043_vm14, 0, %v8302_v38  ;;  %v10325_v38 = vld [vmem:[#allocation3 + $0x120] sm:$0xff] }
 0x5b3   : > { %8303 = vst [vmem:[%s10423_s14 + $0xe0] sm:$0x11] %v6701_v17 }
 0x5b4   : > { %v10052_v48 = vpop.permute.xlu0 %10051 }
 0x5b5   : > { %v10054_v47 = vunpack.i.h.bf16 %v10052_v48  ;;  %v10053_v42 = vunpack.i.l.bf16 %v10052_v48  ;;  %v10067_v44 = vpop.permute.xlu1 %10066  ;;  %v10048_v48 = vunpack.i.l.bf16 %v13197_v6 }
 0x5b6   : > { %v10069_v59 = vunpack.i.h.bf16 %v10067_v44  ;;  %v10068_v15 = vunpack.i.l.bf16 %v10067_v44 }
 0x5b7   : > { %v5666_v39 = vsel %vm3925_vm13, %v5634_v54, %v10053_v42  ;;  %v5667_v10 = vsel %vm3925_vm13, %v5635_v1, %v10054_v47  ;;  %v6603_v54 = vsel %vm13009_vm1, 0, %v8240_v23  ;;  %v8304_v42 = vld [vmem:[%s10423_s14 + $0xe8] sm:$0x11]  ;;  %v8308_v23 = vld [vmem:[%s10423_s14 + $0x118] sm:$0x11] }
 0x5b8   : > { %v10062_v0 = vpop.permute.xlu0 %10061  ;;  %v5698_v37 = vsel %vm14322_vm6, %v5666_v39, %v10058_v55  ;;  %v5699_v16 = vsel %vm14319_vm0, %v5667_v10, %v10059_v46  ;;  %vm14326_vm6 = vmmov %vm14319_vm0  ;;  %8241 = vst [vmem:[%s10423_s14 + $0xc8] sm:$0x11] %v6603_v54  ;;  %v6704_v6 = vsel %vm13043_vm14, 0, %v8304_v42  ;;  %v6606_v46 = vsel %vm13009_vm1, 0, %v8242_v50  ;;  %v10323_v55 = vld [vmem:[#allocation3 + $0x108] sm:$0xff] }
 0x5b9   : > { %v10064_v8 = vunpack.i.h.bf16 %v10062_v0  ;;  %v10063_v63 = vunpack.i.l.bf16 %v10062_v0  ;;  %v5721_v57 = vpack.c.bf16 %v5699_v16, %v5698_v37  ;;  %v10072_v3 = vpop.permute.xlu1 %10071  ;;  %v5478_v44 = vsel %vm2595_vm2, %v10323_v55, %v10048_v48  ;;  %8305 = vst [vmem:[%s10423_s14 + $0xe8] sm:$0x11] %v6704_v6  ;;  %8243 = vst [vmem:[%s10423_s14 + $0xf0] sm:$0x11] %v6606_v46  ;;  %v8244_v16 = vld [vmem:[%s10423_s14 + $0xf8] sm:$0x11] }
 0x5ba   : > { %v10073_v1 = vunpack.i.l.bf16 %v10072_v3  ;;  %v10074_v40 = vunpack.i.h.bf16 %v10072_v3  ;;  %v10018_v3 = vunpack.i.l.bf16 %v13167_v9  ;;  %vm14327_vm0 = vmmov %vm14323_vm3 }
 0x5bb   : > { %v5572_v52 = vsel %vm3826_vm10, %v5540_v33, %v10063_v63  ;;  %v5573_v19 = vsel %vm3826_vm10, %v5541_v34, %v10064_v8  ;;  %8196 = vmatmul.mubr.msk.bf16.gmra.mrb[100].mxu1 %vm4050_vm15, %v5721_v57  ;;  %8213 = vmatmul.mubr.msk.bf16.gmra.mrb[68].mxu0 %vm4050_vm15, %v5721_v57  ;;  %v10033_v8 = vunpack.i.l.bf16 %v13187_v36  ;;  %v6609_v34 = vsel %vm13009_vm1, 0, %v8244_v16 }
 0x5bc   : > { %v5604_v21 = vsel %vm14323_vm3, %v5572_v52, %v10068_v15  ;;  %v5605_v61 = vsel %vm14324_vm7, %v5573_v19, %v10069_v59  ;;  %v13249_v25 = vpop.permute.xlu0 %10076  ;;  %6050 = vmatprep.mubr.bf16.mxu1 %v13252_v27  ;;  %6243 = vmatprep.mubr.bf16.mxu0 %v13252_v27  ;;  %v5510_v39 = vsel %vm3760_vm8, %v5478_v44, %v10073_v1  ;;  %v6707_v33 = vsel %vm13043_vm14, 0, %v8306_v45  ;;  %vm14328_vm3 = vmmov %vm14327_vm0 }
 0x5bd   : > { %v5636_v60 = vsel %vm3892_vm12, %v5604_v21, %v9998_v28  ;;  %v5637_v11 = vsel %vm3892_vm12, %v5605_v61, %v9999_v18  ;;  %v13260_v2 = vpop.permute.xlu1 %10086  ;;  %v5511_v31 = vsel %vm3760_vm8, %v5479_v4, %v10074_v40  ;;  %v5542_v37 = vsel %vm3793_vm9, %v5510_v39, %v10003_v24  ;;  %8245 = vst [vmem:[%s10423_s14 + $0xf8] sm:$0x11] %v6609_v34  ;;  %vm14329_vm7 = vmmov %vm14325_vm5 }
 0x5be   : > { %v5668_v43 = vsel %vm3925_vm13, %v5636_v60, %v10023_v7  ;;  %v5669_v22 = vsel %vm3925_vm13, %v5637_v11, %v10024_v56  ;;  %v5543_v63 = vsel %vm3793_vm9, %v5511_v31, %v10004_v53  ;;  %8307 = vst [vmem:[%s10423_s14 + $0x110] sm:$0x11] %v6707_v33  ;;  %v5574_v59 = vsel %vm3826_vm10, %v5542_v37, %v10033_v8 }
 0x5bf   : > { %v5700_v51 = vsel %vm14325_vm5, %v5668_v43, %v10028_v62  ;;  %v5701_v13 = vsel %vm14326_vm6, %v5669_v22, %v10029_v30  ;;  %v10038_v18 = vunpack.i.l.bf16 %v13192_v20  ;;  %v5575_v28 = vsel %vm3826_vm10, %v5543_v63, %v10034_v41  ;;  %v10326_v30 = vld [vmem:[#allocation3 + $0x128] sm:$0xff]  ;;  %vm14330_vm6 = vmmov %vm14327_vm0 }
 0x5c0   : > { %v13266_v26 = vpop.permute.xlu0 %10081  ;;  %v5722_v49 = vpack.c.bf16 %v5701_v13, %v5700_v51  ;;  %v10019_v52 = vunpack.i.h.bf16 %v13167_v9  ;;  %v10039_v19 = vunpack.i.h.bf16 %v13192_v20  ;;  %v10043_v21 = vunpack.i.l.bf16 %v13209_v32  ;;  %v8246_v13 = vld [vmem:[%s10423_s14 + $0x120] sm:$0x11] }
 0x5c1   : > { %v13270_v5 = vpop.permute.xlu1 %10091  ;;  %v10088_v36 = vunpack.i.l.bf16 %v13260_v2  ;;  %v10089_v60 = vunpack.i.h.bf16 %v13260_v2  ;;  %v5606_v11 = vsel %vm14327_vm0, %v5574_v59, %v10038_v18  ;;  %v5480_v9 = vsel %vm2595_vm2, %v10325_v38, %v10018_v3 }
 0x5c2   : > { %v5607_v56 = vsel %vm14328_vm3, %v5575_v28, %v10039_v19  ;;  %v10044_v20 = vunpack.i.h.bf16 %v13209_v32  ;;  %v5481_v62 = vsel %vm2595_vm2, %v10326_v30, %v10019_v52  ;;  %v5512_v43 = vsel %vm3760_vm8, %v5480_v9, %v10043_v21  ;;  %v10327_v28 = vld [vmem:[#allocation3 + $0x140] sm:$0xff]  ;;  %v10328_v19 = vld [vmem:[#allocation3 + $0x138] sm:$0xff]  ;;  %vm14332_vm3 = vmmov %vm14325_vm5 }
 0x5c3   : > { %8197 = vmatmul.mubr.msk.bf16.gmra.mrb[104].mxu1 %vm4050_vm15, %v5722_v49  ;;  %8214 = vmatmul.mubr.msk.bf16.gmra.mrb[72].mxu0 %vm4050_vm15, %v5722_v49  ;;  %v5638_v2 = vsel %vm3892_vm12, %v5606_v11, %v10088_v36  ;;  %v6710_v51 = vsel %vm13043_vm14, 0, %v8308_v23  ;;  %v5639_v54 = vsel %vm3892_vm12, %v5607_v56, %v10089_v60  ;;  %v6612_v32 = vsel %vm13009_vm1, 0, %v8246_v13  ;;  %v14331_v30 = vld [vmem:[#allocation21_spill] sm:$0xff] }
 0x5c4   : > { %v13282_v47 = vpop.permute.xlu0 %10096  ;;  %6060 = vmatprep.mubr.bf16.mxu1 %v13252_v27  ;;  %6253 = vmatprep.mubr.bf16.mxu0 %v13252_v27  ;;  %8309 = vst [vmem:[%s10423_s14 + $0x118] sm:$0x11] %v6710_v51  ;;  %v10094_v49 = vunpack.i.h.bf16 %v13270_v5  ;;  %v10093_v12 = vunpack.i.l.bf16 %v13270_v5  ;;  %8247 = vst [vmem:[%s10423_s14 + $0x120] sm:$0x11] %v6612_v32  ;;  %v5513_v40 = vsel %vm3760_vm8, %v5481_v62, %v10044_v20  ;;  %v10079_v6 = vunpack.i.h.bf16 %v13249_v25 }
 0x5c5   : > { %v13288_v58 = vpop.permute.xlu1 %10101  ;;  %v10078_v44 = vunpack.i.l.bf16 %v13249_v25  ;;  %v10084_v9 = vunpack.i.h.bf16 %v13266_v26  ;;  %v10083_v20 = vunpack.i.l.bf16 %v13266_v26  ;;  %v5750_v62 = vsub.s32 0, %v14331_v30 }
 0x5c6   : > { %v5545_v16 = vsel %vm3793_vm9, %v5513_v40, %v10094_v49  ;;  %v5544_v45 = vsel %vm3793_vm9, %v5512_v43, %v10093_v12  ;;  %v10104_v11 = vunpack.i.h.bf16 %v13288_v58  ;;  %v10103_v56 = vunpack.i.l.bf16 %v13288_v58 }
 0x5c7   : > { %v5758_v43 = vsub.s32 2, %v14331_v30  ;;  %v5754_v32 = vsub.s32 1, %v14331_v30  ;;  %v5762_v49 = vsub.s32 3, %v14331_v30 }
 0x5c8   : > { %v13301_v10 = vpop.permute.xlu0 %10106 }
 0x5c9   : > { %v13306_v0 = vpop.permute.xlu1 %10111  ;;  %v10108_v58 = vunpack.i.l.bf16 %v13301_v10 }
 0x5cc   : > { %v13313_v57 = vpop.permute.xlu0 %10116 }
 0x5ce   : > { %v13323_v15 = vpop.permute.xlu1 %10126 }
 0x5cf   : > { %v10129_v29 = vunpack.i.h.bf16 %v13323_v15  ;;  %v10128_v24 = vunpack.i.l.bf16 %v13323_v15 }
 0x5d0   : > { %v13332_v61 = vpop.permute.xlu0 %10121 }
 0x5d1   : > { %v5483_v52 = vsel %vm2595_vm2, %v10327_v28, %v10129_v29  ;;  %v5482_v21 = vsel %vm2595_vm2, %v10328_v19, %v10128_v24 }
 0x5d2   : > { %v10137_v7 = vpop.permute.xlu1 %10136 }
 0x5d3   : > { %v10139_v1 = vunpack.i.h.bf16 %v10137_v7  ;;  %v10138_v42 = vunpack.i.l.bf16 %v10137_v7 }
 0x5d4   : > { %v10132_v22 = vpop.permute.xlu0 %10131 }
 0x5d5   : > { %v10134_v17 = vunpack.i.h.bf16 %v10132_v22  ;;  %v10133_v48 = vunpack.i.l.bf16 %v10132_v22  ;;  %v10109_v22 = vunpack.i.h.bf16 %v13301_v10 }
 0x5d6   : > { %v10147_v50 = vpop.permute.xlu1 %10146 }
 0x5d7   : > { %v5670_v46 = vsel %vm3925_vm13, %v5638_v2, %v10133_v48  ;;  %v5671_v55 = vsel %vm3925_vm13, %v5639_v54, %v10134_v17  ;;  %v10149_v8 = vunpack.i.h.bf16 %v10147_v50  ;;  %v10148_v63 = vunpack.i.l.bf16 %v10147_v50  ;;  %v8248_v2 = vld [vmem:[%s10423_s14 + $0x128] sm:$0x11]  ;;  %v8310_v17 = vld [vmem:[%s10423_s14 + $0x140] sm:$0x11] }
 0x5d8   : > { %v10142_v4 = vpop.permute.xlu0 %10141  ;;  %v5702_v39 = vsel %vm14329_vm7, %v5670_v46, %v10138_v42  ;;  %v5703_v5 = vsel %vm14325_vm5, %v5671_v55, %v10139_v1  ;;  %vm14333_vm7 = vmmov %vm14332_vm3  ;;  %v5746_v42 = vld [vmem:[%s14249_s7] sm:$0xf]  ;;  %v6615_v50 = vsel %vm13009_vm1, 0, %v8248_v2  ;;  %v6713_v40 = vsel %vm13043_vm14, 0, %v8310_v17  ;;  %v8252_v2 = vld [vmem:[%s10423_s14 + $0x158] sm:$0x11] }
 0x5d9   : > { %v10144_v31 = vunpack.i.h.bf16 %v10142_v4  ;;  %v10143_v53 = vunpack.i.l.bf16 %v10142_v4  ;;  %v5723_v37 = vpack.c.bf16 %v5703_v5, %v5702_v39  ;;  %v10114_v46 = vunpack.i.h.bf16 %v13306_v0  ;;  %8249 = vst [vmem:[%s10423_s14 + $0x128] sm:$0x11] %v6615_v50  ;;  %8311 = vst [vmem:[%s10423_s14 + $0x140] sm:$0x11] %v6713_v40  ;;  %v8250_v4 = vld [vmem:[%s10423_s14 + $0x150] sm:$0x11] }
 0x5da   : > { %v10152_v34 = vpop.permute.xlu1 %10151  ;;  %v10113_v55 = vunpack.i.l.bf16 %v13306_v0  ;;  %v10099_v39 = vunpack.i.h.bf16 %v13282_v47  ;;  %v10098_v5 = vunpack.i.l.bf16 %v13282_v47  ;;  %v10119_v47 = vunpack.i.h.bf16 %v13313_v57  ;;  %vm14334_vm5 = vmmov %vm14327_vm0 }
 0x5db   : > { %v5576_v25 = vsel %vm3826_vm10, %v5544_v45, %v10143_v53  ;;  %v5577_v33 = vsel %vm3826_vm10, %v5545_v16, %v10144_v31  ;;  %v10154_v41 = vunpack.i.h.bf16 %v10152_v34  ;;  %v10153_v59 = vunpack.i.l.bf16 %v10152_v34  ;;  %8198 = vmatmul.mubr.msk.bf16.gmra.mrb[108].mxu1 %vm4050_vm15, %v5723_v37  ;;  %8215 = vmatmul.mubr.msk.bf16.gmra.mrb[76].mxu0 %vm4050_vm15, %v5723_v37 }
 0x5dc   : > { %v5608_v15 = vsel %vm14330_vm6, %v5576_v25, %v10148_v63  ;;  %v5609_v3 = vsel %vm14327_vm0, %v5577_v33, %v10149_v8  ;;  %v13370_v18 = vpop.permute.xlu0 %10156  ;;  %6070 = vmatprep.mubr.bf16.mxu1 %v13252_v27  ;;  %6263 = vmatprep.mubr.bf16.mxu0 %v13252_v27  ;;  %v6618_v31 = vsel %vm13009_vm1, 0, %v8250_v4  ;;  %v10123_v53 = vunpack.i.l.bf16 %v13332_v61  ;;  %vm14335_vm6 = vmmov %vm14327_vm0 }
 0x5dd   : > { %v5640_v36 = vsel %vm3892_vm12, %v5608_v15, %v10078_v44  ;;  %v5641_v60 = vsel %vm3892_vm12, %v5609_v3, %v10079_v6  ;;  %v5514_v7 = vsel %vm3760_vm8, %v5482_v21, %v10153_v59  ;;  %v5515_v23 = vsel %vm3760_vm8, %v5483_v52, %v10154_v41  ;;  %v8312_v6 = vld [vmem:[%s10423_s14 + $0x148] sm:$0x11]  ;;  %8251 = vst [vmem:[%s10423_s14 + $0x150] sm:$0x11] %v6618_v31 }
 0x5de   : > { %v13382_v38 = vpop.permute.xlu1 %10161  ;;  %v5672_v13 = vsel %vm3925_vm13, %v5640_v36, %v10103_v56  ;;  %v5673_v54 = vsel %vm3925_vm13, %v5641_v60, %v10104_v11  ;;  %v5546_v26 = vsel %vm3793_vm9, %v5514_v7, %v10083_v20  ;;  %v5547_v48 = vsel %vm3793_vm9, %v5515_v23, %v10084_v9  ;;  %v10329_v15 = vld [vmem:[#allocation3 + $0x158] sm:$0xff] }
 0x5df   : > { %v5704_v10 = vsel %vm14332_vm3, %v5672_v13, %v10108_v58  ;;  %v5705_v1 = vsel %vm14333_vm7, %v5673_v54, %v10109_v22  ;;  %v6716_v29 = vsel %vm13043_vm14, 0, %v8312_v6  ;;  %v5578_v0 = vsel %vm3826_vm10, %v5546_v26, %v10113_v55  ;;  %vm14336_vm7 = vmmov %vm14332_vm3 }
 0x5e0   : > { %v13391_v51 = vpop.permute.xlu0 %10176  ;;  %v5724_v44 = vpack.c.bf16 %v5705_v1, %v5704_v10  ;;  %8313 = vst [vmem:[%s10423_s14 + $0x148] sm:$0x11] %v6716_v29  ;;  %v5579_v37 = vsel %vm3826_vm10, %v5547_v48, %v10114_v46  ;;  %v13429_v16 = vrot.slane %v5746_v42, %v5750_v62  ;;  %v10118_v45 = vunpack.i.l.bf16 %v13313_v57  ;;  %v10331_v29 = vld [vmem:[#allocation3 + $0x170] sm:$0xff] }
 0x5e1   : > { %v10124_v8 = vunpack.i.h.bf16 %v13332_v61  ;;  %v13437_v34 = vrot.slane %v5746_v42, %v5758_v43  ;;  %v10164_v25 = vunpack.i.h.bf16 %v13382_v38  ;;  %v10163_v33 = vunpack.i.l.bf16 %v13382_v38  ;;  %v10330_v61 = vld [vmem:[#allocation3 + $0x150] sm:$0xff] }
 0x5e2   : > { %v13400_v12 = vpop.permute.xlu1 %10166  ;;  %v13443_v41 = vrot.slane %v5746_v42, %v5754_v32  ;;  %v13445_v59 = vrot.slane %v5746_v42, %v5762_v49  ;;  %v5485_v57 = vsel %vm2595_vm2, %v10329_v15, %v10099_v39  ;;  %v5484_v3 = vsel %vm2595_vm2, %v10330_v61, %v10098_v5  ;;  %v10332_v39 = vld [vmem:[#allocation3 + $0x168] sm:$0xff] }
 0x5e3   : > { %8199 = vmatmul.mubr.msk.bf16.gmra.mrb[112].mxu1 %vm4050_vm15, %v5724_v44  ;;  %8216 = vmatmul.mubr.msk.bf16.gmra.mrb[80].mxu0 %vm4050_vm15, %v5724_v44  ;;  %v5610_v28 = vsel %vm14334_vm5, %v5578_v0, %v10118_v45  ;;  %v5611_v52 = vsel %vm14335_vm6, %v5579_v37, %v10119_v47  ;;  %v5516_v21 = vsel %vm3760_vm8, %v5484_v3, %v10123_v53  ;;  %v10169_v36 = vunpack.i.h.bf16 %v13400_v12 }
 0x5e4   : > { %v10187_v24 = vpop.permute.xlu0 %10186  ;;  %6080 = vmatprep.mubr.bf16.mxu1 %v13252_v27  ;;  %6273 = vmatprep.mubr.bf16.mxu0 %v13252_v27  ;;  %v10168_v60 = vunpack.i.l.bf16 %v13400_v12  ;;  %v5517_v56 = vsel %vm3760_vm8, %v5485_v57, %v10124_v8  ;;  %v10159_v7 = vunpack.i.h.bf16 %v13370_v18  ;;  %v10158_v23 = vunpack.i.l.bf16 %v13370_v18  ;;  %v8314_v12 = vld [vmem:[%s10423_s14 + $0x170] sm:$0x11] }
 0x5e5   : > { %v10189_v11 = vunpack.i.h.bf16 %v10187_v24  ;;  %v10188_v38 = vunpack.i.l.bf16 %v10187_v24  ;;  %v5643_v20 = vsel %vm3892_vm12, %v5611_v52, %v10164_v25  ;;  %v5642_v30 = vsel %vm3892_vm12, %v5610_v28, %v10163_v33 }
 0x5e6   : > { %v13435_v63 = vpop.permute.xlu1 %10171  ;;  %v10179_v22 = vunpack.i.h.bf16 %v13391_v51  ;;  %v6621_v17 = vsel %vm13009_vm1, 0, %v8252_v2  ;;  %v10178_v26 = vunpack.i.l.bf16 %v13391_v51  ;;  %v5549_v48 = vsel %vm3793_vm9, %v5517_v56, %v10169_v36 }
 0x5e7   : > { %v5548_v32 = vsel %vm3793_vm9, %v5516_v21, %v10168_v60  ;;  %v5675_v49 = vsel %vm3925_vm13, %v5643_v20, %v10189_v11  ;;  %8253 = vst [vmem:[%s10423_s14 + $0x158] sm:$0x11] %v6621_v17  ;;  %v5674_v10 = vsel %vm3925_vm13, %v5642_v30, %v10188_v38  ;;  %v10174_v1 = vunpack.i.h.bf16 %v13435_v63 }
 0x5e8   : > { %v10197_v19 = vpop.permute.xlu0 %10196  ;;  %v10173_v42 = vunpack.i.l.bf16 %v13435_v63  ;;  %v6719_v40 = vsel %vm13043_vm14, 0, %v8314_v12  ;;  %vm7742_vm0 = vcmask 1047556   ;;  %vm14337_vm5 = vcmask 1043456  }
 0x5e9   : > { %v10199_v62 = vunpack.i.h.bf16 %v10197_v19  ;;  %v10198_v43 = vunpack.i.l.bf16 %v10197_v19  ;;  %8315 = vst [vmem:[%s10423_s14 + $0x170] sm:$0x11] %v6719_v40  ;;  %vm13520_vm6 = vmand %vm14337_vm5, %vm6677_vm11  ;;  %vm14342_vm11 = vcmask 326656  }
 0x5ea   : > { %v10182_v9 = vpop.permute.xlu1 %10181 }
 0x5eb   : > { %v10184_v58 = vunpack.i.h.bf16 %v10182_v9  ;;  %v10183_v13 = vunpack.i.l.bf16 %v10182_v9  ;;  %v13477_v6 = vsel %vm3826_vm10, %v5549_v48, %v10199_v62  ;;  %v13480_v46 = vsel %vm3826_vm10, %v5548_v32, %v10198_v43 }
 0x5ec   : > { %v13461_v54 = vpop.permute.xlu0 %10201 }
 0x5ed   : > { %v13484_v4 = vsel %vm2595_vm2, %v10331_v29, %v10184_v58  ;;  %v13487_v5 = vsel %vm2595_vm2, %v10332_v39, %v10183_v13  ;;  %v10204_v24 = vunpack.i.h.bf16 %v13461_v54  ;;  %v10203_v31 = vunpack.i.l.bf16 %v13461_v54  ;;  %v8316_v39 = vld [vmem:[%s10423_s14 + $0x178] sm:$0x11] }
 0x5ee   : > { %v10192_v50 = vpop.permute.xlu1 %10191  ;;  %vm7098_vm2 = vsmask.f32 4368 }
 0x5ef   : > { %v10194_v55 = vunpack.i.h.bf16 %v10192_v50  ;;  %v10193_v44 = vunpack.i.l.bf16 %v10192_v50 }
 0x5f0   : > { %v5952_v53 = vpop.f32.mrb[64].mxu1  ;;  %v6145_v0 = vpop.f32.mrb[32].mxu0 }
 0x5f1   : > { %v5707_v37 = vsel %vm14332_vm3, %v5675_v49, %v10194_v55  ;;  %v5706_v47 = vsel %vm14336_vm7, %v5674_v10, %v10193_v44  ;;  %v5953_v45 = vadd.f32 %v5952_v53, %v13429_v16  ;;  %v6146_v8 = vadd.f32 %v6145_v0, %v13437_v34  ;;  %v13495_v25 = vpop.permute.xlu0 %10211  ;;  %v5954_v33 = vpop.f32.mrb[65].mxu1  ;;  %vm13526_vm3 = vmand %vm7742_vm0, %vm6679_vm4 }
 0x5f2   : > { %v5725_v15 = vpack.c.bf16 %v5707_v37, %v5706_v47  ;;  %v10214_v57 = vunpack.i.h.bf16 %v13495_v25  ;;  %v10213_v61 = vunpack.i.l.bf16 %v13495_v25  ;;  %v5955_v3 = vadd.f32 %v5954_v33, %v13443_v41  ;;  %v6147_v28 = vpop.f32.mrb[33].mxu0  ;;  %v13500_v52 = vpop.permute.xlu1 %10206  ;;  %vm14343_vm4 = vmmov %vm14342_vm11 }
 0x5f3   : > { %v6304_v19 = vmul.f32 0.2, %v5953_v45  ;;  %v6306_v21 = vmul.f32 0.2, %v6146_v8  ;;  %v6148_v36 = vadd.f32 %v6147_v28, %v13445_v59  ;;  %v10209_v60 = vunpack.i.h.bf16 %v13500_v52  ;;  %v5956_v11 = vpop.f32.mrb[66].mxu1  ;;  %v6149_v56 = vpop.f32.mrb[34].mxu0  ;;  %vm13544_vm0 = vmor %vm13526_vm3, %vm13520_vm6 }
 0x5f4   : > { %v6305_v38 = vmul.f32 0.2, %v5955_v3  ;;  %v10208_v9 = vunpack.i.l.bf16 %v13500_v52  ;;  %v5957_v20 = vadd.f32 %v5956_v11, %v13429_v16  ;;  %v6150_v30 = vadd.f32 %v6149_v56, %v13437_v34  ;;  %v5958_v62 = vpop.f32.mrb[67].mxu1  ;;  %8200 = vmatmul.mubr.msk.bf16.gmra.mrb[116].mxu1 %vm4050_vm15, %v5725_v15  ;;  %v6151_v43 = vpop.f32.mrb[35].mxu0  ;;  %8217 = vmatmul.mubr.msk.bf16.gmra.mrb[84].mxu0 %vm4050_vm15, %v5725_v15 }
 0x5f5   : > { %v6432_v2 = vmax.f32 %v5953_v45, %v6304_v19  ;;  %v6434_v58 = vmax.f32 %v6146_v8, %v6306_v21  ;;  %v6307_v13 = vmul.f32 0.2, %v6148_v36  ;;  %v5959_v17 = vadd.f32 %v5958_v62, %v13443_v41  ;;  %6090 = vmatprep.mubr.bf16.mxu1 %v13252_v27  ;;  %6283 = vmatprep.mubr.bf16.mxu0 %v13252_v27  ;;  %v13512_v48 = vpop.permute.xlu0 %10231 }
 0x5f6   : > { %v6433_v32 = vmax.f32 %v5955_v3, %v6305_v38  ;;  %v6308_v49 = vmul.f32 0.2, %v5957_v20  ;;  %v6310_v12 = vmul.f32 0.2, %v6150_v30  ;;  %v6152_v10 = vadd.f32 %v6151_v43, %v13445_v59  ;;  %v10217_v55 = vpop.permute.xlu1 %10216 }
 0x5f7   : > { %v6435_v50 = vmax.f32 %v6148_v36, %v6307_v13  ;;  %v6309_v40 = vmul.f32 0.2, %v5959_v17  ;;  %v10234_v44 = vunpack.i.h.bf16 %v13512_v48  ;;  %v10233_v29 = vunpack.i.l.bf16 %v13512_v48 }
 0x5f8   : > { %v8582_v53 = vpack.c.bf16 %v6433_v32, %v6432_v2  ;;  %v6436_v0 = vmax.f32 %v5957_v20, %v6308_v49  ;;  %v6438_v37 = vmax.f32 %v6150_v30, %v6310_v12  ;;  %v6311_v47 = vmul.f32 0.2, %v6152_v10 }
 0x5f9   : > { %v8583_v8 = vpack.c.bf16 %v6435_v50, %v6434_v58  ;;  %v6437_v33 = vmax.f32 %v5959_v17, %v6309_v40  ;;  %v10219_v15 = vunpack.i.h.bf16 %v10217_v55  ;;  %v10218_v3 = vunpack.i.l.bf16 %v10217_v55  ;;  %v8420_v50 = vld [vmem:[%s10423_s14 + $0x38] sm:$0xff] }
 0x5fa   : > { %v7101_v19 = vshrl.u32 %v8582_v53, 16  ;;  %v7104_v21 = vshll.u32 %v8582_v53, 16  ;;  %v6439_v36 = vmax.f32 %v6152_v10, %v6311_v47  ;;  %v6722_v11 = vsel %vm13043_vm14, 0, %v8316_v39  ;;  %v10222_v62 = vpop.permute.xlu1 %10221 }
 0x5fb   : > { %v7108_v56 = vshrl.u32 %v8583_v8, 16  ;;  %v7111_v38 = vshll.u32 %v8583_v8, 16  ;;  %v8584_v20 = vpack.c.bf16 %v6437_v33, %v6436_v0  ;;  %v5613_v30 = vsel %vm14342_vm11, %v13477_v6, %v10219_v15  ;;  %8317 = vst [vmem:[%s10423_s14 + $0x178] sm:$0x11] %v6722_v11  ;;  %v8418_v6 = vld [vmem:[%s10423_s14 + $0x30] sm:$0xff] }
 0x5fc   : > { %v7103_v43 = vrot.slane %v7101_v19, 7  ;;  %v8585_v2 = vpack.c.bf16 %v6439_v36, %v6438_v37  ;;  %v5645_v58 = vsel %vm3892_vm12, %v5613_v30, %v10159_v7  ;;  %v5612_v13 = vsel %vm14343_vm4, %v13480_v46, %v10218_v3 }
 0x5fd   : > { %v7110_v32 = vrot.slane %v7108_v56, 7  ;;  %v7116_v49 = vshrl.u32 %v8584_v20, 16  ;;  %v7119_v12 = vshll.u32 %v8584_v20, 16  ;;  %v5644_v7 = vsel %vm3892_vm12, %v5612_v13, %v10158_v23  ;;  %v8424_v23 = vld [vmem:[%s10423_s14 + $0x50] sm:$0x11] }
 0x5fe   : > { %v7106_v10 = vor.u32 %v7104_v21, %v7103_v43  ;;  %v7114_v46 = vrot.slane %v7103_v43, 4  ;;  %v7125_v40 = vshrl.u32 %v8585_v2, 16  ;;  %v7128_v55 = vshll.u32 %v8585_v2, 16  ;;  %v10227_v47 = vpop.permute.xlu1 %10226  ;;  %v8426_v21 = vld [vmem:[%s10423_s14 + $0x58] sm:$0x11] }
 0x5ff   : > { %v7113_v39 = vor.u32 %v7111_v38, %v7110_v32  ;;  %v7123_v53 = vrot.slane %v7110_v32, 4  ;;  %v7118_v0 = vrot.slane %v7116_v49, 7  ;;  %v10224_v37 = vunpack.i.h.bf16 %v10222_v62  ;;  %v8256_v32 = vld [vmem:[%s10423_s14 + $0x188] sm:$0x11]  ;;  %v8318_v49 = vld [vmem:[%s10423_s14 + $0x1a0] sm:$0x11] }
 0x600   : > { %v7746_v45 = vsel %vm13544_vm0, %v7106_v10, %v8418_v6  ;;  %vm14346_vm7 = vsmask.f32 256  ;;  %v7127_v8 = vrot.slane %v7125_v40, 7  ;;  %v10223_v33 = vunpack.i.l.bf16 %v10222_v62 }
 0x601   : > { %vm13557_vm5 = vmor %vm14346_vm7, %vm7098_vm2  ;;  %v10229_v15 = vunpack.i.h.bf16 %v10227_v47  ;;  %8419 = vst [vmem:[%s10423_s14 + $0x30] sm:$0xff] %v7746_v45  ;;  %v7749_v3 = vsel %vm13544_vm0, %v7113_v39, %v8420_v50  ;;  %v7121_v28 = vor.u32 %v7119_v12, %v7118_v0  ;;  %v7132_v19 = vrot.slane %v7118_v0, 4  ;;  %v8322_v0 = vld [vmem:[%s10423_s14 + $0x1d0] sm:$0x11] }
 0x602   : > { %v5519_v36 = vsel %vm3760_vm8, %v13484_v4, %v10224_v37  ;;  %8421 = vst [vmem:[%s10423_s14 + $0x38] sm:$0xff] %v7749_v3  ;;  %v7130_v11 = vor.u32 %v7128_v55, %v7127_v8  ;;  %v7133_v56 = vrot.slane %v7127_v8, 4  ;;  %v5518_v38 = vsel %vm3760_vm8, %v13487_v5, %v10223_v33  ;;  %vm14349_vm8 = vmmov %vm14343_vm4 }
 0x603   : > { %v5551_v20 = vsel %vm3793_vm9, %v5519_v36, %v10204_v24  ;;  %v7122_v30 = vsel %vm13557_vm5, %v7114_v46, %v7121_v28  ;;  %v7754_v62 = vsel %vm13009_vm1, %v7132_v19, %v8424_v23  ;;  %v5550_v4 = vsel %vm3793_vm9, %v5518_v38, %v10203_v31  ;;  %v10237_v31 = vpop.permute.xlu1 %10236  ;;  %vm14350_vm9 = vmmov %vm14343_vm4 }
 0x604   : > { %v10228_v43 = vunpack.i.l.bf16 %v10227_v47  ;;  %8422 = vst [vmem:[%s10423_s14 + $0x40] sm:$0xff] %v7122_v30  ;;  %8425 = vst [vmem:[%s10423_s14 + $0x50] sm:$0x11] %v7754_v62  ;;  %v7131_v5 = vsel %vm13557_vm5, %v7123_v53, %v7130_v11  ;;  %v7757_v24 = vsel %vm13009_vm1, %v7133_v56, %v8426_v21  ;;  %v5582_v2 = vsel %vm3826_vm10, %v5550_v4, %v10208_v9  ;;  %v8324_v11 = vld [vmem:[%s10423_s14 + $0x1d8] sm:$0x11] }
 0x605   : > { %v5583_v54 = vsel %vm3826_vm10, %v5551_v20, %v10209_v60  ;;  %8423 = vst [vmem:[%s10423_s14 + $0x48] sm:$0xff] %v7131_v5  ;;  %8427 = vst [vmem:[%s10423_s14 + $0x58] sm:$0x11] %v7757_v24  ;;  %v5614_v13 = vsel %vm14349_vm8, %v5582_v2, %v10213_v61  ;;  %v5676_v9 = vsel %vm3925_vm13, %v5644_v7, %v10173_v42  ;;  %v8254_v60 = vld [vmem:[%s10423_s14 + $0x180] sm:$0x11]  ;;  %vm14351_vm10 = vcmask 523264  }
 0x606   : > { %v5615_v6 = vsel %vm14350_vm9, %v5583_v54, %v10214_v57  ;;  %v5677_v52 = vsel %vm3925_vm13, %v5645_v58, %v10174_v1  ;;  %v5646_v12 = vsel %vm3892_vm12, %v5614_v13, %v10228_v43  ;;  %v5708_v25 = vsel %vm14351_vm10, %v5676_v9, %v10178_v26  ;;  %vm14352_vm2 = vmmov %vm14351_vm10  ;;  %v8320_v42 = vld [vmem:[%s10423_s14 + $0x1a8] sm:$0x11]  ;;  %v8258_v1 = vld [vmem:[%s10423_s14 + $0x1b0] sm:$0x11] }
 0x607   : > { %v5647_v61 = vsel %vm3892_vm12, %v5615_v6, %v10229_v15  ;;  %v5709_v63 = vsel %vm14352_vm2, %v5677_v52, %v10179_v22  ;;  %v10239_v58 = vunpack.i.h.bf16 %v10237_v31  ;;  %v10238_v7 = vunpack.i.l.bf16 %v10237_v31  ;;  %vm14353_vm12 = vmmov %vm14352_vm2  ;;  %v8262_v6 = vld [vmem:[%s10423_s14 + $0x1e0] sm:$0x11] }
 0x608   : > { %v5726_v57 = vpack.c.bf16 %v5709_v63, %v5708_v25  ;;  %v6624_v10 = vsel %vm13009_vm1, 0, %v8254_v60  ;;  %v6627_v46 = vsel %vm13009_vm1, 0, %v8256_v32  ;;  %v6725_v26 = vsel %vm13043_vm14, 0, %v8318_v49  ;;  %vm14354_vm6 = vmmov %vm14352_vm2 }
 0x609   : > { %v5678_v51 = vsel %vm3925_vm13, %v5646_v12, %v10233_v29  ;;  %v5679_v22 = vsel %vm3925_vm13, %v5647_v61, %v10234_v44  ;;  %8255 = vst [vmem:[%s10423_s14 + $0x180] sm:$0x11] %v6624_v10  ;;  %8257 = vst [vmem:[%s10423_s14 + $0x188] sm:$0x11] %v6627_v46  ;;  %v6728_v50 = vsel %vm13043_vm14, 0, %v8320_v42  ;;  %v6630_v40 = vsel %vm13009_vm1, 0, %v8258_v1 }
 0x60a   : > { %8201 = vmatmul.mubr.msk.bf16.gmra.mrb[120].mxu1 %vm4050_vm15, %v5726_v57  ;;  %8218 = vmatmul.mubr.msk.bf16.gmra.mrb[88].mxu0 %vm4050_vm15, %v5726_v57  ;;  %8319 = vst [vmem:[%s10423_s14 + $0x1a0] sm:$0x11] %v6725_v26  ;;  %v5710_v29 = vsel %vm14353_vm12, %v5678_v51, %v10238_v7  ;;  %v5711_v48 = vsel %vm14354_vm6, %v5679_v22, %v10239_v58  ;;  %8321 = vst [vmem:[%s10423_s14 + $0x1a8] sm:$0x11] %v6728_v50  ;;  %v8260_v44 = vld [vmem:[%s10423_s14 + $0x1b8] sm:$0x11] }
 0x60b   : > { %6100 = vmatprep.mubr.bf16.mxu1 %v13252_v27  ;;  %6293 = vmatprep.mubr.bf16.mxu0 %v13252_v27  ;;  %8259 = vst [vmem:[%s10423_s14 + $0x1b0] sm:$0x11] %v6630_v40  ;;  %v6633_v55 = vsel %vm13009_vm1, 0, %v8260_v44  ;;  %v5727_v39 = vpack.c.bf16 %v5711_v48, %v5710_v29  ;;  %v6731_v15 = vsel %vm13043_vm14, 0, %v8322_v0  ;;  %v6734_v32 = vsel %vm13043_vm14, 0, %v8324_v11 }
 0x60c   : > { %8261 = vst [vmem:[%s10423_s14 + $0x1b8] sm:$0x11] %v6633_v55  ;;  %8323 = vst [vmem:[%s10423_s14 + $0x1d0] sm:$0x11] %v6731_v15  ;;  %v6636_v63 = vsel %vm13009_vm1, 0, %v8262_v6 }
 0x60d   : > { %8325 = vst [vmem:[%s10423_s14 + $0x1d8] sm:$0x11] %v6734_v32  ;;  %8263 = vst [vmem:[%s10423_s14 + $0x1e0] sm:$0x11] %v6636_v63  ;;  %v8264_v32 = vld [vmem:[%s10423_s14 + $0x1e8] sm:$0x11] }
 0x60e   : > { %v5962_v53 = vpop.f32.mrb[68].mxu1 }
 0x60f   : > { %v5963_v37 = vadd.f32 %v5962_v53, %v13429_v16  ;;  %v6155_v47 = vpop.f32.mrb[36].mxu0  ;;  %v5964_v45 = vpop.f32.mrb[69].mxu1 }
 0x610   : > { %v6156_v27 = vadd.f32 %v6155_v47, %v13437_v34  ;;  %v5965_v23 = vadd.f32 %v5964_v45, %v13443_v41  ;;  %v6157_v8 = vpop.f32.mrb[37].mxu0  ;;  %v5966_v33 = vpop.f32.mrb[70].mxu1 }
 0x611   : > { %v6312_v3 = vmul.f32 0.2, %v5963_v37  ;;  %v6158_v28 = vadd.f32 %v6157_v8, %v13445_v59  ;;  %v5967_v19 = vadd.f32 %v5966_v33, %v13429_v16  ;;  %v6159_v21 = vpop.f32.mrb[38].mxu0  ;;  %v5968_v36 = vpop.f32.mrb[71].mxu1 }
 0x612   : > { %8202 = vmatmul.mubr.msk.bf16.gmra.mrb[124].mxu1 %vm4050_vm15, %v5727_v39  ;;  %8219 = vmatmul.mubr.msk.bf16.gmra.mrb[92].mxu0 %vm4050_vm15, %v5727_v39  ;;  %v6314_v56 = vmul.f32 0.2, %v6156_v27  ;;  %v6313_v38 = vmul.f32 0.2, %v5965_v23  ;;  %v6160_v20 = vadd.f32 %v6159_v21, %v13437_v34  ;;  %v5969_v30 = vadd.f32 %v5968_v36, %v13443_v41  ;;  %v6161_v62 = vpop.f32.mrb[39].mxu0 }
 0x613   : > { %v6440_v4 = vmax.f32 %v5963_v37, %v6312_v3  ;;  %v6315_v43 = vmul.f32 0.2, %v6158_v28  ;;  %v6316_v5 = vmul.f32 0.2, %v5967_v19  ;;  %v6162_v24 = vadd.f32 %v6161_v62, %v13445_v59 }
 0x614   : > { %v6442_v2 = vmax.f32 %v6156_v27, %v6314_v56  ;;  %v6441_v54 = vmax.f32 %v5965_v23, %v6313_v38  ;;  %v6318_v31 = vmul.f32 0.2, %v6160_v20  ;;  %v6317_v13 = vmul.f32 0.2, %v5969_v30  ;;  %v8428_v27 = vld [vmem:[%s10423_s14 + $0x60] sm:$0xff] }
 0x615   : > { %v6443_v9 = vmax.f32 %v6158_v28, %v6315_v43  ;;  %v6444_v52 = vmax.f32 %v5967_v19, %v6316_v5  ;;  %v6319_v60 = vmul.f32 0.2, %v6162_v24  ;;  %v8430_v19 = vld [vmem:[%s10423_s14 + $0x68] sm:$0xff]  ;;  %v8434_v38 = vld [vmem:[%s10423_s14 + $0x80] sm:$0x11] }
 0x616   : > { %v8586_v49 = vpack.c.bf16 %v6441_v54, %v6440_v4  ;;  %v6446_v12 = vmax.f32 %v6160_v20, %v6318_v31  ;;  %v6445_v61 = vmax.f32 %v5969_v30, %v6317_v13  ;;  %v5972_v25 = vpop.f32.mrb[72].mxu1  ;;  %v8436_v5 = vld [vmem:[%s10423_s14 + $0x88] sm:$0x11] }
 0x617   : > { %v8587_v42 = vpack.c.bf16 %v6443_v9, %v6442_v2  ;;  %v6447_v1 = vmax.f32 %v6162_v24, %v6319_v60  ;;  %v13673_v57 = vadd.f32 %v5972_v25, %v13429_v16  ;;  %v6165_v58 = vpop.f32.mrb[40].mxu0  ;;  %v5974_v7 = vpop.f32.mrb[73].mxu1 }
 0x618   : > { %v7135_v10 = vshrl.u32 %v8586_v49, 16  ;;  %v7138_v46 = vshll.u32 %v8586_v49, 16  ;;  %v8588_v26 = vpack.c.bf16 %v6445_v61, %v6444_v52  ;;  %v13677_v51 = vadd.f32 %v6165_v58, %v13437_v34  ;;  %v6167_v22 = vpop.f32.mrb[41].mxu0  ;;  %v5976_v50 = vpop.f32.mrb[74].mxu1  ;;  %v8326_v49 = vld [vmem:[%s10423_s14 + $0x200] sm:$0x11] }
 0x619   : > { %v7142_v40 = vshrl.u32 %v8587_v42, 16  ;;  %v7145_v29 = vshll.u32 %v8587_v42, 16  ;;  %v8589_v48 = vpack.c.bf16 %v6447_v1, %v6446_v12  ;;  %v6320_v44 = vmul.f32 0.2, %v13673_v57  ;;  %v6169_v55 = vpop.f32.mrb[42].mxu0  ;;  %v5978_v39 = vpop.f32.mrb[75].mxu1 }
 0x61a   : > { %v7137_v53 = vrot.slane %v7135_v10, 7  ;;  %v7150_v0 = vshrl.u32 %v8588_v26, 16  ;;  %v7153_v37 = vshll.u32 %v8588_v26, 16  ;;  %v6322_v47 = vmul.f32 0.2, %v13677_v51  ;;  %v6171_v45 = vpop.f32.mrb[43].mxu0 }
 0x61b   : > { %v7144_v23 = vrot.slane %v7142_v40, 7  ;;  %v7159_v8 = vshrl.u32 %v8589_v48, 16  ;;  %v7162_v33 = vshll.u32 %v8589_v48, 16  ;;  %v6448_v15 = vmax.f32 %v13673_v57, %v6320_v44  ;;  %v8266_v48 = vld [vmem:[%s10423_s14 + $0x210] sm:$0x11] }
 0x61c   : > { %v7140_v3 = vor.u32 %v7138_v46, %v7137_v53  ;;  %v7148_v28 = vrot.slane %v7137_v53, 4  ;;  %v7152_v21 = vrot.slane %v7150_v0, 7  ;;  %v6450_v36 = vmax.f32 %v13677_v51, %v6322_v47 }
 0x61d   : > { %v7147_v11 = vor.u32 %v7145_v29, %v7144_v23  ;;  %v7157_v56 = vrot.slane %v7144_v23, 4  ;;  %v7161_v20 = vrot.slane %v7159_v8, 7  ;;  %v5975_v30 = vadd.f32 %v5974_v7, %v13443_v41  ;;  %v8328_v7 = vld [vmem:[%s10423_s14 + $0x208] sm:$0x11]  ;;  %v8438_v23 = vld [vmem:[%s10423_s14 + $0x90] sm:$0xff] }
 0x61e   : > { %v7760_v62 = vsel %vm13544_vm0, %v7140_v3, %v8428_v27  ;;  %v7155_v4 = vor.u32 %v7153_v37, %v7152_v21  ;;  %v7166_v43 = vrot.slane %v7152_v21, 4  ;;  %v6168_v24 = vadd.f32 %v6167_v22, %v13445_v59 }
 0x61f   : > { %8429 = vst [vmem:[%s10423_s14 + $0x60] sm:$0xff] %v7760_v62  ;;  %v7763_v2 = vsel %vm13544_vm0, %v7147_v11, %v8430_v19  ;;  %v7164_v54 = vor.u32 %v7162_v33, %v7161_v20  ;;  %v7167_v31 = vrot.slane %v7161_v20, 4  ;;  %v6321_v13 = vmul.f32 0.2, %v5975_v30  ;;  %v8440_v19 = vld [vmem:[%s10423_s14 + $0x98] sm:$0xff] }
 0x620   : > { %8431 = vst [vmem:[%s10423_s14 + $0x68] sm:$0xff] %v7763_v2  ;;  %v7156_v6 = vsel %vm13557_vm5, %v7148_v28, %v7155_v4  ;;  %v7768_v9 = vsel %vm13009_vm1, %v7166_v43, %v8434_v38  ;;  %v6323_v52 = vmul.f32 0.2, %v6168_v24  ;;  %v5977_v60 = vadd.f32 %v5976_v50, %v13429_v16  ;;  %v8268_v11 = vld [vmem:[%s10423_s14 + $0x218] sm:$0x11] }
 0x621   : > { %8432 = vst [vmem:[%s10423_s14 + $0x70] sm:$0xff] %v7156_v6  ;;  %8435 = vst [vmem:[%s10423_s14 + $0x80] sm:$0x11] %v7768_v9  ;;  %v7165_v12 = vsel %vm13557_vm5, %v7157_v56, %v7164_v54  ;;  %v7771_v61 = vsel %vm13009_vm1, %v7167_v31, %v8436_v5  ;;  %v6449_v25 = vmax.f32 %v5975_v30, %v6321_v13  ;;  %v6639_v26 = vsel %vm13009_vm1, 0, %v8264_v32  ;;  %v8444_v43 = vld [vmem:[%s10423_s14 + $0xb0] sm:$0x11] }
 0x622   : > { %v6170_v63 = vadd.f32 %v6169_v55, %v13437_v34  ;;  %8433 = vst [vmem:[%s10423_s14 + $0x78] sm:$0xff] %v7165_v12  ;;  %8437 = vst [vmem:[%s10423_s14 + $0x88] sm:$0x11] %v7771_v61  ;;  %v6451_v42 = vmax.f32 %v6168_v24, %v6323_v52  ;;  %v6324_v1 = vmul.f32 0.2, %v5977_v60  ;;  %v5979_v57 = vadd.f32 %v5978_v39, %v13443_v41 }
 0x623   : > { %v6172_v58 = vadd.f32 %v6171_v45, %v13445_v59  ;;  %v8590_v10 = vpack.c.bf16 %v6449_v25, %v6448_v15  ;;  %v6737_v51 = vsel %vm13043_vm14, 0, %v8326_v49  ;;  %8265 = vst [vmem:[%s10423_s14 + $0x1e8] sm:$0x11] %v6639_v26  ;;  %v6740_v39 = vsel %vm13043_vm14, 0, %v8328_v7  ;;  %v8446_v52 = vld [vmem:[%s10423_s14 + $0xb8] sm:$0x11] }
 0x624   : > { %v6326_v46 = vmul.f32 0.2, %v6170_v63  ;;  %v8591_v22 = vpack.c.bf16 %v6451_v42, %v6450_v36  ;;  %v6452_v50 = vmax.f32 %v5977_v60, %v6324_v1  ;;  %v6325_v40 = vmul.f32 0.2, %v5979_v57  ;;  %8327 = vst [vmem:[%s10423_s14 + $0x200] sm:$0x11] %v6737_v51 }
 0x625   : > { %v6327_v29 = vmul.f32 0.2, %v6172_v58  ;;  %v7169_v44 = vshrl.u32 %v8590_v10, 16  ;;  %8329 = vst [vmem:[%s10423_s14 + $0x208] sm:$0x11] %v6740_v39  ;;  %v7172_v45 = vshll.u32 %v8590_v10, 16 }
 0x626   : > { %v6454_v55 = vmax.f32 %v6170_v63, %v6326_v46  ;;  %v7176_v53 = vshrl.u32 %v8591_v22, 16  ;;  %v6453_v0 = vmax.f32 %v5979_v57, %v6325_v40  ;;  %v6642_v27 = vsel %vm13009_vm1, 0, %v8266_v48 }
 0x627   : > { %v6455_v37 = vmax.f32 %v6172_v58, %v6327_v29  ;;  %v7171_v47 = vrot.slane %v7169_v44, 7  ;;  %v7179_v33 = vshll.u32 %v8591_v22, 16  ;;  %8267 = vst [vmem:[%s10423_s14 + $0x210] sm:$0x11] %v6642_v27  ;;  %v6645_v20 = vsel %vm13009_vm1, 0, %v8268_v11 }
 0x628   : > { %v7178_v8 = vrot.slane %v7176_v53, 7  ;;  %v8592_v15 = vpack.c.bf16 %v6453_v0, %v6452_v50  ;;  %8269 = vst [vmem:[%s10423_s14 + $0x218] sm:$0x11] %v6645_v20  ;;  %v8330_v58 = vld [vmem:[%s10423_s14 + $0x230] sm:$0x11] }
 0x629   : > { %v8593_v3 = vpack.c.bf16 %v6455_v37, %v6454_v55  ;;  %v7174_v28 = vor.u32 %v7172_v45, %v7171_v47  ;;  %v7182_v5 = vrot.slane %v7171_v47, 4  ;;  %v8332_v44 = vld [vmem:[%s10423_s14 + $0x238] sm:$0x11] }
 0x62a   : > { %v7181_v21 = vor.u32 %v7179_v33, %v7178_v8  ;;  %v7184_v36 = vshrl.u32 %v8592_v15, 16  ;;  %v7187_v4 = vshll.u32 %v8592_v15, 16  ;;  %v7191_v24 = vrot.slane %v7178_v8, 4 }
 0x62b   : > { %v7774_v56 = vsel %vm13544_vm0, %v7174_v28, %v8438_v23  ;;  %v7193_v38 = vshrl.u32 %v8593_v3, 16  ;;  %v7196_v54 = vshll.u32 %v8593_v3, 16  ;;  %v6743_v33 = vsel %vm13043_vm14, 0, %v8330_v58 }
 0x62c   : > { %8439 = vst [vmem:[%s10423_s14 + $0x90] sm:$0xff] %v7774_v56  ;;  %v7777_v30 = vsel %vm13544_vm0, %v7181_v21, %v8440_v19  ;;  %v7186_v62 = vrot.slane %v7184_v36, 7  ;;  %v6746_v15 = vsel %vm13043_vm14, 0, %v8332_v44  ;;  %8331 = vst [vmem:[%s10423_s14 + $0x230] sm:$0x11] %v6743_v33 }
 0x62d   : > { %8441 = vst [vmem:[%s10423_s14 + $0x98] sm:$0xff] %v7777_v30  ;;  %v7195_v2 = vrot.slane %v7193_v38, 7  ;;  %8333 = vst [vmem:[%s10423_s14 + $0x238] sm:$0x11] %v6746_v15 }
 0x62e   : > { %v5982_v31 = vpop.f32.mrb[76].mxu1  ;;  %v6175_v13 = vpop.f32.mrb[44].mxu0  ;;  %v7189_v6 = vor.u32 %v7187_v4, %v7186_v62  ;;  %v7200_v9 = vrot.slane %v7186_v62, 4 }
 0x62f   : > { %v5983_v60 = vadd.f32 %v5982_v31, %v13429_v16  ;;  %v6176_v32 = vadd.f32 %v6175_v13, %v13437_v34  ;;  %v5984_v49 = vpop.f32.mrb[77].mxu1  ;;  %v6177_v12 = vpop.f32.mrb[45].mxu0  ;;  %v7198_v61 = vor.u32 %v7196_v54, %v7195_v2  ;;  %v7201_v25 = vrot.slane %v7195_v2, 4 }
 0x630   : > { %v5985_v63 = vadd.f32 %v5984_v49, %v13443_v41  ;;  %v6178_v42 = vadd.f32 %v6177_v12, %v13445_v59  ;;  %v5986_v1 = vpop.f32.mrb[78].mxu1  ;;  %v6179_v57 = vpop.f32.mrb[46].mxu0  ;;  %v7190_v7 = vsel %vm13557_vm5, %v7182_v5, %v7189_v6  ;;  %v7782_v10 = vsel %vm13009_vm1, %v7200_v9, %v8444_v43 }
 0x631   : > { %v6328_v46 = vmul.f32 0.2, %v5983_v60  ;;  %v6330_v26 = vmul.f32 0.2, %v6176_v32  ;;  %v5988_v51 = vpop.f32.mrb[79].mxu1  ;;  %v6181_v22 = vpop.f32.mrb[47].mxu0  ;;  %v7199_v50 = vsel %vm13557_vm5, %v7191_v24, %v7198_v61  ;;  %v7785_v40 = vsel %vm13009_vm1, %v7201_v25, %v8446_v52 }
 0x632   : > { %8442 = vst [vmem:[%s10423_s14 + $0xa0] sm:$0xff] %v7190_v7  ;;  %8445 = vst [vmem:[%s10423_s14 + $0xb0] sm:$0x11] %v7782_v10  ;;  %v6329_v29 = vmul.f32 0.2, %v5985_v63  ;;  %v5987_v53 = vadd.f32 %v5986_v1, %v13429_v16  ;;  %v6180_v0 = vadd.f32 %v6179_v57, %v13437_v34  ;;  %v5989_v45 = vadd.f32 %v5988_v51, %v13443_v41 }
 0x633   : > { %v6331_v48 = vmul.f32 0.2, %v6178_v42  ;;  %8443 = vst [vmem:[%s10423_s14 + $0xa8] sm:$0xff] %v7199_v50  ;;  %8447 = vst [vmem:[%s10423_s14 + $0xb8] sm:$0x11] %v7785_v40  ;;  %v6456_v55 = vmax.f32 %v5983_v60, %v6328_v46  ;;  %v6458_v39 = vmax.f32 %v6176_v32, %v6330_v26  ;;  %v6182_v27 = vadd.f32 %v6181_v22, %v13445_v59 }
 0x634   : > { %v6457_v37 = vmax.f32 %v5985_v63, %v6329_v29  ;;  %v6332_v23 = vmul.f32 0.2, %v5987_v53  ;;  %v6334_v8 = vmul.f32 0.2, %v6180_v0  ;;  %v6333_v19 = vmul.f32 0.2, %v5989_v45 }
 0x635   : > { %v6459_v47 = vmax.f32 %v6178_v42, %v6331_v48  ;;  %v6335_v21 = vmul.f32 0.2, %v6182_v27  ;;  %v8448_v63 = vld [vmem:[%s10423_s14 + $0xc0] sm:$0xff]  ;;  %v8450_v42 = vld [vmem:[%s10423_s14 + $0xc8] sm:$0xff] }
 0x636   : > { %v8594_v3 = vpack.c.bf16 %v6457_v37, %v6456_v55  ;;  %v5992_v36 = vpop.f32.mrb[80].mxu1  ;;  %v6185_v11 = vpop.f32.mrb[48].mxu0  ;;  %v6460_v56 = vmax.f32 %v5987_v53, %v6332_v23  ;;  %v6462_v38 = vmax.f32 %v6180_v0, %v6334_v8  ;;  %v6461_v13 = vmax.f32 %v5989_v45, %v6333_v19  ;;  %v8454_v45 = vld [vmem:[%s10423_s14 + $0xe0] sm:$0x11] }
 0x637   : > { %v8595_v28 = vpack.c.bf16 %v6459_v47, %v6458_v39  ;;  %v5993_v20 = vadd.f32 %v5992_v36, %v13429_v16  ;;  %v6186_v30 = vadd.f32 %v6185_v11, %v13437_v34  ;;  %v5994_v62 = vpop.f32.mrb[81].mxu1  ;;  %v6187_v4 = vpop.f32.mrb[49].mxu0  ;;  %v6463_v6 = vmax.f32 %v6182_v27, %v6335_v21  ;;  %v8456_v27 = vld [vmem:[%s10423_s14 + $0xe8] sm:$0x11] }
 0x638   : > { %v7203_v43 = vshrl.u32 %v8594_v3, 16  ;;  %v7206_v5 = vshll.u32 %v8594_v3, 16  ;;  %v5996_v54 = vpop.f32.mrb[82].mxu1  ;;  %v6189_v31 = vpop.f32.mrb[50].mxu0  ;;  %v5995_v61 = vadd.f32 %v5994_v62, %v13443_v41  ;;  %v6188_v25 = vadd.f32 %v6187_v4, %v13445_v59 }
 0x639   : > { %v7210_v24 = vshrl.u32 %v8595_v28, 16  ;;  %v7213_v2 = vshll.u32 %v8595_v28, 16  ;;  %v6336_v9 = vmul.f32 0.2, %v5993_v20  ;;  %v6338_v52 = vmul.f32 0.2, %v6186_v30 }
 0x63a   : > { %v5998_v60 = vpop.f32.mrb[83].mxu1  ;;  %v6191_v32 = vpop.f32.mrb[51].mxu0  ;;  %v7205_v49 = vrot.slane %v7203_v43, 7  ;;  %v8596_v1 = vpack.c.bf16 %v6461_v13, %v6460_v56  ;;  %v8597_v57 = vpack.c.bf16 %v6463_v6, %v6462_v38  ;;  %v6337_v55 = vmul.f32 0.2, %v5995_v61 }
 0x63b   : > { %v7212_v12 = vrot.slane %v7210_v24, 7  ;;  %v6464_v58 = vmax.f32 %v5993_v20, %v6336_v9  ;;  %v6466_v7 = vmax.f32 %v6186_v30, %v6338_v52  ;;  %v6339_v39 = vmul.f32 0.2, %v6188_v25  ;;  %v8270_v43 = vld [vmem:[%s10423_s14 + $0x240] sm:$0x11] }
 0x63c   : > { %v7208_v10 = vor.u32 %v7206_v5, %v7205_v49  ;;  %v7216_v46 = vrot.slane %v7205_v49, 4  ;;  %v7218_v22 = vshrl.u32 %v8596_v1, 16  ;;  %v7221_v50 = vshll.u32 %v8596_v1, 16  ;;  %v8272_v5 = vld [vmem:[%s10423_s14 + $0x248] sm:$0x11]  ;;  %v8460_v1 = vld [vmem:[%s10423_s14 + $0xf8] sm:$0xff] }
 0x63d   : > { %v7215_v26 = vor.u32 %v7213_v2, %v7212_v12  ;;  %v7225_v51 = vrot.slane %v7212_v12, 4  ;;  %v7227_v40 = vshrl.u32 %v8597_v57, 16  ;;  %v7230_v29 = vshll.u32 %v8597_v57, 16  ;;  %v8334_v24 = vld [vmem:[%s10423_s14 + $0x260] sm:$0x11] }
 0x63e   : > { %v7788_v48 = vsel %vm13544_vm0, %v7208_v10, %v8448_v63  ;;  %v7220_v53 = vrot.slane %v7218_v22, 7  ;;  %v5997_v37 = vadd.f32 %v5996_v54, %v13429_v16  ;;  %v6190_v47 = vadd.f32 %v6189_v31, %v13437_v34  ;;  %v8336_v6 = vld [vmem:[%s10423_s14 + $0x268] sm:$0x11]  ;;  %v8274_v63 = vld [vmem:[%s10423_s14 + $0x270] sm:$0x11] }
 0x63f   : > { %v7791_v44 = vsel %vm13544_vm0, %v7215_v26, %v8450_v42  ;;  %8449 = vst [vmem:[%s10423_s14 + $0xc0] sm:$0xff] %v7788_v48  ;;  %v7229_v0 = vrot.slane %v7227_v40, 7  ;;  %v6465_v23 = vmax.f32 %v5995_v61, %v6337_v55  ;;  %v6467_v8 = vmax.f32 %v6188_v25, %v6339_v39  ;;  %v8458_v42 = vld [vmem:[%s10423_s14 + $0xf0] sm:$0xff]  ;;  %v8276_v55 = vld [vmem:[%s10423_s14 + $0x278] sm:$0x11] }
 0x640   : > { %8451 = vst [vmem:[%s10423_s14 + $0xc8] sm:$0xff] %v7791_v44  ;;  %v5999_v33 = vadd.f32 %v5998_v60, %v13443_v41  ;;  %v6192_v15 = vadd.f32 %v6191_v32, %v13445_v59  ;;  %v7223_v3 = vor.u32 %v7221_v50, %v7220_v53  ;;  %v7234_v28 = vrot.slane %v7220_v53, 4 }
 0x641   : > { %v7232_v19 = vor.u32 %v7230_v29, %v7229_v0  ;;  %v7235_v21 = vrot.slane %v7229_v0, 4  ;;  %v8598_v36 = vpack.c.bf16 %v6465_v23, %v6464_v58  ;;  %v8599_v11 = vpack.c.bf16 %v6467_v8, %v6466_v7  ;;  %v8466_v8 = vld [vmem:[%s10423_s14 + $0x118] sm:$0x11] }
 0x642   : > { %v6340_v56 = vmul.f32 0.2, %v5997_v37  ;;  %v6342_v38 = vmul.f32 0.2, %v6190_v47  ;;  %v7224_v20 = vsel %vm13557_vm5, %v7216_v46, %v7223_v3  ;;  %v7796_v30 = vsel %vm13009_vm1, %v7234_v28, %v8454_v45 }
 0x643   : > { %v7233_v62 = vsel %vm13557_vm5, %v7225_v51, %v7232_v19  ;;  %v7799_v4 = vsel %vm13009_vm1, %v7235_v21, %v8456_v27  ;;  %8452 = vst [vmem:[%s10423_s14 + $0xd0] sm:$0xff] %v7224_v20  ;;  %8455 = vst [vmem:[%s10423_s14 + $0xe0] sm:$0x11] %v7796_v30  ;;  %v7237_v2 = vshrl.u32 %v8598_v36, 16  ;;  %v7240_v54 = vshll.u32 %v8598_v36, 16 }
 0x644   : > { %8453 = vst [vmem:[%s10423_s14 + $0xd8] sm:$0xff] %v7233_v62  ;;  %8457 = vst [vmem:[%s10423_s14 + $0xe8] sm:$0x11] %v7799_v4  ;;  %v7244_v31 = vshrl.u32 %v8599_v11, 16  ;;  %v7247_v13 = vshll.u32 %v8599_v11, 16  ;;  %v6468_v9 = vmax.f32 %v5997_v37, %v6340_v56  ;;  %v6470_v52 = vmax.f32 %v6190_v47, %v6342_v38 }
 0x645   : > { %v6341_v60 = vmul.f32 0.2, %v5999_v33  ;;  %v6343_v32 = vmul.f32 0.2, %v6192_v15  ;;  %v7239_v49 = vrot.slane %v7237_v2, 7  ;;  %v6648_v61 = vsel %vm13009_vm1, 0, %v8270_v43 }
 0x646   : > { %v7246_v12 = vrot.slane %v7244_v31, 7  ;;  %v6651_v25 = vsel %vm13009_vm1, 0, %v8272_v5  ;;  %8271 = vst [vmem:[%s10423_s14 + $0x240] sm:$0x11] %v6648_v61  ;;  %v6749_v7 = vsel %vm13043_vm14, 0, %v8334_v24  ;;  %v6752_v10 = vsel %vm13043_vm14, 0, %v8336_v6 }
 0x647   : > { %v6469_v57 = vmax.f32 %v5999_v33, %v6341_v60  ;;  %v6471_v58 = vmax.f32 %v6192_v15, %v6343_v32  ;;  %8273 = vst [vmem:[%s10423_s14 + $0x248] sm:$0x11] %v6651_v25  ;;  %v7242_v46 = vor.u32 %v7240_v54, %v7239_v49  ;;  %8335 = vst [vmem:[%s10423_s14 + $0x260] sm:$0x11] %v6749_v7  ;;  %v6654_v50 = vsel %vm13009_vm1, 0, %v8274_v63 }
 0x648   : > { %v7249_v26 = vor.u32 %v7247_v13, %v7246_v12  ;;  %8337 = vst [vmem:[%s10423_s14 + $0x268] sm:$0x11] %v6752_v10  ;;  %8275 = vst [vmem:[%s10423_s14 + $0x270] sm:$0x11] %v6654_v50  ;;  %v6657_v39 = vsel %vm13009_vm1, 0, %v8276_v55  ;;  %v7250_v27 = vrot.slane %v7239_v49, 4 }
 0x649   : > { %v8600_v51 = vpack.c.bf16 %v6469_v57, %v6468_v9  ;;  %v8601_v22 = vpack.c.bf16 %v6471_v58, %v6470_v52  ;;  %v7802_v40 = vsel %vm13544_vm0, %v7242_v46, %v8458_v42  ;;  %v8464_v37 = vld [vmem:[%s10423_s14 + $0x110] sm:$0x11]  ;;  %8277 = vst [vmem:[%s10423_s14 + $0x278] sm:$0x11] %v6657_v39  ;;  %v7259_v23 = vrot.slane %v7246_v12, 4 }
 0x64a   : > { %v7805_v29 = vsel %vm13544_vm0, %v7249_v26, %v8460_v1  ;;  %8459 = vst [vmem:[%s10423_s14 + $0xf0] sm:$0xff] %v7802_v40  ;;  %v8338_v61 = vld [vmem:[%s10423_s14 + $0x290] sm:$0x11]  ;;  %v8340_v25 = vld [vmem:[%s10423_s14 + $0x298] sm:$0x11] }
 0x64b   : > { %8461 = vst [vmem:[%s10423_s14 + $0xf8] sm:$0xff] %v7805_v29  ;;  %v7252_v48 = vshrl.u32 %v8600_v51, 16  ;;  %v7261_v44 = vshrl.u32 %v8601_v22, 16  ;;  %v7255_v0 = vshll.u32 %v8600_v51, 16  ;;  %v7264_v45 = vshll.u32 %v8601_v22, 16 }
 0x64c   : > { %v6755_v22 = vsel %vm13043_vm14, 0, %v8338_v61  ;;  %v6758_v50 = vsel %vm13043_vm14, 0, %v8340_v25 }
 0x64d   : > { %v7254_v53 = vrot.slane %v7252_v48, 7  ;;  %v7263_v47 = vrot.slane %v7261_v44, 7  ;;  %8339 = vst [vmem:[%s10423_s14 + $0x290] sm:$0x11] %v6755_v22  ;;  %8341 = vst [vmem:[%s10423_s14 + $0x298] sm:$0x11] %v6758_v50 }
 0x64e   : > { %v6002_v33 = vpop.f32.mrb[84].mxu1  ;;  %v6195_v15 = vpop.f32.mrb[52].mxu0 }
 0x64f   : > { %v7257_v3 = vor.u32 %v7255_v0, %v7254_v53  ;;  %v7268_v28 = vrot.slane %v7254_v53, 4  ;;  %v7266_v19 = vor.u32 %v7264_v45, %v7263_v47  ;;  %v7269_v21 = vrot.slane %v7263_v47, 4  ;;  %v6004_v36 = vpop.f32.mrb[85].mxu1  ;;  %v6197_v11 = vpop.f32.mrb[53].mxu0 }
 0x650   : > { %v6003_v56 = vadd.f32 %v6002_v33, %v13429_v16  ;;  %v6196_v38 = vadd.f32 %v6195_v15, %v13437_v34  ;;  %v6005_v20 = vadd.f32 %v6004_v36, %v13443_v41  ;;  %v6198_v30 = vadd.f32 %v6197_v11, %v13445_v59  ;;  %v6006_v62 = vpop.f32.mrb[86].mxu1  ;;  %v6199_v4 = vpop.f32.mrb[54].mxu0 }
 0x651   : > { %v7258_v43 = vsel %vm13557_vm5, %v7250_v27, %v7257_v3  ;;  %v7810_v5 = vsel %vm13009_vm1, %v7268_v28, %v8464_v37  ;;  %v7267_v24 = vsel %vm13557_vm5, %v7259_v23, %v7266_v19  ;;  %v7813_v2 = vsel %vm13009_vm1, %v7269_v21, %v8466_v8  ;;  %v6008_v54 = vpop.f32.mrb[87].mxu1  ;;  %v6201_v31 = vpop.f32.mrb[55].mxu0 }
 0x652   : > { %8462 = vst [vmem:[%s10423_s14 + $0x100] sm:$0xff] %v7258_v43  ;;  %8465 = vst [vmem:[%s10423_s14 + $0x110] sm:$0x11] %v7810_v5  ;;  %v6344_v13 = vmul.f32 0.2, %v6003_v56  ;;  %v6007_v52 = vadd.f32 %v6006_v62, %v13429_v16  ;;  %v6200_v32 = vadd.f32 %v6199_v4, %v13437_v34  ;;  %v6009_v49 = vadd.f32 %v6008_v54, %v13443_v41 }
 0x653   : > { %8463 = vst [vmem:[%s10423_s14 + $0x108] sm:$0xff] %v7267_v24  ;;  %8467 = vst [vmem:[%s10423_s14 + $0x118] sm:$0x11] %v7813_v2  ;;  %v6346_v6 = vmul.f32 0.2, %v6196_v38  ;;  %v6202_v12 = vadd.f32 %v6201_v31, %v13445_v59  ;;  %v8470_v2 = vld [vmem:[%s10423_s14 + $0x128] sm:$0xff] }
 0x654   : > { %v6345_v9 = vmul.f32 0.2, %v6005_v20  ;;  %v6347_v60 = vmul.f32 0.2, %v6198_v30  ;;  %v6472_v63 = vmax.f32 %v6003_v56, %v6344_v13  ;;  %v6348_v57 = vmul.f32 0.2, %v6007_v52 }
 0x655   : > { %v6474_v42 = vmax.f32 %v6196_v38, %v6346_v6  ;;  %v6350_v7 = vmul.f32 0.2, %v6200_v32  ;;  %v6349_v10 = vmul.f32 0.2, %v6009_v49  ;;  %v6351_v46 = vmul.f32 0.2, %v6202_v12 }
 0x656   : > { %v6473_v1 = vmax.f32 %v6005_v20, %v6345_v9  ;;  %v6475_v58 = vmax.f32 %v6198_v30, %v6347_v60  ;;  %v6476_v51 = vmax.f32 %v6007_v52, %v6348_v57  ;;  %v6012_v55 = vpop.f32.mrb[88].mxu1  ;;  %v6205_v39 = vpop.f32.mrb[56].mxu0  ;;  %v8468_v38 = vld [vmem:[%s10423_s14 + $0x120] sm:$0xff]  ;;  %v8476_v57 = vld [vmem:[%s10423_s14 + $0x148] sm:$0x11] }
 0x657   : > { %v6478_v29 = vmax.f32 %v6200_v32, %v6350_v7  ;;  %v6477_v48 = vmax.f32 %v6009_v49, %v6349_v10  ;;  %v6479_v44 = vmax.f32 %v6202_v12, %v6351_v46  ;;  %v6013_v37 = vadd.f32 %v6012_v55, %v13429_v16  ;;  %v6014_v45 = vpop.f32.mrb[89].mxu1  ;;  %v6207_v27 = vpop.f32.mrb[57].mxu0  ;;  %v8474_v32 = vld [vmem:[%s10423_s14 + $0x140] sm:$0x11] }
 0x658   : > { %v8602_v26 = vpack.c.bf16 %v6473_v1, %v6472_v63  ;;  %v8603_v40 = vpack.c.bf16 %v6475_v58, %v6474_v42  ;;  %v13863_v47 = vadd.f32 %v6205_v39, %v13437_v34  ;;  %v6016_v3 = vpop.f32.mrb[90].mxu1  ;;  %v6209_v28 = vpop.f32.mrb[58].mxu0  ;;  %v6015_v11 = vadd.f32 %v6014_v45, %v13443_v41  ;;  %v8280_v39 = vld [vmem:[%s10423_s14 + $0x2a8] sm:$0x11]  ;;  %v8342_v45 = vld [vmem:[%s10423_s14 + $0x2c0] sm:$0x11] }
 0x659   : > { %v8604_v33 = vpack.c.bf16 %v6477_v48, %v6476_v51  ;;  %v8605_v15 = vpack.c.bf16 %v6479_v44, %v6478_v29  ;;  %v6352_v21 = vmul.f32 0.2, %v6013_v37  ;;  %v6018_v56 = vpop.f32.mrb[91].mxu1  ;;  %v6211_v43 = vpop.f32.mrb[59].mxu0  ;;  %v6208_v61 = vadd.f32 %v6207_v27, %v13445_v59 }
 0x65a   : > { %v7271_v53 = vshrl.u32 %v8602_v26, 16  ;;  %v7274_v0 = vshll.u32 %v8602_v26, 16  ;;  %v7278_v23 = vshrl.u32 %v8603_v40, 16  ;;  %v7281_v8 = vshll.u32 %v8603_v40, 16  ;;  %v8278_v26 = vld [vmem:[%s10423_s14 + $0x2a0] sm:$0x11] }
 0x65b   : > { %v6354_v36 = vmul.f32 0.2, %v13863_v47  ;;  %v7286_v30 = vshrl.u32 %v8604_v33, 16  ;;  %v7289_v62 = vshll.u32 %v8604_v33, 16  ;;  %v7295_v4 = vshrl.u32 %v8605_v15, 16 }
 0x65c   : > { %v7273_v19 = vrot.slane %v7271_v53, 7  ;;  %v7280_v20 = vrot.slane %v7278_v23, 7  ;;  %v7298_v54 = vshll.u32 %v8605_v15, 16  ;;  %v6480_v31 = vmax.f32 %v6013_v37, %v6352_v21  ;;  %v8344_v33 = vld [vmem:[%s10423_s14 + $0x2c8] sm:$0x11] }
 0x65d   : > { %v7288_v9 = vrot.slane %v7286_v30, 7  ;;  %v7297_v52 = vrot.slane %v7295_v4, 7  ;;  %v6482_v49 = vmax.f32 %v13863_v47, %v6354_v36  ;;  %v6353_v12 = vmul.f32 0.2, %v6015_v11  ;;  %v8282_v15 = vld [vmem:[%s10423_s14 + $0x2d0] sm:$0x11] }
 0x65e   : > { %v7276_v5 = vor.u32 %v7274_v0, %v7273_v19  ;;  %v7284_v24 = vrot.slane %v7273_v19, 4  ;;  %v7283_v13 = vor.u32 %v7281_v8, %v7280_v20  ;;  %v7293_v6 = vrot.slane %v7280_v20, 4  ;;  %v8478_v20 = vld [vmem:[%s10423_s14 + $0x150] sm:$0xff] }
 0x65f   : > { %v7291_v63 = vor.u32 %v7289_v62, %v7288_v9  ;;  %v7302_v42 = vrot.slane %v7288_v9, 4  ;;  %v7300_v1 = vor.u32 %v7298_v54, %v7297_v52  ;;  %v7303_v58 = vrot.slane %v7297_v52, 4  ;;  %v8480_v54 = vld [vmem:[%s10423_s14 + $0x158] sm:$0xff] }
 0x660   : > { %v7816_v60 = vsel %vm13544_vm0, %v7276_v5, %v8468_v38  ;;  %v7819_v25 = vsel %vm13544_vm0, %v7283_v13, %v8470_v2  ;;  %v6481_v7 = vmax.f32 %v6015_v11, %v6353_v12  ;;  %v6355_v10 = vmul.f32 0.2, %v6208_v61  ;;  %v8486_v12 = vld [vmem:[%s10423_s14 + $0x178] sm:$0x11] }
 0x661   : > { %8469 = vst [vmem:[%s10423_s14 + $0x120] sm:$0xff] %v7816_v60  ;;  %8471 = vst [vmem:[%s10423_s14 + $0x128] sm:$0xff] %v7819_v25  ;;  %v6017_v46 = vadd.f32 %v6016_v3, %v13429_v16  ;;  %v7292_v51 = vsel %vm13557_vm5, %v7284_v24, %v7291_v63  ;;  %v7824_v22 = vsel %vm13009_vm1, %v7302_v42, %v8474_v32  ;;  %v6660_v47 = vsel %vm13009_vm1, 0, %v8278_v26 }
 0x662   : > { %v7301_v50 = vsel %vm13557_vm5, %v7293_v6, %v7300_v1  ;;  %v6210_v40 = vadd.f32 %v6209_v28, %v13437_v34  ;;  %8472 = vst [vmem:[%s10423_s14 + $0x130] sm:$0xff] %v7292_v51  ;;  %8475 = vst [vmem:[%s10423_s14 + $0x140] sm:$0x11] %v7824_v22  ;;  %v7827_v29 = vsel %vm13009_vm1, %v7303_v58, %v8476_v57  ;;  %v6663_v21 = vsel %vm13009_vm1, 0, %v8280_v39  ;;  %v8284_v1 = vld [vmem:[%s10423_s14 + $0x2d8] sm:$0x11] }
 0x663   : > { %8473 = vst [vmem:[%s10423_s14 + $0x138] sm:$0xff] %v7301_v50  ;;  %v8606_v48 = vpack.c.bf16 %v6481_v7, %v6480_v31  ;;  %v6483_v44 = vmax.f32 %v6208_v61, %v6355_v10  ;;  %v6356_v55 = vmul.f32 0.2, %v6017_v46  ;;  %8477 = vst [vmem:[%s10423_s14 + $0x148] sm:$0x11] %v7827_v29  ;;  %v6019_v0 = vadd.f32 %v6018_v56, %v13443_v41 }
 0x664   : > { %v6358_v53 = vmul.f32 0.2, %v6210_v40  ;;  %v6212_v37 = vadd.f32 %v6211_v43, %v13445_v59  ;;  %8279 = vst [vmem:[%s10423_s14 + $0x2a0] sm:$0x11] %v6660_v47  ;;  %8281 = vst [vmem:[%s10423_s14 + $0x2a8] sm:$0x11] %v6663_v21 }
 0x665   : > { %v7305_v27 = vshrl.u32 %v8606_v48, 16  ;;  %v8607_v23 = vpack.c.bf16 %v6483_v44, %v6482_v49  ;;  %v6484_v8 = vmax.f32 %v6017_v46, %v6356_v55  ;;  %v6357_v28 = vmul.f32 0.2, %v6019_v0  ;;  %v8484_v49 = vld [vmem:[%s10423_s14 + $0x170] sm:$0x11] }
 0x666   : > { %v6486_v3 = vmax.f32 %v6210_v40, %v6358_v53  ;;  %v6359_v19 = vmul.f32 0.2, %v6212_v37  ;;  %v7308_v11 = vshll.u32 %v8606_v48, 16  ;;  %v6761_v38 = vsel %vm13043_vm14, 0, %v8342_v45 }
 0x667   : > { %v7307_v36 = vrot.slane %v7305_v27, 7  ;;  %v7312_v56 = vshrl.u32 %v8607_v23, 16  ;;  %v6485_v30 = vmax.f32 %v6019_v0, %v6357_v28  ;;  %8343 = vst [vmem:[%s10423_s14 + $0x2c0] sm:$0x11] %v6761_v38  ;;  %v6764_v4 = vsel %vm13043_vm14, 0, %v8344_v33 }
 0x668   : > { %v6487_v62 = vmax.f32 %v6212_v37, %v6359_v19  ;;  %v6666_v43 = vsel %vm13009_vm1, 0, %v8282_v15  ;;  %v7315_v2 = vshll.u32 %v8607_v23, 16  ;;  %8345 = vst [vmem:[%s10423_s14 + $0x2c8] sm:$0x11] %v6764_v4  ;;  %v6669_v46 = vsel %vm13009_vm1, 0, %v8284_v1 }
 0x669   : > { %v7310_v5 = vor.u32 %v7308_v11, %v7307_v36  ;;  %v7314_v24 = vrot.slane %v7312_v56, 7  ;;  %8283 = vst [vmem:[%s10423_s14 + $0x2d0] sm:$0x11] %v6666_v43  ;;  %v8608_v31 = vpack.c.bf16 %v6485_v30, %v6484_v8  ;;  %v7318_v57 = vrot.slane %v7307_v36, 4  ;;  %8285 = vst [vmem:[%s10423_s14 + $0x2d8] sm:$0x11] %v6669_v46 }
 0x66a   : > { %v8609_v13 = vpack.c.bf16 %v6487_v62, %v6486_v3  ;;  %v8346_v56 = vld [vmem:[%s10423_s14 + $0x2f0] sm:$0x11]  ;;  %v8348_v38 = vld [vmem:[%s10423_s14 + $0x2f8] sm:$0x11]  ;;  %v8286_v43 = vld [vmem:[%s10423_s14 + $0x300] sm:$0x11] }
 0x66b   : > { %v7830_v6 = vsel %vm13544_vm0, %v7310_v5, %v8478_v20  ;;  %v7317_v9 = vor.u32 %v7315_v2, %v7314_v24  ;;  %v7320_v52 = vshrl.u32 %v8608_v31, 16  ;;  %v7323_v25 = vshll.u32 %v8608_v31, 16 }
 0x66c   : > { %8479 = vst [vmem:[%s10423_s14 + $0x150] sm:$0xff] %v7830_v6  ;;  %v7329_v60 = vshrl.u32 %v8609_v13, 16  ;;  %v7332_v42 = vshll.u32 %v8609_v13, 16  ;;  %v7327_v58 = vrot.slane %v7314_v24, 4  ;;  %v6767_v6 = vsel %vm13043_vm14, 0, %v8346_v56 }
 0x66d   : > { %v7833_v32 = vsel %vm13544_vm0, %v7317_v9, %v8480_v54  ;;  %v7322_v61 = vrot.slane %v7320_v52, 7  ;;  %v6770_v9 = vsel %vm13043_vm14, 0, %v8348_v38  ;;  %8347 = vst [vmem:[%s10423_s14 + $0x2f0] sm:$0x11] %v6767_v6 }
 0x66e   : > { %8481 = vst [vmem:[%s10423_s14 + $0x158] sm:$0xff] %v7833_v32  ;;  %v7331_v63 = vrot.slane %v7329_v60, 7  ;;  %v6022_v7 = vpop.f32.mrb[92].mxu1  ;;  %v6215_v10 = vpop.f32.mrb[60].mxu0  ;;  %8349 = vst [vmem:[%s10423_s14 + $0x2f8] sm:$0x11] %v6770_v9 }
 0x66f   : > { %v7325_v26 = vor.u32 %v7323_v25, %v7322_v61  ;;  %v7336_v51 = vrot.slane %v7322_v61, 4  ;;  %v6024_v40 = vpop.f32.mrb[93].mxu1  ;;  %v6217_v29 = vpop.f32.mrb[61].mxu0  ;;  %v6023_v48 = vadd.f32 %v6022_v7, %v13429_v16  ;;  %v6216_v44 = vadd.f32 %v6215_v10, %v13437_v34 }
 0x670   : > { %v7334_v22 = vor.u32 %v7332_v42, %v7331_v63  ;;  %v7337_v50 = vrot.slane %v7331_v63, 4  ;;  %v6025_v55 = vadd.f32 %v6024_v40, %v13443_v41  ;;  %v6218_v39 = vadd.f32 %v6217_v29, %v13445_v59  ;;  %v6026_v53 = vpop.f32.mrb[94].mxu1  ;;  %v6219_v0 = vpop.f32.mrb[62].mxu0 }
 0x671   : > { %v7326_v37 = vsel %vm13557_vm5, %v7318_v57, %v7325_v26  ;;  %v7838_v47 = vsel %vm13009_vm1, %v7336_v51, %v8484_v49  ;;  %v6028_v23 = vpop.f32.mrb[95].mxu1  ;;  %v6221_v8 = vpop.f32.mrb[63].mxu0  ;;  %v6360_v33 = vmul.f32 0.2, %v6023_v48  ;;  %v6362_v15 = vmul.f32 0.2, %v6216_v44 }
 0x672   : > { %v7335_v45 = vsel %vm13557_vm5, %v7327_v58, %v7334_v22  ;;  %v7841_v27 = vsel %vm13009_vm1, %v7337_v50, %v8486_v12  ;;  %8482 = vst [vmem:[%s10423_s14 + $0x160] sm:$0xff] %v7326_v37  ;;  %8485 = vst [vmem:[%s10423_s14 + $0x170] sm:$0x11] %v7838_v47  ;;  %v6361_v3 = vmul.f32 0.2, %v6025_v55  ;;  %v6027_v28 = vadd.f32 %v6026_v53, %v13429_v16  ;;  %v8488_v51 = vld [vmem:[%s10423_s14 + $0x180] sm:$0xff] }
 0x673   : > { %8483 = vst [vmem:[%s10423_s14 + $0x168] sm:$0xff] %v7335_v45  ;;  %8487 = vst [vmem:[%s10423_s14 + $0x178] sm:$0x11] %v7841_v27  ;;  %v6363_v19 = vmul.f32 0.2, %v6218_v39  ;;  %v6220_v21 = vadd.f32 %v6219_v0, %v13437_v34  ;;  %v6029_v36 = vadd.f32 %v6028_v23, %v13443_v41  ;;  %v6222_v11 = vadd.f32 %v6221_v8, %v13445_v59  ;;  %v8490_v27 = vld [vmem:[%s10423_s14 + $0x188] sm:$0xff] }
 0x674   : > { %v6488_v20 = vmax.f32 %v6023_v48, %v6360_v33  ;;  %v6490_v30 = vmax.f32 %v6216_v44, %v6362_v15  ;;  %v6489_v62 = vmax.f32 %v6025_v55, %v6361_v3  ;;  %v6364_v4 = vmul.f32 0.2, %v6027_v28 }
 0x675   : > { %v6491_v5 = vmax.f32 %v6218_v39, %v6363_v19  ;;  %v6366_v24 = vmul.f32 0.2, %v6220_v21  ;;  %v6365_v2 = vmul.f32 0.2, %v6029_v36  ;;  %v6367_v54 = vmul.f32 0.2, %v6222_v11 }
 0x676   : > { %v8610_v31 = vpack.c.bf16 %v6489_v62, %v6488_v20  ;;  %v6492_v13 = vmax.f32 %v6027_v28, %v6364_v4  ;;  %v6032_v25 = vpop.f32.mrb[96].mxu1  ;;  %v6225_v63 = vpop.f32.mrb[64].mxu0  ;;  %v6672_v42 = vsel %vm13009_vm1, 0, %v8286_v43  ;;  %v8496_v4 = vld [vmem:[%s10423_s14 + $0x1a8] sm:$0x11] }
 0x677   : > { %v8611_v52 = vpack.c.bf16 %v6491_v5, %v6490_v30  ;;  %v6494_v60 = vmax.f32 %v6220_v21, %v6366_v24  ;;  %v6493_v32 = vmax.f32 %v6029_v36, %v6365_v2  ;;  %v6495_v49 = vmax.f32 %v6222_v11, %v6367_v54  ;;  %v6034_v10 = vpop.f32.mrb[97].mxu1  ;;  %v6227_v46 = vpop.f32.mrb[65].mxu0  ;;  %8287 = vst [vmem:[%s10423_s14 + $0x300] sm:$0x11] %v6672_v42  ;;  %v8494_v21 = vld [vmem:[%s10423_s14 + $0x1a0] sm:$0x11] }
 0x678   : > { %v7339_v12 = vshrl.u32 %v8610_v31, 16  ;;  %v7342_v61 = vshll.u32 %v8610_v31, 16  ;;  %v6033_v22 = vadd.f32 %v6032_v25, %v13429_v16  ;;  %v13964_v50 = vadd.f32 %v6225_v63, %v13437_v34  ;;  %v6036_v29 = vpop.f32.mrb[98].mxu1  ;;  %v6229_v48 = vpop.f32.mrb[66].mxu0  ;;  %v8288_v54 = vld [vmem:[%s10423_s14 + $0x308] sm:$0x11] }
 0x679   : > { %v7346_v1 = vshrl.u32 %v8611_v52, 16  ;;  %v7349_v57 = vshll.u32 %v8611_v52, 16  ;;  %v8612_v58 = vpack.c.bf16 %v6493_v32, %v6492_v13  ;;  %v8613_v7 = vpack.c.bf16 %v6495_v49, %v6494_v60  ;;  %v6038_v0 = vpop.f32.mrb[99].mxu1  ;;  %v6231_v37 = vpop.f32.mrb[67].mxu0 }
 0x67a   : > { %v7341_v26 = vrot.slane %v7339_v12, 7  ;;  %v6035_v40 = vadd.f32 %v6034_v10, %v13443_v41  ;;  %v6368_v8 = vmul.f32 0.2, %v6033_v22  ;;  %v6370_v11 = vmul.f32 0.2, %v13964_v50 }
 0x67b   : > { %v7348_v44 = vrot.slane %v7346_v1, 7  ;;  %v7354_v55 = vshrl.u32 %v8612_v58, 16  ;;  %v7357_v39 = vshll.u32 %v8612_v58, 16  ;;  %v7363_v53 = vshrl.u32 %v8613_v7, 16  ;;  %v8350_v12 = vld [vmem:[%s10423_s14 + $0x320] sm:$0x11] }
 0x67c   : > { %v7344_v47 = vor.u32 %v7342_v61, %v7341_v26  ;;  %v7352_v45 = vrot.slane %v7341_v26, 4  ;;  %v7366_v23 = vshll.u32 %v8613_v7, 16  ;;  %v6496_v36 = vmax.f32 %v6033_v22, %v6368_v8  ;;  %v8352_v1 = vld [vmem:[%s10423_s14 + $0x328] sm:$0x11]  ;;  %v8500_v8 = vld [vmem:[%s10423_s14 + $0x1b8] sm:$0xff] }
 0x67d   : > { %v7351_v33 = vor.u32 %v7349_v57, %v7348_v44  ;;  %v7361_v15 = vrot.slane %v7348_v44, 4  ;;  %v7356_v3 = vrot.slane %v7354_v55, 7  ;;  %v7365_v28 = vrot.slane %v7363_v53, 7  ;;  %v8498_v44 = vld [vmem:[%s10423_s14 + $0x1b0] sm:$0xff] }
 0x67e   : > { %v7844_v19 = vsel %vm13544_vm0, %v7344_v47, %v8488_v51  ;;  %v6369_v56 = vmul.f32 0.2, %v6035_v40  ;;  %v6498_v5 = vmax.f32 %v13964_v50, %v6370_v11  ;;  %v6228_v2 = vadd.f32 %v6227_v46, %v13445_v59 }
 0x67f   : > { %8489 = vst [vmem:[%s10423_s14 + $0x180] sm:$0xff] %v7844_v19  ;;  %v7847_v38 = vsel %vm13544_vm0, %v7351_v33, %v8490_v27  ;;  %v7359_v20 = vor.u32 %v7357_v39, %v7356_v3  ;;  %v7370_v30 = vrot.slane %v7356_v3, 4  ;;  %v7368_v62 = vor.u32 %v7366_v23, %v7365_v28  ;;  %v8504_v19 = vld [vmem:[%s10423_s14 + $0x1d0] sm:$0x11] }
 0x680   : > { %8491 = vst [vmem:[%s10423_s14 + $0x188] sm:$0xff] %v7847_v38  ;;  %v7371_v43 = vrot.slane %v7365_v28, 4  ;;  %v6497_v24 = vmax.f32 %v6035_v40, %v6369_v56  ;;  %v6037_v9 = vadd.f32 %v6036_v29, %v13429_v16  ;;  %v6371_v32 = vmul.f32 0.2, %v6228_v2 }
 0x681   : > { %v7360_v31 = vsel %vm13557_vm5, %v7352_v45, %v7359_v20  ;;  %v7852_v13 = vsel %vm13009_vm1, %v7370_v30, %v8494_v21  ;;  %v7369_v6 = vsel %vm13557_vm5, %v7361_v15, %v7368_v62  ;;  %v6230_v49 = vadd.f32 %v6229_v48, %v13437_v34  ;;  %v8506_v20 = vld [vmem:[%s10423_s14 + $0x1d8] sm:$0x11] }
 0x682   : > { %8492 = vst [vmem:[%s10423_s14 + $0x190] sm:$0xff] %v7360_v31  ;;  %8495 = vst [vmem:[%s10423_s14 + $0x1a0] sm:$0x11] %v7852_v13  ;;  %v7855_v52 = vsel %vm13009_vm1, %v7371_v43, %v8496_v4  ;;  %v8614_v60 = vpack.c.bf16 %v6497_v24, %v6496_v36  ;;  %v6372_v61 = vmul.f32 0.2, %v6037_v9  ;;  %v6039_v25 = vadd.f32 %v6038_v0, %v13443_v41 }
 0x683   : > { %8493 = vst [vmem:[%s10423_s14 + $0x198] sm:$0xff] %v7369_v6  ;;  %8497 = vst [vmem:[%s10423_s14 + $0x1a8] sm:$0x11] %v7855_v52  ;;  %v6232_v63 = vadd.f32 %v6231_v37, %v13445_v59  ;;  %v6675_v42 = vsel %vm13009_vm1, 0, %v8288_v54  ;;  %v6499_v7 = vmax.f32 %v6228_v2, %v6371_v32  ;;  %v6374_v10 = vmul.f32 0.2, %v6230_v49 }
 0x684   : > { %v7373_v57 = vshrl.u32 %v8614_v60, 16  ;;  %v7376_v58 = vshll.u32 %v8614_v60, 16  ;;  %8289 = vst [vmem:[%s10423_s14 + $0x308] sm:$0x11] %v6675_v42  ;;  %v6500_v46 = vmax.f32 %v6037_v9, %v6372_v61  ;;  %v6373_v26 = vmul.f32 0.2, %v6039_v25 }
 0x685   : > { %v6375_v51 = vmul.f32 0.2, %v6232_v63  ;;  %v6773_v22 = vsel %vm13043_vm14, 0, %v8350_v12  ;;  %v8615_v40 = vpack.c.bf16 %v6499_v7, %v6498_v5  ;;  %v6502_v29 = vmax.f32 %v6230_v49, %v6374_v10 }
 0x686   : > { %v7375_v50 = vrot.slane %v7373_v57, 7  ;;  %8351 = vst [vmem:[%s10423_s14 + $0x320] sm:$0x11] %v6773_v22  ;;  %v6776_v48 = vsel %vm13043_vm14, 0, %v8352_v1  ;;  %v6501_v55 = vmax.f32 %v6039_v25, %v6373_v26 }
 0x687   : > { %v6503_v39 = vmax.f32 %v6232_v63, %v6375_v51  ;;  %8353 = vst [vmem:[%s10423_s14 + $0x328] sm:$0x11] %v6776_v48  ;;  %v7380_v0 = vshrl.u32 %v8615_v40, 16  ;;  %v7383_v23 = vshll.u32 %v8615_v40, 16 }
 0x688   : > { %v7378_v53 = vor.u32 %v7376_v58, %v7375_v50  ;;  %v8616_v37 = vpack.c.bf16 %v6501_v55, %v6500_v46  ;;  %v7386_v11 = vrot.slane %v7375_v50, 4 }
 0x689   : > { %v8617_v47 = vpack.c.bf16 %v6503_v39, %v6502_v29  ;;  %v7382_v27 = vrot.slane %v7380_v0, 7 }
 0x68a   : > { %v7858_v45 = vsel %vm13544_vm0, %v7378_v53, %v8498_v44  ;;  %v7388_v35 = vshrl.u32 %v8616_v37, 16  ;;  %v7391_v28 = vshll.u32 %v8616_v37, 16 }
 0x68b   : > { %8499 = vst [vmem:[%s10423_s14 + $0x1b0] sm:$0xff] %v7858_v45  ;;  %v7397_v33 = vshrl.u32 %v8617_v47, 16  ;;  %v7385_v15 = vor.u32 %v7383_v23, %v7382_v27  ;;  %v7400_v36 = vshll.u32 %v8617_v47, 16  ;;  %v7395_v56 = vrot.slane %v7382_v27, 4 }
 0x68c   : > { %v7390_v3 = vrot.slane %v7388_v35, 7 }
 0x68d   : > { %v7399_v21 = vrot.slane %v7397_v33, 7  ;;  %v7861_v38 = vsel %vm13544_vm0, %v7385_v15, %v8500_v8 }
 0x68e   : > { %v6042_v30 = vpop.f32.mrb[100].mxu1  ;;  %v6235_v62 = vpop.f32.mrb[68].mxu0  ;;  %8501 = vst [vmem:[%s10423_s14 + $0x1b8] sm:$0xff] %v7861_v38  ;;  %v7393_v4 = vor.u32 %v7391_v28, %v7390_v3  ;;  %v7404_v43 = vrot.slane %v7390_v3, 4 }
 0x68f   : > { %v7402_v5 = vor.u32 %v7400_v36, %v7399_v21  ;;  %v7405_v24 = vrot.slane %v7399_v21, 4  ;;  %v6044_v2 = vpop.f32.mrb[101].mxu1  ;;  %v6237_v54 = vpop.f32.mrb[69].mxu0  ;;  %v6043_v31 = vadd.f32 %v6042_v30, %v13429_v16  ;;  %v6236_v13 = vadd.f32 %v6235_v62, %v13437_v34 }
 0x690   : > { %v6045_v6 = vadd.f32 %v6044_v2, %v13443_v41  ;;  %v6238_v9 = vadd.f32 %v6237_v54, %v13445_v59  ;;  %v6046_v52 = vpop.f32.mrb[102].mxu1  ;;  %v6239_v60 = vpop.f32.mrb[70].mxu0  ;;  %v7394_v32 = vsel %vm13557_vm5, %v7386_v11, %v7393_v4  ;;  %v7866_v49 = vsel %vm13009_vm1, %v7404_v43, %v8504_v19  ;;  %v8508_v11 = vld [vmem:[%s10423_s14 + $0x1e0] sm:$0xff] }
 0x691   : > { %v7403_v12 = vsel %vm13557_vm5, %v7395_v56, %v7402_v5  ;;  %v7869_v61 = vsel %vm13009_vm1, %v7405_v24, %v8506_v20  ;;  %v6048_v25 = vpop.f32.mrb[103].mxu1  ;;  %v6241_v63 = vpop.f32.mrb[71].mxu0  ;;  %8502 = vst [vmem:[%s10423_s14 + $0x1c0] sm:$0xff] %v7394_v32  ;;  %8505 = vst [vmem:[%s10423_s14 + $0x1d0] sm:$0x11] %v7866_v49  ;;  %v6047_v58 = vadd.f32 %v6046_v52, %v13429_v16 }
 0x692   : > { %8503 = vst [vmem:[%s10423_s14 + $0x1c8] sm:$0xff] %v7403_v12  ;;  %8507 = vst [vmem:[%s10423_s14 + $0x1d8] sm:$0x11] %v7869_v61  ;;  %v6376_v42 = vmul.f32 0.2, %v6043_v31  ;;  %v6240_v10 = vadd.f32 %v6239_v60, %v13437_v34  ;;  %v6049_v46 = vadd.f32 %v6048_v25, %v13443_v41  ;;  %v6242_v26 = vadd.f32 %v6241_v63, %v13445_v59 }
 0x693   : > { %v6378_v1 = vmul.f32 0.2, %v6236_v13  ;;  %v6377_v57 = vmul.f32 0.2, %v6045_v6  ;;  %v6379_v7 = vmul.f32 0.2, %v6238_v9 }
 0x694   : > { %v6504_v51 = vmax.f32 %v6043_v31, %v6376_v42  ;;  %v6380_v40 = vmul.f32 0.2, %v6047_v58  ;;  %v6382_v48 = vmul.f32 0.2, %v6240_v10  ;;  %v6381_v44 = vmul.f32 0.2, %v6049_v46 }
 0x695   : > { %v6506_v22 = vmax.f32 %v6236_v13, %v6378_v1  ;;  %v6505_v50 = vmax.f32 %v6045_v6, %v6377_v57  ;;  %v6507_v29 = vmax.f32 %v6238_v9, %v6379_v7  ;;  %v6383_v55 = vmul.f32 0.2, %v6242_v26  ;;  %v8510_v6 = vld [vmem:[%s10423_s14 + $0x1e8] sm:$0xff]  ;;  %v8514_v25 = vld [vmem:[%s10423_s14 + $0x200] sm:$0x11] }
 0x696   : > { %v6508_v53 = vmax.f32 %v6047_v58, %v6380_v40  ;;  %v6510_v37 = vmax.f32 %v6240_v10, %v6382_v48  ;;  %v6509_v47 = vmax.f32 %v6049_v46, %v6381_v44  ;;  %v6052_v8 = vpop.f32.mrb[104].mxu1  ;;  %v6245_v35 = vpop.f32.mrb[72].mxu0  ;;  %v8516_v46 = vld [vmem:[%s10423_s14 + $0x208] sm:$0x11] }
 0x697   : > { %v8618_v39 = vpack.c.bf16 %v6505_v50, %v6504_v51  ;;  %v8619_v0 = vpack.c.bf16 %v6507_v29, %v6506_v22  ;;  %v6511_v45 = vmax.f32 %v6242_v26, %v6383_v55  ;;  %v6054_v19 = vpop.f32.mrb[105].mxu1  ;;  %v6247_v21 = vpop.f32.mrb[73].mxu0  ;;  %v6053_v56 = vadd.f32 %v6052_v8, %v13429_v16 }
 0x698   : > { %v8620_v3 = vpack.c.bf16 %v6509_v47, %v6508_v53  ;;  %v6246_v38 = vadd.f32 %v6245_v35, %v13437_v34  ;;  %v6055_v20 = vadd.f32 %v6054_v19, %v13443_v41  ;;  %v6056_v30 = vpop.f32.mrb[106].mxu1  ;;  %v6249_v62 = vpop.f32.mrb[74].mxu0  ;;  %v6248_v50 = vadd.f32 %v6247_v21, %v13445_v59 }
 0x699   : > { %v7407_v27 = vshrl.u32 %v8618_v39, 16  ;;  %v7410_v23 = vshll.u32 %v8618_v39, 16  ;;  %v7414_v33 = vshrl.u32 %v8619_v0, 16  ;;  %v7417_v15 = vshll.u32 %v8619_v0, 16  ;;  %v6058_v2 = vpop.f32.mrb[107].mxu1  ;;  %v6251_v54 = vpop.f32.mrb[75].mxu0 }
 0x69a   : > { %v8621_v28 = vpack.c.bf16 %v6511_v45, %v6510_v37  ;;  %v7422_v43 = vshrl.u32 %v8620_v3, 16  ;;  %v7425_v5 = vshll.u32 %v8620_v3, 16  ;;  %v6384_v52 = vmul.f32 0.2, %v6053_v56 }
 0x69b   : > { %v7409_v36 = vrot.slane %v7407_v27, 7  ;;  %v7416_v4 = vrot.slane %v7414_v33, 7  ;;  %v6386_v42 = vmul.f32 0.2, %v6246_v38  ;;  %v6385_v1 = vmul.f32 0.2, %v6055_v20 }
 0x69c   : > { %v7431_v24 = vshrl.u32 %v8621_v28, 16  ;;  %v7434_v9 = vshll.u32 %v8621_v28, 16  ;;  %v7424_v49 = vrot.slane %v7422_v43, 7  ;;  %v6512_v63 = vmax.f32 %v6053_v56, %v6384_v52 }
 0x69d   : > { %v7412_v31 = vor.u32 %v7410_v23, %v7409_v36  ;;  %v7420_v13 = vrot.slane %v7409_v36, 4  ;;  %v7419_v60 = vor.u32 %v7417_v15, %v7416_v4  ;;  %v7429_v32 = vrot.slane %v7416_v4, 4  ;;  %v8518_v36 = vld [vmem:[%s10423_s14 + $0x210] sm:$0xff] }
 0x69e   : > { %v7433_v12 = vrot.slane %v7431_v24, 7  ;;  %v7427_v58 = vor.u32 %v7425_v5, %v7424_v49  ;;  %v7438_v7 = vrot.slane %v7424_v49, 4  ;;  %v6514_v51 = vmax.f32 %v6246_v38, %v6386_v42  ;;  %v8520_v24 = vld [vmem:[%s10423_s14 + $0x218] sm:$0xff] }
 0x69f   : > { %v7872_v61 = vsel %vm13544_vm0, %v7412_v31, %v8508_v11  ;;  %v7875_v57 = vsel %vm13544_vm0, %v7419_v60, %v8510_v6  ;;  %v6513_v22 = vmax.f32 %v6055_v20, %v6385_v1  ;;  %v6057_v44 = vadd.f32 %v6056_v30, %v13429_v16 }
 0x6a0   : > { %8509 = vst [vmem:[%s10423_s14 + $0x1e0] sm:$0xff] %v7872_v61  ;;  %v7436_v10 = vor.u32 %v7434_v9, %v7433_v12  ;;  %8511 = vst [vmem:[%s10423_s14 + $0x1e8] sm:$0xff] %v7875_v57  ;;  %v7439_v26 = vrot.slane %v7433_v12, 4  ;;  %v7428_v40 = vsel %vm13557_vm5, %v7420_v13, %v7427_v58  ;;  %v7880_v29 = vsel %vm13009_vm1, %v7438_v7, %v8514_v25  ;;  %v8524_v9 = vld [vmem:[%s10423_s14 + $0x230] sm:$0x11] }
 0x6a1   : > { %8512 = vst [vmem:[%s10423_s14 + $0x1f0] sm:$0xff] %v7428_v40  ;;  %8515 = vst [vmem:[%s10423_s14 + $0x200] sm:$0x11] %v7880_v29  ;;  %v8622_v39 = vpack.c.bf16 %v6513_v22, %v6512_v63  ;;  %v6387_v53 = vmul.f32 0.2, %v6248_v50  ;;  %v6250_v0 = vadd.f32 %v6249_v62, %v13437_v34  ;;  %v6059_v47 = vadd.f32 %v6058_v2, %v13443_v41 }
 0x6a2   : > { %v7437_v48 = vsel %vm13557_vm5, %v7429_v32, %v7436_v10  ;;  %v7883_v55 = vsel %vm13009_vm1, %v7439_v26, %v8516_v46  ;;  %v6388_v37 = vmul.f32 0.2, %v6057_v44  ;;  %v6252_v45 = vadd.f32 %v6251_v54, %v13445_v59  ;;  %v8526_v61 = vld [vmem:[%s10423_s14 + $0x238] sm:$0x11] }
 0x6a3   : > { %8513 = vst [vmem:[%s10423_s14 + $0x1f8] sm:$0xff] %v7437_v48  ;;  %8517 = vst [vmem:[%s10423_s14 + $0x208] sm:$0x11] %v7883_v55  ;;  %v7441_v27 = vshrl.u32 %v8622_v39, 16  ;;  %v6515_v23 = vmax.f32 %v6248_v50, %v6387_v53  ;;  %v6390_v8 = vmul.f32 0.2, %v6250_v0 }
 0x6a4   : > { %v6516_v35 = vmax.f32 %v6057_v44, %v6388_v37  ;;  %v6389_v33 = vmul.f32 0.2, %v6059_v47  ;;  %v6391_v15 = vmul.f32 0.2, %v6252_v45  ;;  %v7444_v28 = vshll.u32 %v8622_v39, 16 }
 0x6a5   : > { %v7443_v3 = vrot.slane %v7441_v27, 7  ;;  %v8623_v19 = vpack.c.bf16 %v6515_v23, %v6514_v51  ;;  %v6518_v21 = vmax.f32 %v6250_v0, %v6390_v8 }
 0x6a6   : > { %v6517_v11 = vmax.f32 %v6059_v47, %v6389_v33  ;;  %v6519_v56 = vmax.f32 %v6252_v45, %v6391_v15 }
 0x6a7   : > { %v7446_v38 = vor.u32 %v7444_v28, %v7443_v3  ;;  %v7448_v20 = vshrl.u32 %v8623_v19, 16  ;;  %v7451_v5 = vshll.u32 %v8623_v19, 16  ;;  %v7454_v32 = vrot.slane %v7443_v3, 4 }
 0x6a8   : > { %v8624_v30 = vpack.c.bf16 %v6517_v11, %v6516_v35  ;;  %v8625_v62 = vpack.c.bf16 %v6519_v56, %v6518_v21 }
 0x6a9   : > { %v7886_v4 = vsel %vm13544_vm0, %v7446_v38, %v8518_v36  ;;  %v7450_v43 = vrot.slane %v7448_v20, 7 }
 0x6aa   : > { %8519 = vst [vmem:[%s10423_s14 + $0x210] sm:$0xff] %v7886_v4  ;;  %v7456_v2 = vshrl.u32 %v8624_v30, 16  ;;  %v7465_v54 = vshrl.u32 %v8625_v62, 16  ;;  %v7459_v6 = vshll.u32 %v8624_v30, 16  ;;  %v7468_v60 = vshll.u32 %v8625_v62, 16 }
 0x6ab   : > { %v7453_v31 = vor.u32 %v7451_v5, %v7450_v43  ;;  %v7463_v49 = vrot.slane %v7450_v43, 4 }
 0x6ac   : > { %v7458_v13 = vrot.slane %v7456_v2, 7  ;;  %v7467_v52 = vrot.slane %v7465_v54, 7 }
 0x6ad   : > { %v7889_v12 = vsel %vm13544_vm0, %v7453_v31, %v8520_v24 }
 0x6ae   : > { %v6062_v25 = vpop.f32.mrb[108].mxu1  ;;  %v6255_v63 = vpop.f32.mrb[76].mxu0  ;;  %8521 = vst [vmem:[%s10423_s14 + $0x218] sm:$0xff] %v7889_v12  ;;  %v7461_v42 = vor.u32 %v7459_v6, %v7458_v13  ;;  %v7472_v1 = vrot.slane %v7458_v13, 4  ;;  %v7470_v57 = vor.u32 %v7468_v60, %v7467_v52  ;;  %v7473_v58 = vrot.slane %v7467_v52, 4 }
 0x6af   : > { %v6064_v7 = vpop.f32.mrb[109].mxu1  ;;  %v6257_v10 = vpop.f32.mrb[77].mxu0  ;;  %v6063_v46 = vadd.f32 %v6062_v25, %v13429_v16  ;;  %v6256_v26 = vadd.f32 %v6255_v63, %v13437_v34 }
 0x6b0   : > { %v6065_v51 = vadd.f32 %v6064_v7, %v13443_v41  ;;  %v6258_v22 = vadd.f32 %v6257_v10, %v13445_v59  ;;  %v6066_v50 = vpop.f32.mrb[110].mxu1  ;;  %v6259_v40 = vpop.f32.mrb[78].mxu0  ;;  %v7462_v29 = vsel %vm13557_vm5, %v7454_v32, %v7461_v42  ;;  %v7894_v48 = vsel %vm13009_vm1, %v7472_v1, %v8524_v9  ;;  %v8528_v32 = vld [vmem:[%s10423_s14 + $0x240] sm:$0xff] }
 0x6b1   : > { %v7471_v44 = vsel %vm13557_vm5, %v7463_v49, %v7470_v57  ;;  %v7897_v55 = vsel %vm13009_vm1, %v7473_v58, %v8526_v61  ;;  %v6068_v39 = vpop.f32.mrb[111].mxu1  ;;  %v6261_v53 = vpop.f32.mrb[79].mxu0  ;;  %8522 = vst [vmem:[%s10423_s14 + $0x220] sm:$0xff] %v7462_v29  ;;  %8525 = vst [vmem:[%s10423_s14 + $0x230] sm:$0x11] %v7894_v48  ;;  %v6067_v45 = vadd.f32 %v6066_v50, %v13429_v16 }
 0x6b2   : > { %8523 = vst [vmem:[%s10423_s14 + $0x228] sm:$0xff] %v7471_v44  ;;  %8527 = vst [vmem:[%s10423_s14 + $0x238] sm:$0x11] %v7897_v55  ;;  %v6392_v0 = vmul.f32 0.2, %v6063_v46  ;;  %v6260_v23 = vadd.f32 %v6259_v40, %v13437_v34  ;;  %v6069_v8 = vadd.f32 %v6068_v39, %v13443_v41  ;;  %v6262_v35 = vadd.f32 %v6261_v53, %v13445_v59 }
 0x6b3   : > { %v6394_v37 = vmul.f32 0.2, %v6256_v26  ;;  %v6393_v47 = vmul.f32 0.2, %v6065_v51  ;;  %v6395_v27 = vmul.f32 0.2, %v6258_v22 }
 0x6b4   : > { %v6520_v33 = vmax.f32 %v6063_v46, %v6392_v0  ;;  %v6396_v28 = vmul.f32 0.2, %v6067_v45  ;;  %v6398_v21 = vmul.f32 0.2, %v6260_v23  ;;  %v6397_v36 = vmul.f32 0.2, %v6069_v8 }
 0x6b5   : > { %v6522_v15 = vmax.f32 %v6256_v26, %v6394_v37  ;;  %v6521_v3 = vmax.f32 %v6065_v51, %v6393_v47  ;;  %v6523_v19 = vmax.f32 %v6258_v22, %v6395_v27  ;;  %v6399_v11 = vmul.f32 0.2, %v6262_v35  ;;  %v8530_v51 = vld [vmem:[%s10423_s14 + $0x248] sm:$0xff]  ;;  %v8534_v39 = vld [vmem:[%s10423_s14 + $0x260] sm:$0x11] }
 0x6b6   : > { %v6524_v38 = vmax.f32 %v6067_v45, %v6396_v28  ;;  %v6526_v30 = vmax.f32 %v6260_v23, %v6398_v21  ;;  %v6525_v62 = vmax.f32 %v6069_v8, %v6397_v36  ;;  %v6072_v24 = vpop.f32.mrb[112].mxu1  ;;  %v6265_v2 = vpop.f32.mrb[80].mxu0  ;;  %v8536_v8 = vld [vmem:[%s10423_s14 + $0x268] sm:$0x11] }
 0x6b7   : > { %v8626_v56 = vpack.c.bf16 %v6521_v3, %v6520_v33  ;;  %v8627_v20 = vpack.c.bf16 %v6523_v19, %v6522_v15  ;;  %v6527_v4 = vmax.f32 %v6262_v35, %v6399_v11  ;;  %v6074_v9 = vpop.f32.mrb[113].mxu1  ;;  %v6267_v52 = vpop.f32.mrb[81].mxu0  ;;  %v6073_v49 = vadd.f32 %v6072_v24, %v13429_v16 }
 0x6b8   : > { %v8628_v13 = vpack.c.bf16 %v6525_v62, %v6524_v38  ;;  %v6266_v12 = vadd.f32 %v6265_v2, %v13437_v34  ;;  %v6075_v61 = vadd.f32 %v6074_v9, %v13443_v41  ;;  %v6076_v25 = vpop.f32.mrb[114].mxu1  ;;  %v6269_v63 = vpop.f32.mrb[82].mxu0  ;;  %v6268_v3 = vadd.f32 %v6267_v52, %v13445_v59 }
 0x6b9   : > { %v7475_v43 = vshrl.u32 %v8626_v56, 16  ;;  %v7478_v5 = vshll.u32 %v8626_v56, 16  ;;  %v7482_v54 = vshrl.u32 %v8627_v20, 16  ;;  %v7485_v31 = vshll.u32 %v8627_v20, 16  ;;  %v6078_v7 = vpop.f32.mrb[115].mxu1  ;;  %v6271_v10 = vpop.f32.mrb[83].mxu0 }
 0x6ba   : > { %v8629_v6 = vpack.c.bf16 %v6527_v4, %v6526_v30  ;;  %v7490_v1 = vshrl.u32 %v8628_v13, 16  ;;  %v7493_v57 = vshll.u32 %v8628_v13, 16  ;;  %v6400_v50 = vmul.f32 0.2, %v6073_v49 }
 0x6bb   : > { %v7477_v60 = vrot.slane %v7475_v43, 7  ;;  %v7484_v42 = vrot.slane %v7482_v54, 7  ;;  %v6402_v0 = vmul.f32 0.2, %v6266_v12  ;;  %v6401_v37 = vmul.f32 0.2, %v6075_v61 }
 0x6bc   : > { %v7499_v58 = vshrl.u32 %v8629_v6, 16  ;;  %v7502_v22 = vshll.u32 %v8629_v6, 16  ;;  %v7492_v48 = vrot.slane %v7490_v1, 7  ;;  %v6528_v53 = vmax.f32 %v6073_v49, %v6400_v50 }
 0x6bd   : > { %v7480_v46 = vor.u32 %v7478_v5, %v7477_v60  ;;  %v7488_v26 = vrot.slane %v7477_v60, 4  ;;  %v7487_v40 = vor.u32 %v7485_v31, %v7484_v42  ;;  %v7497_v29 = vrot.slane %v7484_v42, 4  ;;  %v8538_v60 = vld [vmem:[%s10423_s14 + $0x270] sm:$0xff] }
 0x6be   : > { %v7501_v44 = vrot.slane %v7499_v58, 7  ;;  %v7495_v45 = vor.u32 %v7493_v57, %v7492_v48  ;;  %v7506_v27 = vrot.slane %v7492_v48, 4  ;;  %v6530_v33 = vmax.f32 %v6266_v12, %v6402_v0 }
 0x6bf   : > { %v7900_v55 = vsel %vm13544_vm0, %v7480_v46, %v8528_v32  ;;  %v7903_v47 = vsel %vm13544_vm0, %v7487_v40, %v8530_v51  ;;  %v6529_v15 = vmax.f32 %v6075_v61, %v6401_v37  ;;  %v6077_v36 = vadd.f32 %v6076_v25, %v13429_v16 }
 0x6c0   : > { %8529 = vst [vmem:[%s10423_s14 + $0x240] sm:$0xff] %v7900_v55  ;;  %v7504_v23 = vor.u32 %v7502_v22, %v7501_v44  ;;  %8531 = vst [vmem:[%s10423_s14 + $0x248] sm:$0xff] %v7903_v47  ;;  %v7507_v35 = vrot.slane %v7501_v44, 4  ;;  %v7496_v28 = vsel %vm13557_vm5, %v7488_v26, %v7495_v45  ;;  %v7908_v19 = vsel %vm13009_vm1, %v7506_v27, %v8534_v39  ;;  %v8540_v39 = vld [vmem:[%s10423_s14 + $0x278] sm:$0xff] }
 0x6c1   : > { %8532 = vst [vmem:[%s10423_s14 + $0x250] sm:$0xff] %v7496_v28  ;;  %8535 = vst [vmem:[%s10423_s14 + $0x260] sm:$0x11] %v7908_v19  ;;  %v8630_v56 = vpack.c.bf16 %v6529_v15, %v6528_v53  ;;  %v6403_v38 = vmul.f32 0.2, %v6268_v3  ;;  %v6270_v20 = vadd.f32 %v6269_v63, %v13437_v34  ;;  %v6079_v62 = vadd.f32 %v6078_v7, %v13443_v41 }
 0x6c2   : > { %v7505_v21 = vsel %vm13557_vm5, %v7497_v29, %v7504_v23  ;;  %v7911_v11 = vsel %vm13009_vm1, %v7507_v35, %v8536_v8  ;;  %v6404_v30 = vmul.f32 0.2, %v6077_v36  ;;  %v6272_v4 = vadd.f32 %v6271_v10, %v13445_v59  ;;  %v8544_v19 = vld [vmem:[%s10423_s14 + $0x290] sm:$0x11] }
 0x6c3   : > { %8533 = vst [vmem:[%s10423_s14 + $0x258] sm:$0xff] %v7505_v21  ;;  %8537 = vst [vmem:[%s10423_s14 + $0x268] sm:$0x11] %v7911_v11  ;;  %v7509_v43 = vshrl.u32 %v8630_v56, 16  ;;  %v6531_v5 = vmax.f32 %v6268_v3, %v6403_v38  ;;  %v6406_v24 = vmul.f32 0.2, %v6270_v20 }
 0x6c4   : > { %v6532_v2 = vmax.f32 %v6077_v36, %v6404_v30  ;;  %v6405_v54 = vmul.f32 0.2, %v6079_v62  ;;  %v6407_v31 = vmul.f32 0.2, %v6272_v4  ;;  %v7512_v6 = vshll.u32 %v8630_v56, 16 }
 0x6c5   : > { %v7511_v13 = vrot.slane %v7509_v43, 7  ;;  %v8631_v9 = vpack.c.bf16 %v6531_v5, %v6530_v33  ;;  %v6534_v52 = vmax.f32 %v6270_v20, %v6406_v24  ;;  %v8546_v21 = vld [vmem:[%s10423_s14 + $0x298] sm:$0x11] }
 0x6c6   : > { %v6533_v32 = vmax.f32 %v6079_v62, %v6405_v54  ;;  %v6535_v49 = vmax.f32 %v6272_v4, %v6407_v31 }
 0x6c7   : > { %v6082_v12 = vpop.f32.mrb[116].mxu1  ;;  %v6275_v61 = vpop.f32.mrb[84].mxu0  ;;  %v7514_v25 = vor.u32 %v7512_v6, %v7511_v13  ;;  %v7522_v63 = vrot.slane %v7511_v13, 4  ;;  %v7516_v42 = vshrl.u32 %v8631_v9, 16  ;;  %v7519_v1 = vshll.u32 %v8631_v9, 16 }
 0x6c8   : > { %v6084_v57 = vpop.f32.mrb[117].mxu1  ;;  %v6277_v58 = vpop.f32.mrb[85].mxu0  ;;  %v8632_v7 = vpack.c.bf16 %v6533_v32, %v6532_v2  ;;  %v8633_v10 = vpack.c.bf16 %v6535_v49, %v6534_v52  ;;  %v6083_v46 = vadd.f32 %v6082_v12, %v13429_v16  ;;  %v6276_v26 = vadd.f32 %v6275_v61, %v13437_v34 }
 0x6c9   : > { %v6086_v51 = vpop.f32.mrb[118].mxu1  ;;  %v6279_v22 = vpop.f32.mrb[86].mxu0  ;;  %v7914_v50 = vsel %vm13544_vm0, %v7514_v25, %v8538_v60  ;;  %v7518_v40 = vrot.slane %v7516_v42, 7  ;;  %v6085_v29 = vadd.f32 %v6084_v57, %v13443_v41  ;;  %v6278_v48 = vadd.f32 %v6277_v58, %v13445_v59 }
 0x6ca   : > { %v6088_v44 = vpop.f32.mrb[119].mxu1  ;;  %v6281_v55 = vpop.f32.mrb[87].mxu0  ;;  %8539 = vst [vmem:[%s10423_s14 + $0x270] sm:$0xff] %v7914_v50  ;;  %v7524_v53 = vshrl.u32 %v8632_v7, 16  ;;  %v7527_v0 = vshll.u32 %v8632_v7, 16  ;;  %v7533_v37 = vshrl.u32 %v8633_v10, 16  ;;  %v6087_v56 = vadd.f32 %v6086_v51, %v13429_v16 }
 0x6cb   : > { %v7536_v47 = vshll.u32 %v8633_v10, 16  ;;  %v7521_v45 = vor.u32 %v7519_v1, %v7518_v40  ;;  %v7531_v27 = vrot.slane %v7518_v40, 4  ;;  %v6408_v23 = vmul.f32 0.2, %v6083_v46  ;;  %v8548_v10 = vld [vmem:[%s10423_s14 + $0x2a0] sm:$0xff] }
 0x6cc   : > { %v6410_v8 = vmul.f32 0.2, %v6276_v26  ;;  %v7526_v35 = vrot.slane %v7524_v53, 7  ;;  %v7535_v33 = vrot.slane %v7533_v37, 7  ;;  %v6409_v15 = vmul.f32 0.2, %v6085_v29 }
 0x6cd   : > { %v6411_v3 = vmul.f32 0.2, %v6278_v48  ;;  %v7917_v28 = vsel %vm13544_vm0, %v7521_v45, %v8540_v39  ;;  %v6536_v36 = vmax.f32 %v6083_v46, %v6408_v23  ;;  %v6412_v5 = vmul.f32 0.2, %v6087_v56  ;;  %v8550_v46 = vld [vmem:[%s10423_s14 + $0x2a8] sm:$0xff] }
 0x6ce   : > { %v6538_v11 = vmax.f32 %v6276_v26, %v6410_v8  ;;  %8541 = vst [vmem:[%s10423_s14 + $0x278] sm:$0xff] %v7917_v28  ;;  %v7529_v38 = vor.u32 %v7527_v0, %v7526_v35  ;;  %v7540_v20 = vrot.slane %v7526_v35, 4  ;;  %v7538_v30 = vor.u32 %v7536_v47, %v7535_v33 }
 0x6cf   : > { %v7541_v62 = vrot.slane %v7535_v33, 4  ;;  %v6537_v4 = vmax.f32 %v6085_v29, %v6409_v15  ;;  %v6539_v43 = vmax.f32 %v6278_v48, %v6411_v3  ;;  %v6280_v24 = vadd.f32 %v6279_v22, %v13437_v34 }
 0x6d0   : > { %v7530_v2 = vsel %vm13557_vm5, %v7522_v63, %v7529_v38  ;;  %v7922_v54 = vsel %vm13009_vm1, %v7540_v20, %v8544_v19  ;;  %v7539_v31 = vsel %vm13557_vm5, %v7531_v27, %v7538_v30  ;;  %v6089_v60 = vadd.f32 %v6088_v44, %v13443_v41  ;;  %v8554_v27 = vld [vmem:[%s10423_s14 + $0x2c0] sm:$0x11]  ;;  %v8556_v19 = vld [vmem:[%s10423_s14 + $0x2c8] sm:$0x11] }
 0x6d1   : > { %v7925_v13 = vsel %vm13009_vm1, %v7541_v62, %v8546_v21  ;;  %8542 = vst [vmem:[%s10423_s14 + $0x280] sm:$0xff] %v7530_v2  ;;  %8545 = vst [vmem:[%s10423_s14 + $0x290] sm:$0x11] %v7922_v54  ;;  %v8634_v6 = vpack.c.bf16 %v6537_v4, %v6536_v36  ;;  %v8635_v9 = vpack.c.bf16 %v6539_v43, %v6538_v11  ;;  %v6414_v52 = vmul.f32 0.2, %v6280_v24 }
 0x6d2   : > { %8543 = vst [vmem:[%s10423_s14 + $0x288] sm:$0xff] %v7539_v31  ;;  %8547 = vst [vmem:[%s10423_s14 + $0x298] sm:$0x11] %v7925_v13  ;;  %v6282_v32 = vadd.f32 %v6281_v55, %v13445_v59  ;;  %v6540_v61 = vmax.f32 %v6087_v56, %v6412_v5  ;;  %v6413_v63 = vmul.f32 0.2, %v6089_v60 }
 0x6d3   : > { %v7543_v49 = vshrl.u32 %v8634_v6, 16  ;;  %v7550_v12 = vshrl.u32 %v8635_v9, 16  ;;  %v6542_v25 = vmax.f32 %v6280_v24, %v6414_v52  ;;  %v7546_v57 = vshll.u32 %v8634_v6, 16 }
 0x6d4   : > { %v6415_v42 = vmul.f32 0.2, %v6282_v32  ;;  %v7553_v7 = vshll.u32 %v8635_v9, 16  ;;  %v6541_v26 = vmax.f32 %v6089_v60, %v6413_v63 }
 0x6d5   : > { %v7545_v1 = vrot.slane %v7543_v49, 7  ;;  %v7552_v58 = vrot.slane %v7550_v12, 7 }
 0x6d6   : > { %v6543_v51 = vmax.f32 %v6282_v32, %v6415_v42  ;;  %v8636_v40 = vpack.c.bf16 %v6541_v26, %v6540_v61 }
 0x6d7   : > { %v7548_v22 = vor.u32 %v7546_v57, %v7545_v1  ;;  %v7555_v50 = vor.u32 %v7553_v7, %v7552_v58  ;;  %v7556_v3 = vrot.slane %v7545_v1, 4  ;;  %v7565_v28 = vrot.slane %v7552_v58, 4 }
 0x6d8   : > { %v8637_v29 = vpack.c.bf16 %v6543_v51, %v6542_v25  ;;  %v7558_v55 = vshrl.u32 %v8636_v40, 16  ;;  %v7561_v53 = vshll.u32 %v8636_v40, 16 }
 0x6d9   : > { %v7928_v48 = vsel %vm13544_vm0, %v7548_v22, %v8548_v10  ;;  %v7931_v44 = vsel %vm13544_vm0, %v7555_v50, %v8550_v46 }
 0x6da   : > { %8549 = vst [vmem:[%s10423_s14 + $0x2a0] sm:$0xff] %v7928_v48  ;;  %8551 = vst [vmem:[%s10423_s14 + $0x2a8] sm:$0xff] %v7931_v44  ;;  %v7567_v39 = vshrl.u32 %v8637_v29, 16  ;;  %v7570_v0 = vshll.u32 %v8637_v29, 16  ;;  %v7560_v45 = vrot.slane %v7558_v55, 7 }
 0x6dc   : > { %v7569_v23 = vrot.slane %v7567_v39, 7  ;;  %v7563_v38 = vor.u32 %v7561_v53, %v7560_v45  ;;  %v7574_v20 = vrot.slane %v7560_v45, 4 }
 0x6dd   : > { %v6092_v37 = vpop.f32.mrb[120].mxu1  ;;  %v6285_v47 = vpop.f32.mrb[88].mxu0 }
 0x6de   : > { %v6093_v8 = vadd.f32 %v6092_v37, %v13429_v16  ;;  %v6286_v35 = vadd.f32 %v6285_v47, %v13437_v34  ;;  %v6094_v33 = vpop.f32.mrb[121].mxu1  ;;  %v6287_v15 = vpop.f32.mrb[89].mxu0  ;;  %v7572_v30 = vor.u32 %v7570_v0, %v7569_v23  ;;  %v7575_v62 = vrot.slane %v7569_v23, 4 }
 0x6df   : > { %v6095_v21 = vadd.f32 %v6094_v33, %v13443_v41  ;;  %v6288_v36 = vadd.f32 %v6287_v15, %v13445_v59  ;;  %v6096_v11 = vpop.f32.mrb[122].mxu1  ;;  %v6289_v56 = vpop.f32.mrb[90].mxu0  ;;  %v7564_v31 = vsel %vm13557_vm5, %v7556_v3, %v7563_v38  ;;  %v7936_v13 = vsel %vm13009_vm1, %v7574_v20, %v8554_v27  ;;  %v8560_v38 = vld [vmem:[%s10423_s14 + $0x2d8] sm:$0xff] }
 0x6e0   : > { %v6098_v4 = vpop.f32.mrb[123].mxu1  ;;  %v6291_v43 = vpop.f32.mrb[91].mxu0  ;;  %v6416_v5 = vmul.f32 0.2, %v6093_v8  ;;  %v6418_v24 = vmul.f32 0.2, %v6286_v35  ;;  %v6097_v54 = vadd.f32 %v6096_v11, %v13429_v16  ;;  %v7573_v6 = vsel %vm13557_vm5, %v7565_v28, %v7572_v30 }
 0x6e1   : > { %v6417_v2 = vmul.f32 0.2, %v6095_v21  ;;  %v7939_v9 = vsel %vm13009_vm1, %v7575_v62, %v8556_v19  ;;  %8552 = vst [vmem:[%s10423_s14 + $0x2b0] sm:$0xff] %v7564_v31  ;;  %8555 = vst [vmem:[%s10423_s14 + $0x2c0] sm:$0x11] %v7936_v13  ;;  %v6290_v61 = vadd.f32 %v6289_v56, %v13437_v34  ;;  %v6099_v25 = vadd.f32 %v6098_v4, %v13443_v41 }
 0x6e2   : > { %8553 = vst [vmem:[%s10423_s14 + $0x2b8] sm:$0xff] %v7573_v6  ;;  %8557 = vst [vmem:[%s10423_s14 + $0x2c8] sm:$0x11] %v7939_v9  ;;  %v6544_v52 = vmax.f32 %v6093_v8, %v6416_v5  ;;  %v6546_v60 = vmax.f32 %v6286_v35, %v6418_v24  ;;  %v6419_v49 = vmul.f32 0.2, %v6288_v36  ;;  %v6292_v63 = vadd.f32 %v6291_v43, %v13445_v59  ;;  %v8558_v35 = vld [vmem:[%s10423_s14 + $0x2d0] sm:$0xff] }
 0x6e3   : > { %v6545_v32 = vmax.f32 %v6095_v21, %v6417_v2  ;;  %v6420_v12 = vmul.f32 0.2, %v6097_v54  ;;  %v6422_v10 = vmul.f32 0.2, %v6290_v61  ;;  %v6421_v46 = vmul.f32 0.2, %v6099_v25 }
 0x6e4   : > { %v6547_v1 = vmax.f32 %v6288_v36, %v6419_v49  ;;  %v6423_v26 = vmul.f32 0.2, %v6292_v63 }
 0x6e5   : > { %v8638_v42 = vpack.c.bf16 %v6545_v32, %v6544_v52  ;;  %v6102_v57 = vpop.f32.mrb[124].mxu1  ;;  %v6295_v58 = vpop.f32.mrb[92].mxu0  ;;  %v6548_v7 = vmax.f32 %v6097_v54, %v6420_v12  ;;  %v6550_v44 = vmax.f32 %v6290_v61, %v6422_v10  ;;  %v6549_v55 = vmax.f32 %v6099_v25, %v6421_v46  ;;  %v8564_v52 = vld [vmem:[%s10423_s14 + $0x2f0] sm:$0x11] }
 0x6e6   : > { %v8639_v50 = vpack.c.bf16 %v6547_v1, %v6546_v60  ;;  %v6103_v40 = vadd.f32 %v6102_v57, %v13429_v16  ;;  %v6104_v29 = vpop.f32.mrb[125].mxu1  ;;  %v6297_v48 = vpop.f32.mrb[93].mxu0  ;;  %v6551_v39 = vmax.f32 %v6292_v63, %v6423_v26  ;;  %v6296_v53 = vadd.f32 %v6295_v58, %v13437_v34  ;;  %v8566_v60 = vld [vmem:[%s10423_s14 + $0x2f8] sm:$0x11] }
 0x6e7   : > { %v7577_v51 = vshrl.u32 %v8638_v42, 16  ;;  %v7580_v22 = vshll.u32 %v8638_v42, 16  ;;  %v6106_v0 = vpop.f32.mrb[126].mxu1  ;;  %v6299_v37 = vpop.f32.mrb[94].mxu0  ;;  %v8640_v33 = vpack.c.bf16 %v6549_v55, %v6548_v7  ;;  %v6105_v28 = vadd.f32 %v6104_v29, %v13443_v41 }
 0x6e8   : > { %v7584_v45 = vshrl.u32 %v8639_v50, 16  ;;  %v7587_v27 = vshll.u32 %v8639_v50, 16  ;;  %v6424_v23 = vmul.f32 0.2, %v6103_v40  ;;  %v6108_v8 = vpop.f32.mrb[127].mxu1  ;;  %v8641_v15 = vpack.c.bf16 %v6551_v39, %v6550_v44  ;;  %v6301_v19 = vpop.f32.mrb[95].mxu0 }
 0x6e9   : > { %v7579_v47 = vrot.slane %v7577_v51, 7  ;;  %v6426_v3 = vmul.f32 0.2, %v6296_v53  ;;  %v7592_v20 = vshrl.u32 %v8640_v33, 16  ;;  %v7595_v30 = vshll.u32 %v8640_v33, 16 }
 0x6ea   : > { %v7586_v11 = vrot.slane %v7584_v45, 7  ;;  %v6552_v56 = vmax.f32 %v6103_v40, %v6424_v23  ;;  %v7601_v62 = vshrl.u32 %v8641_v15, 16  ;;  %v7604_v4 = vshll.u32 %v8641_v15, 16 }
 0x6eb   : > { %v7582_v21 = vor.u32 %v7580_v22, %v7579_v47  ;;  %v7590_v36 = vrot.slane %v7579_v47, 4  ;;  %v6554_v2 = vmax.f32 %v6296_v53, %v6426_v3  ;;  %v7594_v54 = vrot.slane %v7592_v20, 7 }
 0x6ec   : > { %v7589_v5 = vor.u32 %v7587_v27, %v7586_v11  ;;  %v7599_v24 = vrot.slane %v7586_v11, 4  ;;  %v7603_v31 = vrot.slane %v7601_v62, 7  ;;  %v6425_v13 = vmul.f32 0.2, %v6105_v28 }
 0x6ed   : > { %v7942_v43 = vsel %vm13544_vm0, %v7582_v21, %v8558_v35  ;;  %v6298_v6 = vadd.f32 %v6297_v48, %v13445_v59  ;;  %v6107_v32 = vadd.f32 %v6106_v0, %v13429_v16  ;;  %v6300_v49 = vadd.f32 %v6299_v37, %v13437_v34  ;;  %v8568_v37 = vld [vmem:[%s10423_s14 + $0x300] sm:$0xff]  ;;  %v8570_v35 = vld [vmem:[%s10423_s14 + $0x308] sm:$0xff] }
 0x6ee   : > { %8559 = vst [vmem:[%s10423_s14 + $0x2d0] sm:$0xff] %v7942_v43  ;;  %v7945_v9 = vsel %vm13544_vm0, %v7589_v5, %v8560_v38  ;;  %v6109_v12 = vadd.f32 %v6108_v8, %v13443_v41  ;;  %v7597_v61 = vor.u32 %v7595_v30, %v7594_v54  ;;  %v7608_v25 = vrot.slane %v7594_v54, 4  ;;  %v8576_v43 = vld [vmem:[%s10423_s14 + $0x328] sm:$0x11] }
 0x6ef   : > { %8561 = vst [vmem:[%s10423_s14 + $0x2d8] sm:$0xff] %v7945_v9  ;;  %v7606_v63 = vor.u32 %v7604_v4, %v7603_v31  ;;  %v7609_v42 = vrot.slane %v7603_v31, 4  ;;  %v6553_v1 = vmax.f32 %v6105_v28, %v6425_v13  ;;  %v6427_v57 = vmul.f32 0.2, %v6298_v6 }
 0x6f0   : > { %v6428_v58 = vmul.f32 0.2, %v6107_v32  ;;  %v6430_v7 = vmul.f32 0.2, %v6300_v49  ;;  %v7598_v16 = vsel %vm13557_vm5, %v7590_v36, %v7597_v61  ;;  %v7950_v34 = vsel %vm13009_vm1, %v7608_v25, %v8564_v52 }
 0x6f1   : > { %v7607_v41 = vsel %vm13557_vm5, %v7599_v24, %v7606_v63  ;;  %v7953_v10 = vsel %vm13009_vm1, %v7609_v42, %v8566_v60  ;;  %8562 = vst [vmem:[%s10423_s14 + $0x2e0] sm:$0xff] %v7598_v16  ;;  %8565 = vst [vmem:[%s10423_s14 + $0x2f0] sm:$0x11] %v7950_v34  ;;  %v8642_v46 = vpack.c.bf16 %v6553_v1, %v6552_v56  ;;  %v6429_v22 = vmul.f32 0.2, %v6109_v12 }
 0x6f2   : > { %8563 = vst [vmem:[%s10423_s14 + $0x2e8] sm:$0xff] %v7607_v41  ;;  %8567 = vst [vmem:[%s10423_s14 + $0x2f8] sm:$0x11] %v7953_v10  ;;  %v6555_v26 = vmax.f32 %v6298_v6, %v6427_v57  ;;  %v6556_v51 = vmax.f32 %v6107_v32, %v6428_v58  ;;  %v6302_v50 = vadd.f32 %v6301_v19, %v13445_v59  ;;  %v8574_v56 = vld [vmem:[%s10423_s14 + $0x320] sm:$0x11] }
 0x6f3   : > { %v7611_v40 = vshrl.u32 %v8642_v46, 16  ;;  %v6558_v48 = vmax.f32 %v6300_v49, %v6430_v7  ;;  %v6557_v44 = vmax.f32 %v6109_v12, %v6429_v22  ;;  %v7614_v53 = vshll.u32 %v8642_v46, 16 }
 0x6f4   : > { %v8643_v29 = vpack.c.bf16 %v6555_v26, %v6554_v2  ;;  %v6431_v55 = vmul.f32 0.2, %v6302_v50 }
 0x6f5   : > { %v7613_v39 = vrot.slane %v7611_v40, 7  ;;  %v8644_v47 = vpack.c.bf16 %v6557_v44, %v6556_v51 }
 0x6f6   : > { %v7618_v0 = vshrl.u32 %v8643_v29, 16  ;;  %v6559_v45 = vmax.f32 %v6302_v50, %v6431_v55  ;;  %v7621_v8 = vshll.u32 %v8643_v29, 16 }
 0x6f7   : > { %v7616_v27 = vor.u32 %v7614_v53, %v7613_v39  ;;  %v7626_v33 = vshrl.u32 %v8644_v47, 16  ;;  %v7629_v19 = vshll.u32 %v8644_v47, 16  ;;  %v7624_v36 = vrot.slane %v7613_v39, 4 }
 0x6f8   : > { %v7620_v23 = vrot.slane %v7618_v0, 7  ;;  %v8645_v59 = vpack.c.bf16 %v6559_v45, %v6558_v48 }
 0x6f9   : > { %v7956_v15 = vsel %vm13544_vm0, %v7616_v27, %v8568_v37  ;;  %v7628_v28 = vrot.slane %v7626_v33, 7 }
 0x6fa   : > { %v7623_v3 = vor.u32 %v7621_v8, %v7620_v23  ;;  %8569 = vst [vmem:[%s10423_s14 + $0x300] sm:$0xff] %v7956_v15  ;;  %v7635_v21 = vshrl.u32 %v8645_v59, 16  ;;  %v7638_v62 = vshll.u32 %v8645_v59, 16  ;;  %v7633_v4 = vrot.slane %v7620_v23, 4 }
 0x6fb   : > { %v7631_v38 = vor.u32 %v7629_v19, %v7628_v28  ;;  %v7642_v20 = vrot.slane %v7628_v28, 4 }
 0x6fc   : > { %v7959_v11 = vsel %vm13544_vm0, %v7623_v3, %v8570_v35  ;;  %v7637_v30 = vrot.slane %v7635_v21, 7 }
 0x6fd   : > { %8571 = vst [vmem:[%s10423_s14 + $0x308] sm:$0xff] %v7959_v11  ;;  %v7632_v5 = vsel %vm13557_vm5, %v7624_v36, %v7631_v38  ;;  %v7964_v24 = vsel %vm13009_vm1, %v7642_v20, %v8574_v56 }
 0x6fe   : > { %v7640_v2 = vor.u32 %v7638_v62, %v7637_v30  ;;  %v7643_v54 = vrot.slane %v7637_v30, 4  ;;  %8572 = vst [vmem:[%s10423_s14 + $0x310] sm:$0xff] %v7632_v5  ;;  %8575 = vst [vmem:[%s10423_s14 + $0x320] sm:$0x11] %v7964_v24 }
 0x700   : > { %v7641_v17 = vsel %vm13557_vm5, %v7633_v4, %v7640_v2  ;;  %v7967_v31 = vsel %vm13009_vm1, %v7643_v54, %v8576_v43 }
 0x701   : > { %8573 = vst [vmem:[%s10423_s14 + $0x318] sm:$0xff] %v7641_v17  ;;  %8577 = vst [vmem:[%s10423_s14 + $0x328] sm:$0x11] %v7967_v31 }
 0x702 PF: > { %s18_s27 = sadd.s32 1, %s10339_s27  }
 0x703   : > { %p15_p4 = scmp.ge.s32.totalorder %s18_s27, 4  }
 0x705   :  { %17 = sbr.rel (!%p15_p4) target bundleno = 1 (0x1), region = 91 }

</bundles_post_ra>
